<compile_context>
chip_gen: v7x
topology: tpu7x:2x2x1
jax: 0.10.0
libtpu: 0.0.40
codegen_flags: <defaults>
</compile_context>

<pallas_src>
import functools

import jax
import jax.numpy as jnp
from jax.experimental import pallas as pl
from jax.experimental.pallas import tpu as pltpu

NDF = 32
EPS = 1e-5
SLOPE = 0.2


# ----------------------------------------------------------------------------
# Pallas kernels
# ----------------------------------------------------------------------------
def _gemm_act_kernel(a_ref, b_ref, o_ref, *, act):
    """One M-tile GEMM (full K, full Cout) with optional fused LeakyReLU."""
    acc = jnp.dot(a_ref[...], b_ref[...], preferred_element_type=jnp.float32)
    if act == "lrelu":
        acc = jnp.where(acc >= 0, acc, SLOPE * acc)
    o_ref[...] = acc.astype(o_ref.dtype)


def _gemm_stats_kernel(a_ref, b_ref, o_ref, sum_ref, ssq_ref):
    """GEMM M-tile + fused per-channel sum / sum-of-squares accumulation.

    sum_ref / ssq_ref have a constant block index across the (single,
    "arbitrary") grid axis, so they stay resident in VMEM and accumulate the
    BatchNorm statistics globally over M.
    """
    @pl.when(pl.program_id(0) == 0)
    def _():
        sum_ref[...] = jnp.zeros_like(sum_ref)
        ssq_ref[...] = jnp.zeros_like(ssq_ref)

    acc = jnp.dot(a_ref[...], b_ref[...], preferred_element_type=jnp.float32)
    o_ref[...] = acc.astype(o_ref.dtype)
    sum_ref[...] += jnp.sum(acc, axis=0, keepdims=True)
    ssq_ref[...] += jnp.sum(acc * acc, axis=0, keepdims=True)


def _bn_affine_lrelu_kernel(y_ref, scale_ref, shift_ref, o_ref):
    """Per-channel affine (precomputed BN scale/shift) + LeakyReLU, f32 math."""
    z = y_ref[...].astype(jnp.float32) * scale_ref[...] + shift_ref[...]
    o_ref[...] = jnp.where(z >= 0, z, SLOPE * z).astype(o_ref.dtype)


# ----------------------------------------------------------------------------
# Tiling helpers
# ----------------------------------------------------------------------------
def _tm_cap(k, c, budget_bytes=6 * 1024 * 1024):
    """Largest M tile (multiple of 8, <= 1024) whose double-buffered bf16
    blocks (A tile, B tile, output tile) stay within a VMEM budget."""
    fixed = 2 * 2 * k * c                 # B tile (bf16), double-buffered
    per_row = 2 * 2 * (k + c)             # A tile + out tile bytes per M row
    cap = (budget_bytes - fixed) // max(per_row, 1)
    cap = max(64, min(1024, int(cap)))
    return (cap // 8) * 8


def _choose_tm(m, cap):
    """Pick an M tile: full M if small, else a multiple-of-8 divisor <= cap.

    Returns (tm, m_padded). Padding rows (zeros) only in the rare fallback
    case; zero rows contribute nothing to the BN sums and are sliced off."""
    if m <= cap:
        return m, m
    for t in range(cap, 0, -8):
        if m % t == 0:
            return t, m
    return cap, ((m + cap - 1) // cap) * cap


# ----------------------------------------------------------------------------
# pallas_call wrappers
# ----------------------------------------------------------------------------
def pallas_conv_gemm(a, b, *, act=None, out_dtype=jnp.bfloat16):
    """a: (M, K) bf16, b: (K, C) bf16 -> (M, C). Grid only over M tiles."""
    m, k = a.shape
    _, c = b.shape
    tm, mp = _choose_tm(m, _tm_cap(k, c))
    if mp != m:
        a = jnp.pad(a, ((0, mp - m), (0, 0)))
    out = pl.pallas_call(
        functools.partial(_gemm_act_kernel, act=act),
        out_shape=jax.ShapeDtypeStruct((mp, c), out_dtype),
        grid_spec=pltpu.PrefetchScalarGridSpec(
            num_scalar_prefetch=0,
            grid=(mp // tm,),
            in_specs=[
                pl.BlockSpec((tm, k), lambda i: (i, 0)),
                pl.BlockSpec((k, c), lambda i: (0, 0)),
            ],
            out_specs=pl.BlockSpec((tm, c), lambda i: (i, 0)),
        ),
        compiler_params=pltpu.CompilerParams(
            dimension_semantics=("parallel",)
        ),
    )(a, b)
    return out[:m] if mp != m else out


def pallas_conv_gemm_bn_stats(a, b, *, out_dtype=jnp.bfloat16):
    """GEMM + fused per-channel sum/sum-sq (global over M) for BatchNorm."""
    m, k = a.shape
    _, c = b.shape
    tm, mp = _choose_tm(m, _tm_cap(k, c))
    if mp != m:
        a = jnp.pad(a, ((0, mp - m), (0, 0)))
    y, s, ssq = pl.pallas_call(
        _gemm_stats_kernel,
        out_shape=(
            jax.ShapeDtypeStruct((mp, c), out_dtype),
            jax.ShapeDtypeStruct((1, c), jnp.float32),
            jax.ShapeDtypeStruct((1, c), jnp.float32),
        ),
        grid_spec=pltpu.PrefetchScalarGridSpec(
            num_scalar_prefetch=0,
            grid=(mp // tm,),
            in_specs=[
                pl.BlockSpec((tm, k), lambda i: (i, 0)),
                pl.BlockSpec((k, c), lambda i: (0, 0)),
            ],
            out_specs=[
                pl.BlockSpec((tm, c), lambda i: (i, 0)),
                pl.BlockSpec((1, c), lambda i: (0, 0)),
                pl.BlockSpec((1, c), lambda i: (0, 0)),
            ],
        ),
        # Stats accumulate across M tiles -> reduction-carrying axis.
        compiler_params=pltpu.CompilerParams(
            dimension_semantics=("arbitrary",)
        ),
    )(a, b)
    return (y[:m] if mp != m else y), s, ssq


def pallas_bn_affine_lrelu(y, scale, shift, *, out_dtype=jnp.bfloat16,
                           tm_cap=1024):
    """y: (M, C); per-channel y*scale+shift then LeakyReLU, tiled over M."""
    m, c = y.shape
    tm, mp = _choose_tm(m, tm_cap)
    if mp != m:
        y = jnp.pad(y, ((0, mp - m), (0, 0)))
    out = pl.pallas_call(
        _bn_affine_lrelu_kernel,
        out_shape=jax.ShapeDtypeStruct((mp, c), out_dtype),
        grid_spec=pltpu.PrefetchScalarGridSpec(
            num_scalar_prefetch=0,
            grid=(mp // tm,),
            in_specs=[
                pl.BlockSpec((tm, c), lambda i: (i, 0)),
                pl.BlockSpec((1, c), lambda i: (0, 0)),
                pl.BlockSpec((1, c), lambda i: (0, 0)),
            ],
            out_specs=pl.BlockSpec((tm, c), lambda i: (i, 0)),
        ),
        compiler_params=pltpu.CompilerParams(
            dimension_semantics=("parallel",)
        ),
    )(y, scale, shift)
    return out[:m] if mp != m else out


# ----------------------------------------------------------------------------
# im2col (NHWC, feature order (cin, kh, kw)) and weight prep
# ----------------------------------------------------------------------------
def _patches(x_nhwc, k, stride, pad):
    """x: (N, H, W, C) -> (N*OH*OW, C*k*k) bf16, feature order (c, kh, kw)."""
    n, h, w, c = x_nhwc.shape
    p = jax.lax.conv_general_dilated_patches(
        x_nhwc,
        filter_shape=(k, k),
        window_strides=(stride, stride),
        padding=((pad, pad), (pad, pad)),
        dimension_numbers=("NHWC", "HWIO", "NHWC"),
    )
    oh = (h + 2 * pad - k) // stride + 1
    ow = (w + 2 * pad - k) // stride + 1
    return p.reshape(n * oh * ow, c * k * k).astype(jnp.bfloat16), oh, ow


def _wmat(w):
    """(Cout, Cin, KH, KW) -> (Cin*KH*KW, Cout) bf16 (matches patch ordering)."""
    cout = w.shape[0]
    return w.reshape(cout, -1).T.astype(jnp.bfloat16)


# ----------------------------------------------------------------------------
# DNet forward
# ----------------------------------------------------------------------------
def init_params(key):
    shapes = {
        "w1": (NDF, 3, 4, 4),
        "w2": (NDF * 2, NDF, 4, 4),
        "w3": (NDF * 4, NDF * 2, 4, 4),
        "w4": (NDF * 8, NDF * 4, 4, 4),
        "w5": (1, NDF * 8, 4, 4),
    }
    params = {}
    keys = jax.random.split(key, len(shapes))
    for k_, (name, shp) in zip(keys, shapes.items()):
        params[name] = 0.02 * jax.random.normal(k_, shp, dtype=jnp.float32)
    # BatchNorm2d default init: gamma=1, beta=0.
    for idx, c in ((2, NDF * 2), (3, NDF * 4), (4, NDF * 8)):
        params[f"g{idx}"] = jnp.ones((c,), jnp.float32)
        params[f"b{idx}"] = jnp.zeros((c,), jnp.float32)
    return params


def _conv_bn_lrelu(x_nhwc, w, gamma, beta):
    """Conv(4,2,1) + training-mode BatchNorm2d + LeakyReLU(0.2), flat NHWC."""
    n = x_nhwc.shape[0]
    a, oh, ow = _patches(x_nhwc, 4, 2, 1)
    wm = _wmat(w)
    cout = wm.shape[1]
    m = a.shape[0]

    y, s, ssq = pallas_conv_gemm_bn_stats(a, wm)        # y: (M, Cout) bf16
    mean = s / m                                        # (1, Cout) f32
    var = jnp.maximum(ssq / m - mean * mean, 0.0)       # biased batch variance
    scale = gamma.reshape(1, -1) * jax.lax.rsqrt(var + EPS)
    shift = beta.reshape(1, -1) - mean * scale

    z = pallas_bn_affine_lrelu(y, scale, shift)         # (M, Cout) bf16
    return z.reshape(n, oh, ow, cout)


@jax.jit
def dnet_forward(x, params):
    n = x.shape[0]
    x = jnp.transpose(x, (0, 2, 3, 1))                  # NCHW -> NHWC (once)

    # Layer 1: Conv(3 -> ndf, 4, 2, 1) with LeakyReLU fused into the GEMM.
    a, oh, ow = _patches(x, 4, 2, 1)
    y = pallas_conv_gemm(a, _wmat(params["w1"]), act="lrelu")
    x = y.reshape(n, oh, ow, NDF)

    # Layers 2-4: Conv + BatchNorm(batch stats) + LeakyReLU.
    x = _conv_bn_lrelu(x, params["w2"], params["g2"], params["b2"])
    x = _conv_bn_lrelu(x, params["w3"], params["g3"], params["b3"])
    x = _conv_bn_lrelu(x, params["w4"], params["g4"], params["b4"])

    # Layer 5: Conv(8ndf -> 1, 4, 1, 0) == (N, 4096) x (4096, 1) GEMV.
    # Plain XLA dot beats a Pallas call at this size.
    a, _, _ = _patches(x, 4, 1, 0)                      # (N, 4096) bf16
    out = jnp.dot(a, _wmat(params["w5"]),
                  preferred_element_type=jnp.float32)   # (N, 1)
    out = out.reshape(n, 1, 1, 1)
    return jnp.squeeze(out)                             # matches out.squeeze()


if __name__ == "__main__":
    key = jax.random.PRNGKey(0)
    kp, kx = jax.random.split(key)
    params = init_params(kp)
    # DCGAN discriminator expects 64x64 RGB inputs (architecture-implied:
    # four stride-2 convs then a 4x4 valid conv -> 1x1).
    x = jax.random.normal(kx, (2, 3, 64, 64), dtype=jnp.float32)

    out = dnet_forward(x, params)
    out = jax.block_until_ready(out)
    assert out.shape == (2,), out.shape
    assert jnp.all(jnp.isfinite(out))
    print("KERNEL_OK")
</pallas_src>

<mosaic_0001>
module attributes {stable_mosaic.version = 11 : i64} {
  func.func @_gemm_act_kernel(%arg0: i32, %arg1: memref<1024x48xbf16, #tpu.memory_space<vmem>>, %arg2: memref<48x32xbf16, #tpu.memory_space<vmem>>, %arg3: memref<1024x32xbf16, #tpu.memory_space<vmem>>) attributes {dimension_semantics = [#tpu.dimension_semantics<parallel>], iteration_bounds = array<i64: 2>, scalar_prefetch = 0 : i64, scratch_operands = 0 : i64, tpu.core_type = #tpu.core_type<tc>, window_params = [{transform_indices = @transform_0, window_bounds = array<i64: 1024, 48>}, {pipeline_mode = #tpu.pipeline_mode<synchronous>, transform_indices = @transform_1, window_bounds = array<i64: 48, 32>}, {transform_indices = @transform_2, window_bounds = array<i64: 1024, 32>}]} {
    %c0 = arith.constant 0 : index
    %c0_0 = arith.constant 0 : index
    %0 = vector.load %arg1[%c0, %c0_0] : memref<1024x48xbf16, #tpu.memory_space<vmem>>, vector<1024x48xbf16>
    %c0_1 = arith.constant 0 : index
    %c0_2 = arith.constant 0 : index
    %1 = vector.load %arg2[%c0_1, %c0_2] : memref<48x32xbf16, #tpu.memory_space<vmem>>, vector<48x32xbf16>
    %cst = arith.constant dense<0.000000e+00> : vector<1024x32xf32>
    %2 = tpu.matmul %0, %1, %cst {dimension_numbers = #tpu.dot_dimension_numbers<[1], [0], [0], [1], [0, 0, 1, 1], [], []>} : vector<1024x48xbf16>, vector<48x32xbf16>, vector<1024x32xf32> -> vector<1024x32xf32>
    %cst_3 = arith.constant 0.000000e+00 : f32
    %3 = vector.broadcast %cst_3 : f32 to vector<1024x32xf32>
    %4 = arith.cmpf oge, %2, %3 : vector<1024x32xf32>
    %cst_4 = arith.constant 2.000000e-01 : f32
    %5 = vector.broadcast %cst_4 : f32 to vector<1024x32xf32>
    %6 = arith.mulf %5, %2 : vector<1024x32xf32>
    %7 = arith.select %4, %2, %6 : vector<1024x32xi1>, vector<1024x32xf32>
    %8 = arith.truncf %7 : vector<1024x32xf32> to vector<1024x32xbf16>
    %c0_5 = arith.constant 0 : index
    %c0_6 = arith.constant 0 : index
    %9 = vector.load %arg3[%c0_5, %c0_6] : memref<1024x32xbf16, #tpu.memory_space<vmem>>, vector<1024x32xbf16>
    tpu.vector_store %arg3[%c0_5, %c0_6], %8 {strides = array<i32>} : memref<1024x32xbf16, #tpu.memory_space<vmem>>, vector<1024x32xbf16>,
    return
  }
  func.func @transform_0(%arg0: i32) -> (i32, i32) {
    %c0_i32 = arith.constant 0 : i32
    %c0_i32_0 = arith.constant 0 : i32
    return %arg0, %c0_i32 : i32, i32
  }
  func.func @transform_1(%arg0: i32) -> (i32, i32) {
    %c0_i32 = arith.constant 0 : i32
    %c0_i32_0 = arith.constant 0 : i32
    %c0_i32_1 = arith.constant 0 : i32
    return %c0_i32, %c0_i32_0 : i32, i32
  }
  func.func @transform_2(%arg0: i32) -> (i32, i32) {
    %c0_i32 = arith.constant 0 : i32
    %c0_i32_0 = arith.constant 0 : i32
    return %arg0, %c0_i32 : i32, i32
  }
}

module attributes {stable_mosaic.version = 11 : i64} {
  func.func @_gemm_stats_kernel(%arg0: i32, %arg1: memref<512x512xbf16, #tpu.memory_space<vmem>>, %arg2: memref<512x64xbf16, #tpu.memory_space<vmem>>, %arg3: memref<512x64xbf16, #tpu.memory_space<vmem>>, %arg4: memref<1x64xf32, #tpu.memory_space<vmem>>, %arg5: memref<1x64xf32, #tpu.memory_space<vmem>>) attributes {dimension_semantics = [#tpu.dimension_semantics<arbitrary>], iteration_bounds = array<i64: 1>, scalar_prefetch = 0 : i64, scratch_operands = 0 : i64, tpu.core_type = #tpu.core_type<tc>, window_params = [{transform_indices = @transform_0, window_bounds = array<i64: 512, 512>}, {pipeline_mode = #tpu.pipeline_mode<synchronous>, transform_indices = @transform_1, window_bounds = array<i64: 512, 64>}, {transform_indices = @transform_2, window_bounds = array<i64: 512, 64>}, {pipeline_mode = #tpu.pipeline_mode<synchronous>, transform_indices = @transform_3, window_bounds = array<i64: 1, 64>}, {pipeline_mode = #tpu.pipeline_mode<synchronous>, transform_indices = @transform_4, window_bounds = array<i64: 1, 64>}]} {
    %c0_i32 = arith.constant 0 : i32
    %0 = arith.cmpi eq, %arg0, %c0_i32 : i32
    %1 = arith.extui %0 : i1 to i32
    %c0_i32_0 = arith.constant 0 : i32
    %2 = arith.cmpi ne, %1, %c0_i32_0 : i32
    scf.if %2 {
      %cst_16 = arith.constant 0.000000e+00 : f32
      %19 = vector.broadcast %cst_16 : f32 to vector<1x64xf32>
      %c0_17 = arith.constant 0 : index
      %c0_18 = arith.constant 0 : index
      %20 = vector.load %arg4[%c0_17, %c0_18] : memref<1x64xf32, #tpu.memory_space<vmem>>, vector<1x64xf32>
      tpu.vector_store %arg4[%c0_17, %c0_18], %19 {strides = array<i32>} : memref<1x64xf32, #tpu.memory_space<vmem>>, vector<1x64xf32>,
      %cst_19 = arith.constant 0.000000e+00 : f32
      %21 = vector.broadcast %cst_19 : f32 to vector<1x64xf32>
      %c0_20 = arith.constant 0 : index
      %c0_21 = arith.constant 0 : index
      %22 = vector.load %arg5[%c0_20, %c0_21] : memref<1x64xf32, #tpu.memory_space<vmem>>, vector<1x64xf32>
      tpu.vector_store %arg5[%c0_20, %c0_21], %21 {strides = array<i32>} : memref<1x64xf32, #tpu.memory_space<vmem>>, vector<1x64xf32>,
    } else {
    }
    %c0 = arith.constant 0 : index
    %c0_1 = arith.constant 0 : index
    %3 = vector.load %arg1[%c0, %c0_1] : memref<512x512xbf16, #tpu.memory_space<vmem>>, vector<512x512xbf16>
    %c0_2 = arith.constant 0 : index
    %c0_3 = arith.constant 0 : index
    %4 = vector.load %arg2[%c0_2, %c0_3] : memref<512x64xbf16, #tpu.memory_space<vmem>>, vector<512x64xbf16>
    %cst = arith.constant dense<0.000000e+00> : vector<512x64xf32>
    %5 = tpu.matmul %3, %4, %cst {dimension_numbers = #tpu.dot_dimension_numbers<[1], [0], [0], [1], [0, 0, 1, 1], [], []>} : vector<512x512xbf16>, vector<512x64xbf16>, vector<512x64xf32> -> vector<512x64xf32>
    %6 = arith.truncf %5 : vector<512x64xf32> to vector<512x64xbf16>
    %c0_4 = arith.constant 0 : index
    %c0_5 = arith.constant 0 : index
    %7 = vector.load %arg3[%c0_4, %c0_5] : memref<512x64xbf16, #tpu.memory_space<vmem>>, vector<512x64xbf16>
    tpu.vector_store %arg3[%c0_4, %c0_5], %6 {strides = array<i32>} : memref<512x64xbf16, #tpu.memory_space<vmem>>, vector<512x64xbf16>,
    %c0_6 = arith.constant 0 : index
    %c0_7 = arith.constant 0 : index
    %8 = vector.load %arg4[%c0_6, %c0_7] : memref<1x64xf32, #tpu.memory_space<vmem>>, vector<1x64xf32>
    %cst_8 = arith.constant dense<0.000000e+00> : vector<64xf32>
    %9 = vector.multi_reduction <add>, %5, %cst_8 [0] : vector<512x64xf32> to vector<64xf32>
    %10 = vector.shape_cast %9 : vector<64xf32> to vector<1x64xf32>
    %11 = arith.addf %8, %10 : vector<1x64xf32>
    %c0_9 = arith.constant 0 : index
    %c0_10 = arith.constant 0 : index
    %12 = vector.load %arg4[%c0_9, %c0_10] : memref<1x64xf32, #tpu.memory_space<vmem>>, vector<1x64xf32>
    tpu.vector_store %arg4[%c0_9, %c0_10], %11 {strides = array<i32>} : memref<1x64xf32, #tpu.memory_space<vmem>>, vector<1x64xf32>,
    %c0_11 = arith.constant 0 : index
    %c0_12 = arith.constant 0 : index
    %13 = vector.load %arg5[%c0_11, %c0_12] : memref<1x64xf32, #tpu.memory_space<vmem>>, vector<1x64xf32>
    %14 = arith.mulf %5, %5 : vector<512x64xf32>
    %cst_13 = arith.constant dense<0.000000e+00> : vector<64xf32>
    %15 = vector.multi_reduction <add>, %14, %cst_13 [0] : vector<512x64xf32> to vector<64xf32>
    %16 = vector.shape_cast %15 : vector<64xf32> to vector<1x64xf32>
    %17 = arith.addf %13, %16 : vector<1x64xf32>
    %c0_14 = arith.constant 0 : index
    %c0_15 = arith.constant 0 : index
    %18 = vector.load %arg5[%c0_14, %c0_15] : memref<1x64xf32, #tpu.memory_space<vmem>>, vector<1x64xf32>
    tpu.vector_store %arg5[%c0_14, %c0_15], %17 {strides = array<i32>} : memref<1x64xf32, #tpu.memory_space<vmem>>, vector<1x64xf32>,
    return
  }
  func.func @transform_0(%arg0: i32) -> (i32, i32) {
    %c0_i32 = arith.constant 0 : i32
    %c0_i32_0 = arith.constant 0 : i32
    return %arg0, %c0_i32 : i32, i32
  }
  func.func @transform_1(%arg0: i32) -> (i32, i32) {
    %c0_i32 = arith.constant 0 : i32
    %c0_i32_0 = arith.constant 0 : i32
    %c0_i32_1 = arith.constant 0 : i32
    return %c0_i32, %c0_i32_0 : i32, i32
  }
  func.func @transform_2(%arg0: i32) -> (i32, i32) {
    %c0_i32 = arith.constant 0 : i32
    %c0_i32_0 = arith.constant 0 : i32
    return %arg0, %c0_i32 : i32, i32
  }
  func.func @transform_3(%arg0: i32) -> (i32, i32) {
    %c0_i32 = arith.constant 0 : i32
    %c0_i32_0 = arith.constant 0 : i32
    %c0_i32_1 = arith.constant 0 : i32
    return %c0_i32, %c0_i32_0 : i32, i32
  }
  func.func @transform_4(%arg0: i32) -> (i32, i32) {
    %c0_i32 = arith.constant 0 : i32
    %c0_i32_0 = arith.constant 0 : i32
    %c0_i32_1 = arith.constant 0 : i32
    return %c0_i32, %c0_i32_0 : i32, i32
  }
}

module attributes {stable_mosaic.version = 11 : i64} {
  func.func @_bn_affine_lrelu_kernel(%arg0: i32, %arg1: memref<512x64xbf16, #tpu.memory_space<vmem>>, %arg2: memref<1x64xf32, #tpu.memory_space<vmem>>, %arg3: memref<1x64xf32, #tpu.memory_space<vmem>>, %arg4: memref<512x64xbf16, #tpu.memory_space<vmem>>) attributes {dimension_semantics = [#tpu.dimension_semantics<parallel>], iteration_bounds = array<i64: 1>, scalar_prefetch = 0 : i64, scratch_operands = 0 : i64, tpu.core_type = #tpu.core_type<tc>, window_params = [{transform_indices = @transform_0, window_bounds = array<i64: 512, 64>}, {pipeline_mode = #tpu.pipeline_mode<synchronous>, transform_indices = @transform_1, window_bounds = array<i64: 1, 64>}, {pipeline_mode = #tpu.pipeline_mode<synchronous>, transform_indices = @transform_2, window_bounds = array<i64: 1, 64>}, {transform_indices = @transform_3, window_bounds = array<i64: 512, 64>}]} {
    %c0 = arith.constant 0 : index
    %c0_0 = arith.constant 0 : index
    %0 = vector.load %arg1[%c0, %c0_0] : memref<512x64xbf16, #tpu.memory_space<vmem>>, vector<512x64xbf16>
    %1 = arith.extf %0 : vector<512x64xbf16> to vector<512x64xf32>
    %c0_1 = arith.constant 0 : index
    %c0_2 = arith.constant 0 : index
    %2 = vector.load %arg2[%c0_1, %c0_2] : memref<1x64xf32, #tpu.memory_space<vmem>>, vector<1x64xf32>
    %3 = vector.broadcast %2 : vector<1x64xf32> to vector<512x64xf32>
    %4 = arith.mulf %1, %3 : vector<512x64xf32>
    %c0_3 = arith.constant 0 : index
    %c0_4 = arith.constant 0 : index
    %5 = vector.load %arg3[%c0_3, %c0_4] : memref<1x64xf32, #tpu.memory_space<vmem>>, vector<1x64xf32>
    %6 = vector.broadcast %5 : vector<1x64xf32> to vector<512x64xf32>
    %7 = arith.addf %4, %6 : vector<512x64xf32>
    %cst = arith.constant 0.000000e+00 : f32
    %8 = vector.broadcast %cst : f32 to vector<512x64xf32>
    %9 = arith.cmpf oge, %7, %8 : vector<512x64xf32>
    %cst_5 = arith.constant 2.000000e-01 : f32
    %10 = vector.broadcast %cst_5 : f32 to vector<512x64xf32>
    %11 = arith.mulf %10, %7 : vector<512x64xf32>
    %12 = arith.select %9, %7, %11 : vector<512x64xi1>, vector<512x64xf32>
    %13 = arith.truncf %12 : vector<512x64xf32> to vector<512x64xbf16>
    %c0_6 = arith.constant 0 : index
    %c0_7 = arith.constant 0 : index
    %14 = vector.load %arg4[%c0_6, %c0_7] : memref<512x64xbf16, #tpu.memory_space<vmem>>, vector<512x64xbf16>
    tpu.vector_store %arg4[%c0_6, %c0_7], %13 {strides = array<i32>} : memref<512x64xbf16, #tpu.memory_space<vmem>>, vector<512x64xbf16>,
    return
  }
  func.func @transform_0(%arg0: i32) -> (i32, i32) {
    %c0_i32 = arith.constant 0 : i32
    %c0_i32_0 = arith.constant 0 : i32
    return %arg0, %c0_i32 : i32, i32
  }
  func.func @transform_1(%arg0: i32) -> (i32, i32) {
    %c0_i32 = arith.constant 0 : i32
    %c0_i32_0 = arith.constant 0 : i32
    %c0_i32_1 = arith.constant 0 : i32
    return %c0_i32, %c0_i32_0 : i32, i32
  }
  func.func @transform_2(%arg0: i32) -> (i32, i32) {
    %c0_i32 = arith.constant 0 : i32
    %c0_i32_0 = arith.constant 0 : i32
    %c0_i32_1 = arith.constant 0 : i32
    return %c0_i32, %c0_i32_0 : i32, i32
  }
  func.func @transform_3(%arg0: i32) -> (i32, i32) {
    %c0_i32 = arith.constant 0 : i32
    %c0_i32_0 = arith.constant 0 : i32
    return %arg0, %c0_i32 : i32, i32
  }
}

module attributes {stable_mosaic.version = 11 : i64} {
  func.func @_gemm_stats_kernel(%arg0: i32, %arg1: memref<128x1024xbf16, #tpu.memory_space<vmem>>, %arg2: memref<1024x128xbf16, #tpu.memory_space<vmem>>, %arg3: memref<128x128xbf16, #tpu.memory_space<vmem>>, %arg4: memref<1x128xf32, #tpu.memory_space<vmem>>, %arg5: memref<1x128xf32, #tpu.memory_space<vmem>>) attributes {dimension_semantics = [#tpu.dimension_semantics<arbitrary>], iteration_bounds = array<i64: 1>, scalar_prefetch = 0 : i64, scratch_operands = 0 : i64, tpu.core_type = #tpu.core_type<tc>, window_params = [{transform_indices = @transform_0, window_bounds = array<i64: 128, 1024>}, {pipeline_mode = #tpu.pipeline_mode<synchronous>, transform_indices = @transform_1, window_bounds = array<i64: 1024, 128>}, {transform_indices = @transform_2, window_bounds = array<i64: 128, 128>}, {pipeline_mode = #tpu.pipeline_mode<synchronous>, transform_indices = @transform_3, window_bounds = array<i64: 1, 128>}, {pipeline_mode = #tpu.pipeline_mode<synchronous>, transform_indices = @transform_4, window_bounds = array<i64: 1, 128>}]} {
    %c0_i32 = arith.constant 0 : i32
    %0 = arith.cmpi eq, %arg0, %c0_i32 : i32
    %1 = arith.extui %0 : i1 to i32
    %c0_i32_0 = arith.constant 0 : i32
    %2 = arith.cmpi ne, %1, %c0_i32_0 : i32
    scf.if %2 {
      %cst_16 = arith.constant 0.000000e+00 : f32
      %19 = vector.broadcast %cst_16 : f32 to vector<1x128xf32>
      %c0_17 = arith.constant 0 : index
      %c0_18 = arith.constant 0 : index
      %20 = vector.load %arg4[%c0_17, %c0_18] : memref<1x128xf32, #tpu.memory_space<vmem>>, vector<1x128xf32>
      tpu.vector_store %arg4[%c0_17, %c0_18], %19 {strides = array<i32>} : memref<1x128xf32, #tpu.memory_space<vmem>>, vector<1x128xf32>,
      %cst_19 = arith.constant 0.000000e+00 : f32
      %21 = vector.broadcast %cst_19 : f32 to vector<1x128xf32>
      %c0_20 = arith.constant 0 : index
      %c0_21 = arith.constant 0 : index
      %22 = vector.load %arg5[%c0_20, %c0_21] : memref<1x128xf32, #tpu.memory_space<vmem>>, vector<1x128xf32>
      tpu.vector_store %arg5[%c0_20, %c0_21], %21 {strides = array<i32>} : memref<1x128xf32, #tpu.memory_space<vmem>>, vector<1x128xf32>,
    } else {
    }
    %c0 = arith.constant 0 : index
    %c0_1 = arith.constant 0 : index
    %3 = vector.load %arg1[%c0, %c0_1] : memref<128x1024xbf16, #tpu.memory_space<vmem>>, vector<128x1024xbf16>
    %c0_2 = arith.constant 0 : index
    %c0_3 = arith.constant 0 : index
    %4 = vector.load %arg2[%c0_2, %c0_3] : memref<1024x128xbf16, #tpu.memory_space<vmem>>, vector<1024x128xbf16>
    %cst = arith.constant dense<0.000000e+00> : vector<128x128xf32>
    %5 = tpu.matmul %3, %4, %cst {dimension_numbers = #tpu.dot_dimension_numbers<[1], [0], [0], [1], [0, 0, 1, 1], [], []>} : vector<128x1024xbf16>, vector<1024x128xbf16>, vector<128x128xf32> -> vector<128x128xf32>
    %6 = arith.truncf %5 : vector<128x128xf32> to vector<128x128xbf16>
    %c0_4 = arith.constant 0 : index
    %c0_5 = arith.constant 0 : index
    %7 = vector.load %arg3[%c0_4, %c0_5] : memref<128x128xbf16, #tpu.memory_space<vmem>>, vector<128x128xbf16>
    tpu.vector_store %arg3[%c0_4, %c0_5], %6 {strides = array<i32>} : memref<128x128xbf16, #tpu.memory_space<vmem>>, vector<128x128xbf16>,
    %c0_6 = arith.constant 0 : index
    %c0_7 = arith.constant 0 : index
    %8 = vector.load %arg4[%c0_6, %c0_7] : memref<1x128xf32, #tpu.memory_space<vmem>>, vector<1x128xf32>
    %cst_8 = arith.constant dense<0.000000e+00> : vector<128xf32>
    %9 = vector.multi_reduction <add>, %5, %cst_8 [0] : vector<128x128xf32> to vector<128xf32>
    %10 = vector.shape_cast %9 : vector<128xf32> to vector<1x128xf32>
    %11 = arith.addf %8, %10 : vector<1x128xf32>
    %c0_9 = arith.constant 0 : index
    %c0_10 = arith.constant 0 : index
    %12 = vector.load %arg4[%c0_9, %c0_10] : memref<1x128xf32, #tpu.memory_space<vmem>>, vector<1x128xf32>
    tpu.vector_store %arg4[%c0_9, %c0_10], %11 {strides = array<i32>} : memref<1x128xf32, #tpu.memory_space<vmem>>, vector<1x128xf32>,
    %c0_11 = arith.constant 0 : index
    %c0_12 = arith.constant 0 : index
    %13 = vector.load %arg5[%c0_11, %c0_12] : memref<1x128xf32, #tpu.memory_space<vmem>>, vector<1x128xf32>
    %14 = arith.mulf %5, %5 : vector<128x128xf32>
    %cst_13 = arith.constant dense<0.000000e+00> : vector<128xf32>
    %15 = vector.multi_reduction <add>, %14, %cst_13 [0] : vector<128x128xf32> to vector<128xf32>
    %16 = vector.shape_cast %15 : vector<128xf32> to vector<1x128xf32>
    %17 = arith.addf %13, %16 : vector<1x128xf32>
    %c0_14 = arith.constant 0 : index
    %c0_15 = arith.constant 0 : index
    %18 = vector.load %arg5[%c0_14, %c0_15] : memref<1x128xf32, #tpu.memory_space<vmem>>, vector<1x128xf32>
    tpu.vector_store %arg5[%c0_14, %c0_15], %17 {strides = array<i32>} : memref<1x128xf32, #tpu.memory_space<vmem>>, vector<1x128xf32>,
    return
  }
  func.func @transform_0(%arg0: i32) -> (i32, i32) {
    %c0_i32 = arith.constant 0 : i32
    %c0_i32_0 = arith.constant 0 : i32
    return %arg0, %c0_i32 : i32, i32
  }
  func.func @transform_1(%arg0: i32) -> (i32, i32) {
    %c0_i32 = arith.constant 0 : i32
    %c0_i32_0 = arith.constant 0 : i32
    %c0_i32_1 = arith.constant 0 : i32
    return %c0_i32, %c0_i32_0 : i32, i32
  }
  func.func @transform_2(%arg0: i32) -> (i32, i32) {
    %c0_i32 = arith.constant 0 : i32
    %c0_i32_0 = arith.constant 0 : i32
    return %arg0, %c0_i32 : i32, i32
  }
  func.func @transform_3(%arg0: i32) -> (i32, i32) {
    %c0_i32 = arith.constant 0 : i32
    %c0_i32_0 = arith.constant 0 : i32
    %c0_i32_1 = arith.constant 0 : i32
    return %c0_i32, %c0_i32_0 : i32, i32
  }
  func.func @transform_4(%arg0: i32) -> (i32, i32) {
    %c0_i32 = arith.constant 0 : i32
    %c0_i32_0 = arith.constant 0 : i32
    %c0_i32_1 = arith.constant 0 : i32
    return %c0_i32, %c0_i32_0 : i32, i32
  }
}

module attributes {stable_mosaic.version = 11 : i64} {
  func.func @_bn_affine_lrelu_kernel(%arg0: i32, %arg1: memref<128x128xbf16, #tpu.memory_space<vmem>>, %arg2: memref<1x128xf32, #tpu.memory_space<vmem>>, %arg3: memref<1x128xf32, #tpu.memory_space<vmem>>, %arg4: memref<128x128xbf16, #tpu.memory_space<vmem>>) attributes {dimension_semantics = [#tpu.dimension_semantics<parallel>], iteration_bounds = array<i64: 1>, scalar_prefetch = 0 : i64, scratch_operands = 0 : i64, tpu.core_type = #tpu.core_type<tc>, window_params = [{transform_indices = @transform_0, window_bounds = array<i64: 128, 128>}, {pipeline_mode = #tpu.pipeline_mode<synchronous>, transform_indices = @transform_1, window_bounds = array<i64: 1, 128>}, {pipeline_mode = #tpu.pipeline_mode<synchronous>, transform_indices = @transform_2, window_bounds = array<i64: 1, 128>}, {transform_indices = @transform_3, window_bounds = array<i64: 128, 128>}]} {
    %c0 = arith.constant 0 : index
    %c0_0 = arith.constant 0 : index
    %0 = vector.load %arg1[%c0, %c0_0] : memref<128x128xbf16, #tpu.memory_space<vmem>>, vector<128x128xbf16>
    %1 = arith.extf %0 : vector<128x128xbf16> to vector<128x128xf32>
    %c0_1 = arith.constant 0 : index
    %c0_2 = arith.constant 0 : index
    %2 = vector.load %arg2[%c0_1, %c0_2] : memref<1x128xf32, #tpu.memory_space<vmem>>, vector<1x128xf32>
    %3 = vector.broadcast %2 : vector<1x128xf32> to vector<128x128xf32>
    %4 = arith.mulf %1, %3 : vector<128x128xf32>
    %c0_3 = arith.constant 0 : index
    %c0_4 = arith.constant 0 : index
    %5 = vector.load %arg3[%c0_3, %c0_4] : memref<1x128xf32, #tpu.memory_space<vmem>>, vector<1x128xf32>
    %6 = vector.broadcast %5 : vector<1x128xf32> to vector<128x128xf32>
    %7 = arith.addf %4, %6 : vector<128x128xf32>
    %cst = arith.constant 0.000000e+00 : f32
    %8 = vector.broadcast %cst : f32 to vector<128x128xf32>
    %9 = arith.cmpf oge, %7, %8 : vector<128x128xf32>
    %cst_5 = arith.constant 2.000000e-01 : f32
    %10 = vector.broadcast %cst_5 : f32 to vector<128x128xf32>
    %11 = arith.mulf %10, %7 : vector<128x128xf32>
    %12 = arith.select %9, %7, %11 : vector<128x128xi1>, vector<128x128xf32>
    %13 = arith.truncf %12 : vector<128x128xf32> to vector<128x128xbf16>
    %c0_6 = arith.constant 0 : index
    %c0_7 = arith.constant 0 : index
    %14 = vector.load %arg4[%c0_6, %c0_7] : memref<128x128xbf16, #tpu.memory_space<vmem>>, vector<128x128xbf16>
    tpu.vector_store %arg4[%c0_6, %c0_7], %13 {strides = array<i32>} : memref<128x128xbf16, #tpu.memory_space<vmem>>, vector<128x128xbf16>,
    return
  }
  func.func @transform_0(%arg0: i32) -> (i32, i32) {
    %c0_i32 = arith.constant 0 : i32
    %c0_i32_0 = arith.constant 0 : i32
    return %arg0, %c0_i32 : i32, i32
  }
  func.func @transform_1(%arg0: i32) -> (i32, i32) {
    %c0_i32 = arith.constant 0 : i32
    %c0_i32_0 = arith.constant 0 : i32
    %c0_i32_1 = arith.constant 0 : i32
    return %c0_i32, %c0_i32_0 : i32, i32
  }
  func.func @transform_2(%arg0: i32) -> (i32, i32) {
    %c0_i32 = arith.constant 0 : i32
    %c0_i32_0 = arith.constant 0 : i32
    %c0_i32_1 = arith.constant 0 : i32
    return %c0_i32, %c0_i32_0 : i32, i32
  }
  func.func @transform_3(%arg0: i32) -> (i32, i32) {
    %c0_i32 = arith.constant 0 : i32
    %c0_i32_0 = arith.constant 0 : i32
    return %arg0, %c0_i32 : i32, i32
  }
}

module attributes {stable_mosaic.version = 11 : i64} {
  func.func @_gemm_stats_kernel(%arg0: i32, %arg1: memref<32x2048xbf16, #tpu.memory_space<vmem>>, %arg2: memref<2048x256xbf16, #tpu.memory_space<vmem>>, %arg3: memref<32x256xbf16, #tpu.memory_space<vmem>>, %arg4: memref<1x256xf32, #tpu.memory_space<vmem>>, %arg5: memref<1x256xf32, #tpu.memory_space<vmem>>) attributes {dimension_semantics = [#tpu.dimension_semantics<arbitrary>], iteration_bounds = array<i64: 1>, scalar_prefetch = 0 : i64, scratch_operands = 0 : i64, tpu.core_type = #tpu.core_type<tc>, window_params = [{transform_indices = @transform_0, window_bounds = array<i64: 32, 2048>}, {pipeline_mode = #tpu.pipeline_mode<synchronous>, transform_indices = @transform_1, window_bounds = array<i64: 2048, 256>}, {transform_indices = @transform_2, window_bounds = array<i64: 32, 256>}, {pipeline_mode = #tpu.pipeline_mode<synchronous>, transform_indices = @transform_3, window_bounds = array<i64: 1, 256>}, {pipeline_mode = #tpu.pipeline_mode<synchronous>, transform_indices = @transform_4, window_bounds = array<i64: 1, 256>}]} {
    %c0_i32 = arith.constant 0 : i32
    %0 = arith.cmpi eq, %arg0, %c0_i32 : i32
    %1 = arith.extui %0 : i1 to i32
    %c0_i32_0 = arith.constant 0 : i32
    %2 = arith.cmpi ne, %1, %c0_i32_0 : i32
    scf.if %2 {
      %cst_16 = arith.constant 0.000000e+00 : f32
      %19 = vector.broadcast %cst_16 : f32 to vector<1x256xf32>
      %c0_17 = arith.constant 0 : index
      %c0_18 = arith.constant 0 : index
      %20 = vector.load %arg4[%c0_17, %c0_18] : memref<1x256xf32, #tpu.memory_space<vmem>>, vector<1x256xf32>
      tpu.vector_store %arg4[%c0_17, %c0_18], %19 {strides = array<i32>} : memref<1x256xf32, #tpu.memory_space<vmem>>, vector<1x256xf32>,
      %cst_19 = arith.constant 0.000000e+00 : f32
      %21 = vector.broadcast %cst_19 : f32 to vector<1x256xf32>
      %c0_20 = arith.constant 0 : index
      %c0_21 = arith.constant 0 : index
      %22 = vector.load %arg5[%c0_20, %c0_21] : memref<1x256xf32, #tpu.memory_space<vmem>>, vector<1x256xf32>
      tpu.vector_store %arg5[%c0_20, %c0_21], %21 {strides = array<i32>} : memref<1x256xf32, #tpu.memory_space<vmem>>, vector<1x256xf32>,
    } else {
    }
    %c0 = arith.constant 0 : index
    %c0_1 = arith.constant 0 : index
    %3 = vector.load %arg1[%c0, %c0_1] : memref<32x2048xbf16, #tpu.memory_space<vmem>>, vector<32x2048xbf16>
    %c0_2 = arith.constant 0 : index
    %c0_3 = arith.constant 0 : index
    %4 = vector.load %arg2[%c0_2, %c0_3] : memref<2048x256xbf16, #tpu.memory_space<vmem>>, vector<2048x256xbf16>
    %cst = arith.constant dense<0.000000e+00> : vector<32x256xf32>
    %5 = tpu.matmul %3, %4, %cst {dimension_numbers = #tpu.dot_dimension_numbers<[1], [0], [0], [1], [0, 0, 1, 1], [], []>} : vector<32x2048xbf16>, vector<2048x256xbf16>, vector<32x256xf32> -> vector<32x256xf32>
    %6 = arith.truncf %5 : vector<32x256xf32> to vector<32x256xbf16>
    %c0_4 = arith.constant 0 : index
    %c0_5 = arith.constant 0 : index
    %7 = vector.load %arg3[%c0_4, %c0_5] : memref<32x256xbf16, #tpu.memory_space<vmem>>, vector<32x256xbf16>
    tpu.vector_store %arg3[%c0_4, %c0_5], %6 {strides = array<i32>} : memref<32x256xbf16, #tpu.memory_space<vmem>>, vector<32x256xbf16>,
    %c0_6 = arith.constant 0 : index
    %c0_7 = arith.constant 0 : index
    %8 = vector.load %arg4[%c0_6, %c0_7] : memref<1x256xf32, #tpu.memory_space<vmem>>, vector<1x256xf32>
    %cst_8 = arith.constant dense<0.000000e+00> : vector<256xf32>
    %9 = vector.multi_reduction <add>, %5, %cst_8 [0] : vector<32x256xf32> to vector<256xf32>
    %10 = vector.shape_cast %9 : vector<256xf32> to vector<1x256xf32>
    %11 = arith.addf %8, %10 : vector<1x256xf32>
    %c0_9 = arith.constant 0 : index
    %c0_10 = arith.constant 0 : index
    %12 = vector.load %arg4[%c0_9, %c0_10] : memref<1x256xf32, #tpu.memory_space<vmem>>, vector<1x256xf32>
    tpu.vector_store %arg4[%c0_9, %c0_10], %11 {strides = array<i32>} : memref<1x256xf32, #tpu.memory_space<vmem>>, vector<1x256xf32>,
    %c0_11 = arith.constant 0 : index
    %c0_12 = arith.constant 0 : index
    %13 = vector.load %arg5[%c0_11, %c0_12] : memref<1x256xf32, #tpu.memory_space<vmem>>, vector<1x256xf32>
    %14 = arith.mulf %5, %5 : vector<32x256xf32>
    %cst_13 = arith.constant dense<0.000000e+00> : vector<256xf32>
    %15 = vector.multi_reduction <add>, %14, %cst_13 [0] : vector<32x256xf32> to vector<256xf32>
    %16 = vector.shape_cast %15 : vector<256xf32> to vector<1x256xf32>
    %17 = arith.addf %13, %16 : vector<1x256xf32>
    %c0_14 = arith.constant 0 : index
    %c0_15 = arith.constant 0 : index
    %18 = vector.load %arg5[%c0_14, %c0_15] : memref<1x256xf32, #tpu.memory_space<vmem>>, vector<1x256xf32>
    tpu.vector_store %arg5[%c0_14, %c0_15], %17 {strides = array<i32>} : memref<1x256xf32, #tpu.memory_space<vmem>>, vector<1x256xf32>,
    return
  }
  func.func @transform_0(%arg0: i32) -> (i32, i32) {
    %c0_i32 = arith.constant 0 : i32
    %c0_i32_0 = arith.constant 0 : i32
    return %arg0, %c0_i32 : i32, i32
  }
  func.func @transform_1(%arg0: i32) -> (i32, i32) {
    %c0_i32 = arith.constant 0 : i32
    %c0_i32_0 = arith.constant 0 : i32
    %c0_i32_1 = arith.constant 0 : i32
    return %c0_i32, %c0_i32_0 : i32, i32
  }
  func.func @transform_2(%arg0: i32) -> (i32, i32) {
    %c0_i32 = arith.constant 0 : i32
    %c0_i32_0 = arith.constant 0 : i32
    return %arg0, %c0_i32 : i32, i32
  }
  func.func @transform_3(%arg0: i32) -> (i32, i32) {
    %c0_i32 = arith.constant 0 : i32
    %c0_i32_0 = arith.constant 0 : i32
    %c0_i32_1 = arith.constant 0 : i32
    return %c0_i32, %c0_i32_0 : i32, i32
  }
  func.func @transform_4(%arg0: i32) -> (i32, i32) {
    %c0_i32 = arith.constant 0 : i32
    %c0_i32_0 = arith.constant 0 : i32
    %c0_i32_1 = arith.constant 0 : i32
    return %c0_i32, %c0_i32_0 : i32, i32
  }
}

module attributes {stable_mosaic.version = 11 : i64} {
  func.func @_bn_affine_lrelu_kernel(%arg0: i32, %arg1: memref<32x256xbf16, #tpu.memory_space<vmem>>, %arg2: memref<1x256xf32, #tpu.memory_space<vmem>>, %arg3: memref<1x256xf32, #tpu.memory_space<vmem>>, %arg4: memref<32x256xbf16, #tpu.memory_space<vmem>>) attributes {dimension_semantics = [#tpu.dimension_semantics<parallel>], iteration_bounds = array<i64: 1>, scalar_prefetch = 0 : i64, scratch_operands = 0 : i64, tpu.core_type = #tpu.core_type<tc>, window_params = [{transform_indices = @transform_0, window_bounds = array<i64: 32, 256>}, {pipeline_mode = #tpu.pipeline_mode<synchronous>, transform_indices = @transform_1, window_bounds = array<i64: 1, 256>}, {pipeline_mode = #tpu.pipeline_mode<synchronous>, transform_indices = @transform_2, window_bounds = array<i64: 1, 256>}, {transform_indices = @transform_3, window_bounds = array<i64: 32, 256>}]} {
    %c0 = arith.constant 0 : index
    %c0_0 = arith.constant 0 : index
    %0 = vector.load %arg1[%c0, %c0_0] : memref<32x256xbf16, #tpu.memory_space<vmem>>, vector<32x256xbf16>
    %1 = arith.extf %0 : vector<32x256xbf16> to vector<32x256xf32>
    %c0_1 = arith.constant 0 : index
    %c0_2 = arith.constant 0 : index
    %2 = vector.load %arg2[%c0_1, %c0_2] : memref<1x256xf32, #tpu.memory_space<vmem>>, vector<1x256xf32>
    %3 = vector.broadcast %2 : vector<1x256xf32> to vector<32x256xf32>
    %4 = arith.mulf %1, %3 : vector<32x256xf32>
    %c0_3 = arith.constant 0 : index
    %c0_4 = arith.constant 0 : index
    %5 = vector.load %arg3[%c0_3, %c0_4] : memref<1x256xf32, #tpu.memory_space<vmem>>, vector<1x256xf32>
    %6 = vector.broadcast %5 : vector<1x256xf32> to vector<32x256xf32>
    %7 = arith.addf %4, %6 : vector<32x256xf32>
    %cst = arith.constant 0.000000e+00 : f32
    %8 = vector.broadcast %cst : f32 to vector<32x256xf32>
    %9 = arith.cmpf oge, %7, %8 : vector<32x256xf32>
    %cst_5 = arith.constant 2.000000e-01 : f32
    %10 = vector.broadcast %cst_5 : f32 to vector<32x256xf32>
    %11 = arith.mulf %10, %7 : vector<32x256xf32>
    %12 = arith.select %9, %7, %11 : vector<32x256xi1>, vector<32x256xf32>
    %13 = arith.truncf %12 : vector<32x256xf32> to vector<32x256xbf16>
    %c0_6 = arith.constant 0 : index
    %c0_7 = arith.constant 0 : index
    %14 = vector.load %arg4[%c0_6, %c0_7] : memref<32x256xbf16, #tpu.memory_space<vmem>>, vector<32x256xbf16>
    tpu.vector_store %arg4[%c0_6, %c0_7], %13 {strides = array<i32>} : memref<32x256xbf16, #tpu.memory_space<vmem>>, vector<32x256xbf16>,
    return
  }
  func.func @transform_0(%arg0: i32) -> (i32, i32) {
    %c0_i32 = arith.constant 0 : i32
    %c0_i32_0 = arith.constant 0 : i32
    return %arg0, %c0_i32 : i32, i32
  }
  func.func @transform_1(%arg0: i32) -> (i32, i32) {
    %c0_i32 = arith.constant 0 : i32
    %c0_i32_0 = arith.constant 0 : i32
    %c0_i32_1 = arith.constant 0 : i32
    return %c0_i32, %c0_i32_0 : i32, i32
  }
  func.func @transform_2(%arg0: i32) -> (i32, i32) {
    %c0_i32 = arith.constant 0 : i32
    %c0_i32_0 = arith.constant 0 : i32
    %c0_i32_1 = arith.constant 0 : i32
    return %c0_i32, %c0_i32_0 : i32, i32
  }
  func.func @transform_3(%arg0: i32) -> (i32, i32) {
    %c0_i32 = arith.constant 0 : i32
    %c0_i32_0 = arith.constant 0 : i32
    return %arg0, %c0_i32 : i32, i32
  }
}

</mosaic_0001>

<bundles_post_ra>
// kernel: dnet_forward.7
= control target key start
LH: loop header
LB: loop body
LE: loop exit
PB: predicated region body
PF: predicated region fallthrough
CT: control target
= control target key end

     0   :  { %s3142_s9 = smov 0   ;;  %s3564_s0 = inlined_call_operand.vmem [shape: bf16[2048,48], index: 0, kind: input, shape index: {}]   ;;  %s3565_s1 = inlined_call_operand.vmem [shape: bf16[48,32], index: 1, kind: input, shape index: {}]   ;;  %s3566_s2 = inlined_call_operand.vmem [shape: bf16[2048,32], index: 2, kind: output, shape index: {}]  }
   0x1 LB: > { %s2439_s10 = sadd.s32 4294967295, %s3125_s9   ;;  %p2443_p0 = scmp.ge.s32.totalorder %s3125_s9, 1  ;;  %s3125_s9 = sphi %s3142_s9, %s12_s9  }
   0x2   : > { %p113_p1 = scmp.lt.s32.totalorder %s3125_s9, 3 }
   0x4   : > { %p114_p2 = pnand %p2443_p0, %p113_p1 }
   0x5   : > { %v3052_v0 = vld [vmem:[%s3565_s1] sm:$0xff] (!%p114_p2)   ;;  %s2444_s13 = sshll.u32 (!%p114_p2), %s2439_s10, 7  ;;  %v3053_v1 = vld [vmem:[%s3565_s1 + $0x8] sm:$0xff] (!%p114_p2)   ;;  %v3054_v2 = vld [vmem:[%s3565_s1 + $0x10] sm:$0xff] (!%p114_p2)   ;;  %vm620_vm0 = vcmask (!%p114_p2), 392192   ;;  %vm2254_vm3 = vcmask (!%p114_p2), 257024  }
   0x6   : > { %117 = sbr.rel (%p114_p2) target bundleno = 366 (0x16e), region = 28  ;;  %p136_p3 = scmp.lt.s32.totalorder (!%p114_p2), %s2444_s13, 255  ;;  %2904 = vmatprep.subr.bf16.mxu0 (!%p114_p2), %v3052_v0  ;;  %3038 = vmatprep.subr.bf16.mxu1 (!%p114_p2), %v3052_v0 }
   0x7   : > { %2905 = vmatpush3.bf16.msra.mxu0 (!%p114_p2), %v3052_v0  ;;  %3041 = vmatpush3.bf16.msra.mxu1 (!%p114_p2), %v3052_v0 }
   0x8   : > { %2906 = vmatprep.subr.bf16.mxu0 (!%p114_p2), %v3053_v1  ;;  %3039 = vmatprep.subr.bf16.mxu1 (!%p114_p2), %v3053_v1 }
   0xb   : > { %2907 = vmatpush3.bf16.msra.mxu0 (!%p114_p2), %v3053_v1  ;;  %3042 = vmatpush3.bf16.msra.mxu1 (!%p114_p2), %v3053_v1 }
   0xc   : > { %2908 = vmatprep.subr.bf16.mxu0 (!%p114_p2), %v3054_v2  ;;  %3040 = vmatprep.subr.bf16.mxu1 (!%p114_p2), %v3054_v2 }
   0xd   : > { %s3568_s13 = smov (!%p136_p3, %s2444_s13), 255 }
   0xe   : > { %s2445_s18 = sshll.u32 %s3568_s13, 2 }
   0xf   : > { %s3167_s21 = scalar_lea.vmem %s3564_s0, %s2445_s18  ;;  %2909 = vmatpush3.bf16.msra.mxu0 %v3054_v2  ;;  %3043 = vmatpush3.bf16.msra.mxu1 %v3054_v2  ;;  %s3302_s24 = scalar_lea.vmem %s3566_s2, %s2445_s18 }
  0x10   : > { %v3055_v3 = vld [vmem:[%s3167_s21] sm:$0xff]   ;;  %v3057_v5 = vld [vmem:[%s3167_s21 + $0x8] sm:$0xff]   ;;  %v3059_v7 = vld [vmem:[%s3167_s21 + $0x10] sm:$0xff]  }
  0x11   : > { %v3056_v4 = vld [vmem:[%s3167_s21 + $0x100] sm:$0xff]   ;;  %2910 = vmatprep.mubr.msk.bf16.mxu0 %vm620_vm0, %v3055_v3  ;;  %v3058_v6 = vld [vmem:[%s3167_s21 + $0x108] sm:$0xff]   ;;  %v3060_v8 = vld [vmem:[%s3167_s21 + $0x110] sm:$0xff]  }
  0x12   : > { %2974 = vmatprep.mubr.msk.bf16.mxu1 %vm620_vm0, %v3056_v4  ;;  %2911 = vmatmul.mubr.msk.bf16.vlgmr.msra.gmra.mrb[0].mxu0 %vm620_vm0, %v3057_v5  ;;  %v3061_v9 = vld [vmem:[%s3167_s21 + $0x18] sm:$0xff]   ;;  %v3063_v11 = vld [vmem:[%s3167_s21 + $0x20] sm:$0xff]   ;;  %v3065_v13 = vld [vmem:[%s3167_s21 + $0x28] sm:$0xff]  }
  0x13   : > { %2975 = vmatmul.mubr.msk.bf16.vlgmr.msra.gmra.mrb[0].mxu1 %vm620_vm0, %v3058_v6  ;;  %2914 = vmatprep.mubr.msk.bf16.mxu0 %vm620_vm0, %v3059_v7  ;;  %v3062_v10 = vld [vmem:[%s3167_s21 + $0x118] sm:$0xff]   ;;  %v3064_v12 = vld [vmem:[%s3167_s21 + $0x120] sm:$0xff]   ;;  %v3066_v14 = vld [vmem:[%s3167_s21 + $0x128] sm:$0xff]  }
  0x14   : > { %2978 = vmatprep.mubr.msk.bf16.mxu1 %vm620_vm0, %v3060_v8  ;;  %v3067_v15 = vld [vmem:[%s3167_s21 + $0x30] sm:$0xff]   ;;  %v3069_v17 = vld [vmem:[%s3167_s21 + $0x38] sm:$0xff]   ;;  %v3071_v19 = vld [vmem:[%s3167_s21 + $0x40] sm:$0xff]  }
  0x15   : > { %v3068_v16 = vld [vmem:[%s3167_s21 + $0x130] sm:$0xff]   ;;  %v3070_v18 = vld [vmem:[%s3167_s21 + $0x138] sm:$0xff]   ;;  %v3072_v20 = vld [vmem:[%s3167_s21 + $0x140] sm:$0xff]  }
  0x16   : > { %v3073_v21 = vld [vmem:[%s3167_s21 + $0x48] sm:$0xff]   ;;  %v3075_v23 = vld [vmem:[%s3167_s21 + $0x50] sm:$0xff]   ;;  %v3077_v25 = vld [vmem:[%s3167_s21 + $0x58] sm:$0xff]  }
  0x17   : > { %v3074_v22 = vld [vmem:[%s3167_s21 + $0x148] sm:$0xff]   ;;  %v3076_v24 = vld [vmem:[%s3167_s21 + $0x150] sm:$0xff]   ;;  %v3078_v26 = vld [vmem:[%s3167_s21 + $0x158] sm:$0xff]  }
  0x18   : > { %v3079_v27 = vld [vmem:[%s3167_s21 + $0x60] sm:$0xff]   ;;  %v3081_v29 = vld [vmem:[%s3167_s21 + $0x68] sm:$0xff]   ;;  %v3083_v31 = vld [vmem:[%s3167_s21 + $0x70] sm:$0xff]  }
  0x19   : > { %v3080_v28 = vld [vmem:[%s3167_s21 + $0x160] sm:$0xff]   ;;  %v3082_v30 = vld [vmem:[%s3167_s21 + $0x168] sm:$0xff]   ;;  %v3084_v32 = vld [vmem:[%s3167_s21 + $0x170] sm:$0xff]  }
  0x1a   : > { %2915 = vmatmul.mubr.msk.bf16.gmra.mrb[4].mxu0 %vm620_vm0, %v3061_v9  ;;  %v3085_v33 = vld [vmem:[%s3167_s21 + $0x78] sm:$0xff]   ;;  %v3087_v35 = vld [vmem:[%s3167_s21 + $0x80] sm:$0xff]   ;;  %v3089_v37 = vld [vmem:[%s3167_s21 + $0x88] sm:$0xff]  }
  0x1b   : > { %2979 = vmatmul.mubr.msk.bf16.gmra.mrb[4].mxu1 %vm620_vm0, %v3062_v10  ;;  %2918 = vmatprep.mubr.msk.bf16.mxu0 %vm620_vm0, %v3063_v11  ;;  %v3086_v34 = vld [vmem:[%s3167_s21 + $0x178] sm:$0xff]   ;;  %v3088_v36 = vld [vmem:[%s3167_s21 + $0x180] sm:$0xff]   ;;  %v3090_v38 = vld [vmem:[%s3167_s21 + $0x188] sm:$0xff]  }
  0x1c   : > { %2982 = vmatprep.mubr.msk.bf16.mxu1 %vm620_vm0, %v3064_v12  ;;  %v3091_v39 = vld [vmem:[%s3167_s21 + $0x90] sm:$0xff]   ;;  %v3093_v41 = vld [vmem:[%s3167_s21 + $0x98] sm:$0xff]   ;;  %v3095_v43 = vld [vmem:[%s3167_s21 + $0xa0] sm:$0xff]  }
  0x1d   : > { %v3092_v40 = vld [vmem:[%s3167_s21 + $0x190] sm:$0xff]   ;;  %v3094_v42 = vld [vmem:[%s3167_s21 + $0x198] sm:$0xff]   ;;  %v3096_v44 = vld [vmem:[%s3167_s21 + $0x1a0] sm:$0xff]  }
  0x1e   : > { %v3097_v45 = vld [vmem:[%s3167_s21 + $0xa8] sm:$0xff]   ;;  %v3099_v47 = vld [vmem:[%s3167_s21 + $0xb0] sm:$0xff]   ;;  %v3101_v49 = vld [vmem:[%s3167_s21 + $0xb8] sm:$0xff]  }
  0x1f   : > { %v3098_v46 = vld [vmem:[%s3167_s21 + $0x1a8] sm:$0xff]   ;;  %v3100_v48 = vld [vmem:[%s3167_s21 + $0x1b0] sm:$0xff]   ;;  %v3102_v50 = vld [vmem:[%s3167_s21 + $0x1b8] sm:$0xff]  }
  0x20   : > { %v3103_v51 = vld [vmem:[%s3167_s21 + $0xc0] sm:$0xff]   ;;  %v3105_v53 = vld [vmem:[%s3167_s21 + $0xc8] sm:$0xff]   ;;  %v3107_v55 = vld [vmem:[%s3167_s21 + $0xd0] sm:$0xff]  }
  0x21   : > { %v3104_v52 = vld [vmem:[%s3167_s21 + $0x1c0] sm:$0xff]   ;;  %v3106_v54 = vld [vmem:[%s3167_s21 + $0x1c8] sm:$0xff]   ;;  %v3108_v56 = vld [vmem:[%s3167_s21 + $0x1d0] sm:$0xff]  }
  0x22   : > { %2919 = vmatmul.mubr.msk.bf16.gmra.mrb[8].mxu0 %vm620_vm0, %v3065_v13  ;;  %v3109_v57 = vld [vmem:[%s3167_s21 + $0xd8] sm:$0xff]   ;;  %v3111_v59 = vld [vmem:[%s3167_s21 + $0xe0] sm:$0xff]   ;;  %v3113_v61 = vld [vmem:[%s3167_s21 + $0xe8] sm:$0xff]  }
  0x23   : > { %2983 = vmatmul.mubr.msk.bf16.gmra.mrb[8].mxu1 %vm620_vm0, %v3066_v14  ;;  %2922 = vmatprep.mubr.msk.bf16.mxu0 %vm620_vm0, %v3067_v15  ;;  %v3110_v58 = vld [vmem:[%s3167_s21 + $0x1d8] sm:$0xff]   ;;  %v3112_v60 = vld [vmem:[%s3167_s21 + $0x1e0] sm:$0xff]   ;;  %v3114_v62 = vld [vmem:[%s3167_s21 + $0x1e8] sm:$0xff]  }
  0x24   : > { %2986 = vmatprep.mubr.msk.bf16.mxu1 %vm620_vm0, %v3068_v16  ;;  %v3115_v63 = vld [vmem:[%s3167_s21 + $0xf0] sm:$0xff]   ;;  %v3117_v1 = vld [vmem:[%s3167_s21 + $0xf8] sm:$0xff]  }
  0x25   : > { %v3116_v0 = vld [vmem:[%s3167_s21 + $0x1f0] sm:$0xff]   ;;  %v3118_v2 = vld [vmem:[%s3167_s21 + $0x1f8] sm:$0xff]  }
  0x2a   : > { %2923 = vmatmul.mubr.msk.bf16.gmra.mrb[12].mxu0 %vm620_vm0, %v3069_v17 }
  0x2b   : > { %2987 = vmatmul.mubr.msk.bf16.gmra.mrb[12].mxu1 %vm620_vm0, %v3070_v18  ;;  %2926 = vmatprep.mubr.msk.bf16.mxu0 %vm620_vm0, %v3071_v19 }
  0x2c   : > { %2990 = vmatprep.mubr.msk.bf16.mxu1 %vm620_vm0, %v3072_v20 }
  0x32   : > { %2927 = vmatmul.mubr.msk.bf16.gmra.mrb[16].mxu0 %vm620_vm0, %v3073_v21 }
  0x33   : > { %2991 = vmatmul.mubr.msk.bf16.gmra.mrb[16].mxu1 %vm620_vm0, %v3074_v22  ;;  %2930 = vmatprep.mubr.msk.bf16.mxu0 %vm620_vm0, %v3075_v23 }
  0x34   : > { %2994 = vmatprep.mubr.msk.bf16.mxu1 %vm620_vm0, %v3076_v24 }
  0x3a   : > { %2931 = vmatmul.mubr.msk.bf16.gmra.mrb[20].mxu0 %vm620_vm0, %v3077_v25 }
  0x3b   : > { %2995 = vmatmul.mubr.msk.bf16.gmra.mrb[20].mxu1 %vm620_vm0, %v3078_v26  ;;  %2934 = vmatprep.mubr.msk.bf16.mxu0 %vm620_vm0, %v3079_v27 }
  0x3c   : > { %2998 = vmatprep.mubr.msk.bf16.mxu1 %vm620_vm0, %v3080_v28 }
  0x42   : > { %2935 = vmatmul.mubr.msk.bf16.gmra.mrb[24].mxu0 %vm620_vm0, %v3081_v29 }
  0x43   : > { %2999 = vmatmul.mubr.msk.bf16.gmra.mrb[24].mxu1 %vm620_vm0, %v3082_v30  ;;  %2938 = vmatprep.mubr.msk.bf16.mxu0 %vm620_vm0, %v3083_v31 }
  0x44   : > { %3002 = vmatprep.mubr.msk.bf16.mxu1 %vm620_vm0, %v3084_v32 }
  0x4a   : > { %2939 = vmatmul.mubr.msk.bf16.gmra.mrb[28].mxu0 %vm620_vm0, %v3085_v33 }
  0x4b   : > { %3003 = vmatmul.mubr.msk.bf16.gmra.mrb[28].mxu1 %vm620_vm0, %v3086_v34  ;;  %2942 = vmatprep.mubr.msk.bf16.mxu0 %vm620_vm0, %v3087_v35 }
  0x4c   : > { %3006 = vmatprep.mubr.msk.bf16.mxu1 %vm620_vm0, %v3088_v36 }
  0x52   : > { %2943 = vmatmul.mubr.msk.bf16.gmra.mrb[32].mxu0 %vm620_vm0, %v3089_v37 }
  0x53   : > { %3007 = vmatmul.mubr.msk.bf16.gmra.mrb[32].mxu1 %vm620_vm0, %v3090_v38  ;;  %2946 = vmatprep.mubr.msk.bf16.mxu0 %vm620_vm0, %v3091_v39 }
  0x54   : > { %3010 = vmatprep.mubr.msk.bf16.mxu1 %vm620_vm0, %v3092_v40 }
  0x5a   : > { %2947 = vmatmul.mubr.msk.bf16.gmra.mrb[36].mxu0 %vm620_vm0, %v3093_v41 }
  0x5b   : > { %3011 = vmatmul.mubr.msk.bf16.gmra.mrb[36].mxu1 %vm620_vm0, %v3094_v42  ;;  %2950 = vmatprep.mubr.msk.bf16.mxu0 %vm620_vm0, %v3095_v43 }
  0x5c   : > { %3014 = vmatprep.mubr.msk.bf16.mxu1 %vm620_vm0, %v3096_v44 }
  0x62   : > { %2951 = vmatmul.mubr.msk.bf16.gmra.mrb[40].mxu0 %vm620_vm0, %v3097_v45 }
  0x63   : > { %3015 = vmatmul.mubr.msk.bf16.gmra.mrb[40].mxu1 %vm620_vm0, %v3098_v46  ;;  %2954 = vmatprep.mubr.msk.bf16.mxu0 %vm620_vm0, %v3099_v47 }
  0x64   : > { %3018 = vmatprep.mubr.msk.bf16.mxu1 %vm620_vm0, %v3100_v48 }
  0x6a   : > { %2955 = vmatmul.mubr.msk.bf16.gmra.mrb[44].mxu0 %vm620_vm0, %v3101_v49 }
  0x6b   : > { %3019 = vmatmul.mubr.msk.bf16.gmra.mrb[44].mxu1 %vm620_vm0, %v3102_v50  ;;  %2958 = vmatprep.mubr.msk.bf16.mxu0 %vm620_vm0, %v3103_v51 }
  0x6c   : > { %3022 = vmatprep.mubr.msk.bf16.mxu1 %vm620_vm0, %v3104_v52 }
  0x72   : > { %2959 = vmatmul.mubr.msk.bf16.gmra.mrb[48].mxu0 %vm620_vm0, %v3105_v53 }
  0x73   : > { %3023 = vmatmul.mubr.msk.bf16.gmra.mrb[48].mxu1 %vm620_vm0, %v3106_v54  ;;  %2962 = vmatprep.mubr.msk.bf16.mxu0 %vm620_vm0, %v3107_v55 }
  0x74   : > { %3026 = vmatprep.mubr.msk.bf16.mxu1 %vm620_vm0, %v3108_v56 }
  0x7a   : > { %2963 = vmatmul.mubr.msk.bf16.gmra.mrb[52].mxu0 %vm620_vm0, %v3109_v57 }
  0x7b   : > { %3027 = vmatmul.mubr.msk.bf16.gmra.mrb[52].mxu1 %vm620_vm0, %v3110_v58  ;;  %2966 = vmatprep.mubr.msk.bf16.mxu0 %vm620_vm0, %v3111_v59 }
  0x7c   : > { %3030 = vmatprep.mubr.msk.bf16.mxu1 %vm620_vm0, %v3112_v60 }
  0x82   : > { %2967 = vmatmul.mubr.msk.bf16.gmra.mrb[56].mxu0 %vm620_vm0, %v3113_v61 }
  0x83   : > { %3031 = vmatmul.mubr.msk.bf16.gmra.mrb[56].mxu1 %vm620_vm0, %v3114_v62  ;;  %2970 = vmatprep.mubr.msk.bf16.mxu0 %vm620_vm0, %v3115_v63 }
  0x84   : > { %3034 = vmatprep.mubr.msk.bf16.mxu1 %vm620_vm0, %v3116_v0 }
  0x8a   : > { %2971 = vmatmul.mubr.msk.bf16.gmra.mrb[60].mxu0 %vm620_vm0, %v3117_v1 }
  0x8b   : > { %3035 = vmatmul.mubr.msk.bf16.gmra.mrb[60].mxu1 %vm620_vm0, %v3118_v2 }
  0xe5   : > { %v2912_v3 = vpop.f32.mrb[0].mxu0 }
  0xe6   : > { %v2976_v4 = vpop.f32.mrb[0].mxu1  ;;  %vm1360_vm1 = vcmp.ge.f32.partialorder %v2912_v3, 0.0  ;;  %v1488_v5 = vmul.f32 0.2, %v2912_v3  ;;  %v847_v7 = vpop.f32.mrb[1].mxu0 }
  0xe7   : > { %vm1424_vm2 = vcmp.ge.f32.partialorder %v2976_v4, 0.0  ;;  %v1552_v6 = vmul.f32 0.2, %v2976_v4  ;;  %v1103_v8 = vpop.f32.mrb[1].mxu1  ;;  %vm1358_vm4 = vcmp.ge.f32.partialorder %v847_v7, 0.0  ;;  %v2913_v12 = vpop.f32.mrb[2].mxu0 }
  0xe8   : > { %v1616_v9 = vsel %vm1360_vm1, %v2912_v3, %v1488_v5  ;;  %v1486_v11 = vmul.f32 0.2, %v847_v7  ;;  %v2977_v13 = vpop.f32.mrb[2].mxu1  ;;  %vm1422_vm5 = vcmp.ge.f32.partialorder %v1103_v8, 0.0  ;;  %v1550_v16 = vmul.f32 0.2, %v1103_v8 }
  0xe9   : > { %v1680_v10 = vsel %vm1424_vm2, %v2976_v4, %v1552_v6  ;;  %v2711_v14 = vpack.c.bf16 %v1616_v9, %v1616_v9  ;;  %v850_v17 = vpop.f32.mrb[3].mxu0  ;;  %v1106_v18 = vpop.f32.mrb[3].mxu1  ;;  %vm1361_vm6 = vcmp.ge.f32.partialorder %v2913_v12, 0.0  ;;  %v1489_v20 = vmul.f32 0.2, %v2913_v12 }
  0xea   : > { %v2775_v15 = vpack.c.bf16 %v1680_v10, %v1680_v10  ;;  %v1614_v19 = vsel %vm1358_vm4, %v847_v7, %v1486_v11  ;;  %vm1425_vm7 = vcmp.ge.f32.partialorder %v2977_v13, 0.0  ;;  %v1678_v22 = vsel %vm1422_vm5, %v1103_v8, %v1550_v16 }
  0xeb   : > { %2257 = vst.msk [vmem:[%s3302_s24 + $0x8] sm:$0xf] %vm2254_vm3, %v2711_v14  ;;  %v2709_v21 = vpack.c.bf16 %v1614_v19, %v1614_v19  ;;  %v1553_v23 = vmul.f32 0.2, %v2977_v13  ;;  %vm1359_vm8 = vcmp.ge.f32.partialorder %v850_v17, 0.0  ;;  %v2773_v24 = vpack.c.bf16 %v1678_v22, %v1678_v22 }
  0xec   : > { %2321 = vst.msk [vmem:[%s3302_s24 + $0x108] sm:$0xf] %vm2254_vm3, %v2775_v15  ;;  %v1617_v25 = vsel %vm1361_vm6, %v2913_v12, %v1489_v20  ;;  %v1487_v26 = vmul.f32 0.2, %v850_v17  ;;  %vm1423_vm9 = vcmp.ge.f32.partialorder %v1106_v18, 0.0 }
  0xed   : > { %2255 = vst.msk [vmem:[%s3302_s24] sm:$0xf] %vm2254_vm3, %v2709_v21  ;;  %v2712_v27 = vpack.c.bf16 %v1617_v25, %v1617_v25  ;;  %v1681_v28 = vsel %vm1425_vm7, %v2977_v13, %v1553_v23  ;;  %v1551_v29 = vmul.f32 0.2, %v1106_v18  ;;  %v2916_v30 = vpop.f32.mrb[4].mxu0 }
  0xee   : > { %v2980_v31 = vpop.f32.mrb[4].mxu1  ;;  %2319 = vst.msk [vmem:[%s3302_s24 + $0x100] sm:$0xf] %vm2254_vm3, %v2773_v24  ;;  %v2776_v32 = vpack.c.bf16 %v1681_v28, %v1681_v28  ;;  %v1615_v33 = vsel %vm1359_vm8, %v850_v17, %v1487_v26  ;;  %vm1364_vm10 = vcmp.ge.f32.partialorder %v2916_v30, 0.0  ;;  %v1492_v34 = vmul.f32 0.2, %v2916_v30 }
  0xef   : > { %v863_v35 = vpop.f32.mrb[5].mxu0  ;;  %v1119_v36 = vpop.f32.mrb[5].mxu1  ;;  %2258 = vst.msk [vmem:[%s3302_s24 + $0xc] sm:$0xf] %vm2254_vm3, %v2712_v27  ;;  %v2710_v37 = vpack.c.bf16 %v1615_v33, %v1615_v33  ;;  %v1679_v38 = vsel %vm1423_vm9, %v1106_v18, %v1551_v29  ;;  %vm1428_vm11 = vcmp.ge.f32.partialorder %v2980_v31, 0.0 }
  0xf0   : > { %v1556_v39 = vmul.f32 0.2, %v2980_v31  ;;  %v2917_v40 = vpop.f32.mrb[6].mxu0  ;;  %v2981_v41 = vpop.f32.mrb[6].mxu1  ;;  %2322 = vst.msk [vmem:[%s3302_s24 + $0x10c] sm:$0xf] %vm2254_vm3, %v2776_v32  ;;  %v2774_v42 = vpack.c.bf16 %v1679_v38, %v1679_v38  ;;  %v1620_v43 = vsel %vm1364_vm10, %v2916_v30, %v1492_v34 }
  0xf1   : > { %vm1362_vm12 = vcmp.ge.f32.partialorder %v863_v35, 0.0  ;;  %v1490_v44 = vmul.f32 0.2, %v863_v35  ;;  %v866_v45 = vpop.f32.mrb[7].mxu0  ;;  %v1122_v46 = vpop.f32.mrb[7].mxu1  ;;  %v2715_v47 = vpack.c.bf16 %v1620_v43, %v1620_v43  ;;  %vm1426_vm13 = vcmp.ge.f32.partialorder %v1119_v36, 0.0 }
  0xf2   : > { %2256 = vst.msk [vmem:[%s3302_s24 + $0x4] sm:$0xf] %vm2254_vm3, %v2710_v37  ;;  %v1684_v48 = vsel %vm1428_vm11, %v2980_v31, %v1556_v39  ;;  %v1554_v49 = vmul.f32 0.2, %v1119_v36  ;;  %2320 = vst.msk [vmem:[%s3302_s24 + $0x104] sm:$0xf] %vm2254_vm3, %v2774_v42 }
  0xf3   : > { %v2779_v50 = vpack.c.bf16 %v1684_v48, %v1684_v48  ;;  %v1618_v51 = vsel %vm1362_vm12, %v863_v35, %v1490_v44  ;;  %vm1365_vm14 = vcmp.ge.f32.partialorder %v2917_v40, 0.0  ;;  %v1493_v52 = vmul.f32 0.2, %v2917_v40  ;;  %2261 = vst.msk [vmem:[%s3302_s24 + $0x18] sm:$0xf] %vm2254_vm3, %v2715_v47 }
  0xf4   : > { %v2713_v53 = vpack.c.bf16 %v1618_v51, %v1618_v51  ;;  %v1682_v54 = vsel %vm1426_vm13, %v1119_v36, %v1554_v49  ;;  %vm1429_vm15 = vcmp.ge.f32.partialorder %v2981_v41, 0.0  ;;  %v1557_v55 = vmul.f32 0.2, %v2981_v41 }
  0xf5   : > { %2325 = vst.msk [vmem:[%s3302_s24 + $0x118] sm:$0xf] %vm2254_vm3, %v2779_v50  ;;  %v2777_v56 = vpack.c.bf16 %v1682_v54, %v1682_v54  ;;  %v1621_v57 = vsel %vm1365_vm14, %v2917_v40, %v1493_v52  ;;  %vm1363_vm0 = vcmp.ge.f32.partialorder %v866_v45, 0.0  ;;  %v1491_v58 = vmul.f32 0.2, %v866_v45  ;;  %v2920_v62 = vpop.f32.mrb[8].mxu0 }
  0xf6   : > { %2259 = vst.msk [vmem:[%s3302_s24 + $0x10] sm:$0xf] %vm2254_vm3, %v2713_v53  ;;  %v2716_v59 = vpack.c.bf16 %v1621_v57, %v1621_v57  ;;  %v1685_v60 = vsel %vm1429_vm15, %v2981_v41, %v1557_v55  ;;  %vm1427_vm1 = vcmp.ge.f32.partialorder %v1122_v46, 0.0  ;;  %v1555_v61 = vmul.f32 0.2, %v1122_v46  ;;  %v2984_v63 = vpop.f32.mrb[8].mxu1 }
  0xf7   : > { %2323 = vst.msk [vmem:[%s3302_s24 + $0x110] sm:$0xf] %vm2254_vm3, %v2777_v56  ;;  %v2780_v0 = vpack.c.bf16 %v1685_v60, %v1685_v60  ;;  %v1619_v1 = vsel %vm1363_vm0, %v866_v45, %v1491_v58  ;;  %vm1368_vm2 = vcmp.ge.f32.partialorder %v2920_v62, 0.0  ;;  %v1496_v2 = vmul.f32 0.2, %v2920_v62  ;;  %v879_v3 = vpop.f32.mrb[9].mxu0 }
  0xf8   : > { %v1135_v4 = vpop.f32.mrb[9].mxu1  ;;  %2262 = vst.msk [vmem:[%s3302_s24 + $0x1c] sm:$0xf] %vm2254_vm3, %v2716_v59  ;;  %v2714_v5 = vpack.c.bf16 %v1619_v1, %v1619_v1  ;;  %v1683_v6 = vsel %vm1427_vm1, %v1122_v46, %v1555_v61  ;;  %vm1432_vm4 = vcmp.ge.f32.partialorder %v2984_v63, 0.0  ;;  %v1560_v7 = vmul.f32 0.2, %v2984_v63 }
  0xf9   : > { %v2921_v8 = vpop.f32.mrb[10].mxu0  ;;  %v2985_v9 = vpop.f32.mrb[10].mxu1  ;;  %2326 = vst.msk [vmem:[%s3302_s24 + $0x11c] sm:$0xf] %vm2254_vm3, %v2780_v0  ;;  %v2778_v10 = vpack.c.bf16 %v1683_v6, %v1683_v6  ;;  %v1624_v11 = vsel %vm1368_vm2, %v2920_v62, %v1496_v2  ;;  %vm1366_vm5 = vcmp.ge.f32.partialorder %v879_v3, 0.0  ;;  %vm1430_vm6 = vcmp.ge.f32.partialorder %v1135_v4, 0.0 }
  0xfa   : > { %v1494_v12 = vmul.f32 0.2, %v879_v3  ;;  %v882_v13 = vpop.f32.mrb[11].mxu0  ;;  %v1138_v14 = vpop.f32.mrb[11].mxu1  ;;  %2260 = vst.msk [vmem:[%s3302_s24 + $0x14] sm:$0xf] %vm2254_vm3, %v2714_v5  ;;  %v2719_v15 = vpack.c.bf16 %v1624_v11, %v1624_v11  ;;  %v1688_v16 = vsel %vm1432_vm4, %v2984_v63, %v1560_v7 }
  0xfb   : > { %v1558_v17 = vmul.f32 0.2, %v1135_v4  ;;  %2324 = vst.msk [vmem:[%s3302_s24 + $0x114] sm:$0xf] %vm2254_vm3, %v2778_v10  ;;  %v2783_v18 = vpack.c.bf16 %v1688_v16, %v1688_v16  ;;  %vm1369_vm7 = vcmp.ge.f32.partialorder %v2921_v8, 0.0  ;;  %vm1433_vm8 = vcmp.ge.f32.partialorder %v2985_v9, 0.0 }
  0xfc   : > { %v1622_v19 = vsel %vm1366_vm5, %v879_v3, %v1494_v12  ;;  %v1497_v20 = vmul.f32 0.2, %v2921_v8  ;;  %2265 = vst.msk [vmem:[%s3302_s24 + $0x28] sm:$0xf] %vm2254_vm3, %v2719_v15  ;;  %v1561_v23 = vmul.f32 0.2, %v2985_v9 }
  0xfd   : > { %v2717_v21 = vpack.c.bf16 %v1622_v19, %v1622_v19  ;;  %v1686_v22 = vsel %vm1430_vm6, %v1135_v4, %v1558_v17  ;;  %2329 = vst.msk [vmem:[%s3302_s24 + $0x128] sm:$0xf] %vm2254_vm3, %v2783_v18  ;;  %vm1367_vm9 = vcmp.ge.f32.partialorder %v882_v13, 0.0  ;;  %v1495_v26 = vmul.f32 0.2, %v882_v13  ;;  %v2924_v30 = vpop.f32.mrb[12].mxu0 }
  0xfe   : > { %v2781_v24 = vpack.c.bf16 %v1686_v22, %v1686_v22  ;;  %v1625_v25 = vsel %vm1369_vm7, %v2921_v8, %v1497_v20  ;;  %v1689_v28 = vsel %vm1433_vm8, %v2985_v9, %v1561_v23  ;;  %vm1431_vm10 = vcmp.ge.f32.partialorder %v1138_v14, 0.0  ;;  %v2988_v31 = vpop.f32.mrb[12].mxu1  ;;  %v895_v35 = vpop.f32.mrb[13].mxu0 }
  0xff   : > { %2263 = vst.msk [vmem:[%s3302_s24 + $0x20] sm:$0xf] %vm2254_vm3, %v2717_v21  ;;  %v2720_v27 = vpack.c.bf16 %v1625_v25, %v1625_v25  ;;  %v1559_v29 = vmul.f32 0.2, %v1138_v14  ;;  %v2784_v32 = vpack.c.bf16 %v1689_v28, %v1689_v28  ;;  %v1623_v33 = vsel %vm1367_vm9, %v882_v13, %v1495_v26  ;;  %v1151_v36 = vpop.f32.mrb[13].mxu1  ;;  %v2925_v40 = vpop.f32.mrb[14].mxu0 }
 0x100   : > { %2327 = vst.msk [vmem:[%s3302_s24 + $0x120] sm:$0xf] %vm2254_vm3, %v2781_v24  ;;  %vm1372_vm11 = vcmp.ge.f32.partialorder %v2924_v30, 0.0  ;;  %v1500_v34 = vmul.f32 0.2, %v2924_v30  ;;  %v2718_v37 = vpack.c.bf16 %v1623_v33, %v1623_v33  ;;  %vm1436_vm12 = vcmp.ge.f32.partialorder %v2988_v31, 0.0 }
 0x101   : > { %2266 = vst.msk [vmem:[%s3302_s24 + $0x2c] sm:$0xf] %vm2254_vm3, %v2720_v27  ;;  %v1687_v38 = vsel %vm1431_vm10, %v1138_v14, %v1559_v29  ;;  %v1564_v39 = vmul.f32 0.2, %v2988_v31  ;;  %v2989_v41 = vpop.f32.mrb[14].mxu1  ;;  %vm1370_vm13 = vcmp.ge.f32.partialorder %v895_v35, 0.0 }
 0x102   : > { %2330 = vst.msk [vmem:[%s3302_s24 + $0x12c] sm:$0xf] %vm2254_vm3, %v2784_v32  ;;  %v2782_v42 = vpack.c.bf16 %v1687_v38, %v1687_v38  ;;  %v1628_v43 = vsel %vm1372_vm11, %v2924_v30, %v1500_v34  ;;  %v1498_v44 = vmul.f32 0.2, %v895_v35  ;;  %v898_v45 = vpop.f32.mrb[15].mxu0  ;;  %v1154_v46 = vpop.f32.mrb[15].mxu1 }
 0x103   : > { %2264 = vst.msk [vmem:[%s3302_s24 + $0x24] sm:$0xf] %vm2254_vm3, %v2718_v37  ;;  %v2723_v47 = vpack.c.bf16 %v1628_v43, %v1628_v43  ;;  %v1692_v48 = vsel %vm1436_vm12, %v2988_v31, %v1564_v39  ;;  %vm1434_vm14 = vcmp.ge.f32.partialorder %v1151_v36, 0.0  ;;  %v1562_v49 = vmul.f32 0.2, %v1151_v36 }
 0x104   : > { %2328 = vst.msk [vmem:[%s3302_s24 + $0x124] sm:$0xf] %vm2254_vm3, %v2782_v42  ;;  %v2787_v50 = vpack.c.bf16 %v1692_v48, %v1692_v48  ;;  %v1626_v51 = vsel %vm1370_vm13, %v895_v35, %v1498_v44  ;;  %vm1373_vm15 = vcmp.ge.f32.partialorder %v2925_v40, 0.0  ;;  %v1501_v52 = vmul.f32 0.2, %v2925_v40 }
 0x105   : > { %2269 = vst.msk [vmem:[%s3302_s24 + $0x38] sm:$0xf] %vm2254_vm3, %v2723_v47  ;;  %v2721_v53 = vpack.c.bf16 %v1626_v51, %v1626_v51  ;;  %v1690_v54 = vsel %vm1434_vm14, %v1151_v36, %v1562_v49  ;;  %vm1437_vm0 = vcmp.ge.f32.partialorder %v2989_v41, 0.0  ;;  %v1565_v55 = vmul.f32 0.2, %v2989_v41  ;;  %v2928_v62 = vpop.f32.mrb[16].mxu0 }
 0x106   : > { %2333 = vst.msk [vmem:[%s3302_s24 + $0x138] sm:$0xf] %vm2254_vm3, %v2787_v50  ;;  %v2785_v56 = vpack.c.bf16 %v1690_v54, %v1690_v54  ;;  %v1629_v57 = vsel %vm1373_vm15, %v2925_v40, %v1501_v52  ;;  %vm1371_vm1 = vcmp.ge.f32.partialorder %v898_v45, 0.0  ;;  %v1499_v58 = vmul.f32 0.2, %v898_v45  ;;  %v2992_v63 = vpop.f32.mrb[16].mxu1 }
 0x107   : > { %2267 = vst.msk [vmem:[%s3302_s24 + $0x30] sm:$0xf] %vm2254_vm3, %v2721_v53  ;;  %v2724_v59 = vpack.c.bf16 %v1629_v57, %v1629_v57  ;;  %v1693_v60 = vsel %vm1437_vm0, %v2989_v41, %v1565_v55  ;;  %vm1435_vm2 = vcmp.ge.f32.partialorder %v1154_v46, 0.0  ;;  %v1563_v61 = vmul.f32 0.2, %v1154_v46  ;;  %v911_v3 = vpop.f32.mrb[17].mxu0 }
 0x108   : > { %2331 = vst.msk [vmem:[%s3302_s24 + $0x130] sm:$0xf] %vm2254_vm3, %v2785_v56  ;;  %v2788_v0 = vpack.c.bf16 %v1693_v60, %v1693_v60  ;;  %v1627_v1 = vsel %vm1371_vm1, %v898_v45, %v1499_v58  ;;  %vm1376_vm4 = vcmp.ge.f32.partialorder %v2928_v62, 0.0  ;;  %v1504_v2 = vmul.f32 0.2, %v2928_v62  ;;  %v1167_v4 = vpop.f32.mrb[17].mxu1 }
 0x109   : > { %2270 = vst.msk [vmem:[%s3302_s24 + $0x3c] sm:$0xf] %vm2254_vm3, %v2724_v59  ;;  %v2722_v5 = vpack.c.bf16 %v1627_v1, %v1627_v1  ;;  %v1691_v6 = vsel %vm1435_vm2, %v1154_v46, %v1563_v61  ;;  %vm1440_vm5 = vcmp.ge.f32.partialorder %v2992_v63, 0.0  ;;  %v1568_v7 = vmul.f32 0.2, %v2992_v63  ;;  %v2929_v8 = vpop.f32.mrb[18].mxu0 }
 0x10a   : > { %v2993_v9 = vpop.f32.mrb[18].mxu1  ;;  %2334 = vst.msk [vmem:[%s3302_s24 + $0x13c] sm:$0xf] %vm2254_vm3, %v2788_v0  ;;  %v2786_v10 = vpack.c.bf16 %v1691_v6, %v1691_v6  ;;  %v1632_v11 = vsel %vm1376_vm4, %v2928_v62, %v1504_v2  ;;  %vm1374_vm6 = vcmp.ge.f32.partialorder %v911_v3, 0.0  ;;  %v1502_v12 = vmul.f32 0.2, %v911_v3 }
 0x10b   : > { %v914_v13 = vpop.f32.mrb[19].mxu0  ;;  %v1170_v14 = vpop.f32.mrb[19].mxu1  ;;  %2268 = vst.msk [vmem:[%s3302_s24 + $0x34] sm:$0xf] %vm2254_vm3, %v2722_v5  ;;  %v2727_v15 = vpack.c.bf16 %v1632_v11, %v1632_v11  ;;  %v1696_v16 = vsel %vm1440_vm5, %v2992_v63, %v1568_v7  ;;  %vm1438_vm7 = vcmp.ge.f32.partialorder %v1167_v4, 0.0  ;;  %vm1377_vm8 = vcmp.ge.f32.partialorder %v2929_v8, 0.0 }
 0x10c   : > { %v1566_v17 = vmul.f32 0.2, %v1167_v4  ;;  %2332 = vst.msk [vmem:[%s3302_s24 + $0x134] sm:$0xf] %vm2254_vm3, %v2786_v10  ;;  %v2791_v18 = vpack.c.bf16 %v1696_v16, %v1696_v16  ;;  %v1630_v19 = vsel %vm1374_vm6, %v911_v3, %v1502_v12  ;;  %v1505_v20 = vmul.f32 0.2, %v2929_v8 }
 0x10d   : > { %2273 = vst.msk [vmem:[%s3302_s24 + $0x48] sm:$0xf] %vm2254_vm3, %v2727_v15  ;;  %v2725_v21 = vpack.c.bf16 %v1630_v19, %v1630_v19  ;;  %vm1441_vm9 = vcmp.ge.f32.partialorder %v2993_v9, 0.0  ;;  %v1569_v23 = vmul.f32 0.2, %v2993_v9  ;;  %vm1375_vm10 = vcmp.ge.f32.partialorder %v914_v13, 0.0 }
 0x10e   : > { %v1694_v22 = vsel %vm1438_vm7, %v1167_v4, %v1566_v17  ;;  %2337 = vst.msk [vmem:[%s3302_s24 + $0x148] sm:$0xf] %vm2254_vm3, %v2791_v18  ;;  %v1633_v25 = vsel %vm1377_vm8, %v2929_v8, %v1505_v20  ;;  %v1503_v26 = vmul.f32 0.2, %v914_v13  ;;  %vm1439_vm11 = vcmp.ge.f32.partialorder %v1170_v14, 0.0  ;;  %v2932_v30 = vpop.f32.mrb[20].mxu0 }
 0x10f   : > { %v2789_v24 = vpack.c.bf16 %v1694_v22, %v1694_v22  ;;  %2271 = vst.msk [vmem:[%s3302_s24 + $0x40] sm:$0xf] %vm2254_vm3, %v2725_v21  ;;  %v2728_v27 = vpack.c.bf16 %v1633_v25, %v1633_v25  ;;  %v1697_v28 = vsel %vm1441_vm9, %v2993_v9, %v1569_v23  ;;  %v1567_v29 = vmul.f32 0.2, %v1170_v14  ;;  %v2996_v31 = vpop.f32.mrb[20].mxu1  ;;  %v927_v35 = vpop.f32.mrb[21].mxu0 }
 0x110   : > { %v2792_v32 = vpack.c.bf16 %v1697_v28, %v1697_v28  ;;  %v1631_v33 = vsel %vm1375_vm10, %v914_v13, %v1503_v26  ;;  %vm1380_vm12 = vcmp.ge.f32.partialorder %v2932_v30, 0.0  ;;  %v1508_v34 = vmul.f32 0.2, %v2932_v30  ;;  %v1183_v36 = vpop.f32.mrb[21].mxu1  ;;  %v2933_v40 = vpop.f32.mrb[22].mxu0 }
 0x111   : > { %2335 = vst.msk [vmem:[%s3302_s24 + $0x140] sm:$0xf] %vm2254_vm3, %v2789_v24  ;;  %2274 = vst.msk [vmem:[%s3302_s24 + $0x4c] sm:$0xf] %vm2254_vm3, %v2728_v27  ;;  %v2726_v37 = vpack.c.bf16 %v1631_v33, %v1631_v33  ;;  %v1695_v38 = vsel %vm1439_vm11, %v1170_v14, %v1567_v29  ;;  %vm1444_vm13 = vcmp.ge.f32.partialorder %v2996_v31, 0.0  ;;  %v2997_v41 = vpop.f32.mrb[22].mxu1 }
 0x112   : > { %v1572_v39 = vmul.f32 0.2, %v2996_v31  ;;  %2338 = vst.msk [vmem:[%s3302_s24 + $0x14c] sm:$0xf] %vm2254_vm3, %v2792_v32  ;;  %v2790_v42 = vpack.c.bf16 %v1695_v38, %v1695_v38  ;;  %v1636_v43 = vsel %vm1380_vm12, %v2932_v30, %v1508_v34  ;;  %vm1378_vm14 = vcmp.ge.f32.partialorder %v927_v35, 0.0  ;;  %v930_v45 = vpop.f32.mrb[23].mxu0 }
 0x113   : > { %v1506_v44 = vmul.f32 0.2, %v927_v35  ;;  %v1186_v46 = vpop.f32.mrb[23].mxu1  ;;  %2272 = vst.msk [vmem:[%s3302_s24 + $0x44] sm:$0xf] %vm2254_vm3, %v2726_v37  ;;  %v2731_v47 = vpack.c.bf16 %v1636_v43, %v1636_v43  ;;  %vm1442_vm15 = vcmp.ge.f32.partialorder %v1183_v36, 0.0 }
 0x114   : > { %v1700_v48 = vsel %vm1444_vm13, %v2996_v31, %v1572_v39  ;;  %v1570_v49 = vmul.f32 0.2, %v1183_v36  ;;  %2336 = vst.msk [vmem:[%s3302_s24 + $0x144] sm:$0xf] %vm2254_vm3, %v2790_v42  ;;  %vm1381_vm0 = vcmp.ge.f32.partialorder %v2933_v40, 0.0  ;;  %vm1445_vm1 = vcmp.ge.f32.partialorder %v2997_v41, 0.0 }
 0x115   : > { %v2795_v50 = vpack.c.bf16 %v1700_v48, %v1700_v48  ;;  %v1634_v51 = vsel %vm1378_vm14, %v927_v35, %v1506_v44  ;;  %v1509_v52 = vmul.f32 0.2, %v2933_v40  ;;  %2277 = vst.msk [vmem:[%s3302_s24 + $0x58] sm:$0xf] %vm2254_vm3, %v2731_v47  ;;  %v1573_v55 = vmul.f32 0.2, %v2997_v41 }
 0x116   : > { %v2729_v53 = vpack.c.bf16 %v1634_v51, %v1634_v51  ;;  %v1698_v54 = vsel %vm1442_vm15, %v1183_v36, %v1570_v49  ;;  %vm1379_vm2 = vcmp.ge.f32.partialorder %v930_v45, 0.0  ;;  %v1507_v58 = vmul.f32 0.2, %v930_v45  ;;  %v2936_v62 = vpop.f32.mrb[24].mxu0  ;;  %v3000_v63 = vpop.f32.mrb[24].mxu1 }
 0x117   : > { %2341 = vst.msk [vmem:[%s3302_s24 + $0x158] sm:$0xf] %vm2254_vm3, %v2795_v50  ;;  %v2793_v56 = vpack.c.bf16 %v1698_v54, %v1698_v54  ;;  %v1637_v57 = vsel %vm1381_vm0, %v2933_v40, %v1509_v52  ;;  %v1701_v60 = vsel %vm1445_vm1, %v2997_v41, %v1573_v55  ;;  %vm1443_vm4 = vcmp.ge.f32.partialorder %v1186_v46, 0.0  ;;  %v943_v3 = vpop.f32.mrb[25].mxu0  ;;  %v1199_v4 = vpop.f32.mrb[25].mxu1 }
 0x118   : > { %2275 = vst.msk [vmem:[%s3302_s24 + $0x50] sm:$0xf] %vm2254_vm3, %v2729_v53  ;;  %v2732_v59 = vpack.c.bf16 %v1637_v57, %v1637_v57  ;;  %v1571_v61 = vmul.f32 0.2, %v1186_v46  ;;  %v2796_v0 = vpack.c.bf16 %v1701_v60, %v1701_v60  ;;  %v1635_v1 = vsel %vm1379_vm2, %v930_v45, %v1507_v58  ;;  %v2937_v8 = vpop.f32.mrb[26].mxu0  ;;  %v3001_v9 = vpop.f32.mrb[26].mxu1 }
 0x119   : > { %2339 = vst.msk [vmem:[%s3302_s24 + $0x150] sm:$0xf] %vm2254_vm3, %v2793_v56  ;;  %vm1384_vm5 = vcmp.ge.f32.partialorder %v2936_v62, 0.0  ;;  %v1512_v2 = vmul.f32 0.2, %v2936_v62  ;;  %v2730_v5 = vpack.c.bf16 %v1635_v1, %v1635_v1  ;;  %vm1448_vm6 = vcmp.ge.f32.partialorder %v3000_v63, 0.0 }
 0x11a   : > { %2278 = vst.msk [vmem:[%s3302_s24 + $0x5c] sm:$0xf] %vm2254_vm3, %v2732_v59  ;;  %v1699_v6 = vsel %vm1443_vm4, %v1186_v46, %v1571_v61  ;;  %v1576_v7 = vmul.f32 0.2, %v3000_v63  ;;  %2342 = vst.msk [vmem:[%s3302_s24 + $0x15c] sm:$0xf] %vm2254_vm3, %v2796_v0 }
 0x11b   : > { %v2794_v10 = vpack.c.bf16 %v1699_v6, %v1699_v6  ;;  %v1640_v11 = vsel %vm1384_vm5, %v2936_v62, %v1512_v2  ;;  %vm1382_vm7 = vcmp.ge.f32.partialorder %v943_v3, 0.0  ;;  %v1510_v12 = vmul.f32 0.2, %v943_v3  ;;  %v946_v13 = vpop.f32.mrb[27].mxu0  ;;  %v1202_v14 = vpop.f32.mrb[27].mxu1 }
 0x11c   : > { %2276 = vst.msk [vmem:[%s3302_s24 + $0x54] sm:$0xf] %vm2254_vm3, %v2730_v5  ;;  %v2735_v15 = vpack.c.bf16 %v1640_v11, %v1640_v11  ;;  %v1704_v16 = vsel %vm1448_vm6, %v3000_v63, %v1576_v7  ;;  %vm1446_vm8 = vcmp.ge.f32.partialorder %v1199_v4, 0.0  ;;  %v1574_v17 = vmul.f32 0.2, %v1199_v4 }
 0x11d   : > { %2340 = vst.msk [vmem:[%s3302_s24 + $0x154] sm:$0xf] %vm2254_vm3, %v2794_v10  ;;  %v2799_v18 = vpack.c.bf16 %v1704_v16, %v1704_v16  ;;  %v1638_v19 = vsel %vm1382_vm7, %v943_v3, %v1510_v12  ;;  %vm1385_vm9 = vcmp.ge.f32.partialorder %v2937_v8, 0.0  ;;  %v1513_v20 = vmul.f32 0.2, %v2937_v8  ;;  %v2940_v30 = vpop.f32.mrb[28].mxu0 }
 0x11e   : > { %2281 = vst.msk [vmem:[%s3302_s24 + $0x68] sm:$0xf] %vm2254_vm3, %v2735_v15  ;;  %v2733_v21 = vpack.c.bf16 %v1638_v19, %v1638_v19  ;;  %v1702_v22 = vsel %vm1446_vm8, %v1199_v4, %v1574_v17  ;;  %vm1449_vm10 = vcmp.ge.f32.partialorder %v3001_v9, 0.0  ;;  %v1577_v23 = vmul.f32 0.2, %v3001_v9  ;;  %v3004_v31 = vpop.f32.mrb[28].mxu1 }
 0x11f   : > { %2345 = vst.msk [vmem:[%s3302_s24 + $0x168] sm:$0xf] %vm2254_vm3, %v2799_v18  ;;  %v2797_v24 = vpack.c.bf16 %v1702_v22, %v1702_v22  ;;  %v1641_v25 = vsel %vm1385_vm9, %v2937_v8, %v1513_v20  ;;  %vm1383_vm11 = vcmp.ge.f32.partialorder %v946_v13, 0.0  ;;  %v1511_v26 = vmul.f32 0.2, %v946_v13  ;;  %v959_v35 = vpop.f32.mrb[29].mxu0 }
 0x120   : > { %2279 = vst.msk [vmem:[%s3302_s24 + $0x60] sm:$0xf] %vm2254_vm3, %v2733_v21  ;;  %v2736_v27 = vpack.c.bf16 %v1641_v25, %v1641_v25  ;;  %v1705_v28 = vsel %vm1449_vm10, %v3001_v9, %v1577_v23  ;;  %vm1447_vm12 = vcmp.ge.f32.partialorder %v1202_v14, 0.0  ;;  %v1575_v29 = vmul.f32 0.2, %v1202_v14  ;;  %v1215_v36 = vpop.f32.mrb[29].mxu1 }
 0x121   : > { %2343 = vst.msk [vmem:[%s3302_s24 + $0x160] sm:$0xf] %vm2254_vm3, %v2797_v24  ;;  %v2800_v32 = vpack.c.bf16 %v1705_v28, %v1705_v28  ;;  %v1639_v33 = vsel %vm1383_vm11, %v946_v13, %v1511_v26  ;;  %vm1388_vm13 = vcmp.ge.f32.partialorder %v2940_v30, 0.0  ;;  %v1516_v34 = vmul.f32 0.2, %v2940_v30  ;;  %v2941_v40 = vpop.f32.mrb[30].mxu0 }
 0x122   : > { %2282 = vst.msk [vmem:[%s3302_s24 + $0x6c] sm:$0xf] %vm2254_vm3, %v2736_v27  ;;  %v2734_v37 = vpack.c.bf16 %v1639_v33, %v1639_v33  ;;  %v1703_v38 = vsel %vm1447_vm12, %v1202_v14, %v1575_v29  ;;  %vm1452_vm14 = vcmp.ge.f32.partialorder %v3004_v31, 0.0  ;;  %v1580_v39 = vmul.f32 0.2, %v3004_v31  ;;  %v3005_v41 = vpop.f32.mrb[30].mxu1 }
 0x123   : > { %2346 = vst.msk [vmem:[%s3302_s24 + $0x16c] sm:$0xf] %vm2254_vm3, %v2800_v32  ;;  %v2798_v42 = vpack.c.bf16 %v1703_v38, %v1703_v38  ;;  %v1644_v43 = vsel %vm1388_vm13, %v2940_v30, %v1516_v34  ;;  %vm1386_vm15 = vcmp.ge.f32.partialorder %v959_v35, 0.0  ;;  %v1514_v44 = vmul.f32 0.2, %v959_v35  ;;  %v962_v45 = vpop.f32.mrb[31].mxu0 }
 0x124   : > { %v1218_v46 = vpop.f32.mrb[31].mxu1  ;;  %2280 = vst.msk [vmem:[%s3302_s24 + $0x64] sm:$0xf] %vm2254_vm3, %v2734_v37  ;;  %v2739_v47 = vpack.c.bf16 %v1644_v43, %v1644_v43  ;;  %v1708_v48 = vsel %vm1452_vm14, %v3004_v31, %v1580_v39  ;;  %vm1450_vm0 = vcmp.ge.f32.partialorder %v1215_v36, 0.0  ;;  %v1578_v49 = vmul.f32 0.2, %v1215_v36 }
 0x125   : > { %2344 = vst.msk [vmem:[%s3302_s24 + $0x164] sm:$0xf] %vm2254_vm3, %v2798_v42  ;;  %v2803_v50 = vpack.c.bf16 %v1708_v48, %v1708_v48  ;;  %v1642_v51 = vsel %vm1386_vm15, %v959_v35, %v1514_v44  ;;  %vm1389_vm1 = vcmp.ge.f32.partialorder %v2941_v40, 0.0  ;;  %v1517_v52 = vmul.f32 0.2, %v2941_v40  ;;  %v2944_v62 = vpop.f32.mrb[32].mxu0 }
 0x126   : > { %2285 = vst.msk [vmem:[%s3302_s24 + $0x78] sm:$0xf] %vm2254_vm3, %v2739_v47  ;;  %v2737_v53 = vpack.c.bf16 %v1642_v51, %v1642_v51  ;;  %v1706_v54 = vsel %vm1450_vm0, %v1215_v36, %v1578_v49  ;;  %vm1453_vm2 = vcmp.ge.f32.partialorder %v3005_v41, 0.0  ;;  %v1581_v55 = vmul.f32 0.2, %v3005_v41  ;;  %v3008_v63 = vpop.f32.mrb[32].mxu1 }
 0x127   : > { %2349 = vst.msk [vmem:[%s3302_s24 + $0x178] sm:$0xf] %vm2254_vm3, %v2803_v50  ;;  %v2801_v56 = vpack.c.bf16 %v1706_v54, %v1706_v54  ;;  %v1645_v57 = vsel %vm1389_vm1, %v2941_v40, %v1517_v52  ;;  %vm1387_vm4 = vcmp.ge.f32.partialorder %v962_v45, 0.0  ;;  %v1515_v58 = vmul.f32 0.2, %v962_v45  ;;  %v975_v3 = vpop.f32.mrb[33].mxu0 }
 0x128   : > { %2283 = vst.msk [vmem:[%s3302_s24 + $0x70] sm:$0xf] %vm2254_vm3, %v2737_v53  ;;  %v2740_v59 = vpack.c.bf16 %v1645_v57, %v1645_v57  ;;  %v1709_v60 = vsel %vm1453_vm2, %v3005_v41, %v1581_v55  ;;  %vm1451_vm5 = vcmp.ge.f32.partialorder %v1218_v46, 0.0  ;;  %v1579_v61 = vmul.f32 0.2, %v1218_v46  ;;  %v1231_v4 = vpop.f32.mrb[33].mxu1 }
 0x129   : > { %2347 = vst.msk [vmem:[%s3302_s24 + $0x170] sm:$0xf] %vm2254_vm3, %v2801_v56  ;;  %v2804_v0 = vpack.c.bf16 %v1709_v60, %v1709_v60  ;;  %v1643_v1 = vsel %vm1387_vm4, %v962_v45, %v1515_v58  ;;  %vm1392_vm6 = vcmp.ge.f32.partialorder %v2944_v62, 0.0  ;;  %v1520_v2 = vmul.f32 0.2, %v2944_v62  ;;  %v2945_v8 = vpop.f32.mrb[34].mxu0 }
 0x12a   : > { %2286 = vst.msk [vmem:[%s3302_s24 + $0x7c] sm:$0xf] %vm2254_vm3, %v2740_v59  ;;  %v2738_v5 = vpack.c.bf16 %v1643_v1, %v1643_v1  ;;  %v1707_v6 = vsel %vm1451_vm5, %v1218_v46, %v1579_v61  ;;  %vm1456_vm7 = vcmp.ge.f32.partialorder %v3008_v63, 0.0  ;;  %v1584_v7 = vmul.f32 0.2, %v3008_v63  ;;  %v3009_v9 = vpop.f32.mrb[34].mxu1 }
 0x12b   : > { %2350 = vst.msk [vmem:[%s3302_s24 + $0x17c] sm:$0xf] %vm2254_vm3, %v2804_v0  ;;  %v2802_v10 = vpack.c.bf16 %v1707_v6, %v1707_v6  ;;  %v1648_v11 = vsel %vm1392_vm6, %v2944_v62, %v1520_v2  ;;  %vm1390_vm8 = vcmp.ge.f32.partialorder %v975_v3, 0.0  ;;  %v1518_v12 = vmul.f32 0.2, %v975_v3  ;;  %v978_v13 = vpop.f32.mrb[35].mxu0 }
 0x12c   : > { %v1234_v14 = vpop.f32.mrb[35].mxu1  ;;  %2284 = vst.msk [vmem:[%s3302_s24 + $0x74] sm:$0xf] %vm2254_vm3, %v2738_v5  ;;  %v2743_v15 = vpack.c.bf16 %v1648_v11, %v1648_v11  ;;  %v1712_v16 = vsel %vm1456_vm7, %v3008_v63, %v1584_v7  ;;  %vm1454_vm9 = vcmp.ge.f32.partialorder %v1231_v4, 0.0  ;;  %v1582_v17 = vmul.f32 0.2, %v1231_v4 }
 0x12d   : > { %2348 = vst.msk [vmem:[%s3302_s24 + $0x174] sm:$0xf] %vm2254_vm3, %v2802_v10  ;;  %v2807_v18 = vpack.c.bf16 %v1712_v16, %v1712_v16  ;;  %v1646_v19 = vsel %vm1390_vm8, %v975_v3, %v1518_v12  ;;  %vm1393_vm10 = vcmp.ge.f32.partialorder %v2945_v8, 0.0  ;;  %v1521_v20 = vmul.f32 0.2, %v2945_v8  ;;  %v2948_v30 = vpop.f32.mrb[36].mxu0 }
 0x12e   : > { %2289 = vst.msk [vmem:[%s3302_s24 + $0x88] sm:$0xf] %vm2254_vm3, %v2743_v15  ;;  %v2741_v21 = vpack.c.bf16 %v1646_v19, %v1646_v19  ;;  %v1710_v22 = vsel %vm1454_vm9, %v1231_v4, %v1582_v17  ;;  %vm1457_vm11 = vcmp.ge.f32.partialorder %v3009_v9, 0.0  ;;  %v1585_v23 = vmul.f32 0.2, %v3009_v9  ;;  %v3012_v31 = vpop.f32.mrb[36].mxu1 }
 0x12f   : > { %2353 = vst.msk [vmem:[%s3302_s24 + $0x188] sm:$0xf] %vm2254_vm3, %v2807_v18  ;;  %v2805_v24 = vpack.c.bf16 %v1710_v22, %v1710_v22  ;;  %v1649_v25 = vsel %vm1393_vm10, %v2945_v8, %v1521_v20  ;;  %vm1391_vm12 = vcmp.ge.f32.partialorder %v978_v13, 0.0  ;;  %v1519_v26 = vmul.f32 0.2, %v978_v13  ;;  %v991_v35 = vpop.f32.mrb[37].mxu0 }
 0x130   : > { %2287 = vst.msk [vmem:[%s3302_s24 + $0x80] sm:$0xf] %vm2254_vm3, %v2741_v21  ;;  %v2744_v27 = vpack.c.bf16 %v1649_v25, %v1649_v25  ;;  %v1713_v28 = vsel %vm1457_vm11, %v3009_v9, %v1585_v23  ;;  %vm1455_vm13 = vcmp.ge.f32.partialorder %v1234_v14, 0.0  ;;  %v1583_v29 = vmul.f32 0.2, %v1234_v14  ;;  %v1247_v36 = vpop.f32.mrb[37].mxu1 }
 0x131   : > { %2351 = vst.msk [vmem:[%s3302_s24 + $0x180] sm:$0xf] %vm2254_vm3, %v2805_v24  ;;  %v2808_v32 = vpack.c.bf16 %v1713_v28, %v1713_v28  ;;  %v1647_v33 = vsel %vm1391_vm12, %v978_v13, %v1519_v26  ;;  %vm1396_vm14 = vcmp.ge.f32.partialorder %v2948_v30, 0.0  ;;  %v1524_v34 = vmul.f32 0.2, %v2948_v30  ;;  %v2949_v40 = vpop.f32.mrb[38].mxu0 }
 0x132   : > { %2290 = vst.msk [vmem:[%s3302_s24 + $0x8c] sm:$0xf] %vm2254_vm3, %v2744_v27  ;;  %v2742_v37 = vpack.c.bf16 %v1647_v33, %v1647_v33  ;;  %v1711_v38 = vsel %vm1455_vm13, %v1234_v14, %v1583_v29  ;;  %vm1460_vm15 = vcmp.ge.f32.partialorder %v3012_v31, 0.0  ;;  %v1588_v39 = vmul.f32 0.2, %v3012_v31  ;;  %v3013_v41 = vpop.f32.mrb[38].mxu1 }
 0x133   : > { %2354 = vst.msk [vmem:[%s3302_s24 + $0x18c] sm:$0xf] %vm2254_vm3, %v2808_v32  ;;  %v2806_v42 = vpack.c.bf16 %v1711_v38, %v1711_v38  ;;  %v1652_v43 = vsel %vm1396_vm14, %v2948_v30, %v1524_v34  ;;  %vm1394_vm0 = vcmp.ge.f32.partialorder %v991_v35, 0.0  ;;  %v1522_v44 = vmul.f32 0.2, %v991_v35  ;;  %v994_v45 = vpop.f32.mrb[39].mxu0 }
 0x134   : > { %v1250_v46 = vpop.f32.mrb[39].mxu1  ;;  %2288 = vst.msk [vmem:[%s3302_s24 + $0x84] sm:$0xf] %vm2254_vm3, %v2742_v37  ;;  %v2747_v47 = vpack.c.bf16 %v1652_v43, %v1652_v43  ;;  %v1716_v48 = vsel %vm1460_vm15, %v3012_v31, %v1588_v39  ;;  %vm1458_vm1 = vcmp.ge.f32.partialorder %v1247_v36, 0.0  ;;  %v1586_v49 = vmul.f32 0.2, %v1247_v36 }
 0x135   : > { %2352 = vst.msk [vmem:[%s3302_s24 + $0x184] sm:$0xf] %vm2254_vm3, %v2806_v42  ;;  %v2811_v50 = vpack.c.bf16 %v1716_v48, %v1716_v48  ;;  %v1650_v51 = vsel %vm1394_vm0, %v991_v35, %v1522_v44  ;;  %vm1397_vm2 = vcmp.ge.f32.partialorder %v2949_v40, 0.0  ;;  %v1525_v52 = vmul.f32 0.2, %v2949_v40  ;;  %v2952_v62 = vpop.f32.mrb[40].mxu0 }
 0x136   : > { %2293 = vst.msk [vmem:[%s3302_s24 + $0x98] sm:$0xf] %vm2254_vm3, %v2747_v47  ;;  %v2745_v53 = vpack.c.bf16 %v1650_v51, %v1650_v51  ;;  %v1714_v54 = vsel %vm1458_vm1, %v1247_v36, %v1586_v49  ;;  %vm1461_vm4 = vcmp.ge.f32.partialorder %v3013_v41, 0.0  ;;  %v1589_v55 = vmul.f32 0.2, %v3013_v41  ;;  %v3016_v63 = vpop.f32.mrb[40].mxu1 }
 0x137   : > { %2357 = vst.msk [vmem:[%s3302_s24 + $0x198] sm:$0xf] %vm2254_vm3, %v2811_v50  ;;  %v2809_v56 = vpack.c.bf16 %v1714_v54, %v1714_v54  ;;  %v1653_v57 = vsel %vm1397_vm2, %v2949_v40, %v1525_v52  ;;  %vm1395_vm5 = vcmp.ge.f32.partialorder %v994_v45, 0.0  ;;  %v1523_v58 = vmul.f32 0.2, %v994_v45  ;;  %v1007_v3 = vpop.f32.mrb[41].mxu0 }
 0x138   : > { %2291 = vst.msk [vmem:[%s3302_s24 + $0x90] sm:$0xf] %vm2254_vm3, %v2745_v53  ;;  %v2748_v59 = vpack.c.bf16 %v1653_v57, %v1653_v57  ;;  %v1717_v60 = vsel %vm1461_vm4, %v3013_v41, %v1589_v55  ;;  %vm1459_vm6 = vcmp.ge.f32.partialorder %v1250_v46, 0.0  ;;  %v1587_v61 = vmul.f32 0.2, %v1250_v46  ;;  %v1263_v4 = vpop.f32.mrb[41].mxu1 }
 0x139   : > { %2355 = vst.msk [vmem:[%s3302_s24 + $0x190] sm:$0xf] %vm2254_vm3, %v2809_v56  ;;  %v2812_v0 = vpack.c.bf16 %v1717_v60, %v1717_v60  ;;  %v1651_v1 = vsel %vm1395_vm5, %v994_v45, %v1523_v58  ;;  %vm1400_vm7 = vcmp.ge.f32.partialorder %v2952_v62, 0.0  ;;  %v1528_v2 = vmul.f32 0.2, %v2952_v62  ;;  %v2953_v8 = vpop.f32.mrb[42].mxu0 }
 0x13a   : > { %2294 = vst.msk [vmem:[%s3302_s24 + $0x9c] sm:$0xf] %vm2254_vm3, %v2748_v59  ;;  %v2746_v5 = vpack.c.bf16 %v1651_v1, %v1651_v1  ;;  %v1715_v6 = vsel %vm1459_vm6, %v1250_v46, %v1587_v61  ;;  %vm1464_vm8 = vcmp.ge.f32.partialorder %v3016_v63, 0.0  ;;  %v1592_v7 = vmul.f32 0.2, %v3016_v63  ;;  %v3017_v9 = vpop.f32.mrb[42].mxu1 }
 0x13b   : > { %2358 = vst.msk [vmem:[%s3302_s24 + $0x19c] sm:$0xf] %vm2254_vm3, %v2812_v0  ;;  %v2810_v10 = vpack.c.bf16 %v1715_v6, %v1715_v6  ;;  %v1656_v11 = vsel %vm1400_vm7, %v2952_v62, %v1528_v2  ;;  %vm1398_vm9 = vcmp.ge.f32.partialorder %v1007_v3, 0.0  ;;  %v1526_v12 = vmul.f32 0.2, %v1007_v3  ;;  %v1010_v13 = vpop.f32.mrb[43].mxu0 }
 0x13c   : > { %v1266_v14 = vpop.f32.mrb[43].mxu1  ;;  %2292 = vst.msk [vmem:[%s3302_s24 + $0x94] sm:$0xf] %vm2254_vm3, %v2746_v5  ;;  %v2751_v15 = vpack.c.bf16 %v1656_v11, %v1656_v11  ;;  %v1720_v16 = vsel %vm1464_vm8, %v3016_v63, %v1592_v7  ;;  %vm1462_vm10 = vcmp.ge.f32.partialorder %v1263_v4, 0.0  ;;  %v1590_v17 = vmul.f32 0.2, %v1263_v4 }
 0x13d   : > { %2356 = vst.msk [vmem:[%s3302_s24 + $0x194] sm:$0xf] %vm2254_vm3, %v2810_v10  ;;  %v2815_v18 = vpack.c.bf16 %v1720_v16, %v1720_v16  ;;  %v1654_v19 = vsel %vm1398_vm9, %v1007_v3, %v1526_v12  ;;  %vm1401_vm11 = vcmp.ge.f32.partialorder %v2953_v8, 0.0  ;;  %v1529_v20 = vmul.f32 0.2, %v2953_v8  ;;  %v2956_v30 = vpop.f32.mrb[44].mxu0 }
 0x13e   : > { %2297 = vst.msk [vmem:[%s3302_s24 + $0xa8] sm:$0xf] %vm2254_vm3, %v2751_v15  ;;  %v2749_v21 = vpack.c.bf16 %v1654_v19, %v1654_v19  ;;  %v1718_v22 = vsel %vm1462_vm10, %v1263_v4, %v1590_v17  ;;  %vm1465_vm12 = vcmp.ge.f32.partialorder %v3017_v9, 0.0  ;;  %v1593_v23 = vmul.f32 0.2, %v3017_v9  ;;  %v3020_v31 = vpop.f32.mrb[44].mxu1 }
 0x13f   : > { %2361 = vst.msk [vmem:[%s3302_s24 + $0x1a8] sm:$0xf] %vm2254_vm3, %v2815_v18  ;;  %v2813_v24 = vpack.c.bf16 %v1718_v22, %v1718_v22  ;;  %v1657_v25 = vsel %vm1401_vm11, %v2953_v8, %v1529_v20  ;;  %vm1399_vm13 = vcmp.ge.f32.partialorder %v1010_v13, 0.0  ;;  %v1527_v26 = vmul.f32 0.2, %v1010_v13  ;;  %v1023_v35 = vpop.f32.mrb[45].mxu0 }
 0x140   : > { %2295 = vst.msk [vmem:[%s3302_s24 + $0xa0] sm:$0xf] %vm2254_vm3, %v2749_v21  ;;  %v2752_v27 = vpack.c.bf16 %v1657_v25, %v1657_v25  ;;  %v1721_v28 = vsel %vm1465_vm12, %v3017_v9, %v1593_v23  ;;  %vm1463_vm14 = vcmp.ge.f32.partialorder %v1266_v14, 0.0  ;;  %v1591_v29 = vmul.f32 0.2, %v1266_v14  ;;  %v1279_v36 = vpop.f32.mrb[45].mxu1 }
 0x141   : > { %2359 = vst.msk [vmem:[%s3302_s24 + $0x1a0] sm:$0xf] %vm2254_vm3, %v2813_v24  ;;  %v2816_v32 = vpack.c.bf16 %v1721_v28, %v1721_v28  ;;  %v1655_v33 = vsel %vm1399_vm13, %v1010_v13, %v1527_v26  ;;  %vm1404_vm15 = vcmp.ge.f32.partialorder %v2956_v30, 0.0  ;;  %v1532_v34 = vmul.f32 0.2, %v2956_v30  ;;  %v2957_v40 = vpop.f32.mrb[46].mxu0 }
 0x142   : > { %2298 = vst.msk [vmem:[%s3302_s24 + $0xac] sm:$0xf] %vm2254_vm3, %v2752_v27  ;;  %v2750_v37 = vpack.c.bf16 %v1655_v33, %v1655_v33  ;;  %v1719_v38 = vsel %vm1463_vm14, %v1266_v14, %v1591_v29  ;;  %vm1468_vm0 = vcmp.ge.f32.partialorder %v3020_v31, 0.0  ;;  %v1596_v39 = vmul.f32 0.2, %v3020_v31  ;;  %v3021_v41 = vpop.f32.mrb[46].mxu1 }
 0x143   : > { %2362 = vst.msk [vmem:[%s3302_s24 + $0x1ac] sm:$0xf] %vm2254_vm3, %v2816_v32  ;;  %v2814_v42 = vpack.c.bf16 %v1719_v38, %v1719_v38  ;;  %v1660_v43 = vsel %vm1404_vm15, %v2956_v30, %v1532_v34  ;;  %vm1402_vm1 = vcmp.ge.f32.partialorder %v1023_v35, 0.0  ;;  %v1530_v44 = vmul.f32 0.2, %v1023_v35  ;;  %v1026_v45 = vpop.f32.mrb[47].mxu0 }
 0x144   : > { %v1282_v46 = vpop.f32.mrb[47].mxu1  ;;  %2296 = vst.msk [vmem:[%s3302_s24 + $0xa4] sm:$0xf] %vm2254_vm3, %v2750_v37  ;;  %v2755_v47 = vpack.c.bf16 %v1660_v43, %v1660_v43  ;;  %v1724_v48 = vsel %vm1468_vm0, %v3020_v31, %v1596_v39  ;;  %vm1466_vm2 = vcmp.ge.f32.partialorder %v1279_v36, 0.0  ;;  %v1594_v49 = vmul.f32 0.2, %v1279_v36 }
 0x145   : > { %2360 = vst.msk [vmem:[%s3302_s24 + $0x1a4] sm:$0xf] %vm2254_vm3, %v2814_v42  ;;  %v2819_v50 = vpack.c.bf16 %v1724_v48, %v1724_v48  ;;  %v1658_v51 = vsel %vm1402_vm1, %v1023_v35, %v1530_v44  ;;  %vm1405_vm4 = vcmp.ge.f32.partialorder %v2957_v40, 0.0  ;;  %v1533_v52 = vmul.f32 0.2, %v2957_v40  ;;  %v2960_v62 = vpop.f32.mrb[48].mxu0 }
 0x146   : > { %2301 = vst.msk [vmem:[%s3302_s24 + $0xb8] sm:$0xf] %vm2254_vm3, %v2755_v47  ;;  %v2753_v53 = vpack.c.bf16 %v1658_v51, %v1658_v51  ;;  %v1722_v54 = vsel %vm1466_vm2, %v1279_v36, %v1594_v49  ;;  %vm1469_vm5 = vcmp.ge.f32.partialorder %v3021_v41, 0.0  ;;  %v1597_v55 = vmul.f32 0.2, %v3021_v41  ;;  %v3024_v63 = vpop.f32.mrb[48].mxu1 }
 0x147   : > { %2365 = vst.msk [vmem:[%s3302_s24 + $0x1b8] sm:$0xf] %vm2254_vm3, %v2819_v50  ;;  %v2817_v56 = vpack.c.bf16 %v1722_v54, %v1722_v54  ;;  %v1661_v57 = vsel %vm1405_vm4, %v2957_v40, %v1533_v52  ;;  %vm1403_vm6 = vcmp.ge.f32.partialorder %v1026_v45, 0.0  ;;  %v1531_v58 = vmul.f32 0.2, %v1026_v45  ;;  %v1039_v3 = vpop.f32.mrb[49].mxu0 }
 0x148   : > { %2299 = vst.msk [vmem:[%s3302_s24 + $0xb0] sm:$0xf] %vm2254_vm3, %v2753_v53  ;;  %v2756_v59 = vpack.c.bf16 %v1661_v57, %v1661_v57  ;;  %v1725_v60 = vsel %vm1469_vm5, %v3021_v41, %v1597_v55  ;;  %vm1467_vm7 = vcmp.ge.f32.partialorder %v1282_v46, 0.0  ;;  %v1595_v61 = vmul.f32 0.2, %v1282_v46  ;;  %v1295_v4 = vpop.f32.mrb[49].mxu1 }
 0x149   : > { %2363 = vst.msk [vmem:[%s3302_s24 + $0x1b0] sm:$0xf] %vm2254_vm3, %v2817_v56  ;;  %v2820_v0 = vpack.c.bf16 %v1725_v60, %v1725_v60  ;;  %v1659_v1 = vsel %vm1403_vm6, %v1026_v45, %v1531_v58  ;;  %vm1408_vm8 = vcmp.ge.f32.partialorder %v2960_v62, 0.0  ;;  %v1536_v2 = vmul.f32 0.2, %v2960_v62  ;;  %v2961_v8 = vpop.f32.mrb[50].mxu0 }
 0x14a   : > { %2302 = vst.msk [vmem:[%s3302_s24 + $0xbc] sm:$0xf] %vm2254_vm3, %v2756_v59  ;;  %v2754_v5 = vpack.c.bf16 %v1659_v1, %v1659_v1  ;;  %v1723_v6 = vsel %vm1467_vm7, %v1282_v46, %v1595_v61  ;;  %vm1472_vm9 = vcmp.ge.f32.partialorder %v3024_v63, 0.0  ;;  %v1600_v7 = vmul.f32 0.2, %v3024_v63  ;;  %v3025_v9 = vpop.f32.mrb[50].mxu1 }
 0x14b   : > { %2366 = vst.msk [vmem:[%s3302_s24 + $0x1bc] sm:$0xf] %vm2254_vm3, %v2820_v0  ;;  %v2818_v10 = vpack.c.bf16 %v1723_v6, %v1723_v6  ;;  %v1664_v11 = vsel %vm1408_vm8, %v2960_v62, %v1536_v2  ;;  %vm1406_vm10 = vcmp.ge.f32.partialorder %v1039_v3, 0.0  ;;  %v1534_v12 = vmul.f32 0.2, %v1039_v3  ;;  %v1042_v13 = vpop.f32.mrb[51].mxu0 }
 0x14c   : > { %v1298_v14 = vpop.f32.mrb[51].mxu1  ;;  %2300 = vst.msk [vmem:[%s3302_s24 + $0xb4] sm:$0xf] %vm2254_vm3, %v2754_v5  ;;  %v2759_v15 = vpack.c.bf16 %v1664_v11, %v1664_v11  ;;  %v1728_v16 = vsel %vm1472_vm9, %v3024_v63, %v1600_v7  ;;  %vm1470_vm11 = vcmp.ge.f32.partialorder %v1295_v4, 0.0  ;;  %v1598_v17 = vmul.f32 0.2, %v1295_v4 }
 0x14d   : > { %2364 = vst.msk [vmem:[%s3302_s24 + $0x1b4] sm:$0xf] %vm2254_vm3, %v2818_v10  ;;  %v2823_v18 = vpack.c.bf16 %v1728_v16, %v1728_v16  ;;  %v1662_v19 = vsel %vm1406_vm10, %v1039_v3, %v1534_v12  ;;  %vm1409_vm12 = vcmp.ge.f32.partialorder %v2961_v8, 0.0  ;;  %v1537_v20 = vmul.f32 0.2, %v2961_v8  ;;  %v2964_v30 = vpop.f32.mrb[52].mxu0 }
 0x14e   : > { %2305 = vst.msk [vmem:[%s3302_s24 + $0xc8] sm:$0xf] %vm2254_vm3, %v2759_v15  ;;  %v2757_v21 = vpack.c.bf16 %v1662_v19, %v1662_v19  ;;  %v1726_v22 = vsel %vm1470_vm11, %v1295_v4, %v1598_v17  ;;  %vm1473_vm13 = vcmp.ge.f32.partialorder %v3025_v9, 0.0  ;;  %v1601_v23 = vmul.f32 0.2, %v3025_v9  ;;  %v3028_v31 = vpop.f32.mrb[52].mxu1 }
 0x14f   : > { %2369 = vst.msk [vmem:[%s3302_s24 + $0x1c8] sm:$0xf] %vm2254_vm3, %v2823_v18  ;;  %v2821_v24 = vpack.c.bf16 %v1726_v22, %v1726_v22  ;;  %v1665_v25 = vsel %vm1409_vm12, %v2961_v8, %v1537_v20  ;;  %vm1407_vm14 = vcmp.ge.f32.partialorder %v1042_v13, 0.0  ;;  %v1535_v26 = vmul.f32 0.2, %v1042_v13  ;;  %v1055_v35 = vpop.f32.mrb[53].mxu0 }
 0x150   : > { %2303 = vst.msk [vmem:[%s3302_s24 + $0xc0] sm:$0xf] %vm2254_vm3, %v2757_v21  ;;  %v2760_v27 = vpack.c.bf16 %v1665_v25, %v1665_v25  ;;  %v1729_v28 = vsel %vm1473_vm13, %v3025_v9, %v1601_v23  ;;  %vm1471_vm15 = vcmp.ge.f32.partialorder %v1298_v14, 0.0  ;;  %v1599_v29 = vmul.f32 0.2, %v1298_v14  ;;  %v1311_v36 = vpop.f32.mrb[53].mxu1 }
 0x151   : > { %2367 = vst.msk [vmem:[%s3302_s24 + $0x1c0] sm:$0xf] %vm2254_vm3, %v2821_v24  ;;  %v2824_v32 = vpack.c.bf16 %v1729_v28, %v1729_v28  ;;  %v1663_v33 = vsel %vm1407_vm14, %v1042_v13, %v1535_v26  ;;  %vm1412_vm0 = vcmp.ge.f32.partialorder %v2964_v30, 0.0  ;;  %v1540_v34 = vmul.f32 0.2, %v2964_v30  ;;  %v2965_v40 = vpop.f32.mrb[54].mxu0 }
 0x152   : > { %2306 = vst.msk [vmem:[%s3302_s24 + $0xcc] sm:$0xf] %vm2254_vm3, %v2760_v27  ;;  %v2758_v37 = vpack.c.bf16 %v1663_v33, %v1663_v33  ;;  %v1727_v38 = vsel %vm1471_vm15, %v1298_v14, %v1599_v29  ;;  %vm1476_vm1 = vcmp.ge.f32.partialorder %v3028_v31, 0.0  ;;  %v1604_v39 = vmul.f32 0.2, %v3028_v31  ;;  %v3029_v41 = vpop.f32.mrb[54].mxu1 }
 0x153   : > { %2370 = vst.msk [vmem:[%s3302_s24 + $0x1cc] sm:$0xf] %vm2254_vm3, %v2824_v32  ;;  %v2822_v42 = vpack.c.bf16 %v1727_v38, %v1727_v38  ;;  %v1668_v43 = vsel %vm1412_vm0, %v2964_v30, %v1540_v34  ;;  %vm1410_vm2 = vcmp.ge.f32.partialorder %v1055_v35, 0.0  ;;  %v1538_v44 = vmul.f32 0.2, %v1055_v35  ;;  %v1058_v45 = vpop.f32.mrb[55].mxu0 }
 0x154   : > { %v1314_v46 = vpop.f32.mrb[55].mxu1  ;;  %2304 = vst.msk [vmem:[%s3302_s24 + $0xc4] sm:$0xf] %vm2254_vm3, %v2758_v37  ;;  %v2763_v47 = vpack.c.bf16 %v1668_v43, %v1668_v43  ;;  %v1732_v48 = vsel %vm1476_vm1, %v3028_v31, %v1604_v39  ;;  %vm1474_vm4 = vcmp.ge.f32.partialorder %v1311_v36, 0.0  ;;  %v1602_v49 = vmul.f32 0.2, %v1311_v36 }
 0x155   : > { %2368 = vst.msk [vmem:[%s3302_s24 + $0x1c4] sm:$0xf] %vm2254_vm3, %v2822_v42  ;;  %v2827_v50 = vpack.c.bf16 %v1732_v48, %v1732_v48  ;;  %v1666_v51 = vsel %vm1410_vm2, %v1055_v35, %v1538_v44  ;;  %vm1413_vm5 = vcmp.ge.f32.partialorder %v2965_v40, 0.0  ;;  %v1541_v52 = vmul.f32 0.2, %v2965_v40  ;;  %v2968_v62 = vpop.f32.mrb[56].mxu0 }
 0x156   : > { %2309 = vst.msk [vmem:[%s3302_s24 + $0xd8] sm:$0xf] %vm2254_vm3, %v2763_v47  ;;  %v2761_v53 = vpack.c.bf16 %v1666_v51, %v1666_v51  ;;  %v1730_v54 = vsel %vm1474_vm4, %v1311_v36, %v1602_v49  ;;  %vm1477_vm6 = vcmp.ge.f32.partialorder %v3029_v41, 0.0  ;;  %v1605_v55 = vmul.f32 0.2, %v3029_v41  ;;  %v3032_v63 = vpop.f32.mrb[56].mxu1 }
 0x157   : > { %2373 = vst.msk [vmem:[%s3302_s24 + $0x1d8] sm:$0xf] %vm2254_vm3, %v2827_v50  ;;  %v2825_v56 = vpack.c.bf16 %v1730_v54, %v1730_v54  ;;  %v1669_v57 = vsel %vm1413_vm5, %v2965_v40, %v1541_v52  ;;  %vm1411_vm7 = vcmp.ge.f32.partialorder %v1058_v45, 0.0  ;;  %v1539_v58 = vmul.f32 0.2, %v1058_v45  ;;  %v1071_v3 = vpop.f32.mrb[57].mxu0 }
 0x158   : > { %2307 = vst.msk [vmem:[%s3302_s24 + $0xd0] sm:$0xf] %vm2254_vm3, %v2761_v53  ;;  %v2764_v59 = vpack.c.bf16 %v1669_v57, %v1669_v57  ;;  %v1733_v60 = vsel %vm1477_vm6, %v3029_v41, %v1605_v55  ;;  %vm1475_vm8 = vcmp.ge.f32.partialorder %v1314_v46, 0.0  ;;  %v1603_v61 = vmul.f32 0.2, %v1314_v46  ;;  %v1327_v4 = vpop.f32.mrb[57].mxu1 }
 0x159   : > { %2371 = vst.msk [vmem:[%s3302_s24 + $0x1d0] sm:$0xf] %vm2254_vm3, %v2825_v56  ;;  %v2828_v0 = vpack.c.bf16 %v1733_v60, %v1733_v60  ;;  %v1667_v1 = vsel %vm1411_vm7, %v1058_v45, %v1539_v58  ;;  %vm1416_vm9 = vcmp.ge.f32.partialorder %v2968_v62, 0.0  ;;  %v1544_v2 = vmul.f32 0.2, %v2968_v62  ;;  %v2969_v8 = vpop.f32.mrb[58].mxu0 }
 0x15a   : > { %2310 = vst.msk [vmem:[%s3302_s24 + $0xdc] sm:$0xf] %vm2254_vm3, %v2764_v59  ;;  %v2762_v5 = vpack.c.bf16 %v1667_v1, %v1667_v1  ;;  %v1731_v6 = vsel %vm1475_vm8, %v1314_v46, %v1603_v61  ;;  %vm1480_vm10 = vcmp.ge.f32.partialorder %v3032_v63, 0.0  ;;  %v1608_v7 = vmul.f32 0.2, %v3032_v63  ;;  %v3033_v9 = vpop.f32.mrb[58].mxu1 }
 0x15b   : > { %2374 = vst.msk [vmem:[%s3302_s24 + $0x1dc] sm:$0xf] %vm2254_vm3, %v2828_v0  ;;  %v2826_v10 = vpack.c.bf16 %v1731_v6, %v1731_v6  ;;  %v1672_v11 = vsel %vm1416_vm9, %v2968_v62, %v1544_v2  ;;  %vm1414_vm11 = vcmp.ge.f32.partialorder %v1071_v3, 0.0  ;;  %v1542_v12 = vmul.f32 0.2, %v1071_v3  ;;  %v1074_v13 = vpop.f32.mrb[59].mxu0 }
 0x15c   : > { %v1330_v14 = vpop.f32.mrb[59].mxu1  ;;  %2308 = vst.msk [vmem:[%s3302_s24 + $0xd4] sm:$0xf] %vm2254_vm3, %v2762_v5  ;;  %v2767_v15 = vpack.c.bf16 %v1672_v11, %v1672_v11  ;;  %v1736_v16 = vsel %vm1480_vm10, %v3032_v63, %v1608_v7  ;;  %vm1478_vm12 = vcmp.ge.f32.partialorder %v1327_v4, 0.0  ;;  %v1606_v17 = vmul.f32 0.2, %v1327_v4 }
 0x15d   : > { %2372 = vst.msk [vmem:[%s3302_s24 + $0x1d4] sm:$0xf] %vm2254_vm3, %v2826_v10  ;;  %v2831_v18 = vpack.c.bf16 %v1736_v16, %v1736_v16  ;;  %v1670_v19 = vsel %vm1414_vm11, %v1071_v3, %v1542_v12  ;;  %vm1417_vm13 = vcmp.ge.f32.partialorder %v2969_v8, 0.0  ;;  %v1545_v20 = vmul.f32 0.2, %v2969_v8  ;;  %v2972_v30 = vpop.f32.mrb[60].mxu0 }
 0x15e   : > { %2313 = vst.msk [vmem:[%s3302_s24 + $0xe8] sm:$0xf] %vm2254_vm3, %v2767_v15  ;;  %v2765_v21 = vpack.c.bf16 %v1670_v19, %v1670_v19  ;;  %v1734_v22 = vsel %vm1478_vm12, %v1327_v4, %v1606_v17  ;;  %vm1481_vm14 = vcmp.ge.f32.partialorder %v3033_v9, 0.0  ;;  %v1609_v23 = vmul.f32 0.2, %v3033_v9  ;;  %v3036_v31 = vpop.f32.mrb[60].mxu1 }
 0x15f   : > { %2377 = vst.msk [vmem:[%s3302_s24 + $0x1e8] sm:$0xf] %vm2254_vm3, %v2831_v18  ;;  %v2829_v24 = vpack.c.bf16 %v1734_v22, %v1734_v22  ;;  %v1673_v25 = vsel %vm1417_vm13, %v2969_v8, %v1545_v20  ;;  %vm1415_vm15 = vcmp.ge.f32.partialorder %v1074_v13, 0.0  ;;  %v1543_v26 = vmul.f32 0.2, %v1074_v13  ;;  %v1087_v35 = vpop.f32.mrb[61].mxu0 }
 0x160   : > { %2311 = vst.msk [vmem:[%s3302_s24 + $0xe0] sm:$0xf] %vm2254_vm3, %v2765_v21  ;;  %v2768_v27 = vpack.c.bf16 %v1673_v25, %v1673_v25  ;;  %v1737_v28 = vsel %vm1481_vm14, %v3033_v9, %v1609_v23  ;;  %vm1479_vm0 = vcmp.ge.f32.partialorder %v1330_v14, 0.0  ;;  %v1607_v29 = vmul.f32 0.2, %v1330_v14  ;;  %v1343_v36 = vpop.f32.mrb[61].mxu1 }
 0x161   : > { %2375 = vst.msk [vmem:[%s3302_s24 + $0x1e0] sm:$0xf] %vm2254_vm3, %v2829_v24  ;;  %v2832_v32 = vpack.c.bf16 %v1737_v28, %v1737_v28  ;;  %v1671_v33 = vsel %vm1415_vm15, %v1074_v13, %v1543_v26  ;;  %vm1420_vm1 = vcmp.ge.f32.partialorder %v2972_v30, 0.0  ;;  %v1548_v34 = vmul.f32 0.2, %v2972_v30  ;;  %v2973_v40 = vpop.f32.mrb[62].mxu0 }
 0x162   : > { %2314 = vst.msk [vmem:[%s3302_s24 + $0xec] sm:$0xf] %vm2254_vm3, %v2768_v27  ;;  %v2766_v37 = vpack.c.bf16 %v1671_v33, %v1671_v33  ;;  %v1735_v38 = vsel %vm1479_vm0, %v1330_v14, %v1607_v29  ;;  %vm1484_vm2 = vcmp.ge.f32.partialorder %v3036_v31, 0.0  ;;  %v1612_v39 = vmul.f32 0.2, %v3036_v31  ;;  %v3037_v41 = vpop.f32.mrb[62].mxu1 }
 0x163   : > { %2378 = vst.msk [vmem:[%s3302_s24 + $0x1ec] sm:$0xf] %vm2254_vm3, %v2832_v32  ;;  %v2830_v42 = vpack.c.bf16 %v1735_v38, %v1735_v38  ;;  %v1676_v43 = vsel %vm1420_vm1, %v2972_v30, %v1548_v34  ;;  %vm1418_vm4 = vcmp.ge.f32.partialorder %v1087_v35, 0.0  ;;  %v1546_v44 = vmul.f32 0.2, %v1087_v35  ;;  %v1090_v45 = vpop.f32.mrb[63].mxu0 }
 0x164   : > { %v1346_v46 = vpop.f32.mrb[63].mxu1  ;;  %2312 = vst.msk [vmem:[%s3302_s24 + $0xe4] sm:$0xf] %vm2254_vm3, %v2766_v37  ;;  %v2771_v47 = vpack.c.bf16 %v1676_v43, %v1676_v43  ;;  %v1740_v48 = vsel %vm1484_vm2, %v3036_v31, %v1612_v39  ;;  %vm1482_vm5 = vcmp.ge.f32.partialorder %v1343_v36, 0.0  ;;  %v1610_v49 = vmul.f32 0.2, %v1343_v36 }
 0x165   : > { %2376 = vst.msk [vmem:[%s3302_s24 + $0x1e4] sm:$0xf] %vm2254_vm3, %v2830_v42  ;;  %v2835_v50 = vpack.c.bf16 %v1740_v48, %v1740_v48  ;;  %v1674_v51 = vsel %vm1418_vm4, %v1087_v35, %v1546_v44  ;;  %vm1421_vm6 = vcmp.ge.f32.partialorder %v2973_v40, 0.0  ;;  %v1549_v52 = vmul.f32 0.2, %v2973_v40 }
 0x166   : > { %2317 = vst.msk [vmem:[%s3302_s24 + $0xf8] sm:$0xf] %vm2254_vm3, %v2771_v47  ;;  %v2769_v53 = vpack.c.bf16 %v1674_v51, %v1674_v51  ;;  %v1738_v54 = vsel %vm1482_vm5, %v1343_v36, %v1610_v49  ;;  %vm1485_vm7 = vcmp.ge.f32.partialorder %v3037_v41, 0.0  ;;  %v1613_v55 = vmul.f32 0.2, %v3037_v41 }
 0x167   : > { %2381 = vst.msk [vmem:[%s3302_s24 + $0x1f8] sm:$0xf] %vm2254_vm3, %v2835_v50  ;;  %v2833_v56 = vpack.c.bf16 %v1738_v54, %v1738_v54  ;;  %v1677_v57 = vsel %vm1421_vm6, %v2973_v40, %v1549_v52  ;;  %vm1419_vm8 = vcmp.ge.f32.partialorder %v1090_v45, 0.0  ;;  %v1547_v58 = vmul.f32 0.2, %v1090_v45 }
 0x168   : > { %2315 = vst.msk [vmem:[%s3302_s24 + $0xf0] sm:$0xf] %vm2254_vm3, %v2769_v53  ;;  %v2772_v59 = vpack.c.bf16 %v1677_v57, %v1677_v57  ;;  %v1741_v60 = vsel %vm1485_vm7, %v3037_v41, %v1613_v55  ;;  %vm1483_vm9 = vcmp.ge.f32.partialorder %v1346_v46, 0.0  ;;  %v1611_v61 = vmul.f32 0.2, %v1346_v46 }
 0x169   : > { %2379 = vst.msk [vmem:[%s3302_s24 + $0x1f0] sm:$0xf] %vm2254_vm3, %v2833_v56  ;;  %v2836_v62 = vpack.c.bf16 %v1741_v60, %v1741_v60  ;;  %v1675_v63 = vsel %vm1419_vm8, %v1090_v45, %v1547_v58 }
 0x16a   : > { %2318 = vst.msk [vmem:[%s3302_s24 + $0xfc] sm:$0xf] %vm2254_vm3, %v2772_v59  ;;  %v2770_v0 = vpack.c.bf16 %v1675_v63, %v1675_v63  ;;  %v1739_v1 = vsel %vm1483_vm9, %v1346_v46, %v1611_v61 }
 0x16b   : > { %2382 = vst.msk [vmem:[%s3302_s24 + $0x1fc] sm:$0xf] %vm2254_vm3, %v2836_v62  ;;  %v2834_v2 = vpack.c.bf16 %v1739_v1, %v1739_v1 }
 0x16c   : > { %2316 = vst.msk [vmem:[%s3302_s24 + $0xf4] sm:$0xf] %vm2254_vm3, %v2770_v0 }
 0x16d   : > { %2380 = vst.msk [vmem:[%s3302_s24 + $0x1f4] sm:$0xf] %vm2254_vm3, %v2834_v2 }
 0x16e PF: > { %s12_s9 = sadd.s32 1, %s3125_s9  }
 0x16f   : > { %p9_p4 = scmp.ge.s32.totalorder %s12_s9, 4  }
 0x171   :  { %11 = sbr.rel (!%p9_p4) target bundleno = 1 (0x1), region = 58 }

// kernel: dnet_forward.8
= control target key start
LH: loop header
LB: loop body
LE: loop exit
PB: predicated region body
PF: predicated region fallthrough
CT: control target
= control target key end

     0   :  { %v2873_v0 = vmov 0   ;;  %vm1880_vm0 = vcmask 519168   ;;  %vm1946_vm1 = vcmask 523264   ;;  %vm19_vm2 = vcmask 516096   ;;  %s3818_s1 = inlined_call_operand.vmem [shape: bf16[512,64], index: 1, kind: input, shape index: {}]   ;;  %s3819_s0 = inlined_call_operand.vmem [shape: bf16[512,512], index: 0, kind: input, shape index: {}]   ;;  %s3820_s2 = inlined_call_operand.vmem [shape: bf16[512,64], index: 2, kind: output, shape index: {0}]   ;;  %s3821_s3 = inlined_call_operand.vmem [shape: f32[1,64], index: 3, kind: output, shape index: {1}]   ;;  %s3822_s4 = inlined_call_operand.vmem [shape: f32[1,64], index: 4, kind: output, shape index: {2}]  }
   0x1   :  { %1046 = vmatprep.subr.bf16.mxu1 %v2873_v0  ;;  %1335 = vmatprep.subr.bf16.mxu0 %v2873_v0  ;;  %v2649_v1 = vld [vmem:[%s3818_s1] sm:$0xff]   ;;  %v2651_v3 = vld [vmem:[%s3818_s1 + $0x8] sm:$0xff]   ;;  %v2653_v5 = vld [vmem:[%s3818_s1 + $0x10] sm:$0xff]  }
   0x2   :  { %v2650_v2 = vld [vmem:[%s3818_s1 + $0x80] sm:$0xff]   ;;  %1047 = vmatpush1.bf16.msra.mxu1 %v2649_v1  ;;  %v2652_v4 = vld [vmem:[%s3818_s1 + $0x88] sm:$0xff]   ;;  %v2654_v6 = vld [vmem:[%s3818_s1 + $0x90] sm:$0xff]  }
   0x3   :  { %1336 = vmatpush1.bf16.msra.mxu0 %v2650_v2  ;;  %1048 = vmatprep.subr.bf16.mxu1 %v2873_v0  ;;  %v2655_v7 = vld [vmem:[%s3818_s1 + $0x18] sm:$0xff]   ;;  %v2657_v9 = vld [vmem:[%s3818_s1 + $0x20] sm:$0xff]   ;;  %v2659_v11 = vld [vmem:[%s3818_s1 + $0x28] sm:$0xff]  }
   0x4   :  { %1337 = vmatprep.subr.bf16.mxu0 %v2873_v0  ;;  %v2656_v8 = vld [vmem:[%s3818_s1 + $0x98] sm:$0xff]   ;;  %v2658_v10 = vld [vmem:[%s3818_s1 + $0xa0] sm:$0xff]   ;;  %v2660_v12 = vld [vmem:[%s3818_s1 + $0xa8] sm:$0xff]  }
   0x5   :  { %v2661_v13 = vld [vmem:[%s3818_s1 + $0x30] sm:$0xff]   ;;  %v2663_v15 = vld [vmem:[%s3818_s1 + $0x38] sm:$0xff]   ;;  %v2665_v17 = vld [vmem:[%s3818_s1 + $0x40] sm:$0xff]  }
   0x6   :  { %1049 = vmatpush1.bf16.msra.mxu1 %v2651_v3  ;;  %v2662_v14 = vld [vmem:[%s3818_s1 + $0xb0] sm:$0xff]   ;;  %v2664_v16 = vld [vmem:[%s3818_s1 + $0xb8] sm:$0xff]   ;;  %v2666_v18 = vld [vmem:[%s3818_s1 + $0xc0] sm:$0xff]  }
   0x7   :  { %1338 = vmatpush1.bf16.msra.mxu0 %v2652_v4  ;;  %1050 = vmatprep.subr.bf16.mxu1 %v2873_v0  ;;  %v2683_v19 = vld [vmem:[%s3819_s0 + $0x4] ss:$16 sps:$4 sm:$0xff]   ;;  %v2667_v20 = vld [vmem:[%s3818_s1 + $0x48] sm:$0xff]   ;;  %v2671_v25 = vld [vmem:[%s3818_s1 + $0x58] sm:$0xff]  }
   0x8   :  { %1339 = vmatprep.subr.bf16.mxu0 %v2873_v0  ;;  %v2686_v21 = vld [vmem:[%s3819_s0 + $0xc] ss:$16 sps:$4 sm:$0xff]   ;;  %1078 = vmatprep.mubr.bf16.mxu1 %v2683_v19  ;;  %v2669_v23 = vld [vmem:[%s3818_s1 + $0x50] sm:$0xff]   ;;  %v2673_v27 = vld [vmem:[%s3818_s1 + $0x60] sm:$0xff]  }
   0x9   :  { %v2668_v22 = vld [vmem:[%s3818_s1 + $0xc8] sm:$0xff]   ;;  %1367 = vmatprep.mubr.bf16.mxu0 %v2686_v21  ;;  %v2670_v24 = vld [vmem:[%s3818_s1 + $0xd0] sm:$0xff]   ;;  %v2672_v26 = vld [vmem:[%s3818_s1 + $0xd8] sm:$0xff]  }
   0xa   :  { %1051 = vmatpush1.bf16.msra.mxu1 %v2653_v5  ;;  %v2674_v28 = vld [vmem:[%s3818_s1 + $0xe0] sm:$0xff]   ;;  %v2675_v29 = vld [vmem:[%s3818_s1 + $0x68] sm:$0xff]   ;;  %v2677_v31 = vld [vmem:[%s3818_s1 + $0x70] sm:$0xff]  }
   0xb   :  { %1340 = vmatpush1.bf16.msra.mxu0 %v2654_v6  ;;  %1052 = vmatprep.subr.bf16.mxu1 %v2873_v0  ;;  %v2676_v30 = vld [vmem:[%s3818_s1 + $0xe8] sm:$0xff]   ;;  %v2678_v32 = vld [vmem:[%s3818_s1 + $0xf0] sm:$0xff]   ;;  %v2679_v33 = vld [vmem:[%s3818_s1 + $0x78] sm:$0xff]  }
   0xc   :  { %1341 = vmatprep.subr.bf16.mxu0 %v2873_v0  ;;  %v2680_v34 = vld [vmem:[%s3818_s1 + $0xf8] sm:$0xff]   ;;  %v2681_v35 = vld [vmem:[%s3819_s0] ss:$16 sps:$4 sm:$0xff]   ;;  %v2687_v37 = vld [vmem:[%s3819_s0 + $0x24] ss:$16 sps:$4 sm:$0xff]  }
   0xd   :  { %v2684_v36 = vld [vmem:[%s3819_s0 + $0x8] ss:$16 sps:$4 sm:$0xff]   ;;  %v2689_v38 = vld [vmem:[%s3819_s0 + $0x2c] ss:$16 sps:$4 sm:$0xff]   ;;  %v2691_v39 = vld [vmem:[%s3819_s0 + $0x20] ss:$16 sps:$4 sm:$0xff]  }
   0xe   :  { %1053 = vmatpush1.bf16.msra.mxu1 %v2655_v7  ;;  %v2692_v40 = vld [vmem:[%s3819_s0 + $0x28] ss:$16 sps:$4 sm:$0xff]   ;;  %v2693_v41 = vld [vmem:[%s3819_s0 + $0x44] ss:$16 sps:$4 sm:$0xff]   ;;  %v2695_v42 = vld [vmem:[%s3819_s0 + $0x4c] ss:$16 sps:$4 sm:$0xff]  }
   0xf   :  { %1342 = vmatpush1.bf16.msra.mxu0 %v2656_v8  ;;  %1054 = vmatprep.subr.bf16.mxu1 %v2873_v0  ;;  %v2697_v43 = vld [vmem:[%s3819_s0 + $0x40] ss:$16 sps:$4 sm:$0xff]   ;;  %v2698_v44 = vld [vmem:[%s3819_s0 + $0x48] ss:$16 sps:$4 sm:$0xff]   ;;  %v2699_v45 = vld [vmem:[%s3819_s0 + $0x64] ss:$16 sps:$4 sm:$0xff]  }
  0x10   :  { %1343 = vmatprep.subr.bf16.mxu0 %v2873_v0  ;;  %v2701_v46 = vld [vmem:[%s3819_s0 + $0x6c] ss:$16 sps:$4 sm:$0xff]   ;;  %v2703_v47 = vld [vmem:[%s3819_s0 + $0x60] ss:$16 sps:$4 sm:$0xff]   ;;  %v2704_v48 = vld [vmem:[%s3819_s0 + $0x68] ss:$16 sps:$4 sm:$0xff]  }
  0x11   :  { %v2705_v49 = vld [vmem:[%s3819_s0 + $0x84] ss:$16 sps:$4 sm:$0xff]   ;;  %v2707_v50 = vld [vmem:[%s3819_s0 + $0x8c] ss:$16 sps:$4 sm:$0xff]   ;;  %v2709_v51 = vld [vmem:[%s3819_s0 + $0x80] ss:$16 sps:$4 sm:$0xff]  }
  0x12   :  { %1055 = vmatpush1.bf16.msra.mxu1 %v2657_v9  ;;  %v2710_v52 = vld [vmem:[%s3819_s0 + $0x88] ss:$16 sps:$4 sm:$0xff]   ;;  %v2711_v53 = vld [vmem:[%s3819_s0 + $0xa4] ss:$16 sps:$4 sm:$0xff]   ;;  %v2713_v54 = vld [vmem:[%s3819_s0 + $0xac] ss:$16 sps:$4 sm:$0xff]  }
  0x13   :  { %1344 = vmatpush1.bf16.msra.mxu0 %v2658_v10  ;;  %1056 = vmatprep.subr.bf16.mxu1 %v2873_v0  ;;  %v2715_v55 = vld [vmem:[%s3819_s0 + $0xa0] ss:$16 sps:$4 sm:$0xff]   ;;  %v2716_v56 = vld [vmem:[%s3819_s0 + $0xa8] ss:$16 sps:$4 sm:$0xff]   ;;  %v2717_v57 = vld [vmem:[%s3819_s0 + $0xc4] ss:$16 sps:$4 sm:$0xff]  }
  0x14   :  { %1345 = vmatprep.subr.bf16.mxu0 %v2873_v0  ;;  %v2719_v58 = vld [vmem:[%s3819_s0 + $0xcc] ss:$16 sps:$4 sm:$0xff]   ;;  %v2721_v59 = vld [vmem:[%s3819_s0 + $0xc0] ss:$16 sps:$4 sm:$0xff]   ;;  %v2722_v60 = vld [vmem:[%s3819_s0 + $0xc8] ss:$16 sps:$4 sm:$0xff]  }
  0x15   :  { %v2723_v61 = vld [vmem:[%s3819_s0 + $0xe4] ss:$16 sps:$4 sm:$0xff]   ;;  %v2725_v62 = vld [vmem:[%s3819_s0 + $0xec] ss:$16 sps:$4 sm:$0xff]   ;;  %v2727_v63 = vld [vmem:[%s3819_s0 + $0xe0] ss:$16 sps:$4 sm:$0xff]  }
  0x16   :  { %1057 = vmatpush1.bf16.msra.mxu1 %v2659_v11  ;;  %v2729_v1 = vld [vmem:[%s3819_s0 + $0x104] ss:$16 sps:$4 sm:$0xff]   ;;  %v2731_v2 = vld [vmem:[%s3819_s0 + $0x10c] ss:$16 sps:$4 sm:$0xff]   ;;  %v2733_v3 = vld [vmem:[%s3819_s0 + $0x100] ss:$16 sps:$4 sm:$0xff]  }
  0x17   :  { %1346 = vmatpush1.bf16.msra.mxu0 %v2660_v12  ;;  %1058 = vmatprep.subr.bf16.mxu1 %v2873_v0  ;;  %v2734_v4 = vld [vmem:[%s3819_s0 + $0x108] ss:$16 sps:$4 sm:$0xff]   ;;  %v2735_v5 = vld [vmem:[%s3819_s0 + $0x124] ss:$16 sps:$4 sm:$0xff]   ;;  %v2737_v6 = vld [vmem:[%s3819_s0 + $0x12c] ss:$16 sps:$4 sm:$0xff]  }
  0x18   :  { %1347 = vmatprep.subr.bf16.mxu0 %v2873_v0  ;;  %v2739_v7 = vld [vmem:[%s3819_s0 + $0x120] ss:$16 sps:$4 sm:$0xff]   ;;  %v2740_v8 = vld [vmem:[%s3819_s0 + $0x128] ss:$16 sps:$4 sm:$0xff]   ;;  %v2741_v9 = vld [vmem:[%s3819_s0 + $0x144] ss:$16 sps:$4 sm:$0xff]  }
  0x19   :  { %v2743_v10 = vld [vmem:[%s3819_s0 + $0x14c] ss:$16 sps:$4 sm:$0xff]   ;;  %v2745_v11 = vld [vmem:[%s3819_s0 + $0x140] ss:$16 sps:$4 sm:$0xff]   ;;  %v2746_v12 = vld [vmem:[%s3819_s0 + $0x148] ss:$16 sps:$4 sm:$0xff]  }
  0x1a   :  { %1059 = vmatpush1.bf16.msra.mxu1 %v2661_v13  ;;  %v2747_v13 = vld [vmem:[%s3819_s0 + $0x164] ss:$16 sps:$4 sm:$0xff]   ;;  %v2757_v19 = vld [vmem:[%s3819_s0 + $0x180] ss:$16 sps:$4 sm:$0xff]  }
  0x1b   :  { %1348 = vmatpush1.bf16.msra.mxu0 %v2662_v14  ;;  %1060 = vmatprep.subr.bf16.mxu1 %v2873_v0  ;;  %v2749_v14 = vld [vmem:[%s3819_s0 + $0x16c] ss:$16 sps:$4 sm:$0xff]   ;;  %v2759_v21 = vld [vmem:[%s3819_s0 + $0x1a4] ss:$16 sps:$4 sm:$0xff]  }
  0x1c   :  { %1349 = vmatprep.subr.bf16.mxu0 %v2873_v0 }
  0x1e   :  { %1061 = vmatpush1.bf16.msra.mxu1 %v2663_v15  ;;  %v2751_v15 = vld [vmem:[%s3819_s0 + $0x160] ss:$16 sps:$4 sm:$0xff]  }
  0x1f   :  { %1350 = vmatpush1.bf16.msra.mxu0 %v2664_v16  ;;  %1062 = vmatprep.subr.bf16.mxu1 %v2873_v0  ;;  %v2752_v16 = vld [vmem:[%s3819_s0 + $0x168] ss:$16 sps:$4 sm:$0xff]  }
  0x20   :  { %1351 = vmatprep.subr.bf16.mxu0 %v2873_v0 }
  0x22   :  { %1063 = vmatpush1.bf16.msra.mxu1 %v2665_v17  ;;  %v2753_v17 = vld [vmem:[%s3819_s0 + $0x184] ss:$16 sps:$4 sm:$0xff]  }
  0x23   :  { %1352 = vmatpush1.bf16.msra.mxu0 %v2666_v18  ;;  %1064 = vmatprep.subr.bf16.mxu1 %v2873_v0  ;;  %v2755_v18 = vld [vmem:[%s3819_s0 + $0x18c] ss:$16 sps:$4 sm:$0xff]  }
  0x24   :  { %1353 = vmatprep.subr.bf16.mxu0 %v2873_v0 }
  0x26   :  { %1065 = vmatpush1.bf16.msra.mxu1 %v2667_v20  ;;  %v2758_v20 = vld [vmem:[%s3819_s0 + $0x188] ss:$16 sps:$4 sm:$0xff]  }
  0x27   :  { %1354 = vmatpush1.bf16.msra.mxu0 %v2668_v22  ;;  %1066 = vmatprep.subr.bf16.mxu1 %v2873_v0  ;;  %v2761_v22 = vld [vmem:[%s3819_s0 + $0x1ac] ss:$16 sps:$4 sm:$0xff]  }
  0x28   :  { %1355 = vmatprep.subr.bf16.mxu0 %v2873_v0 }
  0x2a   :  { %1067 = vmatpush1.bf16.msra.mxu1 %v2669_v23  ;;  %v2763_v23 = vld [vmem:[%s3819_s0 + $0x1a0] ss:$16 sps:$4 sm:$0xff]  }
  0x2b   :  { %1356 = vmatpush1.bf16.msra.mxu0 %v2670_v24  ;;  %1068 = vmatprep.subr.bf16.mxu1 %v2873_v0  ;;  %v2764_v24 = vld [vmem:[%s3819_s0 + $0x1a8] ss:$16 sps:$4 sm:$0xff]  }
  0x2c   :  { %1357 = vmatprep.subr.bf16.mxu0 %v2873_v0 }
  0x2e   :  { %1069 = vmatpush1.bf16.msra.mxu1 %v2671_v25  ;;  %v2765_v25 = vld [vmem:[%s3819_s0 + $0x1c4] ss:$16 sps:$4 sm:$0xff]  }
  0x2f   :  { %1358 = vmatpush1.bf16.msra.mxu0 %v2672_v26  ;;  %1070 = vmatprep.subr.bf16.mxu1 %v2873_v0  ;;  %v2767_v26 = vld [vmem:[%s3819_s0 + $0x1cc] ss:$16 sps:$4 sm:$0xff]  }
  0x30   :  { %1359 = vmatprep.subr.bf16.mxu0 %v2873_v0 }
  0x32   :  { %1071 = vmatpush1.bf16.msra.mxu1 %v2673_v27  ;;  %v2769_v27 = vld [vmem:[%s3819_s0 + $0x1c0] ss:$16 sps:$4 sm:$0xff]  }
  0x33   :  { %1360 = vmatpush1.bf16.msra.mxu0 %v2674_v28  ;;  %1072 = vmatprep.subr.bf16.mxu1 %v2873_v0  ;;  %v2770_v28 = vld [vmem:[%s3819_s0 + $0x1c8] ss:$16 sps:$4 sm:$0xff]  }
  0x34   :  { %1361 = vmatprep.subr.bf16.mxu0 %v2873_v0 }
  0x36   :  { %1073 = vmatpush1.bf16.msra.mxu1 %v2675_v29  ;;  %v2771_v29 = vld [vmem:[%s3819_s0 + $0x1e4] ss:$16 sps:$4 sm:$0xff]  }
  0x37   :  { %1362 = vmatpush1.bf16.msra.mxu0 %v2676_v30  ;;  %1074 = vmatprep.subr.bf16.mxu1 %v2873_v0  ;;  %v2773_v30 = vld [vmem:[%s3819_s0 + $0x1ec] ss:$16 sps:$4 sm:$0xff]  }
  0x38   :  { %1363 = vmatprep.subr.bf16.mxu0 %v2873_v0 }
  0x3a   :  { %1075 = vmatpush1.bf16.msra.mxu1 %v2677_v31  ;;  %v2775_v31 = vld [vmem:[%s3819_s0 + $0x1e0] ss:$16 sps:$4 sm:$0xff]  }
  0x3b   :  { %1364 = vmatpush1.bf16.msra.mxu0 %v2678_v32  ;;  %1076 = vmatprep.subr.bf16.mxu1 %v2873_v0  ;;  %v2776_v32 = vld [vmem:[%s3819_s0 + $0x1e8] ss:$16 sps:$4 sm:$0xff]  }
  0x3c   :  { %1365 = vmatprep.subr.bf16.mxu0 %v2873_v0  ;;  %v2728_v0 = vld [vmem:[%s3819_s0 + $0xe8] ss:$16 sps:$4 sm:$0xff]  }
  0x3e   :  { %1077 = vmatpush1.bf16.msra.mxu1 %v2679_v33  ;;  %v2777_v33 = vld [vmem:[%s3819_s0 + $0x204] ss:$16 sps:$4 sm:$0xff]  }
  0x3f   :  { %1366 = vmatpush1.bf16.msra.mxu0 %v2680_v34  ;;  %v2779_v34 = vld [vmem:[%s3819_s0 + $0x20c] ss:$16 sps:$4 sm:$0xff]  }
  0x41   :  { %1079 = vmatmul.mubr.bf16.vlgmr.msra.gmra.mrb[0].mxu1 %v2681_v35  ;;  %v2781_v35 = vld [vmem:[%s3819_s0 + $0x200] ss:$16 sps:$4 sm:$0xff]  }
  0x42   :  { %1368 = vmatmul.mubr.bf16.vlgmr.msra.gmra.mrb[0].mxu0 %v2684_v36  ;;  %1086 = vmatprep.mubr.bf16.mxu1 %v2687_v37  ;;  %v2782_v36 = vld [vmem:[%s3819_s0 + $0x208] ss:$16 sps:$4 sm:$0xff]   ;;  %v2783_v37 = vld [vmem:[%s3819_s0 + $0x224] ss:$16 sps:$4 sm:$0xff]  }
  0x43   :  { %1375 = vmatprep.mubr.bf16.mxu0 %v2689_v38  ;;  %v2785_v38 = vld [vmem:[%s3819_s0 + $0x22c] ss:$16 sps:$4 sm:$0xff]  }
  0x49   :  { %1087 = vmatmul.mubr.bf16.gmra.mrb[4].mxu1 %v2691_v39  ;;  %v2787_v39 = vld [vmem:[%s3819_s0 + $0x220] ss:$16 sps:$4 sm:$0xff]  }
  0x4a   :  { %1376 = vmatmul.mubr.bf16.gmra.mrb[4].mxu0 %v2692_v40  ;;  %1094 = vmatprep.mubr.bf16.mxu1 %v2693_v41  ;;  %v2788_v40 = vld [vmem:[%s3819_s0 + $0x228] ss:$16 sps:$4 sm:$0xff]   ;;  %v2789_v41 = vld [vmem:[%s3819_s0 + $0x244] ss:$16 sps:$4 sm:$0xff]  }
  0x4b   :  { %1383 = vmatprep.mubr.bf16.mxu0 %v2695_v42  ;;  %v2791_v42 = vld [vmem:[%s3819_s0 + $0x24c] ss:$16 sps:$4 sm:$0xff]  }
  0x51   :  { %1095 = vmatmul.mubr.bf16.gmra.mrb[8].mxu1 %v2697_v43  ;;  %v2793_v43 = vld [vmem:[%s3819_s0 + $0x240] ss:$16 sps:$4 sm:$0xff]  }
  0x52   :  { %1384 = vmatmul.mubr.bf16.gmra.mrb[8].mxu0 %v2698_v44  ;;  %1102 = vmatprep.mubr.bf16.mxu1 %v2699_v45  ;;  %v2794_v44 = vld [vmem:[%s3819_s0 + $0x248] ss:$16 sps:$4 sm:$0xff]   ;;  %v2795_v45 = vld [vmem:[%s3819_s0 + $0x264] ss:$16 sps:$4 sm:$0xff]  }
  0x53   :  { %1391 = vmatprep.mubr.bf16.mxu0 %v2701_v46  ;;  %v2797_v46 = vld [vmem:[%s3819_s0 + $0x26c] ss:$16 sps:$4 sm:$0xff]  }
  0x59   :  { %1103 = vmatmul.mubr.bf16.gmra.mrb[12].mxu1 %v2703_v47  ;;  %v2799_v47 = vld [vmem:[%s3819_s0 + $0x260] ss:$16 sps:$4 sm:$0xff]  }
  0x5a   :  { %1392 = vmatmul.mubr.bf16.gmra.mrb[12].mxu0 %v2704_v48  ;;  %1110 = vmatprep.mubr.bf16.mxu1 %v2705_v49  ;;  %v2800_v48 = vld [vmem:[%s3819_s0 + $0x268] ss:$16 sps:$4 sm:$0xff]   ;;  %v2801_v49 = vld [vmem:[%s3819_s0 + $0x284] ss:$16 sps:$4 sm:$0xff]  }
  0x5b   :  { %1399 = vmatprep.mubr.bf16.mxu0 %v2707_v50  ;;  %v2803_v50 = vld [vmem:[%s3819_s0 + $0x28c] ss:$16 sps:$4 sm:$0xff]  }
  0x61   :  { %1111 = vmatmul.mubr.bf16.gmra.mrb[16].mxu1 %v2709_v51  ;;  %v2805_v51 = vld [vmem:[%s3819_s0 + $0x280] ss:$16 sps:$4 sm:$0xff]  }
  0x62   :  { %1400 = vmatmul.mubr.bf16.gmra.mrb[16].mxu0 %v2710_v52  ;;  %1118 = vmatprep.mubr.bf16.mxu1 %v2711_v53  ;;  %v2806_v52 = vld [vmem:[%s3819_s0 + $0x288] ss:$16 sps:$4 sm:$0xff]   ;;  %v2807_v53 = vld [vmem:[%s3819_s0 + $0x2a4] ss:$16 sps:$4 sm:$0xff]  }
  0x63   :  { %1407 = vmatprep.mubr.bf16.mxu0 %v2713_v54  ;;  %v2809_v54 = vld [vmem:[%s3819_s0 + $0x2ac] ss:$16 sps:$4 sm:$0xff]  }
  0x69   :  { %1119 = vmatmul.mubr.bf16.gmra.mrb[20].mxu1 %v2715_v55  ;;  %v2811_v55 = vld [vmem:[%s3819_s0 + $0x2a0] ss:$16 sps:$4 sm:$0xff]  }
  0x6a   :  { %1408 = vmatmul.mubr.bf16.gmra.mrb[20].mxu0 %v2716_v56  ;;  %1126 = vmatprep.mubr.bf16.mxu1 %v2717_v57  ;;  %v2812_v56 = vld [vmem:[%s3819_s0 + $0x2a8] ss:$16 sps:$4 sm:$0xff]   ;;  %v2813_v57 = vld [vmem:[%s3819_s0 + $0x2c4] ss:$16 sps:$4 sm:$0xff]  }
  0x6b   :  { %1415 = vmatprep.mubr.bf16.mxu0 %v2719_v58  ;;  %v2815_v58 = vld [vmem:[%s3819_s0 + $0x2cc] ss:$16 sps:$4 sm:$0xff]  }
  0x71   :  { %1127 = vmatmul.mubr.bf16.gmra.mrb[24].mxu1 %v2721_v59  ;;  %v2817_v59 = vld [vmem:[%s3819_s0 + $0x2c0] ss:$16 sps:$4 sm:$0xff]  }
  0x72   :  { %1416 = vmatmul.mubr.bf16.gmra.mrb[24].mxu0 %v2722_v60  ;;  %1134 = vmatprep.mubr.bf16.mxu1 %v2723_v61  ;;  %v2818_v60 = vld [vmem:[%s3819_s0 + $0x2c8] ss:$16 sps:$4 sm:$0xff]   ;;  %v2819_v61 = vld [vmem:[%s3819_s0 + $0x2e4] ss:$16 sps:$4 sm:$0xff]  }
  0x73   :  { %1423 = vmatprep.mubr.bf16.mxu0 %v2725_v62  ;;  %v2821_v62 = vld [vmem:[%s3819_s0 + $0x2ec] ss:$16 sps:$4 sm:$0xff]  }
  0x79   :  { %1135 = vmatmul.mubr.bf16.gmra.mrb[28].mxu1 %v2727_v63  ;;  %v2823_v63 = vld [vmem:[%s3819_s0 + $0x2e0] ss:$16 sps:$4 sm:$0xff]  }
  0x7a   :  { %1424 = vmatmul.mubr.bf16.gmra.mrb[28].mxu0 %v2728_v0  ;;  %1142 = vmatprep.mubr.bf16.mxu1 %v2729_v1  ;;  %v2824_v0 = vld [vmem:[%s3819_s0 + $0x2e8] ss:$16 sps:$4 sm:$0xff]   ;;  %v2825_v1 = vld [vmem:[%s3819_s0 + $0x304] ss:$16 sps:$4 sm:$0xff]  }
  0x7b   :  { %1431 = vmatprep.mubr.bf16.mxu0 %v2731_v2  ;;  %v2827_v2 = vld [vmem:[%s3819_s0 + $0x30c] ss:$16 sps:$4 sm:$0xff]  }
  0x81   :  { %1143 = vmatmul.mubr.bf16.gmra.mrb[32].mxu1 %v2733_v3  ;;  %v2829_v3 = vld [vmem:[%s3819_s0 + $0x300] ss:$16 sps:$4 sm:$0xff]  }
  0x82   :  { %1432 = vmatmul.mubr.bf16.gmra.mrb[32].mxu0 %v2734_v4  ;;  %1150 = vmatprep.mubr.bf16.mxu1 %v2735_v5  ;;  %v2830_v4 = vld [vmem:[%s3819_s0 + $0x308] ss:$16 sps:$4 sm:$0xff]   ;;  %v2831_v5 = vld [vmem:[%s3819_s0 + $0x324] ss:$16 sps:$4 sm:$0xff]  }
  0x83   :  { %1439 = vmatprep.mubr.bf16.mxu0 %v2737_v6  ;;  %v2833_v6 = vld [vmem:[%s3819_s0 + $0x32c] ss:$16 sps:$4 sm:$0xff]  }
  0x89   :  { %1151 = vmatmul.mubr.bf16.gmra.mrb[36].mxu1 %v2739_v7  ;;  %v2835_v7 = vld [vmem:[%s3819_s0 + $0x320] ss:$16 sps:$4 sm:$0xff]  }
  0x8a   :  { %1440 = vmatmul.mubr.bf16.gmra.mrb[36].mxu0 %v2740_v8  ;;  %1158 = vmatprep.mubr.bf16.mxu1 %v2741_v9  ;;  %v2836_v8 = vld [vmem:[%s3819_s0 + $0x328] ss:$16 sps:$4 sm:$0xff]   ;;  %v2837_v9 = vld [vmem:[%s3819_s0 + $0x344] ss:$16 sps:$4 sm:$0xff]  }
  0x8b   :  { %1447 = vmatprep.mubr.bf16.mxu0 %v2743_v10  ;;  %v2839_v10 = vld [vmem:[%s3819_s0 + $0x34c] ss:$16 sps:$4 sm:$0xff]  }
  0x91   :  { %1159 = vmatmul.mubr.bf16.gmra.mrb[40].mxu1 %v2745_v11  ;;  %v2841_v11 = vld [vmem:[%s3819_s0 + $0x340] ss:$16 sps:$4 sm:$0xff]  }
  0x92   :  { %1448 = vmatmul.mubr.bf16.gmra.mrb[40].mxu0 %v2746_v12  ;;  %1166 = vmatprep.mubr.bf16.mxu1 %v2747_v13  ;;  %v2842_v12 = vld [vmem:[%s3819_s0 + $0x348] ss:$16 sps:$4 sm:$0xff]   ;;  %v2843_v13 = vld [vmem:[%s3819_s0 + $0x364] ss:$16 sps:$4 sm:$0xff]  }
  0x93   :  { %1455 = vmatprep.mubr.bf16.mxu0 %v2749_v14  ;;  %v2845_v14 = vld [vmem:[%s3819_s0 + $0x36c] ss:$16 sps:$4 sm:$0xff]  }
  0x99   :  { %1167 = vmatmul.mubr.bf16.gmra.mrb[44].mxu1 %v2751_v15 }
  0x9a   :  { %1456 = vmatmul.mubr.bf16.gmra.mrb[44].mxu0 %v2752_v16  ;;  %1174 = vmatprep.mubr.bf16.mxu1 %v2753_v17 }
  0x9b   :  { %1463 = vmatprep.mubr.bf16.mxu0 %v2755_v18  ;;  %v2847_v18 = vld [vmem:[%s3819_s0 + $0x360] ss:$16 sps:$4 sm:$0xff]  }
  0xa1   :  { %1175 = vmatmul.mubr.bf16.gmra.mrb[48].mxu1 %v2757_v19 }
  0xa2   :  { %1464 = vmatmul.mubr.bf16.gmra.mrb[48].mxu0 %v2758_v20  ;;  %1182 = vmatprep.mubr.bf16.mxu1 %v2759_v21 }
  0xa3   :  { %1471 = vmatprep.mubr.bf16.mxu0 %v2761_v22  ;;  %v2848_v22 = vld [vmem:[%s3819_s0 + $0x368] ss:$16 sps:$4 sm:$0xff]  }
  0xa9   :  { %1183 = vmatmul.mubr.bf16.gmra.mrb[52].mxu1 %v2763_v23  ;;  %v2849_v23 = vld [vmem:[%s3819_s0 + $0x384] ss:$16 sps:$4 sm:$0xff]  }
  0xaa   :  { %1472 = vmatmul.mubr.bf16.gmra.mrb[52].mxu0 %v2764_v24  ;;  %1190 = vmatprep.mubr.bf16.mxu1 %v2765_v25 }
  0xab   :  { %1479 = vmatprep.mubr.bf16.mxu0 %v2767_v26  ;;  %v2851_v26 = vld [vmem:[%s3819_s0 + $0x38c] ss:$16 sps:$4 sm:$0xff]  }
  0xb1   :  { %1191 = vmatmul.mubr.bf16.gmra.mrb[56].mxu1 %v2769_v27 }
  0xb2   :  { %1480 = vmatmul.mubr.bf16.gmra.mrb[56].mxu0 %v2770_v28  ;;  %1198 = vmatprep.mubr.bf16.mxu1 %v2771_v29 }
  0xb3   :  { %1487 = vmatprep.mubr.bf16.mxu0 %v2773_v30 }
  0xb9   :  { %1199 = vmatmul.mubr.bf16.gmra.mrb[60].mxu1 %v2775_v31 }
  0xba   :  { %1488 = vmatmul.mubr.bf16.gmra.mrb[60].mxu0 %v2776_v32  ;;  %1206 = vmatprep.mubr.bf16.mxu1 %v2777_v33 }
  0xbb   :  { %1495 = vmatprep.mubr.bf16.mxu0 %v2779_v34 }
  0xc1   :  { %1207 = vmatmul.mubr.bf16.gmra.mrb[64].mxu1 %v2781_v35 }
  0xc2   :  { %1496 = vmatmul.mubr.bf16.gmra.mrb[64].mxu0 %v2782_v36  ;;  %1214 = vmatprep.mubr.bf16.mxu1 %v2783_v37 }
  0xc3   :  { %1503 = vmatprep.mubr.bf16.mxu0 %v2785_v38 }
  0xc9   :  { %1215 = vmatmul.mubr.bf16.gmra.mrb[68].mxu1 %v2787_v39 }
  0xca   :  { %1504 = vmatmul.mubr.bf16.gmra.mrb[68].mxu0 %v2788_v40  ;;  %1222 = vmatprep.mubr.bf16.mxu1 %v2789_v41 }
  0xcb   :  { %1511 = vmatprep.mubr.bf16.mxu0 %v2791_v42  ;;  %v2853_v42 = vld [vmem:[%s3819_s0 + $0x380] ss:$16 sps:$4 sm:$0xff]  }
  0xd1   :  { %1223 = vmatmul.mubr.bf16.gmra.mrb[72].mxu1 %v2793_v43 }
  0xd2   :  { %1512 = vmatmul.mubr.bf16.gmra.mrb[72].mxu0 %v2794_v44  ;;  %1230 = vmatprep.mubr.bf16.mxu1 %v2795_v45 }
  0xd3   :  { %1519 = vmatprep.mubr.bf16.mxu0 %v2797_v46  ;;  %v2854_v46 = vld [vmem:[%s3819_s0 + $0x388] ss:$16 sps:$4 sm:$0xff]  }
  0xd9   :  { %1231 = vmatmul.mubr.bf16.gmra.mrb[76].mxu1 %v2799_v47  ;;  %v2855_v47 = vld [vmem:[%s3819_s0 + $0x3a4] ss:$16 sps:$4 sm:$0xff]  }
  0xda   :  { %1520 = vmatmul.mubr.bf16.gmra.mrb[76].mxu0 %v2800_v48  ;;  %1238 = vmatprep.mubr.bf16.mxu1 %v2801_v49 }
  0xdb   :  { %1527 = vmatprep.mubr.bf16.mxu0 %v2803_v50  ;;  %v2857_v50 = vld [vmem:[%s3819_s0 + $0x3ac] ss:$16 sps:$4 sm:$0xff]  }
  0xe1   :  { %1239 = vmatmul.mubr.bf16.gmra.mrb[80].mxu1 %v2805_v51 }
  0xe2   :  { %1528 = vmatmul.mubr.bf16.gmra.mrb[80].mxu0 %v2806_v52  ;;  %1246 = vmatprep.mubr.bf16.mxu1 %v2807_v53 }
  0xe3   :  { %1535 = vmatprep.mubr.bf16.mxu0 %v2809_v54 }
  0xe9   :  { %1247 = vmatmul.mubr.bf16.gmra.mrb[84].mxu1 %v2811_v55 }
  0xea   :  { %1536 = vmatmul.mubr.bf16.gmra.mrb[84].mxu0 %v2812_v56  ;;  %1254 = vmatprep.mubr.bf16.mxu1 %v2813_v57 }
  0xeb   :  { %1543 = vmatprep.mubr.bf16.mxu0 %v2815_v58 }
  0xf1   :  { %1255 = vmatmul.mubr.bf16.gmra.mrb[88].mxu1 %v2817_v59 }
  0xf2   :  { %1544 = vmatmul.mubr.bf16.gmra.mrb[88].mxu0 %v2818_v60  ;;  %1262 = vmatprep.mubr.bf16.mxu1 %v2819_v61 }
  0xf3   :  { %1551 = vmatprep.mubr.bf16.mxu0 %v2821_v62 }
  0xf9   :  { %1263 = vmatmul.mubr.bf16.gmra.mrb[92].mxu1 %v2823_v63 }
  0xfa   :  { %1552 = vmatmul.mubr.bf16.gmra.mrb[92].mxu0 %v2824_v0  ;;  %1270 = vmatprep.mubr.bf16.mxu1 %v2825_v1 }
  0xfb   :  { %1559 = vmatprep.mubr.bf16.mxu0 %v2827_v2 }
 0x101   :  { %1271 = vmatmul.mubr.bf16.gmra.mrb[96].mxu1 %v2829_v3 }
 0x102   :  { %1560 = vmatmul.mubr.bf16.gmra.mrb[96].mxu0 %v2830_v4  ;;  %1278 = vmatprep.mubr.bf16.mxu1 %v2831_v5  ;;  %v2859_v4 = vld [vmem:[%s3819_s0 + $0x3a0] ss:$16 sps:$4 sm:$0xff]  }
 0x103   :  { %1567 = vmatprep.mubr.bf16.mxu0 %v2833_v6 }
 0x109   :  { %1279 = vmatmul.mubr.bf16.gmra.mrb[100].mxu1 %v2835_v7 }
 0x10a   :  { %1568 = vmatmul.mubr.bf16.gmra.mrb[100].mxu0 %v2836_v8  ;;  %1286 = vmatprep.mubr.bf16.mxu1 %v2837_v9  ;;  %v2860_v8 = vld [vmem:[%s3819_s0 + $0x3a8] ss:$16 sps:$4 sm:$0xff]   ;;  %v2861_v9 = vld [vmem:[%s3819_s0 + $0x3c4] ss:$16 sps:$4 sm:$0xff]  }
 0x10b   :  { %1575 = vmatprep.mubr.bf16.mxu0 %v2839_v10 }
 0x111   :  { %1287 = vmatmul.mubr.bf16.gmra.mrb[104].mxu1 %v2841_v11 }
 0x112   :  { %1576 = vmatmul.mubr.bf16.gmra.mrb[104].mxu0 %v2842_v12  ;;  %1294 = vmatprep.mubr.bf16.mxu1 %v2843_v13  ;;  %v2863_v12 = vld [vmem:[%s3819_s0 + $0x3cc] ss:$16 sps:$4 sm:$0xff]  }
 0x113   :  { %1583 = vmatprep.mubr.bf16.mxu0 %v2845_v14 }
 0x114   :  { %v1080_v15 = vpop.f32.mrb[0].mxu1 }
 0x115   :  { %v1369_v16 = vpop.f32.mrb[0].mxu0  ;;  %v1082_v17 = vpop.f32.mrb[1].mxu1 }
 0x116   :  { %v1370_v19 = vadd.f32 %v1369_v16, %v1080_v15  ;;  %v1371_v20 = vpop.f32.mrb[1].mxu0  ;;  %v1083_v21 = vpop.f32.mrb[2].mxu1 }
 0x117   :  { %v1372_v24 = vpop.f32.mrb[2].mxu0  ;;  %v1085_v25 = vpop.f32.mrb[3].mxu1 }
 0x118   :  { %v2519_v27 = vpack.c.bf16 %v1370_v19, %v1370_v19  ;;  %v2084_v28 = vmul.f32 %v1370_v19, %v1370_v19  ;;  %v1373_v29 = vadd.f32 %v1372_v24, %v1083_v21  ;;  %v1374_v30 = vpop.f32.mrb[3].mxu0  ;;  %v1947_v31 = vsel %vm1946_vm1, %v1370_v19, 0.0 }
 0x119   :  { %1295 = vmatmul.mubr.bf16.gmra.mrb[108].mxu1 %v2847_v18  ;;  %v2865_v30 = vld [vmem:[%s3819_s0 + $0x3c0] ss:$16 sps:$4 sm:$0xff]  }
 0x11a   :  { %1881 = vst.msk [vmem:[%s3820_s2] sm:$0xf] %vm1880_vm0, %v2519_v27  ;;  %v2520_v32 = vpack.c.bf16 %v1373_v29, %v1373_v29  ;;  %v1948_v33 = vsel %vm1946_vm1, %v1373_v29, 0.0  ;;  %v2085_v34 = vmul.f32 %v1373_v29, %v1373_v29  ;;  %1584 = vmatmul.mubr.bf16.gmra.mrb[108].mxu0 %v2848_v22  ;;  %1302 = vmatprep.mubr.bf16.mxu1 %v2849_v23  ;;  %v2148_v36 = vsel %vm1946_vm1, %v2084_v28, 0.0 }
 0x11b   :  { %v1949_v35 = vadd.f32 %v1948_v33, %v1947_v31  ;;  %1591 = vmatprep.mubr.bf16.mxu0 %v2851_v26 }
 0x11c   :  { %1882 = vst.msk [vmem:[%s3820_s2 + $0x4] sm:$0xf] %vm1880_vm0, %v2520_v32  ;;  %v2149_v37 = vsel %vm1946_vm1, %v2085_v34, 0.0  ;;  %v1088_v38 = vpop.f32.mrb[4].mxu1  ;;  %v2866_v34 = vld [vmem:[%s3819_s0 + $0x3c8] ss:$16 sps:$4 sm:$0xff]  }
 0x11d   :  { %v2150_v39 = vadd.f32 %v2149_v37, %v2148_v36  ;;  %v1377_v40 = vpop.f32.mrb[4].mxu0  ;;  %v1090_v41 = vpop.f32.mrb[5].mxu1 }
 0x11e   :  { %v1378_v43 = vadd.f32 %v1377_v40, %v1088_v38  ;;  %v1379_v44 = vpop.f32.mrb[5].mxu0  ;;  %v1091_v45 = vpop.f32.mrb[6].mxu1  ;;  %v2869_v38 = vld [vmem:[%s3819_s0 + $0x3ec] ss:$16 sps:$4 sm:$0xff]  }
 0x11f   :  { %v1380_v48 = vpop.f32.mrb[6].mxu0  ;;  %v1093_v49 = vpop.f32.mrb[7].mxu1 }
 0x120   :  { %v2521_v51 = vpack.c.bf16 %v1378_v43, %v1378_v43  ;;  %v1950_v52 = vsel %vm1946_vm1, %v1378_v43, 0.0  ;;  %v2086_v53 = vmul.f32 %v1378_v43, %v1378_v43  ;;  %v1381_v54 = vadd.f32 %v1380_v48, %v1091_v45  ;;  %v1382_v55 = vpop.f32.mrb[7].mxu0 }
 0x121   :  { %v1951_v56 = vadd.f32 %v1950_v52, %v1949_v35  ;;  %1303 = vmatmul.mubr.bf16.gmra.mrb[112].mxu1 %v2853_v42  ;;  %v2867_v35 = vld [vmem:[%s3819_s0 + $0x3e4] ss:$16 sps:$4 sm:$0xff]  }
 0x122   :  { %1883 = vst.msk [vmem:[%s3820_s2 + $0x8] sm:$0xf] %vm1880_vm0, %v2521_v51  ;;  %v2151_v57 = vsel %vm1946_vm1, %v2086_v53, 0.0  ;;  %v2522_v58 = vpack.c.bf16 %v1381_v54, %v1381_v54  ;;  %v1952_v59 = vsel %vm1946_vm1, %v1381_v54, 0.0  ;;  %v2087_v60 = vmul.f32 %v1381_v54, %v1381_v54  ;;  %1592 = vmatmul.mubr.bf16.gmra.mrb[112].mxu0 %v2854_v46  ;;  %1310 = vmatprep.mubr.bf16.mxu1 %v2855_v47 }
 0x123   :  { %v2152_v61 = vadd.f32 %v2151_v57, %v2150_v39  ;;  %v1953_v62 = vadd.f32 %v1952_v59, %v1951_v56  ;;  %1599 = vmatprep.mubr.bf16.mxu0 %v2857_v50  ;;  %v2871_v56 = vld [vmem:[%s3819_s0 + $0x3e0] ss:$16 sps:$4 sm:$0xff]  }
 0x124   :  { %1884 = vst.msk [vmem:[%s3820_s2 + $0xc] sm:$0xf] %vm1880_vm0, %v2522_v58  ;;  %v2153_v63 = vsel %vm1946_vm1, %v2087_v60, 0.0  ;;  %v1096_v0 = vpop.f32.mrb[8].mxu1  ;;  %v2872_v60 = vld [vmem:[%s3819_s0 + $0x3e8] ss:$16 sps:$4 sm:$0xff]  }
 0x125   :  { %v2154_v1 = vadd.f32 %v2153_v63, %v2152_v61  ;;  %v1385_v2 = vpop.f32.mrb[8].mxu0  ;;  %v1098_v3 = vpop.f32.mrb[9].mxu1 }
 0x126   :  { %v1386_v5 = vadd.f32 %v1385_v2, %v1096_v0  ;;  %v1387_v6 = vpop.f32.mrb[9].mxu0  ;;  %v1099_v7 = vpop.f32.mrb[10].mxu1 }
 0x127   :  { %v1388_v10 = vpop.f32.mrb[10].mxu0  ;;  %v1101_v11 = vpop.f32.mrb[11].mxu1 }
 0x128   :  { %v2523_v13 = vpack.c.bf16 %v1386_v5, %v1386_v5  ;;  %v1954_v14 = vsel %vm1946_vm1, %v1386_v5, 0.0  ;;  %v2088_v15 = vmul.f32 %v1386_v5, %v1386_v5  ;;  %v1389_v16 = vadd.f32 %v1388_v10, %v1099_v7  ;;  %v1390_v17 = vpop.f32.mrb[11].mxu0 }
 0x129   :  { %v1955_v18 = vadd.f32 %v1954_v14, %v1953_v62  ;;  %1311 = vmatmul.mubr.bf16.gmra.mrb[116].mxu1 %v2859_v4 }
 0x12a   :  { %1885 = vst.msk [vmem:[%s3820_s2 + $0x10] sm:$0xf] %vm1880_vm0, %v2523_v13  ;;  %v2155_v19 = vsel %vm1946_vm1, %v2088_v15, 0.0  ;;  %v2524_v20 = vpack.c.bf16 %v1389_v16, %v1389_v16  ;;  %v1956_v21 = vsel %vm1946_vm1, %v1389_v16, 0.0  ;;  %v2089_v22 = vmul.f32 %v1389_v16, %v1389_v16  ;;  %1600 = vmatmul.mubr.bf16.gmra.mrb[116].mxu0 %v2860_v8  ;;  %1318 = vmatprep.mubr.bf16.mxu1 %v2861_v9 }
 0x12b   :  { %v2156_v23 = vadd.f32 %v2155_v19, %v2154_v1  ;;  %v1957_v24 = vadd.f32 %v1956_v21, %v1955_v18  ;;  %1607 = vmatprep.mubr.bf16.mxu0 %v2863_v12 }
 0x12c   :  { %1886 = vst.msk [vmem:[%s3820_s2 + $0x14] sm:$0xf] %vm1880_vm0, %v2524_v20  ;;  %v2157_v25 = vsel %vm1946_vm1, %v2089_v22, 0.0  ;;  %v1104_v26 = vpop.f32.mrb[12].mxu1 }
 0x12d   :  { %v2158_v27 = vadd.f32 %v2157_v25, %v2156_v23  ;;  %v1393_v28 = vpop.f32.mrb[12].mxu0  ;;  %v1106_v29 = vpop.f32.mrb[13].mxu1 }
 0x12e   :  { %v1394_v31 = vadd.f32 %v1393_v28, %v1104_v26  ;;  %v1395_v32 = vpop.f32.mrb[13].mxu0  ;;  %v1107_v33 = vpop.f32.mrb[14].mxu1 }
 0x12f   :  { %v1396_v36 = vpop.f32.mrb[14].mxu0  ;;  %v1109_v37 = vpop.f32.mrb[15].mxu1 }
 0x130   :  { %v2525_v39 = vpack.c.bf16 %v1394_v31, %v1394_v31  ;;  %v1958_v40 = vsel %vm1946_vm1, %v1394_v31, 0.0  ;;  %v2090_v41 = vmul.f32 %v1394_v31, %v1394_v31  ;;  %v1397_v42 = vadd.f32 %v1396_v36, %v1107_v33  ;;  %v1398_v43 = vpop.f32.mrb[15].mxu0 }
 0x131   :  { %v1959_v44 = vadd.f32 %v1958_v40, %v1957_v24  ;;  %1319 = vmatmul.mubr.bf16.gmra.mrb[120].mxu1 %v2865_v30 }
 0x132   :  { %1887 = vst.msk [vmem:[%s3820_s2 + $0x18] sm:$0xf] %vm1880_vm0, %v2525_v39  ;;  %v2159_v45 = vsel %vm1946_vm1, %v2090_v41, 0.0  ;;  %v2526_v46 = vpack.c.bf16 %v1397_v42, %v1397_v42  ;;  %v1960_v47 = vsel %vm1946_vm1, %v1397_v42, 0.0  ;;  %v2091_v48 = vmul.f32 %v1397_v42, %v1397_v42  ;;  %1608 = vmatmul.mubr.bf16.gmra.mrb[120].mxu0 %v2866_v34  ;;  %1326 = vmatprep.mubr.bf16.mxu1 %v2867_v35 }
 0x133   :  { %v2160_v49 = vadd.f32 %v2159_v45, %v2158_v27  ;;  %v1961_v50 = vadd.f32 %v1960_v47, %v1959_v44  ;;  %1615 = vmatprep.mubr.bf16.mxu0 %v2869_v38 }
 0x134   :  { %1888 = vst.msk [vmem:[%s3820_s2 + $0x1c] sm:$0xf] %vm1880_vm0, %v2526_v46  ;;  %v2161_v51 = vsel %vm1946_vm1, %v2091_v48, 0.0  ;;  %v1112_v52 = vpop.f32.mrb[16].mxu1 }
 0x135   :  { %v2162_v53 = vadd.f32 %v2161_v51, %v2160_v49  ;;  %v1401_v54 = vpop.f32.mrb[16].mxu0  ;;  %v1114_v55 = vpop.f32.mrb[17].mxu1 }
 0x136   :  { %v1402_v57 = vadd.f32 %v1401_v54, %v1112_v52  ;;  %v1403_v58 = vpop.f32.mrb[17].mxu0  ;;  %v1115_v59 = vpop.f32.mrb[18].mxu1 }
 0x137   :  { %v1404_v61 = vpop.f32.mrb[18].mxu0  ;;  %v1117_v62 = vpop.f32.mrb[19].mxu1 }
 0x138   :  { %v2527_v63 = vpack.c.bf16 %v1402_v57, %v1402_v57  ;;  %v1962_v0 = vsel %vm1946_vm1, %v1402_v57, 0.0  ;;  %v2092_v1 = vmul.f32 %v1402_v57, %v1402_v57  ;;  %v1405_v2 = vadd.f32 %v1404_v61, %v1115_v59  ;;  %v1406_v3 = vpop.f32.mrb[19].mxu0 }
 0x139   :  { %v1963_v4 = vadd.f32 %v1962_v0, %v1961_v50  ;;  %1327 = vmatmul.mubr.bf16.gmra.mrb[124].mxu1 %v2871_v56 }
 0x13a   :  { %1889 = vst.msk [vmem:[%s3820_s2 + $0x20] sm:$0xf] %vm1880_vm0, %v2527_v63  ;;  %v2163_v5 = vsel %vm1946_vm1, %v2092_v1, 0.0  ;;  %v2528_v6 = vpack.c.bf16 %v1405_v2, %v1405_v2  ;;  %v1964_v7 = vsel %vm1946_vm1, %v1405_v2, 0.0  ;;  %v2093_v8 = vmul.f32 %v1405_v2, %v1405_v2  ;;  %1616 = vmatmul.mubr.bf16.gmra.mrb[124].mxu0 %v2872_v60 }
 0x13b   :  { %v2164_v9 = vadd.f32 %v2163_v5, %v2162_v53  ;;  %v1965_v10 = vadd.f32 %v1964_v7, %v1963_v4 }
 0x13c   :  { %1890 = vst.msk [vmem:[%s3820_s2 + $0x24] sm:$0xf] %vm1880_vm0, %v2528_v6  ;;  %v2165_v11 = vsel %vm1946_vm1, %v2093_v8, 0.0  ;;  %v1120_v12 = vpop.f32.mrb[20].mxu1 }
 0x13d   :  { %v2166_v13 = vadd.f32 %v2165_v11, %v2164_v9  ;;  %v1409_v14 = vpop.f32.mrb[20].mxu0  ;;  %v1122_v15 = vpop.f32.mrb[21].mxu1 }
 0x13e   :  { %v1410_v16 = vadd.f32 %v1409_v14, %v1120_v12  ;;  %v1411_v17 = vpop.f32.mrb[21].mxu0  ;;  %v1123_v18 = vpop.f32.mrb[22].mxu1 }
 0x13f   :  { %v1412_v19 = vpop.f32.mrb[22].mxu0  ;;  %v1125_v20 = vpop.f32.mrb[23].mxu1 }
 0x140   :  { %v2529_v21 = vpack.c.bf16 %v1410_v16, %v1410_v16  ;;  %v1966_v22 = vsel %vm1946_vm1, %v1410_v16, 0.0  ;;  %v2094_v23 = vmul.f32 %v1410_v16, %v1410_v16  ;;  %v1413_v24 = vadd.f32 %v1412_v19, %v1123_v18  ;;  %v1414_v25 = vpop.f32.mrb[23].mxu0 }
 0x141   :  { %v1967_v26 = vadd.f32 %v1966_v22, %v1965_v10 }
 0x142   :  { %1891 = vst.msk [vmem:[%s3820_s2 + $0x28] sm:$0xf] %vm1880_vm0, %v2529_v21  ;;  %v2167_v27 = vsel %vm1946_vm1, %v2094_v23, 0.0  ;;  %v2530_v28 = vpack.c.bf16 %v1413_v24, %v1413_v24  ;;  %v1968_v29 = vsel %vm1946_vm1, %v1413_v24, 0.0  ;;  %v2095_v30 = vmul.f32 %v1413_v24, %v1413_v24 }
 0x143   :  { %v2168_v31 = vadd.f32 %v2167_v27, %v2166_v13  ;;  %v1969_v32 = vadd.f32 %v1968_v29, %v1967_v26 }
 0x144   :  { %1892 = vst.msk [vmem:[%s3820_s2 + $0x2c] sm:$0xf] %vm1880_vm0, %v2530_v28  ;;  %v2169_v33 = vsel %vm1946_vm1, %v2095_v30, 0.0  ;;  %v1128_v34 = vpop.f32.mrb[24].mxu1 }
 0x145   :  { %v2170_v35 = vadd.f32 %v2169_v33, %v2168_v31  ;;  %v1417_v36 = vpop.f32.mrb[24].mxu0  ;;  %v1130_v37 = vpop.f32.mrb[25].mxu1 }
 0x146   :  { %v1418_v38 = vadd.f32 %v1417_v36, %v1128_v34  ;;  %v1419_v39 = vpop.f32.mrb[25].mxu0  ;;  %v1131_v40 = vpop.f32.mrb[26].mxu1 }
 0x147   :  { %v1420_v41 = vpop.f32.mrb[26].mxu0  ;;  %v1133_v42 = vpop.f32.mrb[27].mxu1 }
 0x148   :  { %v2531_v43 = vpack.c.bf16 %v1418_v38, %v1418_v38  ;;  %v1970_v44 = vsel %vm1946_vm1, %v1418_v38, 0.0  ;;  %v2096_v45 = vmul.f32 %v1418_v38, %v1418_v38  ;;  %v1421_v46 = vadd.f32 %v1420_v41, %v1131_v40  ;;  %v1422_v47 = vpop.f32.mrb[27].mxu0 }
 0x149   :  { %v1971_v48 = vadd.f32 %v1970_v44, %v1969_v32 }
 0x14a   :  { %1893 = vst.msk [vmem:[%s3820_s2 + $0x30] sm:$0xf] %vm1880_vm0, %v2531_v43  ;;  %v2171_v49 = vsel %vm1946_vm1, %v2096_v45, 0.0  ;;  %v2532_v50 = vpack.c.bf16 %v1421_v46, %v1421_v46  ;;  %v1972_v51 = vsel %vm1946_vm1, %v1421_v46, 0.0  ;;  %v2097_v52 = vmul.f32 %v1421_v46, %v1421_v46 }
 0x14b   :  { %v2172_v53 = vadd.f32 %v2171_v49, %v2170_v35  ;;  %v1973_v54 = vadd.f32 %v1972_v51, %v1971_v48 }
 0x14c   :  { %1894 = vst.msk [vmem:[%s3820_s2 + $0x34] sm:$0xf] %vm1880_vm0, %v2532_v50  ;;  %v2173_v55 = vsel %vm1946_vm1, %v2097_v52, 0.0  ;;  %v1136_v56 = vpop.f32.mrb[28].mxu1 }
 0x14d   :  { %v2174_v57 = vadd.f32 %v2173_v55, %v2172_v53  ;;  %v1425_v58 = vpop.f32.mrb[28].mxu0  ;;  %v1138_v59 = vpop.f32.mrb[29].mxu1 }
 0x14e   :  { %v1426_v60 = vadd.f32 %v1425_v58, %v1136_v56  ;;  %v1427_v61 = vpop.f32.mrb[29].mxu0  ;;  %v1139_v62 = vpop.f32.mrb[30].mxu1 }
 0x14f   :  { %v1428_v63 = vpop.f32.mrb[30].mxu0  ;;  %v1141_v0 = vpop.f32.mrb[31].mxu1 }
 0x150   :  { %v2533_v1 = vpack.c.bf16 %v1426_v60, %v1426_v60  ;;  %v1974_v2 = vsel %vm1946_vm1, %v1426_v60, 0.0  ;;  %v2098_v3 = vmul.f32 %v1426_v60, %v1426_v60  ;;  %v1429_v4 = vadd.f32 %v1428_v63, %v1139_v62  ;;  %v1430_v5 = vpop.f32.mrb[31].mxu0 }
 0x151   :  { %v1975_v6 = vadd.f32 %v1974_v2, %v1973_v54 }
 0x152   :  { %1895 = vst.msk [vmem:[%s3820_s2 + $0x38] sm:$0xf] %vm1880_vm0, %v2533_v1  ;;  %v2175_v7 = vsel %vm1946_vm1, %v2098_v3, 0.0  ;;  %v2534_v8 = vpack.c.bf16 %v1429_v4, %v1429_v4  ;;  %v1976_v9 = vsel %vm1946_vm1, %v1429_v4, 0.0  ;;  %v2099_v10 = vmul.f32 %v1429_v4, %v1429_v4 }
 0x153   :  { %v2176_v11 = vadd.f32 %v2175_v7, %v2174_v57  ;;  %v1977_v12 = vadd.f32 %v1976_v9, %v1975_v6 }
 0x154   :  { %1896 = vst.msk [vmem:[%s3820_s2 + $0x3c] sm:$0xf] %vm1880_vm0, %v2534_v8  ;;  %v2177_v13 = vsel %vm1946_vm1, %v2099_v10, 0.0  ;;  %v1144_v14 = vpop.f32.mrb[32].mxu1 }
 0x155   :  { %v2178_v15 = vadd.f32 %v2177_v13, %v2176_v11  ;;  %v1433_v16 = vpop.f32.mrb[32].mxu0  ;;  %v1146_v17 = vpop.f32.mrb[33].mxu1 }
 0x156   :  { %v1434_v18 = vadd.f32 %v1433_v16, %v1144_v14  ;;  %v1435_v19 = vpop.f32.mrb[33].mxu0  ;;  %v1147_v20 = vpop.f32.mrb[34].mxu1 }
 0x157   :  { %v1436_v21 = vpop.f32.mrb[34].mxu0  ;;  %v1149_v22 = vpop.f32.mrb[35].mxu1 }
 0x158   :  { %v2535_v23 = vpack.c.bf16 %v1434_v18, %v1434_v18  ;;  %v1978_v24 = vsel %vm1946_vm1, %v1434_v18, 0.0  ;;  %v2100_v25 = vmul.f32 %v1434_v18, %v1434_v18  ;;  %v1437_v26 = vadd.f32 %v1436_v21, %v1147_v20  ;;  %v1438_v27 = vpop.f32.mrb[35].mxu0 }
 0x159   :  { %v1979_v28 = vadd.f32 %v1978_v24, %v1977_v12 }
 0x15a   :  { %1897 = vst.msk [vmem:[%s3820_s2 + $0x40] sm:$0xf] %vm1880_vm0, %v2535_v23  ;;  %v2179_v29 = vsel %vm1946_vm1, %v2100_v25, 0.0  ;;  %v2536_v30 = vpack.c.bf16 %v1437_v26, %v1437_v26  ;;  %v1980_v31 = vsel %vm1946_vm1, %v1437_v26, 0.0  ;;  %v2101_v32 = vmul.f32 %v1437_v26, %v1437_v26 }
 0x15b   :  { %v2180_v33 = vadd.f32 %v2179_v29, %v2178_v15  ;;  %v1981_v34 = vadd.f32 %v1980_v31, %v1979_v28 }
 0x15c   :  { %1898 = vst.msk [vmem:[%s3820_s2 + $0x44] sm:$0xf] %vm1880_vm0, %v2536_v30  ;;  %v2181_v35 = vsel %vm1946_vm1, %v2101_v32, 0.0  ;;  %v1152_v36 = vpop.f32.mrb[36].mxu1 }
 0x15d   :  { %v2182_v37 = vadd.f32 %v2181_v35, %v2180_v33  ;;  %v1441_v38 = vpop.f32.mrb[36].mxu0  ;;  %v1154_v39 = vpop.f32.mrb[37].mxu1 }
 0x15e   :  { %v1442_v40 = vadd.f32 %v1441_v38, %v1152_v36  ;;  %v1443_v41 = vpop.f32.mrb[37].mxu0  ;;  %v1155_v42 = vpop.f32.mrb[38].mxu1 }
 0x15f   :  { %v1444_v43 = vpop.f32.mrb[38].mxu0  ;;  %v1157_v44 = vpop.f32.mrb[39].mxu1 }
 0x160   :  { %v2537_v45 = vpack.c.bf16 %v1442_v40, %v1442_v40  ;;  %v1982_v46 = vsel %vm1946_vm1, %v1442_v40, 0.0  ;;  %v2102_v47 = vmul.f32 %v1442_v40, %v1442_v40  ;;  %v1445_v48 = vadd.f32 %v1444_v43, %v1155_v42  ;;  %v1446_v49 = vpop.f32.mrb[39].mxu0 }
 0x161   :  { %v1983_v50 = vadd.f32 %v1982_v46, %v1981_v34 }
 0x162   :  { %1899 = vst.msk [vmem:[%s3820_s2 + $0x48] sm:$0xf] %vm1880_vm0, %v2537_v45  ;;  %v2183_v51 = vsel %vm1946_vm1, %v2102_v47, 0.0  ;;  %v2538_v52 = vpack.c.bf16 %v1445_v48, %v1445_v48  ;;  %v1984_v53 = vsel %vm1946_vm1, %v1445_v48, 0.0  ;;  %v2103_v54 = vmul.f32 %v1445_v48, %v1445_v48 }
 0x163   :  { %v2184_v55 = vadd.f32 %v2183_v51, %v2182_v37  ;;  %v1985_v56 = vadd.f32 %v1984_v53, %v1983_v50 }
 0x164   :  { %1900 = vst.msk [vmem:[%s3820_s2 + $0x4c] sm:$0xf] %vm1880_vm0, %v2538_v52  ;;  %v2185_v57 = vsel %vm1946_vm1, %v2103_v54, 0.0  ;;  %v1160_v58 = vpop.f32.mrb[40].mxu1 }
 0x165   :  { %v2186_v59 = vadd.f32 %v2185_v57, %v2184_v55  ;;  %v1449_v60 = vpop.f32.mrb[40].mxu0  ;;  %v1162_v61 = vpop.f32.mrb[41].mxu1 }
 0x166   :  { %v1450_v62 = vadd.f32 %v1449_v60, %v1160_v58  ;;  %v1451_v63 = vpop.f32.mrb[41].mxu0  ;;  %v1163_v0 = vpop.f32.mrb[42].mxu1 }
 0x167   :  { %v1452_v1 = vpop.f32.mrb[42].mxu0  ;;  %v1165_v2 = vpop.f32.mrb[43].mxu1 }
 0x168   :  { %v2539_v3 = vpack.c.bf16 %v1450_v62, %v1450_v62  ;;  %v1986_v4 = vsel %vm1946_vm1, %v1450_v62, 0.0  ;;  %v2104_v5 = vmul.f32 %v1450_v62, %v1450_v62  ;;  %v1453_v6 = vadd.f32 %v1452_v1, %v1163_v0  ;;  %v1454_v7 = vpop.f32.mrb[43].mxu0 }
 0x169   :  { %v1987_v8 = vadd.f32 %v1986_v4, %v1985_v56 }
 0x16a   :  { %1901 = vst.msk [vmem:[%s3820_s2 + $0x50] sm:$0xf] %vm1880_vm0, %v2539_v3  ;;  %v2187_v9 = vsel %vm1946_vm1, %v2104_v5, 0.0  ;;  %v2540_v10 = vpack.c.bf16 %v1453_v6, %v1453_v6  ;;  %v1988_v11 = vsel %vm1946_vm1, %v1453_v6, 0.0  ;;  %v2105_v12 = vmul.f32 %v1453_v6, %v1453_v6 }
 0x16b   :  { %v2188_v13 = vadd.f32 %v2187_v9, %v2186_v59  ;;  %v1989_v14 = vadd.f32 %v1988_v11, %v1987_v8 }
 0x16c   :  { %1902 = vst.msk [vmem:[%s3820_s2 + $0x54] sm:$0xf] %vm1880_vm0, %v2540_v10  ;;  %v2189_v15 = vsel %vm1946_vm1, %v2105_v12, 0.0  ;;  %v1168_v16 = vpop.f32.mrb[44].mxu1 }
 0x16d   :  { %v2190_v17 = vadd.f32 %v2189_v15, %v2188_v13  ;;  %v1457_v18 = vpop.f32.mrb[44].mxu0  ;;  %v1170_v19 = vpop.f32.mrb[45].mxu1 }
 0x16e   :  { %v1458_v20 = vadd.f32 %v1457_v18, %v1168_v16  ;;  %v1459_v21 = vpop.f32.mrb[45].mxu0  ;;  %v1171_v22 = vpop.f32.mrb[46].mxu1 }
 0x16f   :  { %v1460_v23 = vpop.f32.mrb[46].mxu0  ;;  %v1173_v24 = vpop.f32.mrb[47].mxu1 }
 0x170   :  { %v2541_v25 = vpack.c.bf16 %v1458_v20, %v1458_v20  ;;  %v1990_v26 = vsel %vm1946_vm1, %v1458_v20, 0.0  ;;  %v2106_v27 = vmul.f32 %v1458_v20, %v1458_v20  ;;  %v1461_v28 = vadd.f32 %v1460_v23, %v1171_v22  ;;  %v1462_v29 = vpop.f32.mrb[47].mxu0 }
 0x171   :  { %v1991_v30 = vadd.f32 %v1990_v26, %v1989_v14 }
 0x172   :  { %1903 = vst.msk [vmem:[%s3820_s2 + $0x58] sm:$0xf] %vm1880_vm0, %v2541_v25  ;;  %v2191_v31 = vsel %vm1946_vm1, %v2106_v27, 0.0  ;;  %v2542_v32 = vpack.c.bf16 %v1461_v28, %v1461_v28  ;;  %v1992_v33 = vsel %vm1946_vm1, %v1461_v28, 0.0  ;;  %v2107_v34 = vmul.f32 %v1461_v28, %v1461_v28 }
 0x173   :  { %v2192_v35 = vadd.f32 %v2191_v31, %v2190_v17  ;;  %v1993_v36 = vadd.f32 %v1992_v33, %v1991_v30 }
 0x174   :  { %1904 = vst.msk [vmem:[%s3820_s2 + $0x5c] sm:$0xf] %vm1880_vm0, %v2542_v32  ;;  %v2193_v37 = vsel %vm1946_vm1, %v2107_v34, 0.0  ;;  %v1176_v38 = vpop.f32.mrb[48].mxu1 }
 0x175   :  { %v2194_v39 = vadd.f32 %v2193_v37, %v2192_v35  ;;  %v1465_v40 = vpop.f32.mrb[48].mxu0  ;;  %v1178_v41 = vpop.f32.mrb[49].mxu1 }
 0x176   :  { %v1466_v42 = vadd.f32 %v1465_v40, %v1176_v38  ;;  %v1467_v43 = vpop.f32.mrb[49].mxu0  ;;  %v1179_v44 = vpop.f32.mrb[50].mxu1 }
 0x177   :  { %v1468_v45 = vpop.f32.mrb[50].mxu0  ;;  %v1181_v46 = vpop.f32.mrb[51].mxu1 }
 0x178   :  { %v2543_v47 = vpack.c.bf16 %v1466_v42, %v1466_v42  ;;  %v1994_v48 = vsel %vm1946_vm1, %v1466_v42, 0.0  ;;  %v2108_v49 = vmul.f32 %v1466_v42, %v1466_v42  ;;  %v1469_v50 = vadd.f32 %v1468_v45, %v1179_v44  ;;  %v1470_v51 = vpop.f32.mrb[51].mxu0 }
 0x179   :  { %v1995_v52 = vadd.f32 %v1994_v48, %v1993_v36 }
 0x17a   :  { %1905 = vst.msk [vmem:[%s3820_s2 + $0x60] sm:$0xf] %vm1880_vm0, %v2543_v47  ;;  %v2195_v53 = vsel %vm1946_vm1, %v2108_v49, 0.0  ;;  %v2544_v54 = vpack.c.bf16 %v1469_v50, %v1469_v50  ;;  %v1996_v55 = vsel %vm1946_vm1, %v1469_v50, 0.0  ;;  %v2109_v56 = vmul.f32 %v1469_v50, %v1469_v50 }
 0x17b   :  { %v2196_v57 = vadd.f32 %v2195_v53, %v2194_v39  ;;  %v1997_v58 = vadd.f32 %v1996_v55, %v1995_v52 }
 0x17c   :  { %1906 = vst.msk [vmem:[%s3820_s2 + $0x64] sm:$0xf] %vm1880_vm0, %v2544_v54  ;;  %v2197_v59 = vsel %vm1946_vm1, %v2109_v56, 0.0  ;;  %v1184_v60 = vpop.f32.mrb[52].mxu1 }
 0x17d   :  { %v2198_v61 = vadd.f32 %v2197_v59, %v2196_v57  ;;  %v1473_v62 = vpop.f32.mrb[52].mxu0  ;;  %v1186_v63 = vpop.f32.mrb[53].mxu1 }
 0x17e   :  { %v1474_v0 = vadd.f32 %v1473_v62, %v1184_v60  ;;  %v1475_v1 = vpop.f32.mrb[53].mxu0  ;;  %v1187_v2 = vpop.f32.mrb[54].mxu1  ;;  %v2874_v63 = vmov 0.0  }
 0x17f   :  { %v1476_v3 = vpop.f32.mrb[54].mxu0  ;;  %v1189_v4 = vpop.f32.mrb[55].mxu1  ;;  %20 = vst.msk [vmem:[%s3821_s3] sm:$0x1] %vm19_vm2, %v2874_v63  ;;  %21 = vst.msk [vmem:[%s3822_s4] sm:$0x1] %vm19_vm2, %v2874_v63 }
 0x180   :  { %v2545_v5 = vpack.c.bf16 %v1474_v0, %v1474_v0  ;;  %v1998_v6 = vsel %vm1946_vm1, %v1474_v0, 0.0  ;;  %v2110_v7 = vmul.f32 %v1474_v0, %v1474_v0  ;;  %v1477_v8 = vadd.f32 %v1476_v3, %v1187_v2  ;;  %v1478_v9 = vpop.f32.mrb[55].mxu0 }
 0x181   :  { %v1999_v10 = vadd.f32 %v1998_v6, %v1997_v58 }
 0x182   :  { %1907 = vst.msk [vmem:[%s3820_s2 + $0x68] sm:$0xf] %vm1880_vm0, %v2545_v5  ;;  %v2199_v11 = vsel %vm1946_vm1, %v2110_v7, 0.0  ;;  %v2546_v12 = vpack.c.bf16 %v1477_v8, %v1477_v8  ;;  %v2000_v13 = vsel %vm1946_vm1, %v1477_v8, 0.0  ;;  %v2111_v14 = vmul.f32 %v1477_v8, %v1477_v8 }
 0x183   :  { %v2200_v15 = vadd.f32 %v2199_v11, %v2198_v61  ;;  %v2001_v16 = vadd.f32 %v2000_v13, %v1999_v10 }
 0x184   :  { %1908 = vst.msk [vmem:[%s3820_s2 + $0x6c] sm:$0xf] %vm1880_vm0, %v2546_v12  ;;  %v2201_v17 = vsel %vm1946_vm1, %v2111_v14, 0.0  ;;  %v1192_v18 = vpop.f32.mrb[56].mxu1 }
 0x185   :  { %v2202_v19 = vadd.f32 %v2201_v17, %v2200_v15  ;;  %v1481_v20 = vpop.f32.mrb[56].mxu0  ;;  %v1194_v21 = vpop.f32.mrb[57].mxu1 }
 0x186   :  { %v1482_v22 = vadd.f32 %v1481_v20, %v1192_v18  ;;  %v1483_v23 = vpop.f32.mrb[57].mxu0  ;;  %v1195_v24 = vpop.f32.mrb[58].mxu1 }
 0x187   :  { %v1484_v25 = vpop.f32.mrb[58].mxu0  ;;  %v1197_v26 = vpop.f32.mrb[59].mxu1 }
 0x188   :  { %v2547_v27 = vpack.c.bf16 %v1482_v22, %v1482_v22  ;;  %v2002_v28 = vsel %vm1946_vm1, %v1482_v22, 0.0  ;;  %v2112_v29 = vmul.f32 %v1482_v22, %v1482_v22  ;;  %v1485_v30 = vadd.f32 %v1484_v25, %v1195_v24  ;;  %v1486_v31 = vpop.f32.mrb[59].mxu0 }
 0x189   :  { %v2003_v32 = vadd.f32 %v2002_v28, %v2001_v16 }
 0x18a   :  { %1909 = vst.msk [vmem:[%s3820_s2 + $0x70] sm:$0xf] %vm1880_vm0, %v2547_v27  ;;  %v2203_v33 = vsel %vm1946_vm1, %v2112_v29, 0.0  ;;  %v2548_v34 = vpack.c.bf16 %v1485_v30, %v1485_v30  ;;  %v2004_v35 = vsel %vm1946_vm1, %v1485_v30, 0.0  ;;  %v2113_v36 = vmul.f32 %v1485_v30, %v1485_v30 }
 0x18b   :  { %v2204_v37 = vadd.f32 %v2203_v33, %v2202_v19  ;;  %v2005_v38 = vadd.f32 %v2004_v35, %v2003_v32 }
 0x18c   :  { %1910 = vst.msk [vmem:[%s3820_s2 + $0x74] sm:$0xf] %vm1880_vm0, %v2548_v34  ;;  %v2205_v39 = vsel %vm1946_vm1, %v2113_v36, 0.0  ;;  %v1200_v40 = vpop.f32.mrb[60].mxu1 }
 0x18d   :  { %v2206_v41 = vadd.f32 %v2205_v39, %v2204_v37  ;;  %v1489_v42 = vpop.f32.mrb[60].mxu0  ;;  %v1202_v43 = vpop.f32.mrb[61].mxu1 }
 0x18e   :  { %v1490_v44 = vadd.f32 %v1489_v42, %v1200_v40  ;;  %v1491_v45 = vpop.f32.mrb[61].mxu0  ;;  %v1203_v46 = vpop.f32.mrb[62].mxu1 }
 0x18f   :  { %v1492_v47 = vpop.f32.mrb[62].mxu0  ;;  %v1205_v48 = vpop.f32.mrb[63].mxu1 }
 0x190   :  { %v2549_v49 = vpack.c.bf16 %v1490_v44, %v1490_v44  ;;  %v2006_v50 = vsel %vm1946_vm1, %v1490_v44, 0.0  ;;  %v2114_v51 = vmul.f32 %v1490_v44, %v1490_v44  ;;  %v1493_v52 = vadd.f32 %v1492_v47, %v1203_v46  ;;  %v1494_v53 = vpop.f32.mrb[63].mxu0 }
 0x191   :  { %v2007_v54 = vadd.f32 %v2006_v50, %v2005_v38 }
 0x192   :  { %1911 = vst.msk [vmem:[%s3820_s2 + $0x78] sm:$0xf] %vm1880_vm0, %v2549_v49  ;;  %v2207_v55 = vsel %vm1946_vm1, %v2114_v51, 0.0  ;;  %v2550_v56 = vpack.c.bf16 %v1493_v52, %v1493_v52  ;;  %v2008_v57 = vsel %vm1946_vm1, %v1493_v52, 0.0  ;;  %v2115_v58 = vmul.f32 %v1493_v52, %v1493_v52 }
 0x193   :  { %v2208_v59 = vadd.f32 %v2207_v55, %v2206_v41  ;;  %v2009_v60 = vadd.f32 %v2008_v57, %v2007_v54 }
 0x194   :  { %1912 = vst.msk [vmem:[%s3820_s2 + $0x7c] sm:$0xf] %vm1880_vm0, %v2550_v56  ;;  %v2209_v61 = vsel %vm1946_vm1, %v2115_v58, 0.0  ;;  %v1208_v62 = vpop.f32.mrb[64].mxu1 }
 0x195   :  { %v2210_v0 = vadd.f32 %v2209_v61, %v2208_v59  ;;  %v1497_v1 = vpop.f32.mrb[64].mxu0  ;;  %v1210_v2 = vpop.f32.mrb[65].mxu1 }
 0x196   :  { %v1498_v3 = vadd.f32 %v1497_v1, %v1208_v62  ;;  %v1499_v4 = vpop.f32.mrb[65].mxu0  ;;  %v1211_v5 = vpop.f32.mrb[66].mxu1 }
 0x197   :  { %v1500_v6 = vpop.f32.mrb[66].mxu0  ;;  %v1213_v7 = vpop.f32.mrb[67].mxu1 }
 0x198   :  { %v2551_v8 = vpack.c.bf16 %v1498_v3, %v1498_v3  ;;  %v2010_v9 = vsel %vm1946_vm1, %v1498_v3, 0.0  ;;  %v2116_v10 = vmul.f32 %v1498_v3, %v1498_v3  ;;  %v1501_v11 = vadd.f32 %v1500_v6, %v1211_v5  ;;  %v1502_v12 = vpop.f32.mrb[67].mxu0 }
 0x199   :  { %v2011_v13 = vadd.f32 %v2010_v9, %v2009_v60 }
 0x19a   :  { %1913 = vst.msk [vmem:[%s3820_s2 + $0x80] sm:$0xf] %vm1880_vm0, %v2551_v8  ;;  %v2211_v14 = vsel %vm1946_vm1, %v2116_v10, 0.0  ;;  %v2552_v15 = vpack.c.bf16 %v1501_v11, %v1501_v11  ;;  %v2012_v16 = vsel %vm1946_vm1, %v1501_v11, 0.0  ;;  %v2117_v17 = vmul.f32 %v1501_v11, %v1501_v11 }
 0x19b   :  { %v2212_v18 = vadd.f32 %v2211_v14, %v2210_v0  ;;  %v2013_v19 = vadd.f32 %v2012_v16, %v2011_v13 }
 0x19c   :  { %1914 = vst.msk [vmem:[%s3820_s2 + $0x84] sm:$0xf] %vm1880_vm0, %v2552_v15  ;;  %v2213_v20 = vsel %vm1946_vm1, %v2117_v17, 0.0  ;;  %v1216_v21 = vpop.f32.mrb[68].mxu1 }
 0x19d   :  { %v2214_v22 = vadd.f32 %v2213_v20, %v2212_v18  ;;  %v1505_v23 = vpop.f32.mrb[68].mxu0  ;;  %v1218_v24 = vpop.f32.mrb[69].mxu1 }
 0x19e   :  { %v1506_v25 = vadd.f32 %v1505_v23, %v1216_v21  ;;  %v1507_v26 = vpop.f32.mrb[69].mxu0  ;;  %v1219_v27 = vpop.f32.mrb[70].mxu1 }
 0x19f   :  { %v1508_v28 = vpop.f32.mrb[70].mxu0  ;;  %v1221_v29 = vpop.f32.mrb[71].mxu1 }
 0x1a0   :  { %v2553_v30 = vpack.c.bf16 %v1506_v25, %v1506_v25  ;;  %v2014_v31 = vsel %vm1946_vm1, %v1506_v25, 0.0  ;;  %v2118_v32 = vmul.f32 %v1506_v25, %v1506_v25  ;;  %v1509_v33 = vadd.f32 %v1508_v28, %v1219_v27  ;;  %v1510_v34 = vpop.f32.mrb[71].mxu0 }
 0x1a1   :  { %v2015_v35 = vadd.f32 %v2014_v31, %v2013_v19 }
 0x1a2   :  { %1915 = vst.msk [vmem:[%s3820_s2 + $0x88] sm:$0xf] %vm1880_vm0, %v2553_v30  ;;  %v2215_v36 = vsel %vm1946_vm1, %v2118_v32, 0.0  ;;  %v2554_v37 = vpack.c.bf16 %v1509_v33, %v1509_v33  ;;  %v2016_v38 = vsel %vm1946_vm1, %v1509_v33, 0.0  ;;  %v2119_v39 = vmul.f32 %v1509_v33, %v1509_v33 }
 0x1a3   :  { %v2216_v40 = vadd.f32 %v2215_v36, %v2214_v22  ;;  %v2017_v41 = vadd.f32 %v2016_v38, %v2015_v35 }
 0x1a4   :  { %1916 = vst.msk [vmem:[%s3820_s2 + $0x8c] sm:$0xf] %vm1880_vm0, %v2554_v37  ;;  %v2217_v42 = vsel %vm1946_vm1, %v2119_v39, 0.0  ;;  %v1224_v43 = vpop.f32.mrb[72].mxu1 }
 0x1a5   :  { %v2218_v44 = vadd.f32 %v2217_v42, %v2216_v40  ;;  %v1513_v45 = vpop.f32.mrb[72].mxu0  ;;  %v1226_v46 = vpop.f32.mrb[73].mxu1 }
 0x1a6   :  { %v1514_v47 = vadd.f32 %v1513_v45, %v1224_v43  ;;  %v1515_v48 = vpop.f32.mrb[73].mxu0  ;;  %v1227_v49 = vpop.f32.mrb[74].mxu1 }
 0x1a7   :  { %v1516_v50 = vpop.f32.mrb[74].mxu0  ;;  %v1229_v51 = vpop.f32.mrb[75].mxu1 }
 0x1a8   :  { %v2555_v52 = vpack.c.bf16 %v1514_v47, %v1514_v47  ;;  %v2018_v53 = vsel %vm1946_vm1, %v1514_v47, 0.0  ;;  %v2120_v54 = vmul.f32 %v1514_v47, %v1514_v47  ;;  %v1517_v55 = vadd.f32 %v1516_v50, %v1227_v49  ;;  %v1518_v56 = vpop.f32.mrb[75].mxu0 }
 0x1a9   :  { %v2019_v57 = vadd.f32 %v2018_v53, %v2017_v41 }
 0x1aa   :  { %1917 = vst.msk [vmem:[%s3820_s2 + $0x90] sm:$0xf] %vm1880_vm0, %v2555_v52  ;;  %v2219_v58 = vsel %vm1946_vm1, %v2120_v54, 0.0  ;;  %v2556_v59 = vpack.c.bf16 %v1517_v55, %v1517_v55  ;;  %v2020_v60 = vsel %vm1946_vm1, %v1517_v55, 0.0  ;;  %v2121_v61 = vmul.f32 %v1517_v55, %v1517_v55 }
 0x1ab   :  { %v2220_v62 = vadd.f32 %v2219_v58, %v2218_v44  ;;  %v2021_v63 = vadd.f32 %v2020_v60, %v2019_v57 }
 0x1ac   :  { %1918 = vst.msk [vmem:[%s3820_s2 + $0x94] sm:$0xf] %vm1880_vm0, %v2556_v59  ;;  %v2221_v0 = vsel %vm1946_vm1, %v2121_v61, 0.0  ;;  %v1232_v1 = vpop.f32.mrb[76].mxu1 }
 0x1ad   :  { %v2222_v2 = vadd.f32 %v2221_v0, %v2220_v62  ;;  %v1521_v3 = vpop.f32.mrb[76].mxu0  ;;  %v1234_v4 = vpop.f32.mrb[77].mxu1 }
 0x1ae   :  { %v1522_v5 = vadd.f32 %v1521_v3, %v1232_v1  ;;  %v1523_v6 = vpop.f32.mrb[77].mxu0  ;;  %v1235_v7 = vpop.f32.mrb[78].mxu1 }
 0x1af   :  { %v1524_v8 = vpop.f32.mrb[78].mxu0  ;;  %v1237_v9 = vpop.f32.mrb[79].mxu1 }
 0x1b0   :  { %v2557_v10 = vpack.c.bf16 %v1522_v5, %v1522_v5  ;;  %v2022_v11 = vsel %vm1946_vm1, %v1522_v5, 0.0  ;;  %v2122_v12 = vmul.f32 %v1522_v5, %v1522_v5  ;;  %v1525_v13 = vadd.f32 %v1524_v8, %v1235_v7  ;;  %v1526_v14 = vpop.f32.mrb[79].mxu0 }
 0x1b1   :  { %v2023_v15 = vadd.f32 %v2022_v11, %v2021_v63 }
 0x1b2   :  { %1919 = vst.msk [vmem:[%s3820_s2 + $0x98] sm:$0xf] %vm1880_vm0, %v2557_v10  ;;  %v2223_v16 = vsel %vm1946_vm1, %v2122_v12, 0.0  ;;  %v2558_v17 = vpack.c.bf16 %v1525_v13, %v1525_v13  ;;  %v2024_v18 = vsel %vm1946_vm1, %v1525_v13, 0.0  ;;  %v2123_v19 = vmul.f32 %v1525_v13, %v1525_v13 }
 0x1b3   :  { %v2224_v20 = vadd.f32 %v2223_v16, %v2222_v2  ;;  %v2025_v21 = vadd.f32 %v2024_v18, %v2023_v15 }
 0x1b4   :  { %1920 = vst.msk [vmem:[%s3820_s2 + $0x9c] sm:$0xf] %vm1880_vm0, %v2558_v17  ;;  %v2225_v22 = vsel %vm1946_vm1, %v2123_v19, 0.0  ;;  %v1240_v23 = vpop.f32.mrb[80].mxu1 }
 0x1b5   :  { %v2226_v24 = vadd.f32 %v2225_v22, %v2224_v20  ;;  %v1529_v25 = vpop.f32.mrb[80].mxu0  ;;  %v1242_v26 = vpop.f32.mrb[81].mxu1 }
 0x1b6   :  { %v1530_v27 = vadd.f32 %v1529_v25, %v1240_v23  ;;  %v1531_v28 = vpop.f32.mrb[81].mxu0  ;;  %v1243_v29 = vpop.f32.mrb[82].mxu1 }
 0x1b7   :  { %v1532_v30 = vpop.f32.mrb[82].mxu0  ;;  %v1245_v31 = vpop.f32.mrb[83].mxu1 }
 0x1b8   :  { %v2559_v32 = vpack.c.bf16 %v1530_v27, %v1530_v27  ;;  %v2026_v33 = vsel %vm1946_vm1, %v1530_v27, 0.0  ;;  %v2124_v34 = vmul.f32 %v1530_v27, %v1530_v27  ;;  %v1533_v35 = vadd.f32 %v1532_v30, %v1243_v29  ;;  %v1534_v36 = vpop.f32.mrb[83].mxu0 }
 0x1b9   :  { %v2027_v37 = vadd.f32 %v2026_v33, %v2025_v21 }
 0x1ba   :  { %1921 = vst.msk [vmem:[%s3820_s2 + $0xa0] sm:$0xf] %vm1880_vm0, %v2559_v32  ;;  %v2227_v38 = vsel %vm1946_vm1, %v2124_v34, 0.0  ;;  %v2560_v39 = vpack.c.bf16 %v1533_v35, %v1533_v35  ;;  %v2028_v40 = vsel %vm1946_vm1, %v1533_v35, 0.0  ;;  %v2125_v41 = vmul.f32 %v1533_v35, %v1533_v35 }
 0x1bb   :  { %v2228_v42 = vadd.f32 %v2227_v38, %v2226_v24  ;;  %v2029_v43 = vadd.f32 %v2028_v40, %v2027_v37 }
 0x1bc   :  { %1922 = vst.msk [vmem:[%s3820_s2 + $0xa4] sm:$0xf] %vm1880_vm0, %v2560_v39  ;;  %v2229_v44 = vsel %vm1946_vm1, %v2125_v41, 0.0  ;;  %v1248_v45 = vpop.f32.mrb[84].mxu1 }
 0x1bd   :  { %v2230_v46 = vadd.f32 %v2229_v44, %v2228_v42  ;;  %v1537_v47 = vpop.f32.mrb[84].mxu0  ;;  %v1250_v48 = vpop.f32.mrb[85].mxu1 }
 0x1be   :  { %v1538_v49 = vadd.f32 %v1537_v47, %v1248_v45  ;;  %v1539_v50 = vpop.f32.mrb[85].mxu0  ;;  %v1251_v51 = vpop.f32.mrb[86].mxu1 }
 0x1bf   :  { %v1540_v52 = vpop.f32.mrb[86].mxu0  ;;  %v1253_v53 = vpop.f32.mrb[87].mxu1 }
 0x1c0   :  { %v2561_v54 = vpack.c.bf16 %v1538_v49, %v1538_v49  ;;  %v2030_v55 = vsel %vm1946_vm1, %v1538_v49, 0.0  ;;  %v2126_v56 = vmul.f32 %v1538_v49, %v1538_v49  ;;  %v1541_v57 = vadd.f32 %v1540_v52, %v1251_v51  ;;  %v1542_v58 = vpop.f32.mrb[87].mxu0 }
 0x1c1   :  { %v2031_v59 = vadd.f32 %v2030_v55, %v2029_v43 }
 0x1c2   :  { %1923 = vst.msk [vmem:[%s3820_s2 + $0xa8] sm:$0xf] %vm1880_vm0, %v2561_v54  ;;  %v2231_v60 = vsel %vm1946_vm1, %v2126_v56, 0.0  ;;  %v2562_v61 = vpack.c.bf16 %v1541_v57, %v1541_v57  ;;  %v2032_v62 = vsel %vm1946_vm1, %v1541_v57, 0.0  ;;  %v2127_v63 = vmul.f32 %v1541_v57, %v1541_v57 }
 0x1c3   :  { %v2232_v0 = vadd.f32 %v2231_v60, %v2230_v46  ;;  %v2033_v1 = vadd.f32 %v2032_v62, %v2031_v59 }
 0x1c4   :  { %1924 = vst.msk [vmem:[%s3820_s2 + $0xac] sm:$0xf] %vm1880_vm0, %v2562_v61  ;;  %v2233_v2 = vsel %vm1946_vm1, %v2127_v63, 0.0  ;;  %v1256_v3 = vpop.f32.mrb[88].mxu1 }
 0x1c5   :  { %v2234_v4 = vadd.f32 %v2233_v2, %v2232_v0  ;;  %v1545_v5 = vpop.f32.mrb[88].mxu0  ;;  %v1258_v6 = vpop.f32.mrb[89].mxu1 }
 0x1c6   :  { %v1546_v7 = vadd.f32 %v1545_v5, %v1256_v3  ;;  %v1547_v8 = vpop.f32.mrb[89].mxu0  ;;  %v1259_v9 = vpop.f32.mrb[90].mxu1 }
 0x1c7   :  { %v1548_v10 = vpop.f32.mrb[90].mxu0  ;;  %v1261_v11 = vpop.f32.mrb[91].mxu1 }
 0x1c8   :  { %v2563_v12 = vpack.c.bf16 %v1546_v7, %v1546_v7  ;;  %v2034_v13 = vsel %vm1946_vm1, %v1546_v7, 0.0  ;;  %v2128_v14 = vmul.f32 %v1546_v7, %v1546_v7  ;;  %v1549_v15 = vadd.f32 %v1548_v10, %v1259_v9  ;;  %v1550_v16 = vpop.f32.mrb[91].mxu0 }
 0x1c9   :  { %v2035_v17 = vadd.f32 %v2034_v13, %v2033_v1 }
 0x1ca   :  { %1925 = vst.msk [vmem:[%s3820_s2 + $0xb0] sm:$0xf] %vm1880_vm0, %v2563_v12  ;;  %v2235_v18 = vsel %vm1946_vm1, %v2128_v14, 0.0  ;;  %v2564_v19 = vpack.c.bf16 %v1549_v15, %v1549_v15  ;;  %v2036_v20 = vsel %vm1946_vm1, %v1549_v15, 0.0  ;;  %v2129_v21 = vmul.f32 %v1549_v15, %v1549_v15 }
 0x1cb   :  { %v2236_v22 = vadd.f32 %v2235_v18, %v2234_v4  ;;  %v2037_v23 = vadd.f32 %v2036_v20, %v2035_v17 }
 0x1cc   :  { %1926 = vst.msk [vmem:[%s3820_s2 + $0xb4] sm:$0xf] %vm1880_vm0, %v2564_v19  ;;  %v2237_v24 = vsel %vm1946_vm1, %v2129_v21, 0.0  ;;  %v1264_v25 = vpop.f32.mrb[92].mxu1 }
 0x1cd   :  { %v2238_v26 = vadd.f32 %v2237_v24, %v2236_v22  ;;  %v1553_v27 = vpop.f32.mrb[92].mxu0  ;;  %v1266_v28 = vpop.f32.mrb[93].mxu1 }
 0x1ce   :  { %v1554_v29 = vadd.f32 %v1553_v27, %v1264_v25  ;;  %v1555_v30 = vpop.f32.mrb[93].mxu0  ;;  %v1267_v31 = vpop.f32.mrb[94].mxu1 }
 0x1cf   :  { %v1556_v32 = vpop.f32.mrb[94].mxu0  ;;  %v1269_v33 = vpop.f32.mrb[95].mxu1 }
 0x1d0   :  { %v2565_v34 = vpack.c.bf16 %v1554_v29, %v1554_v29  ;;  %v2038_v35 = vsel %vm1946_vm1, %v1554_v29, 0.0  ;;  %v2130_v36 = vmul.f32 %v1554_v29, %v1554_v29  ;;  %v1557_v37 = vadd.f32 %v1556_v32, %v1267_v31  ;;  %v1558_v38 = vpop.f32.mrb[95].mxu0 }
 0x1d1   :  { %v2039_v39 = vadd.f32 %v2038_v35, %v2037_v23 }
 0x1d2   :  { %1927 = vst.msk [vmem:[%s3820_s2 + $0xb8] sm:$0xf] %vm1880_vm0, %v2565_v34  ;;  %v2239_v40 = vsel %vm1946_vm1, %v2130_v36, 0.0  ;;  %v2566_v41 = vpack.c.bf16 %v1557_v37, %v1557_v37  ;;  %v2040_v42 = vsel %vm1946_vm1, %v1557_v37, 0.0  ;;  %v2131_v43 = vmul.f32 %v1557_v37, %v1557_v37 }
 0x1d3   :  { %v2240_v44 = vadd.f32 %v2239_v40, %v2238_v26  ;;  %v2041_v45 = vadd.f32 %v2040_v42, %v2039_v39 }
 0x1d4   :  { %1928 = vst.msk [vmem:[%s3820_s2 + $0xbc] sm:$0xf] %vm1880_vm0, %v2566_v41  ;;  %v2241_v46 = vsel %vm1946_vm1, %v2131_v43, 0.0  ;;  %v1272_v47 = vpop.f32.mrb[96].mxu1 }
 0x1d5   :  { %v2242_v48 = vadd.f32 %v2241_v46, %v2240_v44  ;;  %v1561_v49 = vpop.f32.mrb[96].mxu0  ;;  %v1274_v50 = vpop.f32.mrb[97].mxu1 }
 0x1d6   :  { %v1562_v51 = vadd.f32 %v1561_v49, %v1272_v47  ;;  %v1563_v52 = vpop.f32.mrb[97].mxu0  ;;  %v1275_v53 = vpop.f32.mrb[98].mxu1 }
 0x1d7   :  { %v1564_v54 = vpop.f32.mrb[98].mxu0  ;;  %v1277_v55 = vpop.f32.mrb[99].mxu1 }
 0x1d8   :  { %v2567_v56 = vpack.c.bf16 %v1562_v51, %v1562_v51  ;;  %v2042_v57 = vsel %vm1946_vm1, %v1562_v51, 0.0  ;;  %v2132_v58 = vmul.f32 %v1562_v51, %v1562_v51  ;;  %v1565_v59 = vadd.f32 %v1564_v54, %v1275_v53  ;;  %v1566_v60 = vpop.f32.mrb[99].mxu0 }
 0x1d9   :  { %v2043_v61 = vadd.f32 %v2042_v57, %v2041_v45 }
 0x1da   :  { %1929 = vst.msk [vmem:[%s3820_s2 + $0xc0] sm:$0xf] %vm1880_vm0, %v2567_v56  ;;  %v2243_v62 = vsel %vm1946_vm1, %v2132_v58, 0.0  ;;  %v2568_v63 = vpack.c.bf16 %v1565_v59, %v1565_v59  ;;  %v2044_v0 = vsel %vm1946_vm1, %v1565_v59, 0.0  ;;  %v2133_v1 = vmul.f32 %v1565_v59, %v1565_v59 }
 0x1db   :  { %v2244_v2 = vadd.f32 %v2243_v62, %v2242_v48  ;;  %v2045_v3 = vadd.f32 %v2044_v0, %v2043_v61 }
 0x1dc   :  { %1930 = vst.msk [vmem:[%s3820_s2 + $0xc4] sm:$0xf] %vm1880_vm0, %v2568_v63  ;;  %v2245_v4 = vsel %vm1946_vm1, %v2133_v1, 0.0  ;;  %v1280_v5 = vpop.f32.mrb[100].mxu1 }
 0x1dd   :  { %v2246_v6 = vadd.f32 %v2245_v4, %v2244_v2  ;;  %v1569_v7 = vpop.f32.mrb[100].mxu0  ;;  %v1282_v8 = vpop.f32.mrb[101].mxu1 }
 0x1de   :  { %v1570_v9 = vadd.f32 %v1569_v7, %v1280_v5  ;;  %v1571_v10 = vpop.f32.mrb[101].mxu0  ;;  %v1283_v11 = vpop.f32.mrb[102].mxu1 }
 0x1df   :  { %v1572_v12 = vpop.f32.mrb[102].mxu0  ;;  %v1285_v13 = vpop.f32.mrb[103].mxu1 }
 0x1e0   :  { %v2569_v14 = vpack.c.bf16 %v1570_v9, %v1570_v9  ;;  %v2046_v15 = vsel %vm1946_vm1, %v1570_v9, 0.0  ;;  %v2134_v16 = vmul.f32 %v1570_v9, %v1570_v9  ;;  %v1573_v17 = vadd.f32 %v1572_v12, %v1283_v11  ;;  %v1574_v18 = vpop.f32.mrb[103].mxu0 }
 0x1e1   :  { %v2047_v19 = vadd.f32 %v2046_v15, %v2045_v3 }
 0x1e2   :  { %1931 = vst.msk [vmem:[%s3820_s2 + $0xc8] sm:$0xf] %vm1880_vm0, %v2569_v14  ;;  %v2247_v20 = vsel %vm1946_vm1, %v2134_v16, 0.0  ;;  %v2570_v21 = vpack.c.bf16 %v1573_v17, %v1573_v17  ;;  %v2048_v22 = vsel %vm1946_vm1, %v1573_v17, 0.0  ;;  %v2135_v23 = vmul.f32 %v1573_v17, %v1573_v17 }
 0x1e3   :  { %v2248_v24 = vadd.f32 %v2247_v20, %v2246_v6  ;;  %v2049_v25 = vadd.f32 %v2048_v22, %v2047_v19 }
 0x1e4   :  { %1932 = vst.msk [vmem:[%s3820_s2 + $0xcc] sm:$0xf] %vm1880_vm0, %v2570_v21  ;;  %v2249_v26 = vsel %vm1946_vm1, %v2135_v23, 0.0  ;;  %v1288_v27 = vpop.f32.mrb[104].mxu1 }
 0x1e5   :  { %v2250_v28 = vadd.f32 %v2249_v26, %v2248_v24  ;;  %v1577_v29 = vpop.f32.mrb[104].mxu0  ;;  %v1290_v30 = vpop.f32.mrb[105].mxu1 }
 0x1e6   :  { %v1578_v31 = vadd.f32 %v1577_v29, %v1288_v27  ;;  %v1579_v32 = vpop.f32.mrb[105].mxu0  ;;  %v1291_v33 = vpop.f32.mrb[106].mxu1 }
 0x1e7   :  { %v1580_v34 = vpop.f32.mrb[106].mxu0  ;;  %v1293_v35 = vpop.f32.mrb[107].mxu1 }
 0x1e8   :  { %v2571_v36 = vpack.c.bf16 %v1578_v31, %v1578_v31  ;;  %v2050_v37 = vsel %vm1946_vm1, %v1578_v31, 0.0  ;;  %v2136_v38 = vmul.f32 %v1578_v31, %v1578_v31  ;;  %v1581_v39 = vadd.f32 %v1580_v34, %v1291_v33  ;;  %v1582_v40 = vpop.f32.mrb[107].mxu0 }
 0x1e9   :  { %v2051_v41 = vadd.f32 %v2050_v37, %v2049_v25 }
 0x1ea   :  { %1933 = vst.msk [vmem:[%s3820_s2 + $0xd0] sm:$0xf] %vm1880_vm0, %v2571_v36  ;;  %v2251_v42 = vsel %vm1946_vm1, %v2136_v38, 0.0  ;;  %v2572_v43 = vpack.c.bf16 %v1581_v39, %v1581_v39  ;;  %v2052_v44 = vsel %vm1946_vm1, %v1581_v39, 0.0  ;;  %v2137_v45 = vmul.f32 %v1581_v39, %v1581_v39 }
 0x1eb   :  { %v2252_v46 = vadd.f32 %v2251_v42, %v2250_v28  ;;  %v2053_v47 = vadd.f32 %v2052_v44, %v2051_v41 }
 0x1ec   :  { %1934 = vst.msk [vmem:[%s3820_s2 + $0xd4] sm:$0xf] %vm1880_vm0, %v2572_v43  ;;  %v2253_v48 = vsel %vm1946_vm1, %v2137_v45, 0.0  ;;  %v1296_v49 = vpop.f32.mrb[108].mxu1 }
 0x1ed   :  { %v2254_v50 = vadd.f32 %v2253_v48, %v2252_v46  ;;  %v1585_v51 = vpop.f32.mrb[108].mxu0  ;;  %v1298_v52 = vpop.f32.mrb[109].mxu1 }
 0x1ee   :  { %v1586_v53 = vadd.f32 %v1585_v51, %v1296_v49  ;;  %v1587_v54 = vpop.f32.mrb[109].mxu0  ;;  %v1299_v55 = vpop.f32.mrb[110].mxu1 }
 0x1ef   :  { %v1588_v56 = vpop.f32.mrb[110].mxu0  ;;  %v1301_v57 = vpop.f32.mrb[111].mxu1 }
 0x1f0   :  { %v2573_v58 = vpack.c.bf16 %v1586_v53, %v1586_v53  ;;  %v2054_v59 = vsel %vm1946_vm1, %v1586_v53, 0.0  ;;  %v2138_v60 = vmul.f32 %v1586_v53, %v1586_v53  ;;  %v1589_v61 = vadd.f32 %v1588_v56, %v1299_v55  ;;  %v1590_v62 = vpop.f32.mrb[111].mxu0 }
 0x1f1   :  { %v2055_v63 = vadd.f32 %v2054_v59, %v2053_v47 }
 0x1f2   :  { %1935 = vst.msk [vmem:[%s3820_s2 + $0xd8] sm:$0xf] %vm1880_vm0, %v2573_v58  ;;  %v2255_v0 = vsel %vm1946_vm1, %v2138_v60, 0.0  ;;  %v2574_v1 = vpack.c.bf16 %v1589_v61, %v1589_v61  ;;  %v2056_v2 = vsel %vm1946_vm1, %v1589_v61, 0.0  ;;  %v2139_v3 = vmul.f32 %v1589_v61, %v1589_v61 }
 0x1f3   :  { %v2256_v4 = vadd.f32 %v2255_v0, %v2254_v50  ;;  %v2057_v5 = vadd.f32 %v2056_v2, %v2055_v63 }
 0x1f4   :  { %1936 = vst.msk [vmem:[%s3820_s2 + $0xdc] sm:$0xf] %vm1880_vm0, %v2574_v1  ;;  %v2257_v6 = vsel %vm1946_vm1, %v2139_v3, 0.0  ;;  %v1304_v7 = vpop.f32.mrb[112].mxu1 }
 0x1f5   :  { %v2258_v8 = vadd.f32 %v2257_v6, %v2256_v4  ;;  %v1593_v9 = vpop.f32.mrb[112].mxu0  ;;  %v1306_v10 = vpop.f32.mrb[113].mxu1 }
 0x1f6   :  { %v1594_v11 = vadd.f32 %v1593_v9, %v1304_v7  ;;  %v1595_v12 = vpop.f32.mrb[113].mxu0  ;;  %v1307_v13 = vpop.f32.mrb[114].mxu1 }
 0x1f7   :  { %v1596_v14 = vpop.f32.mrb[114].mxu0  ;;  %v1309_v15 = vpop.f32.mrb[115].mxu1 }
 0x1f8   :  { %v2575_v16 = vpack.c.bf16 %v1594_v11, %v1594_v11  ;;  %v2058_v17 = vsel %vm1946_vm1, %v1594_v11, 0.0  ;;  %v2140_v18 = vmul.f32 %v1594_v11, %v1594_v11  ;;  %v1597_v19 = vadd.f32 %v1596_v14, %v1307_v13  ;;  %v1598_v20 = vpop.f32.mrb[115].mxu0 }
 0x1f9   :  { %v2059_v21 = vadd.f32 %v2058_v17, %v2057_v5 }
 0x1fa   :  { %1937 = vst.msk [vmem:[%s3820_s2 + $0xe0] sm:$0xf] %vm1880_vm0, %v2575_v16  ;;  %v2259_v22 = vsel %vm1946_vm1, %v2140_v18, 0.0  ;;  %v2576_v23 = vpack.c.bf16 %v1597_v19, %v1597_v19  ;;  %v2060_v24 = vsel %vm1946_vm1, %v1597_v19, 0.0  ;;  %v2141_v25 = vmul.f32 %v1597_v19, %v1597_v19 }
 0x1fb   :  { %v2260_v26 = vadd.f32 %v2259_v22, %v2258_v8  ;;  %v2061_v27 = vadd.f32 %v2060_v24, %v2059_v21 }
 0x1fc   :  { %1938 = vst.msk [vmem:[%s3820_s2 + $0xe4] sm:$0xf] %vm1880_vm0, %v2576_v23  ;;  %v2261_v28 = vsel %vm1946_vm1, %v2141_v25, 0.0  ;;  %v1312_v29 = vpop.f32.mrb[116].mxu1 }
 0x1fd   :  { %v2262_v30 = vadd.f32 %v2261_v28, %v2260_v26  ;;  %v1601_v31 = vpop.f32.mrb[116].mxu0  ;;  %v1314_v32 = vpop.f32.mrb[117].mxu1 }
 0x1fe   :  { %v1602_v33 = vadd.f32 %v1601_v31, %v1312_v29  ;;  %v1603_v34 = vpop.f32.mrb[117].mxu0  ;;  %v1315_v35 = vpop.f32.mrb[118].mxu1 }
 0x1ff   :  { %v1604_v36 = vpop.f32.mrb[118].mxu0  ;;  %v1317_v37 = vpop.f32.mrb[119].mxu1 }
 0x200   :  { %v2577_v38 = vpack.c.bf16 %v1602_v33, %v1602_v33  ;;  %v2062_v39 = vsel %vm1946_vm1, %v1602_v33, 0.0  ;;  %v2142_v40 = vmul.f32 %v1602_v33, %v1602_v33  ;;  %v1605_v41 = vadd.f32 %v1604_v36, %v1315_v35  ;;  %v1606_v42 = vpop.f32.mrb[119].mxu0 }
 0x201   :  { %v2063_v43 = vadd.f32 %v2062_v39, %v2061_v27 }
 0x202   :  { %1939 = vst.msk [vmem:[%s3820_s2 + $0xe8] sm:$0xf] %vm1880_vm0, %v2577_v38  ;;  %v2263_v44 = vsel %vm1946_vm1, %v2142_v40, 0.0  ;;  %v2578_v45 = vpack.c.bf16 %v1605_v41, %v1605_v41  ;;  %v2064_v46 = vsel %vm1946_vm1, %v1605_v41, 0.0  ;;  %v2143_v47 = vmul.f32 %v1605_v41, %v1605_v41  ;;  %v1945_v41 = vld [vmem:[%s3821_s3] sm:$0x1] }
 0x203   :  { %v2264_v48 = vadd.f32 %v2263_v44, %v2262_v30  ;;  %v2065_v49 = vadd.f32 %v2064_v46, %v2063_v43  ;;  %v2083_v44 = vld [vmem:[%s3822_s4] sm:$0x1] }
 0x204   :  { %1940 = vst.msk [vmem:[%s3820_s2 + $0xec] sm:$0xf] %vm1880_vm0, %v2578_v45  ;;  %v2265_v50 = vsel %vm1946_vm1, %v2143_v47, 0.0  ;;  %v1320_v51 = vpop.f32.mrb[120].mxu1 }
 0x205   :  { %v2266_v52 = vadd.f32 %v2265_v50, %v2264_v48  ;;  %v1609_v53 = vpop.f32.mrb[120].mxu0  ;;  %v1322_v54 = vpop.f32.mrb[121].mxu1 }
 0x206   :  { %v1610_v55 = vadd.f32 %v1609_v53, %v1320_v51  ;;  %v1611_v56 = vpop.f32.mrb[121].mxu0  ;;  %v1323_v57 = vpop.f32.mrb[122].mxu1 }
 0x207   :  { %v1612_v58 = vpop.f32.mrb[122].mxu0  ;;  %v1325_v59 = vpop.f32.mrb[123].mxu1 }
 0x208   :  { %v2579_v60 = vpack.c.bf16 %v1610_v55, %v1610_v55  ;;  %v2066_v61 = vsel %vm1946_vm1, %v1610_v55, 0.0  ;;  %v2144_v62 = vmul.f32 %v1610_v55, %v1610_v55  ;;  %v1613_v63 = vadd.f32 %v1612_v58, %v1323_v57  ;;  %v1614_v0 = vpop.f32.mrb[123].mxu0 }
 0x209   :  { %v2067_v1 = vadd.f32 %v2066_v61, %v2065_v49 }
 0x20a   :  { %1941 = vst.msk [vmem:[%s3820_s2 + $0xf0] sm:$0xf] %vm1880_vm0, %v2579_v60  ;;  %v2267_v2 = vsel %vm1946_vm1, %v2144_v62, 0.0  ;;  %v2580_v3 = vpack.c.bf16 %v1613_v63, %v1613_v63  ;;  %v2068_v4 = vsel %vm1946_vm1, %v1613_v63, 0.0  ;;  %v2145_v5 = vmul.f32 %v1613_v63, %v1613_v63 }
 0x20b   :  { %v2268_v6 = vadd.f32 %v2267_v2, %v2266_v52  ;;  %v2069_v7 = vadd.f32 %v2068_v4, %v2067_v1 }
 0x20c   :  { %1942 = vst.msk [vmem:[%s3820_s2 + $0xf4] sm:$0xf] %vm1880_vm0, %v2580_v3  ;;  %v2269_v8 = vsel %vm1946_vm1, %v2145_v5, 0.0  ;;  %v1328_v9 = vpop.f32.mrb[124].mxu1 }
 0x20d   :  { %v2270_v10 = vadd.f32 %v2269_v8, %v2268_v6  ;;  %v1617_v11 = vpop.f32.mrb[124].mxu0  ;;  %v1330_v12 = vpop.f32.mrb[125].mxu1 }
 0x20e   :  { %v1618_v13 = vadd.f32 %v1617_v11, %v1328_v9  ;;  %v1619_v14 = vpop.f32.mrb[125].mxu0  ;;  %v1331_v15 = vpop.f32.mrb[126].mxu1 }
 0x20f   :  { %v1620_v16 = vpop.f32.mrb[126].mxu0  ;;  %v1333_v17 = vpop.f32.mrb[127].mxu1 }
 0x210   :  { %v2581_v18 = vpack.c.bf16 %v1618_v13, %v1618_v13  ;;  %v2070_v19 = vsel %vm1946_vm1, %v1618_v13, 0.0  ;;  %v2146_v20 = vmul.f32 %v1618_v13, %v1618_v13  ;;  %v1621_v21 = vadd.f32 %v1620_v16, %v1331_v15  ;;  %v1622_v22 = vpop.f32.mrb[127].mxu0 }
 0x211   :  { %v2071_v23 = vadd.f32 %v2070_v19, %v2069_v7 }
 0x212   :  { %1943 = vst.msk [vmem:[%s3820_s2 + $0xf8] sm:$0xf] %vm1880_vm0, %v2581_v18  ;;  %v2271_v24 = vsel %vm1946_vm1, %v2146_v20, 0.0  ;;  %v2582_v25 = vpack.c.bf16 %v1621_v21, %v1621_v21  ;;  %v2072_v26 = vsel %vm1946_vm1, %v1621_v21, 0.0  ;;  %v2147_v27 = vmul.f32 %v1621_v21, %v1621_v21 }
 0x213   :  { %v2272_v28 = vadd.f32 %v2271_v24, %v2270_v10  ;;  %v2073_v29 = vadd.f32 %v2072_v26, %v2071_v23 }
 0x214   :  { %1944 = vst.msk [vmem:[%s3820_s2 + $0xfc] sm:$0xf] %vm1880_vm0, %v2582_v25  ;;  %v2273_v30 = vsel %vm1946_vm1, %v2147_v27, 0.0 }
 0x215   :  { %v2074_v31 = vrot.slane %v2073_v29, 4  ;;  %v2274_v32 = vadd.f32 %v2273_v30, %v2272_v28 }
 0x217   :  { %v2075_v33 = vadd.f32 %v2074_v31, %v2073_v29  ;;  %v2275_v34 = vrot.slane %v2274_v32, 4 }
 0x219   :  { %v2076_v35 = vrot.slane %v2075_v33, 2  ;;  %v2276_v36 = vadd.f32 %v2275_v34, %v2274_v32 }
 0x21b   :  { %v2077_v37 = vadd.f32 %v2076_v35, %v2075_v33  ;;  %v2277_v38 = vrot.slane %v2276_v36, 2 }
 0x21d   :  { %v2078_v39 = vrot.slane %v2077_v37, 1  ;;  %v2278_v40 = vadd.f32 %v2277_v38, %v2276_v36 }
 0x21f   :  { %v2079_v42 = vadd.f32 %v2078_v39, %v2077_v37  ;;  %v2279_v43 = vrot.slane %v2278_v40, 1 }
 0x221   :  { %v2080_v45 = vadd.f32 %v2079_v42, %v1945_v41  ;;  %v2280_v46 = vadd.f32 %v2279_v43, %v2278_v40 }
 0x223   :  { %2082 = vst.msk [vmem:[%s3821_s3] sm:$0x1] %vm19_vm2, %v2080_v45  ;;  %v2281_v47 = vadd.f32 %v2280_v46, %v2083_v44 }
 0x225   :  { %2282 = vst.msk [vmem:[%s3822_s4] sm:$0x1] %vm19_vm2, %v2281_v47 }

// kernel: dnet_forward.9
= control target key start
LH: loop header
LB: loop body
LE: loop exit
PB: predicated region body
PF: predicated region fallthrough
CT: control target
= control target key end

     0   :  { %vm732_vm0 = vcmask 519168   ;;  %s1608_s0 = inlined_call_operand.vmem [shape: bf16[512,64], index: 0, kind: input, shape index: {}]   ;;  %s1609_s1 = inlined_call_operand.vmem [shape: f32[1,64], index: 1, kind: input, shape index: {}]   ;;  %s1610_s2 = inlined_call_operand.vmem [shape: f32[1,64], index: 2, kind: input, shape index: {}]   ;;  %s1611_s3 = inlined_call_operand.vmem [shape: bf16[512,64], index: 3, kind: output, shape index: {}]  }
   0x1   :  { %v932_v0 = vld [vmem:[%s1608_s0] sm:$0xff]   ;;  %v1059_v4 = vld [vmem:[%s1608_s0 + $0x8] sm:$0xff]   ;;  %v1060_v5 = vld [vmem:[%s1608_s0 + $0x10] sm:$0xff]  }
   0x2   :  { %v1118_v1 = vld [vmem:[%s1609_s1] ss:$0 sm:$0xff]  ;;  %v933_v2 = vunpack.c.l.bf16 %v932_v0  ;;  %v934_v3 = vunpack.c.h.bf16 %v932_v0  ;;  %v1061_v6 = vld [vmem:[%s1608_s0 + $0x18] sm:$0xff]   ;;  %v937_v8 = vunpack.c.l.bf16 %v1059_v4  ;;  %v938_v9 = vunpack.c.h.bf16 %v1059_v4  ;;  %v1063_v40 = vld [vmem:[%s1608_s0 + $0x28] sm:$0xff]  }
   0x3   :  { %v1132_v7 = vld [vmem:[%s1610_s2] ss:$0 sm:$0xff]  ;;  %v941_v10 = vunpack.c.l.bf16 %v1060_v5  ;;  %v942_v11 = vunpack.c.h.bf16 %v1060_v5  ;;  %v945_v14 = vunpack.c.l.bf16 %v1061_v6  ;;  %v946_v15 = vunpack.c.h.bf16 %v1061_v6  ;;  %v1064_v52 = vld [vmem:[%s1608_s0 + $0x30] sm:$0xff]  }
   0x4   :  { %v149_v12 = vmul.f32 %v933_v2, %v1118_v1  ;;  %v150_v13 = vmul.f32 %v934_v3, %v1118_v1  ;;  %v151_v16 = vmul.f32 %v937_v8, %v1118_v1  ;;  %v152_v17 = vmul.f32 %v938_v9, %v1118_v1  ;;  %v1062_v39 = vld [vmem:[%s1608_s0 + $0x20] sm:$0xff]  }
   0x5   :  { %v153_v18 = vmul.f32 %v941_v10, %v1118_v1  ;;  %v154_v19 = vmul.f32 %v942_v11, %v1118_v1  ;;  %v155_v22 = vmul.f32 %v945_v14, %v1118_v1  ;;  %v156_v23 = vmul.f32 %v946_v15, %v1118_v1 }
   0x6   :  { %v220_v20 = vadd.f32 %v1132_v7, %v149_v12  ;;  %v221_v21 = vadd.f32 %v1132_v7, %v150_v13  ;;  %v222_v24 = vadd.f32 %v1132_v7, %v151_v16  ;;  %v223_v25 = vadd.f32 %v1132_v7, %v152_v17  ;;  %v1065_v17 = vld [vmem:[%s1608_s0 + $0x38] sm:$0xff]  }
   0x7   :  { %v224_v26 = vadd.f32 %v1132_v7, %v153_v18  ;;  %v225_v27 = vadd.f32 %v1132_v7, %v154_v19  ;;  %v226_v46 = vadd.f32 %v1132_v7, %v155_v22  ;;  %v227_v47 = vadd.f32 %v1132_v7, %v156_v23  ;;  %v1066_v18 = vld [vmem:[%s1608_s0 + $0x40] sm:$0xff]   ;;  %v1067_v23 = vld [vmem:[%s1608_s0 + $0x48] sm:$0xff]  }
   0x8   :  { %vm284_vm1 = vcmp.ge.f32.partialorder %v220_v20, 0.0  ;;  %v348_v28 = vmul.f32 0.2, %v220_v20  ;;  %vm285_vm2 = vcmp.ge.f32.partialorder %v221_v21, 0.0  ;;  %v349_v29 = vmul.f32 0.2, %v221_v21 }
   0x9   :  { %vm286_vm3 = vcmp.ge.f32.partialorder %v222_v24, 0.0  ;;  %v350_v30 = vmul.f32 0.2, %v222_v24  ;;  %vm287_vm4 = vcmp.ge.f32.partialorder %v223_v25, 0.0  ;;  %v351_v31 = vmul.f32 0.2, %v223_v25 }
   0xa   :  { %v412_v32 = vsel %vm284_vm1, %v220_v20, %v348_v28  ;;  %v413_v33 = vsel %vm285_vm2, %v221_v21, %v349_v29  ;;  %vm288_vm5 = vcmp.ge.f32.partialorder %v224_v26, 0.0  ;;  %v352_v34 = vmul.f32 0.2, %v224_v26 }
   0xb   :  { %v867_v35 = vpack.c.bf16 %v412_v32, %v412_v32  ;;  %v868_v36 = vpack.c.bf16 %v413_v33, %v413_v33  ;;  %v414_v37 = vsel %vm286_vm3, %v222_v24, %v350_v30  ;;  %v415_v38 = vsel %vm287_vm4, %v223_v25, %v351_v31 }
   0xc   :  { %v869_v41 = vpack.c.bf16 %v414_v37, %v414_v37  ;;  %v870_v42 = vpack.c.bf16 %v415_v38, %v415_v38  ;;  %v416_v43 = vsel %vm288_vm5, %v224_v26, %v352_v34  ;;  %vm289_vm6 = vcmp.ge.f32.partialorder %v225_v27, 0.0 }
   0xd   :  { %733 = vst.msk [vmem:[%s1611_s3] sm:$0xf] %vm732_vm0, %v867_v35  ;;  %734 = vst.msk [vmem:[%s1611_s3 + $0x4] sm:$0xf] %vm732_vm0, %v868_v36  ;;  %v871_v44 = vpack.c.bf16 %v416_v43, %v416_v43  ;;  %v353_v45 = vmul.f32 0.2, %v225_v27  ;;  %v949_v48 = vunpack.c.l.bf16 %v1062_v39  ;;  %v950_v49 = vunpack.c.h.bf16 %v1062_v39 }
   0xe   :  { %735 = vst.msk [vmem:[%s1611_s3 + $0x8] sm:$0xf] %vm732_vm0, %v869_v41  ;;  %736 = vst.msk [vmem:[%s1611_s3 + $0xc] sm:$0xf] %vm732_vm0, %v870_v42  ;;  %v953_v50 = vunpack.c.l.bf16 %v1063_v40  ;;  %v954_v51 = vunpack.c.h.bf16 %v1063_v40  ;;  %vm290_vm7 = vcmp.ge.f32.partialorder %v226_v46, 0.0  ;;  %vm291_vm8 = vcmp.ge.f32.partialorder %v227_v47, 0.0 }
   0xf   :  { %737 = vst.msk [vmem:[%s1611_s3 + $0x10] sm:$0xf] %vm732_vm0, %v871_v44  ;;  %v417_v53 = vsel %vm289_vm6, %v225_v27, %v353_v45  ;;  %v354_v54 = vmul.f32 0.2, %v226_v46  ;;  %v355_v56 = vmul.f32 0.2, %v227_v47  ;;  %v157_v57 = vmul.f32 %v949_v48, %v1118_v1 }
  0x10   :  { %v872_v55 = vpack.c.bf16 %v417_v53, %v417_v53  ;;  %v158_v58 = vmul.f32 %v950_v49, %v1118_v1  ;;  %v159_v60 = vmul.f32 %v953_v50, %v1118_v1  ;;  %v160_v61 = vmul.f32 %v954_v51, %v1118_v1 }
  0x11   :  { %v418_v59 = vsel %vm290_vm7, %v226_v46, %v354_v54  ;;  %v957_v62 = vunpack.c.l.bf16 %v1064_v52  ;;  %v419_v0 = vsel %vm291_vm8, %v227_v47, %v355_v56  ;;  %v228_v2 = vadd.f32 %v1132_v7, %v157_v57  ;;  %v1068_v57 = vld [vmem:[%s1608_s0 + $0x50] sm:$0xff]  }
  0x12   :  { %738 = vst.msk [vmem:[%s1611_s3 + $0x14] sm:$0xf] %vm732_vm0, %v872_v55  ;;  %v873_v63 = vpack.c.bf16 %v418_v59, %v418_v59  ;;  %v229_v3 = vadd.f32 %v1132_v7, %v158_v58  ;;  %v874_v4 = vpack.c.bf16 %v419_v0, %v419_v0  ;;  %v230_v5 = vadd.f32 %v1132_v7, %v159_v60 }
  0x13   :  { %v231_v6 = vadd.f32 %v1132_v7, %v160_v61  ;;  %v161_v8 = vmul.f32 %v957_v62, %v1118_v1  ;;  %vm292_vm9 = vcmp.ge.f32.partialorder %v228_v2, 0.0  ;;  %v356_v9 = vmul.f32 0.2, %v228_v2  ;;  %v1069_v62 = vld [vmem:[%s1608_s0 + $0x58] sm:$0xff]  }
  0x14   :  { %739 = vst.msk [vmem:[%s1611_s3 + $0x18] sm:$0xf] %vm732_vm0, %v873_v63  ;;  %vm293_vm10 = vcmp.ge.f32.partialorder %v229_v3, 0.0  ;;  %v357_v10 = vmul.f32 0.2, %v229_v3  ;;  %vm294_vm11 = vcmp.ge.f32.partialorder %v230_v5, 0.0  ;;  %v958_v16 = vunpack.c.h.bf16 %v1064_v52 }
  0x15   :  { %740 = vst.msk [vmem:[%s1611_s3 + $0x1c] sm:$0xf] %vm732_vm0, %v874_v4  ;;  %v358_v11 = vmul.f32 0.2, %v230_v5  ;;  %vm295_vm12 = vcmp.ge.f32.partialorder %v231_v6, 0.0  ;;  %v420_v13 = vsel %vm292_vm9, %v228_v2, %v356_v9  ;;  %v232_v15 = vadd.f32 %v1132_v7, %v161_v8 }
  0x16   :  { %v359_v12 = vmul.f32 0.2, %v231_v6  ;;  %v421_v14 = vsel %vm293_vm10, %v229_v3, %v357_v10  ;;  %v875_v19 = vpack.c.bf16 %v420_v13, %v420_v13  ;;  %v162_v27 = vmul.f32 %v958_v16, %v1118_v1  ;;  %v1070_v3 = vld [vmem:[%s1608_s0 + $0x60] sm:$0xff]   ;;  %v1071_v13 = vld [vmem:[%s1608_s0 + $0x68] sm:$0xff]  }
  0x17   :  { %v876_v20 = vpack.c.bf16 %v421_v14, %v421_v14  ;;  %v422_v21 = vsel %vm294_vm11, %v230_v5, %v358_v11  ;;  %vm296_vm13 = vcmp.ge.f32.partialorder %v232_v15, 0.0  ;;  %v360_v26 = vmul.f32 0.2, %v232_v15 }
  0x18   :  { %v423_v22 = vsel %vm295_vm12, %v231_v6, %v359_v12  ;;  %v877_v24 = vpack.c.bf16 %v422_v21, %v422_v21  ;;  %741 = vst.msk [vmem:[%s1611_s3 + $0x20] sm:$0xf] %vm732_vm0, %v875_v19  ;;  %v961_v28 = vunpack.c.l.bf16 %v1065_v17  ;;  %v962_v29 = vunpack.c.h.bf16 %v1065_v17 }
  0x19   :  { %v878_v25 = vpack.c.bf16 %v423_v22, %v423_v22  ;;  %742 = vst.msk [vmem:[%s1611_s3 + $0x24] sm:$0xf] %vm732_vm0, %v876_v20  ;;  %v965_v30 = vunpack.c.l.bf16 %v1066_v18  ;;  %v424_v31 = vsel %vm296_vm13, %v232_v15, %v360_v26  ;;  %v966_v32 = vunpack.c.h.bf16 %v1066_v18 }
  0x1a   :  { %743 = vst.msk [vmem:[%s1611_s3 + $0x28] sm:$0xf] %vm732_vm0, %v877_v24  ;;  %v969_v33 = vunpack.c.l.bf16 %v1067_v23  ;;  %v970_v34 = vunpack.c.h.bf16 %v1067_v23  ;;  %v879_v35 = vpack.c.bf16 %v424_v31, %v424_v31  ;;  %v233_v36 = vadd.f32 %v1132_v7, %v162_v27 }
  0x1b   :  { %744 = vst.msk [vmem:[%s1611_s3 + $0x2c] sm:$0xf] %vm732_vm0, %v878_v25  ;;  %v163_v37 = vmul.f32 %v961_v28, %v1118_v1  ;;  %v164_v38 = vmul.f32 %v962_v29, %v1118_v1  ;;  %v165_v39 = vmul.f32 %v965_v30, %v1118_v1  ;;  %v166_v40 = vmul.f32 %v966_v32, %v1118_v1 }
  0x1c   :  { %v167_v41 = vmul.f32 %v969_v33, %v1118_v1  ;;  %v168_v42 = vmul.f32 %v970_v34, %v1118_v1  ;;  %745 = vst.msk [vmem:[%s1611_s3 + $0x30] sm:$0xf] %vm732_vm0, %v879_v35  ;;  %vm297_vm14 = vcmp.ge.f32.partialorder %v233_v36, 0.0  ;;  %v361_v43 = vmul.f32 0.2, %v233_v36 }
  0x1d   :  { %v234_v44 = vadd.f32 %v1132_v7, %v163_v37  ;;  %v235_v45 = vadd.f32 %v1132_v7, %v164_v38  ;;  %v236_v46 = vadd.f32 %v1132_v7, %v165_v39  ;;  %v237_v47 = vadd.f32 %v1132_v7, %v166_v40 }
  0x1e   :  { %v238_v48 = vadd.f32 %v1132_v7, %v167_v41  ;;  %v239_v49 = vadd.f32 %v1132_v7, %v168_v42  ;;  %v425_v50 = vsel %vm297_vm14, %v233_v36, %v361_v43  ;;  %v973_v8 = vunpack.c.l.bf16 %v1068_v57  ;;  %v1072_v41 = vld [vmem:[%s1608_s0 + $0x70] sm:$0xff]  }
  0x1f   :  { %vm298_vm15 = vcmp.ge.f32.partialorder %v234_v44, 0.0  ;;  %v362_v51 = vmul.f32 0.2, %v234_v44  ;;  %vm299_vm1 = vcmp.ge.f32.partialorder %v235_v45, 0.0  ;;  %v880_v52 = vpack.c.bf16 %v425_v50, %v425_v50 }
  0x20   :  { %v363_v53 = vmul.f32 0.2, %v235_v45  ;;  %vm300_vm2 = vcmp.ge.f32.partialorder %v236_v46, 0.0  ;;  %v364_v54 = vmul.f32 0.2, %v236_v46  ;;  %vm301_vm3 = vcmp.ge.f32.partialorder %v237_v47, 0.0 }
  0x21   :  { %v426_v55 = vsel %vm298_vm15, %v234_v44, %v362_v51  ;;  %v365_v56 = vmul.f32 0.2, %v237_v47  ;;  %vm302_vm4 = vcmp.ge.f32.partialorder %v238_v48, 0.0  ;;  %746 = vst.msk [vmem:[%s1611_s3 + $0x34] sm:$0xf] %vm732_vm0, %v880_v52  ;;  %vm303_vm5 = vcmp.ge.f32.partialorder %v239_v49, 0.0 }
  0x22   :  { %v881_v58 = vpack.c.bf16 %v426_v55, %v426_v55  ;;  %v427_v59 = vsel %vm299_vm1, %v235_v45, %v363_v53  ;;  %v428_v60 = vsel %vm300_vm2, %v236_v46, %v364_v54  ;;  %v366_v61 = vmul.f32 0.2, %v238_v48  ;;  %v1073_v45 = vld [vmem:[%s1608_s0 + $0x78] sm:$0xff]  }
  0x23   :  { %v882_v63 = vpack.c.bf16 %v427_v59, %v427_v59  ;;  %v883_v0 = vpack.c.bf16 %v428_v60, %v428_v60  ;;  %v429_v2 = vsel %vm301_vm3, %v237_v47, %v365_v56  ;;  %v367_v6 = vmul.f32 0.2, %v239_v49 }
  0x24   :  { %747 = vst.msk [vmem:[%s1611_s3 + $0x38] sm:$0xf] %vm732_vm0, %v881_v58  ;;  %v884_v4 = vpack.c.bf16 %v429_v2, %v429_v2  ;;  %v430_v5 = vsel %vm302_vm4, %v238_v48, %v366_v61  ;;  %v974_v10 = vunpack.c.h.bf16 %v1068_v57  ;;  %v977_v11 = vunpack.c.l.bf16 %v1069_v62 }
  0x25   :  { %748 = vst.msk [vmem:[%s1611_s3 + $0x3c] sm:$0xf] %vm732_vm0, %v882_v63  ;;  %749 = vst.msk [vmem:[%s1611_s3 + $0x40] sm:$0xf] %vm732_vm0, %v883_v0  ;;  %v885_v9 = vpack.c.bf16 %v430_v5, %v430_v5  ;;  %v978_v12 = vunpack.c.h.bf16 %v1069_v62  ;;  %v431_v14 = vsel %vm303_vm5, %v239_v49, %v367_v6  ;;  %v169_v15 = vmul.f32 %v973_v8, %v1118_v1  ;;  %v1074_v62 = vld [vmem:[%s1608_s0 + $0x80] sm:$0xff]  }
  0x26   :  { %750 = vst.msk [vmem:[%s1611_s3 + $0x44] sm:$0xf] %vm732_vm0, %v884_v4  ;;  %v981_v16 = vunpack.c.l.bf16 %v1070_v3  ;;  %v982_v17 = vunpack.c.h.bf16 %v1070_v3  ;;  %v886_v18 = vpack.c.bf16 %v431_v14, %v431_v14  ;;  %v170_v19 = vmul.f32 %v974_v10, %v1118_v1 }
  0x27   :  { %751 = vst.msk [vmem:[%s1611_s3 + $0x48] sm:$0xf] %vm732_vm0, %v885_v9  ;;  %v171_v20 = vmul.f32 %v977_v11, %v1118_v1  ;;  %v172_v21 = vmul.f32 %v978_v12, %v1118_v1  ;;  %v240_v22 = vadd.f32 %v1132_v7, %v169_v15  ;;  %v985_v25 = vunpack.c.l.bf16 %v1071_v13 }
  0x28   :  { %v173_v23 = vmul.f32 %v981_v16, %v1118_v1  ;;  %v174_v24 = vmul.f32 %v982_v17, %v1118_v1  ;;  %752 = vst.msk [vmem:[%s1611_s3 + $0x4c] sm:$0xf] %vm732_vm0, %v886_v18  ;;  %v241_v26 = vadd.f32 %v1132_v7, %v170_v19  ;;  %v986_v29 = vunpack.c.h.bf16 %v1071_v13  ;;  %v1075_v16 = vld [vmem:[%s1608_s0 + $0x88] sm:$0xff]  }
  0x29   :  { %v242_v27 = vadd.f32 %v1132_v7, %v171_v20  ;;  %v243_v28 = vadd.f32 %v1132_v7, %v172_v21  ;;  %vm304_vm6 = vcmp.ge.f32.partialorder %v240_v22, 0.0  ;;  %v368_v30 = vmul.f32 0.2, %v240_v22 }
  0x2a   :  { %v244_v31 = vadd.f32 %v1132_v7, %v173_v23  ;;  %v245_v32 = vadd.f32 %v1132_v7, %v174_v24  ;;  %vm305_vm7 = vcmp.ge.f32.partialorder %v241_v26, 0.0  ;;  %v369_v33 = vmul.f32 0.2, %v241_v26  ;;  %v1076_v24 = vld [vmem:[%s1608_s0 + $0x90] sm:$0xff]  }
  0x2b   :  { %vm306_vm8 = vcmp.ge.f32.partialorder %v242_v27, 0.0  ;;  %v370_v34 = vmul.f32 0.2, %v242_v27  ;;  %v432_v35 = vsel %vm304_vm6, %v240_v22, %v368_v30  ;;  %vm307_vm9 = vcmp.ge.f32.partialorder %v243_v28, 0.0 }
  0x2c   :  { %v371_v36 = vmul.f32 0.2, %v243_v28  ;;  %vm308_vm10 = vcmp.ge.f32.partialorder %v244_v31, 0.0  ;;  %v887_v37 = vpack.c.bf16 %v432_v35, %v432_v35  ;;  %v433_v38 = vsel %vm305_vm7, %v241_v26, %v369_v33 }
  0x2d   :  { %v434_v39 = vsel %vm306_vm8, %v242_v27, %v370_v34  ;;  %v372_v40 = vmul.f32 0.2, %v244_v31  ;;  %v888_v42 = vpack.c.bf16 %v433_v38, %v433_v38  ;;  %vm309_vm11 = vcmp.ge.f32.partialorder %v245_v32, 0.0 }
  0x2e   :  { %v889_v43 = vpack.c.bf16 %v434_v39, %v434_v39  ;;  %v435_v44 = vsel %vm307_vm9, %v243_v28, %v371_v36  ;;  %753 = vst.msk [vmem:[%s1611_s3 + $0x50] sm:$0xf] %vm732_vm0, %v887_v37  ;;  %v373_v48 = vmul.f32 0.2, %v245_v32  ;;  %v175_v49 = vmul.f32 %v985_v25, %v1118_v1 }
  0x2f   :  { %v890_v46 = vpack.c.bf16 %v435_v44, %v435_v44  ;;  %v436_v47 = vsel %vm308_vm10, %v244_v31, %v372_v40  ;;  %754 = vst.msk [vmem:[%s1611_s3 + $0x54] sm:$0xf] %vm732_vm0, %v888_v42  ;;  %v176_v51 = vmul.f32 %v986_v29, %v1118_v1  ;;  %v989_v52 = vunpack.c.l.bf16 %v1072_v41  ;;  %v1359_v29 = vld [vmem:[%s1608_s0 + $0x98] sm:$0xff]  }
  0x30   :  { %755 = vst.msk [vmem:[%s1611_s3 + $0x58] sm:$0xf] %vm732_vm0, %v889_v43  ;;  %v891_v50 = vpack.c.bf16 %v436_v47, %v436_v47  ;;  %v990_v53 = vunpack.c.h.bf16 %v1072_v41  ;;  %v437_v54 = vsel %vm309_vm11, %v245_v32, %v373_v48  ;;  %v246_v55 = vadd.f32 %v1132_v7, %v175_v49 }
  0x31   :  { %756 = vst.msk [vmem:[%s1611_s3 + $0x5c] sm:$0xf] %vm732_vm0, %v890_v46  ;;  %v993_v56 = vunpack.c.l.bf16 %v1073_v45  ;;  %v994_v57 = vunpack.c.h.bf16 %v1073_v45  ;;  %v892_v58 = vpack.c.bf16 %v437_v54, %v437_v54  ;;  %v247_v59 = vadd.f32 %v1132_v7, %v176_v51 }
  0x32   :  { %757 = vst.msk [vmem:[%s1611_s3 + $0x60] sm:$0xf] %vm732_vm0, %v891_v50  ;;  %v177_v60 = vmul.f32 %v989_v52, %v1118_v1  ;;  %v178_v61 = vmul.f32 %v990_v53, %v1118_v1  ;;  %vm310_vm12 = vcmp.ge.f32.partialorder %v246_v55, 0.0  ;;  %v374_v63 = vmul.f32 0.2, %v246_v55 }
  0x33   :  { %v179_v0 = vmul.f32 %v993_v56, %v1118_v1  ;;  %v180_v2 = vmul.f32 %v994_v57, %v1118_v1  ;;  %758 = vst.msk [vmem:[%s1611_s3 + $0x64] sm:$0xf] %vm732_vm0, %v892_v58  ;;  %vm311_vm13 = vcmp.ge.f32.partialorder %v247_v59, 0.0  ;;  %v375_v3 = vmul.f32 0.2, %v247_v59  ;;  %v1078_v58 = vld [vmem:[%s1608_s0 + $0xa0] sm:$0xff]  }
  0x34   :  { %v248_v4 = vadd.f32 %v1132_v7, %v177_v60  ;;  %v249_v5 = vadd.f32 %v1132_v7, %v178_v61  ;;  %v438_v6 = vsel %vm310_vm12, %v246_v55, %v374_v63  ;;  %v997_v10 = vunpack.c.l.bf16 %v1074_v62 }
  0x35   :  { %v250_v8 = vadd.f32 %v1132_v7, %v179_v0  ;;  %v251_v9 = vadd.f32 %v1132_v7, %v180_v2  ;;  %v893_v11 = vpack.c.bf16 %v438_v6, %v438_v6  ;;  %v439_v12 = vsel %vm311_vm13, %v247_v59, %v375_v3  ;;  %v1080_v6 = vld [vmem:[%s1608_s0 + $0xb0] sm:$0xff]  }
  0x36   :  { %vm312_vm14 = vcmp.ge.f32.partialorder %v248_v4, 0.0  ;;  %v376_v13 = vmul.f32 0.2, %v248_v4  ;;  %v894_v14 = vpack.c.bf16 %v439_v12, %v439_v12  ;;  %vm313_vm15 = vcmp.ge.f32.partialorder %v249_v5, 0.0  ;;  %v1081_v12 = vld [vmem:[%s1608_s0 + $0xb8] sm:$0xff]  }
  0x37   :  { %v377_v15 = vmul.f32 0.2, %v249_v5  ;;  %vm314_vm1 = vcmp.ge.f32.partialorder %v250_v8, 0.0  ;;  %759 = vst.msk [vmem:[%s1611_s3 + $0x68] sm:$0xf] %vm732_vm0, %v893_v11  ;;  %vm315_vm2 = vcmp.ge.f32.partialorder %v251_v9, 0.0  ;;  %v181_v22 = vmul.f32 %v997_v10, %v1118_v1 }
  0x38   :  { %v440_v17 = vsel %vm312_vm14, %v248_v4, %v376_v13  ;;  %v378_v18 = vmul.f32 0.2, %v250_v8  ;;  %v379_v19 = vmul.f32 0.2, %v251_v9  ;;  %760 = vst.msk [vmem:[%s1611_s3 + $0x6c] sm:$0xf] %vm732_vm0, %v894_v14  ;;  %v998_v23 = vunpack.c.h.bf16 %v1074_v62 }
  0x39   :  { %v895_v20 = vpack.c.bf16 %v440_v17, %v440_v17  ;;  %v441_v21 = vsel %vm313_vm15, %v249_v5, %v377_v15  ;;  %v1001_v28 = vunpack.c.l.bf16 %v1075_v16  ;;  %v252_v32 = vadd.f32 %v1132_v7, %v181_v22  ;;  %v1079_v5 = vld [vmem:[%s1608_s0 + $0xa8] sm:$0xff]  }
  0x3a   :  { %v896_v25 = vpack.c.bf16 %v441_v21, %v441_v21  ;;  %v442_v26 = vsel %vm314_vm1, %v250_v8, %v378_v18  ;;  %v443_v27 = vsel %vm315_vm2, %v251_v9, %v379_v19  ;;  %v182_v33 = vmul.f32 %v998_v23, %v1118_v1 }
  0x3b   :  { %761 = vst.msk [vmem:[%s1611_s3 + $0x70] sm:$0xf] %vm732_vm0, %v895_v20  ;;  %v897_v30 = vpack.c.bf16 %v442_v26, %v442_v26  ;;  %v898_v31 = vpack.c.bf16 %v443_v27, %v443_v27  ;;  %v183_v34 = vmul.f32 %v1001_v28, %v1118_v1  ;;  %v1002_v35 = vunpack.c.h.bf16 %v1075_v16 }
  0x3c   :  { %762 = vst.msk [vmem:[%s1611_s3 + $0x74] sm:$0xf] %vm732_vm0, %v896_v25  ;;  %v1005_v36 = vunpack.c.l.bf16 %v1076_v24  ;;  %v1006_v37 = vunpack.c.h.bf16 %v1076_v24  ;;  %vm316_vm3 = vcmp.ge.f32.partialorder %v252_v32, 0.0  ;;  %v380_v38 = vmul.f32 0.2, %v252_v32 }
  0x3d   :  { %763 = vst.msk [vmem:[%s1611_s3 + $0x78] sm:$0xf] %vm732_vm0, %v897_v30  ;;  %764 = vst.msk [vmem:[%s1611_s3 + $0x7c] sm:$0xf] %vm732_vm0, %v898_v31  ;;  %v253_v39 = vadd.f32 %v1132_v7, %v182_v33  ;;  %v1009_v40 = vunpack.c.l.bf16 %v1359_v29  ;;  %v254_v41 = vadd.f32 %v1132_v7, %v183_v34  ;;  %v184_v42 = vmul.f32 %v1002_v35, %v1118_v1 }
  0x3e   :  { %v185_v43 = vmul.f32 %v1005_v36, %v1118_v1  ;;  %v186_v44 = vmul.f32 %v1006_v37, %v1118_v1  ;;  %v444_v45 = vsel %vm316_vm3, %v252_v32, %v380_v38  ;;  %v1010_v3 = vunpack.c.h.bf16 %v1359_v29 }
  0x3f   :  { %vm317_vm4 = vcmp.ge.f32.partialorder %v253_v39, 0.0  ;;  %v381_v46 = vmul.f32 0.2, %v253_v39  ;;  %v187_v47 = vmul.f32 %v1009_v40, %v1118_v1  ;;  %v899_v48 = vpack.c.bf16 %v444_v45, %v444_v45 }
  0x40   :  { %vm318_vm5 = vcmp.ge.f32.partialorder %v254_v41, 0.0  ;;  %v382_v49 = vmul.f32 0.2, %v254_v41  ;;  %v255_v50 = vadd.f32 %v1132_v7, %v184_v42  ;;  %v256_v52 = vadd.f32 %v1132_v7, %v185_v43 }
  0x41   :  { %v445_v51 = vsel %vm317_vm4, %v253_v39, %v381_v46  ;;  %v257_v53 = vadd.f32 %v1132_v7, %v186_v44  ;;  %v258_v54 = vadd.f32 %v1132_v7, %v187_v47  ;;  %765 = vst.msk [vmem:[%s1611_s3 + $0x80] sm:$0xf] %vm732_vm0, %v899_v48  ;;  %v1013_v4 = vunpack.c.l.bf16 %v1078_v58 }
  0x42   :  { %v900_v55 = vpack.c.bf16 %v445_v51, %v445_v51  ;;  %v446_v56 = vsel %vm318_vm5, %v254_v41, %v382_v49  ;;  %vm319_vm6 = vcmp.ge.f32.partialorder %v255_v50, 0.0  ;;  %v383_v57 = vmul.f32 0.2, %v255_v50  ;;  %v1082_v41 = vld [vmem:[%s1608_s0 + $0xc0] sm:$0xff]  }
  0x43   :  { %v901_v59 = vpack.c.bf16 %v446_v56, %v446_v56  ;;  %vm320_vm7 = vcmp.ge.f32.partialorder %v256_v52, 0.0  ;;  %v384_v60 = vmul.f32 0.2, %v256_v52  ;;  %vm321_vm8 = vcmp.ge.f32.partialorder %v257_v53, 0.0 }
  0x44   :  { %766 = vst.msk [vmem:[%s1611_s3 + $0x84] sm:$0xf] %vm732_vm0, %v900_v55  ;;  %v447_v61 = vsel %vm319_vm6, %v255_v50, %v383_v57  ;;  %v385_v62 = vmul.f32 0.2, %v257_v53  ;;  %vm322_vm9 = vcmp.ge.f32.partialorder %v258_v54, 0.0  ;;  %v1014_v11 = vunpack.c.h.bf16 %v1078_v58 }
  0x45   :  { %v386_v63 = vmul.f32 0.2, %v258_v54  ;;  %767 = vst.msk [vmem:[%s1611_s3 + $0x88] sm:$0xf] %vm732_vm0, %v901_v59  ;;  %v902_v0 = vpack.c.bf16 %v447_v61, %v447_v61  ;;  %v448_v2 = vsel %vm320_vm7, %v256_v52, %v384_v60  ;;  %v188_v15 = vmul.f32 %v1010_v3, %v1118_v1  ;;  %v1083_v52 = vld [vmem:[%s1608_s0 + $0xc8] sm:$0xff]  }
  0x46   :  { %v903_v8 = vpack.c.bf16 %v448_v2, %v448_v2  ;;  %v449_v9 = vsel %vm321_vm8, %v257_v53, %v385_v62  ;;  %v189_v16 = vmul.f32 %v1013_v4, %v1118_v1  ;;  %v190_v17 = vmul.f32 %v1014_v11, %v1118_v1 }
  0x47   :  { %v450_v10 = vsel %vm322_vm9, %v258_v54, %v386_v63  ;;  %768 = vst.msk [vmem:[%s1611_s3 + $0x8c] sm:$0xf] %vm732_vm0, %v902_v0  ;;  %v904_v13 = vpack.c.bf16 %v449_v9, %v449_v9  ;;  %v1017_v18 = vunpack.c.l.bf16 %v1079_v5  ;;  %v1018_v19 = vunpack.c.h.bf16 %v1079_v5  ;;  %v1084_v9 = vld [vmem:[%s1608_s0 + $0xd0] sm:$0xff]  }
  0x48   :  { %v905_v14 = vpack.c.bf16 %v450_v10, %v450_v10  ;;  %769 = vst.msk [vmem:[%s1611_s3 + $0x90] sm:$0xf] %vm732_vm0, %v903_v8  ;;  %v1021_v20 = vunpack.c.l.bf16 %v1080_v6  ;;  %v259_v21 = vadd.f32 %v1132_v7, %v188_v15  ;;  %v260_v22 = vadd.f32 %v1132_v7, %v189_v16 }
  0x49   :  { %770 = vst.msk [vmem:[%s1611_s3 + $0x94] sm:$0xf] %vm732_vm0, %v904_v13  ;;  %v1022_v23 = vunpack.c.h.bf16 %v1080_v6  ;;  %v1025_v24 = vunpack.c.l.bf16 %v1081_v12  ;;  %v261_v25 = vadd.f32 %v1132_v7, %v190_v17  ;;  %v191_v26 = vmul.f32 %v1017_v18, %v1118_v1 }
  0x4a   :  { %771 = vst.msk [vmem:[%s1611_s3 + $0x98] sm:$0xf] %vm732_vm0, %v905_v14  ;;  %v192_v27 = vmul.f32 %v1018_v19, %v1118_v1  ;;  %v193_v28 = vmul.f32 %v1021_v20, %v1118_v1  ;;  %vm323_vm10 = vcmp.ge.f32.partialorder %v259_v21, 0.0  ;;  %v387_v29 = vmul.f32 0.2, %v259_v21 }
  0x4b   :  { %vm324_vm11 = vcmp.ge.f32.partialorder %v260_v22, 0.0  ;;  %v388_v30 = vmul.f32 0.2, %v260_v22  ;;  %vm325_vm12 = vcmp.ge.f32.partialorder %v261_v25, 0.0  ;;  %v389_v31 = vmul.f32 0.2, %v261_v25 }
  0x4c   :  { %v262_v32 = vadd.f32 %v1132_v7, %v191_v26  ;;  %v263_v33 = vadd.f32 %v1132_v7, %v192_v27  ;;  %v451_v34 = vsel %vm323_vm10, %v259_v21, %v387_v29  ;;  %v264_v36 = vadd.f32 %v1132_v7, %v193_v28 }
  0x4d   :  { %v452_v35 = vsel %vm324_vm11, %v260_v22, %v388_v30  ;;  %v194_v37 = vmul.f32 %v1022_v23, %v1118_v1  ;;  %v906_v38 = vpack.c.bf16 %v451_v34, %v451_v34  ;;  %v453_v40 = vsel %vm325_vm12, %v261_v25, %v389_v31  ;;  %v1085_v23 = vld [vmem:[%s1608_s0 + $0xd8] sm:$0xff]   ;;  %v1086_v30 = vld [vmem:[%s1608_s0 + $0xe0] sm:$0xff]  }
  0x4e   :  { %v907_v39 = vpack.c.bf16 %v452_v35, %v452_v35  ;;  %vm326_vm13 = vcmp.ge.f32.partialorder %v262_v32, 0.0  ;;  %v908_v42 = vpack.c.bf16 %v453_v40, %v453_v40  ;;  %v390_v43 = vmul.f32 0.2, %v262_v32 }
  0x4f   :  { %vm327_vm14 = vcmp.ge.f32.partialorder %v263_v33, 0.0  ;;  %v391_v44 = vmul.f32 0.2, %v263_v33  ;;  %772 = vst.msk [vmem:[%s1611_s3 + $0x9c] sm:$0xf] %vm732_vm0, %v906_v38  ;;  %vm328_vm15 = vcmp.ge.f32.partialorder %v264_v36, 0.0  ;;  %v265_v46 = vadd.f32 %v1132_v7, %v194_v37 }
  0x50   :  { %773 = vst.msk [vmem:[%s1611_s3 + $0xa0] sm:$0xf] %vm732_vm0, %v907_v39  ;;  %v392_v45 = vmul.f32 0.2, %v264_v36  ;;  %v195_v47 = vmul.f32 %v1025_v24, %v1118_v1  ;;  %774 = vst.msk [vmem:[%s1611_s3 + $0xa4] sm:$0xf] %vm732_vm0, %v908_v42  ;;  %v454_v48 = vsel %vm326_vm13, %v262_v32, %v390_v43  ;;  %v1026_v50 = vunpack.c.h.bf16 %v1081_v12 }
  0x51   :  { %v455_v49 = vsel %vm327_vm14, %v263_v33, %v391_v44  ;;  %v1029_v51 = vunpack.c.l.bf16 %v1082_v41  ;;  %v909_v53 = vpack.c.bf16 %v454_v48, %v454_v48  ;;  %vm329_vm1 = vcmp.ge.f32.partialorder %v265_v46, 0.0  ;;  %v1087_v39 = vld [vmem:[%s1608_s0 + $0xe8] sm:$0xff]  }
  0x52   :  { %v910_v54 = vpack.c.bf16 %v455_v49, %v455_v49  ;;  %v456_v55 = vsel %vm328_vm15, %v264_v36, %v392_v45  ;;  %v393_v57 = vmul.f32 0.2, %v265_v46  ;;  %v266_v58 = vadd.f32 %v1132_v7, %v195_v47 }
  0x53   :  { %v911_v56 = vpack.c.bf16 %v456_v55, %v456_v55  ;;  %v196_v59 = vmul.f32 %v1026_v50, %v1118_v1  ;;  %775 = vst.msk [vmem:[%s1611_s3 + $0xa8] sm:$0xf] %vm732_vm0, %v909_v53  ;;  %v197_v60 = vmul.f32 %v1029_v51, %v1118_v1  ;;  %v1030_v61 = vunpack.c.h.bf16 %v1082_v41 }
  0x54   :  { %776 = vst.msk [vmem:[%s1611_s3 + $0xac] sm:$0xf] %vm732_vm0, %v910_v54  ;;  %v1033_v62 = vunpack.c.l.bf16 %v1083_v52  ;;  %v1034_v63 = vunpack.c.h.bf16 %v1083_v52  ;;  %v457_v0 = vsel %vm329_vm1, %v265_v46, %v393_v57  ;;  %vm330_vm2 = vcmp.ge.f32.partialorder %v266_v58, 0.0 }
  0x55   :  { %777 = vst.msk [vmem:[%s1611_s3 + $0xb0] sm:$0xf] %vm732_vm0, %v911_v56  ;;  %v394_v2 = vmul.f32 0.2, %v266_v58  ;;  %v267_v3 = vadd.f32 %v1132_v7, %v196_v59  ;;  %v912_v4 = vpack.c.bf16 %v457_v0, %v457_v0  ;;  %v268_v5 = vadd.f32 %v1132_v7, %v197_v60  ;;  %v1088_v0 = vld [vmem:[%s1608_s0 + $0xf0] sm:$0xff]  }
  0x56   :  { %v198_v6 = vmul.f32 %v1030_v61, %v1118_v1  ;;  %v199_v8 = vmul.f32 %v1033_v62, %v1118_v1  ;;  %v200_v12 = vmul.f32 %v1034_v63, %v1118_v1  ;;  %v1037_v19 = vunpack.c.l.bf16 %v1084_v9 }
  0x57   :  { %v458_v10 = vsel %vm330_vm2, %v266_v58, %v394_v2  ;;  %vm331_vm3 = vcmp.ge.f32.partialorder %v267_v3, 0.0  ;;  %v395_v11 = vmul.f32 0.2, %v267_v3  ;;  %778 = vst.msk [vmem:[%s1611_s3 + $0xb4] sm:$0xf] %vm732_vm0, %v912_v4  ;;  %vm332_vm4 = vcmp.ge.f32.partialorder %v268_v5, 0.0 }
  0x58   :  { %v913_v13 = vpack.c.bf16 %v458_v10, %v458_v10  ;;  %v396_v14 = vmul.f32 0.2, %v268_v5  ;;  %v269_v15 = vadd.f32 %v1132_v7, %v198_v6  ;;  %v270_v17 = vadd.f32 %v1132_v7, %v199_v8 }
  0x59   :  { %v459_v16 = vsel %vm331_vm3, %v267_v3, %v395_v11  ;;  %v271_v18 = vadd.f32 %v1132_v7, %v200_v12  ;;  %v201_v28 = vmul.f32 %v1037_v19, %v1118_v1  ;;  %v1038_v29 = vunpack.c.h.bf16 %v1084_v9 }
  0x5a   :  { %779 = vst.msk [vmem:[%s1611_s3 + $0xb8] sm:$0xf] %vm732_vm0, %v913_v13  ;;  %v914_v20 = vpack.c.bf16 %v459_v16, %v459_v16  ;;  %v460_v21 = vsel %vm332_vm4, %v268_v5, %v396_v14  ;;  %vm333_vm5 = vcmp.ge.f32.partialorder %v269_v15, 0.0  ;;  %v397_v22 = vmul.f32 0.2, %v269_v15  ;;  %v1089_v13 = vld [vmem:[%s1608_s0 + $0xf8] sm:$0xff]  }
  0x5b   :  { %v915_v24 = vpack.c.bf16 %v460_v21, %v460_v21  ;;  %vm334_vm6 = vcmp.ge.f32.partialorder %v270_v17, 0.0  ;;  %v398_v25 = vmul.f32 0.2, %v270_v17  ;;  %vm335_vm7 = vcmp.ge.f32.partialorder %v271_v18, 0.0 }
  0x5c   :  { %780 = vst.msk [vmem:[%s1611_s3 + $0xbc] sm:$0xf] %vm732_vm0, %v914_v20  ;;  %v461_v26 = vsel %vm333_vm5, %v269_v15, %v397_v22  ;;  %v399_v27 = vmul.f32 0.2, %v271_v18  ;;  %v1041_v33 = vunpack.c.l.bf16 %v1085_v23  ;;  %v1042_v34 = vunpack.c.h.bf16 %v1085_v23 }
  0x5d   :  { %781 = vst.msk [vmem:[%s1611_s3 + $0xc0] sm:$0xf] %vm732_vm0, %v915_v24  ;;  %v916_v31 = vpack.c.bf16 %v461_v26, %v461_v26  ;;  %v462_v32 = vsel %vm334_vm6, %v270_v17, %v398_v25  ;;  %v272_v37 = vadd.f32 %v1132_v7, %v201_v28  ;;  %v202_v38 = vmul.f32 %v1038_v29, %v1118_v1 }
  0x5e   :  { %v917_v35 = vpack.c.bf16 %v462_v32, %v462_v32  ;;  %v463_v36 = vsel %vm335_vm7, %v271_v18, %v399_v27  ;;  %v203_v41 = vmul.f32 %v1041_v33, %v1118_v1  ;;  %v204_v42 = vmul.f32 %v1042_v34, %v1118_v1  ;;  %v1090_v27 = vld [vmem:[%s1609_s1] ss:$0 sm:$0xff] }
  0x5f   :  { %782 = vst.msk [vmem:[%s1611_s3 + $0xc4] sm:$0xf] %vm732_vm0, %v916_v31  ;;  %v918_v40 = vpack.c.bf16 %v463_v36, %v463_v36  ;;  %v1045_v43 = vunpack.c.l.bf16 %v1086_v30  ;;  %vm336_vm8 = vcmp.ge.f32.partialorder %v272_v37, 0.0  ;;  %v400_v44 = vmul.f32 0.2, %v272_v37 }
  0x60   :  { %783 = vst.msk [vmem:[%s1611_s3 + $0xc8] sm:$0xf] %vm732_vm0, %v917_v35  ;;  %v273_v45 = vadd.f32 %v1132_v7, %v202_v38  ;;  %v1046_v46 = vunpack.c.h.bf16 %v1086_v30  ;;  %v274_v47 = vadd.f32 %v1132_v7, %v203_v41  ;;  %v275_v48 = vadd.f32 %v1132_v7, %v204_v42 }
  0x61   :  { %784 = vst.msk [vmem:[%s1611_s3 + $0xcc] sm:$0xf] %vm732_vm0, %v918_v40  ;;  %v205_v49 = vmul.f32 %v1045_v43, %v1118_v1  ;;  %v1049_v50 = vunpack.c.l.bf16 %v1087_v39  ;;  %v464_v51 = vsel %vm336_vm8, %v272_v37, %v400_v44  ;;  %v1050_v63 = vunpack.c.h.bf16 %v1087_v39 }
  0x62   :  { %vm337_vm9 = vcmp.ge.f32.partialorder %v273_v45, 0.0  ;;  %v401_v52 = vmul.f32 0.2, %v273_v45  ;;  %v206_v53 = vmul.f32 %v1046_v46, %v1118_v1  ;;  %v919_v54 = vpack.c.bf16 %v464_v51, %v464_v51 }
  0x63   :  { %vm338_vm10 = vcmp.ge.f32.partialorder %v274_v47, 0.0  ;;  %v402_v55 = vmul.f32 0.2, %v274_v47  ;;  %vm339_vm11 = vcmp.ge.f32.partialorder %v275_v48, 0.0  ;;  %v403_v57 = vmul.f32 0.2, %v275_v48 }
  0x64   :  { %v465_v56 = vsel %vm337_vm9, %v273_v45, %v401_v52  ;;  %v276_v58 = vadd.f32 %v1132_v7, %v205_v49  ;;  %v277_v59 = vadd.f32 %v1132_v7, %v206_v53  ;;  %785 = vst.msk [vmem:[%s1611_s3 + $0xd0] sm:$0xf] %vm732_vm0, %v919_v54  ;;  %v207_v62 = vmul.f32 %v1049_v50, %v1118_v1 }
  0x65   :  { %v920_v60 = vpack.c.bf16 %v465_v56, %v465_v56  ;;  %v466_v61 = vsel %vm338_vm10, %v274_v47, %v402_v55  ;;  %v467_v3 = vsel %vm339_vm11, %v275_v48, %v403_v57  ;;  %v208_v10 = vmul.f32 %v1050_v63, %v1118_v1 }
  0x66   :  { %v921_v2 = vpack.c.bf16 %v466_v61, %v466_v61  ;;  %vm340_vm12 = vcmp.ge.f32.partialorder %v276_v58, 0.0  ;;  %v404_v4 = vmul.f32 0.2, %v276_v58  ;;  %v922_v5 = vpack.c.bf16 %v467_v3, %v467_v3 }
  0x67   :  { %786 = vst.msk [vmem:[%s1611_s3 + $0xd4] sm:$0xf] %vm732_vm0, %v920_v60  ;;  %vm341_vm13 = vcmp.ge.f32.partialorder %v277_v59, 0.0  ;;  %v405_v6 = vmul.f32 0.2, %v277_v59  ;;  %v278_v8 = vadd.f32 %v1132_v7, %v207_v62  ;;  %v1053_v11 = vunpack.c.l.bf16 %v1088_v0 }
  0x68   :  { %787 = vst.msk [vmem:[%s1611_s3 + $0xd8] sm:$0xf] %vm732_vm0, %v921_v2  ;;  %v468_v9 = vsel %vm340_vm12, %v276_v58, %v404_v4  ;;  %v1054_v12 = vunpack.c.h.bf16 %v1088_v0  ;;  %788 = vst.msk [vmem:[%s1611_s3 + $0xdc] sm:$0xf] %vm732_vm0, %v922_v5  ;;  %v279_v18 = vadd.f32 %v1132_v7, %v208_v10  ;;  %v1057_v22 = vunpack.c.l.bf16 %v1089_v13 }
  0x69   :  { %v923_v14 = vpack.c.bf16 %v468_v9, %v468_v9  ;;  %v469_v15 = vsel %vm341_vm13, %v277_v59, %v405_v6  ;;  %vm342_vm14 = vcmp.ge.f32.partialorder %v278_v8, 0.0  ;;  %v406_v16 = vmul.f32 0.2, %v278_v8 }
  0x6a   :  { %v924_v17 = vpack.c.bf16 %v469_v15, %v469_v15  ;;  %v209_v19 = vmul.f32 %v1053_v11, %v1118_v1  ;;  %v210_v20 = vmul.f32 %v1054_v12, %v1118_v1  ;;  %v1058_v23 = vunpack.c.h.bf16 %v1089_v13 }
  0x6b   :  { %789 = vst.msk [vmem:[%s1611_s3 + $0xe0] sm:$0xf] %vm732_vm0, %v923_v14  ;;  %v470_v21 = vsel %vm342_vm14, %v278_v8, %v406_v16  ;;  %vm343_vm15 = vcmp.ge.f32.partialorder %v279_v18, 0.0  ;;  %v407_v25 = vmul.f32 0.2, %v279_v18  ;;  %v211_v28 = vmul.f32 %v1090_v27, %v1057_v22 }
  0x6c   :  { %790 = vst.msk [vmem:[%s1611_s3 + $0xe4] sm:$0xf] %vm732_vm0, %v924_v17  ;;  %v925_v24 = vpack.c.bf16 %v470_v21, %v470_v21  ;;  %v280_v26 = vadd.f32 %v1132_v7, %v209_v19  ;;  %v281_v1 = vadd.f32 %v1132_v7, %v210_v20  ;;  %v212_v29 = vmul.f32 %v1090_v27, %v1058_v23  ;;  %v1091_v7 = vld [vmem:[%s1610_s2] ss:$0 sm:$0xff] }
  0x6d   :  { %v471_v30 = vsel %vm343_vm15, %v279_v18, %v407_v25  ;;  %v282_v34 = vadd.f32 %v1091_v7, %v211_v28 }
  0x6e   :  { %791 = vst.msk [vmem:[%s1611_s3 + $0xe8] sm:$0xf] %vm732_vm0, %v925_v24  ;;  %vm344_vm1 = vcmp.ge.f32.partialorder %v280_v26, 0.0  ;;  %v408_v31 = vmul.f32 0.2, %v280_v26  ;;  %v926_v32 = vpack.c.bf16 %v471_v30, %v471_v30  ;;  %vm345_vm2 = vcmp.ge.f32.partialorder %v281_v1, 0.0 }
  0x6f   :  { %v409_v33 = vmul.f32 0.2, %v281_v1  ;;  %v283_v36 = vadd.f32 %v1091_v7, %v212_v29  ;;  %vm346_vm3 = vcmp.ge.f32.partialorder %v282_v34, 0.0  ;;  %v410_v39 = vmul.f32 0.2, %v282_v34 }
  0x70   :  { %v472_v35 = vsel %vm344_vm1, %v280_v26, %v408_v31  ;;  %792 = vst.msk [vmem:[%s1611_s3 + $0xec] sm:$0xf] %vm732_vm0, %v926_v32 }
  0x71   :  { %v927_v37 = vpack.c.bf16 %v472_v35, %v472_v35  ;;  %v473_v38 = vsel %vm345_vm2, %v281_v1, %v409_v33  ;;  %vm347_vm4 = vcmp.ge.f32.partialorder %v283_v36, 0.0  ;;  %v411_v41 = vmul.f32 0.2, %v283_v36 }
  0x72   :  { %v928_v40 = vpack.c.bf16 %v473_v38, %v473_v38  ;;  %v474_v42 = vsel %vm346_vm3, %v282_v34, %v410_v39 }
  0x73   :  { %793 = vst.msk [vmem:[%s1611_s3 + $0xf0] sm:$0xf] %vm732_vm0, %v927_v37  ;;  %v929_v43 = vpack.c.bf16 %v474_v42, %v474_v42  ;;  %v475_v44 = vsel %vm347_vm4, %v283_v36, %v411_v41 }
  0x74   :  { %794 = vst.msk [vmem:[%s1611_s3 + $0xf4] sm:$0xf] %vm732_vm0, %v928_v40  ;;  %v930_v45 = vpack.c.bf16 %v475_v44, %v475_v44 }
  0x75   :  { %795 = vst.msk [vmem:[%s1611_s3 + $0xf8] sm:$0xf] %vm732_vm0, %v929_v43 }
  0x76   :  { %796 = vst.msk [vmem:[%s1611_s3 + $0xfc] sm:$0xf] %vm732_vm0, %v930_v45 }

// kernel: dnet_forward.10
= control target key start
LH: loop header
LB: loop body
LE: loop exit
PB: predicated region body
PF: predicated region fallthrough
CT: control target
= control target key end

     0   :  { %s2489_s1 = inlined_call_operand.vmem [shape: bf16[1024,128], index: 1, kind: input, shape index: {}]   ;;  %s2490_s0 = inlined_call_operand.vmem [shape: bf16[128,1024], index: 0, kind: input, shape index: {}]   ;;  %s2491_s3 = inlined_call_operand.vmem [shape: f32[1,128], index: 3, kind: output, shape index: {1}]   ;;  %s2492_s4 = inlined_call_operand.vmem [shape: f32[1,128], index: 4, kind: output, shape index: {2}]   ;;  %s2493_s2 = inlined_call_operand.vmem [shape: bf16[128,128], index: 2, kind: output, shape index: {0}]  }
   0x1   :  { %v1925_v0 = vld [vmem:[%s2489_s1 + $0x40] sm:$0xff]   ;;  %v1929_v4 = vld [vmem:[%s2489_s1 + $0x48] sm:$0xff]   ;;  %v1933_v8 = vld [vmem:[%s2489_s1 + $0x50] sm:$0xff]  }
   0x2   :  { %v1926_v1 = vld [vmem:[%s2489_s1 + $0xc0] sm:$0xff]   ;;  %1668 = vmatprep.subr.bf16.mxu0 %v1925_v0  ;;  %v1930_v5 = vld [vmem:[%s2489_s1 + $0xc8] sm:$0xff]   ;;  %v1934_v9 = vld [vmem:[%s2489_s1 + $0xd0] sm:$0xff]  }
   0x3   :  { %v1927_v2 = vld [vmem:[%s2489_s1] sm:$0xff]   ;;  %1732 = vmatprep.subr.bf16.mxu1 %v1926_v1  ;;  %v1931_v6 = vld [vmem:[%s2489_s1 + $0x8] sm:$0xff]   ;;  %v1935_v10 = vld [vmem:[%s2489_s1 + $0x10] sm:$0xff]  }
   0x4   :  { %v1928_v3 = vld [vmem:[%s2489_s1 + $0x80] sm:$0xff]   ;;  %1669 = vmatpush3.bf16.msra.mxu0 %v1927_v2  ;;  %v1932_v7 = vld [vmem:[%s2489_s1 + $0x88] sm:$0xff]   ;;  %v1936_v11 = vld [vmem:[%s2489_s1 + $0x90] sm:$0xff]  }
   0x5   :  { %1733 = vmatpush3.bf16.msra.mxu1 %v1928_v3  ;;  %1670 = vmatprep.subr.bf16.mxu0 %v1929_v4  ;;  %v1937_v12 = vld [vmem:[%s2489_s1 + $0x58] sm:$0xff]   ;;  %v1941_v16 = vld [vmem:[%s2489_s1 + $0x60] sm:$0xff]   ;;  %v1945_v20 = vld [vmem:[%s2489_s1 + $0x68] sm:$0xff]  }
   0x6   :  { %1734 = vmatprep.subr.bf16.mxu1 %v1930_v5  ;;  %v1938_v13 = vld [vmem:[%s2489_s1 + $0xd8] sm:$0xff]   ;;  %v1942_v17 = vld [vmem:[%s2489_s1 + $0xe0] sm:$0xff]   ;;  %v1946_v21 = vld [vmem:[%s2489_s1 + $0xe8] sm:$0xff]  }
   0x7   :  { %v1939_v14 = vld [vmem:[%s2489_s1 + $0x18] sm:$0xff]   ;;  %v1943_v18 = vld [vmem:[%s2489_s1 + $0x20] sm:$0xff]   ;;  %v1947_v22 = vld [vmem:[%s2489_s1 + $0x28] sm:$0xff]  }
   0x8   :  { %1671 = vmatpush3.bf16.msra.mxu0 %v1931_v6  ;;  %v1940_v15 = vld [vmem:[%s2489_s1 + $0x98] sm:$0xff]   ;;  %v1944_v19 = vld [vmem:[%s2489_s1 + $0xa0] sm:$0xff]   ;;  %v1948_v23 = vld [vmem:[%s2489_s1 + $0xa8] sm:$0xff]  }
   0x9   :  { %1735 = vmatpush3.bf16.msra.mxu1 %v1932_v7  ;;  %1672 = vmatprep.subr.bf16.mxu0 %v1933_v8  ;;  %v1949_v24 = vld [vmem:[%s2489_s1 + $0x70] sm:$0xff]   ;;  %v1953_v28 = vld [vmem:[%s2489_s1 + $0x78] sm:$0xff]   ;;  %v21_v32 = vld [vmem:[%s2490_s0] sm:$0xff] }
   0xa   :  { %1736 = vmatprep.subr.bf16.mxu1 %v1934_v9  ;;  %v1950_v25 = vld [vmem:[%s2489_s1 + $0xf0] sm:$0xff]   ;;  %v1954_v29 = vld [vmem:[%s2489_s1 + $0xf8] sm:$0xff]   ;;  %v25_v33 = vld [vmem:[%s2490_s0 + $0x20] sm:$0xff] }
   0xb   :  { %v1951_v26 = vld [vmem:[%s2489_s1 + $0x30] sm:$0xff]   ;;  %v1955_v30 = vld [vmem:[%s2489_s1 + $0x38] sm:$0xff]   ;;  %v22_v34 = vld [vmem:[%s2490_s0 + $0x8] sm:$0xff]  ;;  %v1461_v35 = vcombine.low %v21_v32, %v25_v33  ;;  %v1462_v36 = vcombine.high %v21_v32, %v25_v33 }
   0xc   :  { %1673 = vmatpush3.bf16.msra.mxu0 %v1935_v10  ;;  %v1952_v27 = vld [vmem:[%s2489_s1 + $0xb0] sm:$0xff]   ;;  %v1956_v31 = vld [vmem:[%s2489_s1 + $0xb8] sm:$0xff]   ;;  %v26_v37 = vld [vmem:[%s2490_s0 + $0x28] sm:$0xff] }
   0xd   :  { %1737 = vmatpush3.bf16.msra.mxu1 %v1936_v11  ;;  %1674 = vmatprep.subr.bf16.mxu0 %v1937_v12  ;;  %v1463_v38 = vcombine.low %v22_v34, %v26_v37  ;;  %v1464_v39 = vcombine.high %v22_v34, %v26_v37  ;;  %v1957_v40 = vld [vmem:[%s2489_s1 + $0x140] sm:$0xff]   ;;  %v30_v47 = vld [vmem:[%s2490_s0 + $0x48] sm:$0xff]  ;;  %v1965_v62 = vld [vmem:[%s2489_s1 + $0x150] sm:$0xff]  }
   0xe   :  { %1738 = vmatprep.subr.bf16.mxu1 %v1938_v13  ;;  %949 = vmatprep.mubr.bf16.mxu0 %v1462_v36  ;;  %v1958_v41 = vld [vmem:[%s2489_s1 + $0x100] sm:$0xff]   ;;  %v34_v48 = vld [vmem:[%s2490_s0 + $0x68] sm:$0xff]  ;;  %v1966_v63 = vld [vmem:[%s2489_s1 + $0x110] sm:$0xff]  }
   0xf   :  { %1046 = vmatprep.mubr.bf16.mxu1 %v1464_v39  ;;  %v1959_v42 = vld [vmem:[%s2489_s1 + $0x1c0] sm:$0xff]   ;;  %v1472_v49 = vcombine.high %v30_v47, %v34_v48  ;;  %v1961_v50 = vld [vmem:[%s2489_s1 + $0x148] sm:$0xff]   ;;  %v1471_v53 = vcombine.low %v30_v47, %v34_v48  ;;  %v1967_v0 = vld [vmem:[%s2489_s1 + $0x1d0] sm:$0xff]  }
  0x10   :  { %1675 = vmatpush3.bf16.msra.mxu0 %v1939_v14  ;;  %v1960_v43 = vld [vmem:[%s2489_s1 + $0x180] sm:$0xff]   ;;  %v1962_v52 = vld [vmem:[%s2489_s1 + $0x108] sm:$0xff]   ;;  %v1968_v1 = vld [vmem:[%s2489_s1 + $0x190] sm:$0xff]  }
  0x11   :  { %1739 = vmatpush3.bf16.msra.mxu1 %v1940_v15  ;;  %1676 = vmatprep.subr.bf16.mxu0 %v1941_v16  ;;  %v29_v44 = vld [vmem:[%s2490_s0 + $0x40] sm:$0xff]  ;;  %v1963_v54 = vld [vmem:[%s2489_s1 + $0x1c8] sm:$0xff]   ;;  %v1969_v10 = vld [vmem:[%s2489_s1 + $0x158] sm:$0xff]  }
  0x12   :  { %1740 = vmatprep.subr.bf16.mxu1 %v1942_v17  ;;  %v33_v45 = vld [vmem:[%s2490_s0 + $0x60] sm:$0xff]  ;;  %v1964_v55 = vld [vmem:[%s2489_s1 + $0x188] sm:$0xff]   ;;  %v1970_v11 = vld [vmem:[%s2489_s1 + $0x118] sm:$0xff]  }
  0x13   :  { %v1470_v46 = vcombine.high %v29_v44, %v33_v45  ;;  %v1469_v51 = vcombine.low %v29_v44, %v33_v45  ;;  %v37_v56 = vld [vmem:[%s2490_s0 + $0x80] sm:$0xff]  ;;  %v38_v58 = vld [vmem:[%s2490_s0 + $0x88] sm:$0xff]  ;;  %v1971_v12 = vld [vmem:[%s2489_s1 + $0x1d8] sm:$0xff]  }
  0x14   :  { %1677 = vmatpush3.bf16.msra.mxu0 %v1943_v18  ;;  %v41_v57 = vld [vmem:[%s2490_s0 + $0xa0] sm:$0xff]  ;;  %v42_v59 = vld [vmem:[%s2490_s0 + $0xa8] sm:$0xff]  ;;  %v1972_v13 = vld [vmem:[%s2489_s1 + $0x198] sm:$0xff]  }
  0x15   :  { %1741 = vmatpush3.bf16.msra.mxu1 %v1944_v19  ;;  %1678 = vmatprep.subr.bf16.mxu0 %v1945_v20  ;;  %v1478_v60 = vcombine.high %v37_v56, %v41_v57  ;;  %v1480_v61 = vcombine.high %v38_v58, %v42_v59  ;;  %v1477_v2 = vcombine.low %v37_v56, %v41_v57  ;;  %v45_v3 = vld [vmem:[%s2490_s0 + $0xc0] sm:$0xff]  ;;  %v46_v5 = vld [vmem:[%s2490_s0 + $0xc8] sm:$0xff]  ;;  %v1982_v39 = vld [vmem:[%s2489_s1 + $0x130] sm:$0xff]  }
  0x16   :  { %1742 = vmatprep.subr.bf16.mxu1 %v1946_v21  ;;  %v49_v4 = vld [vmem:[%s2490_s0 + $0xe0] sm:$0xff]  ;;  %v1479_v6 = vcombine.low %v38_v58, %v42_v59  ;;  %v50_v8 = vld [vmem:[%s2490_s0 + $0xe8] sm:$0xff]  ;;  %v1986_v48 = vld [vmem:[%s2489_s1 + $0x138] sm:$0xff]  }
  0x17   :  { %v1486_v7 = vcombine.high %v45_v3, %v49_v4  ;;  %v1488_v9 = vcombine.high %v46_v5, %v50_v8  ;;  %v53_v14 = vld [vmem:[%s2490_s0 + $0x100] sm:$0xff]  ;;  %v54_v16 = vld [vmem:[%s2490_s0 + $0x108] sm:$0xff]  ;;  %v1485_v19 = vcombine.low %v45_v3, %v49_v4  ;;  %v1487_v21 = vcombine.low %v46_v5, %v50_v8  ;;  %v32_v8 = vld [vmem:[%s2490_s0 + $0x58] sm:$0xff] }
  0x18   :  { %1679 = vmatpush3.bf16.msra.mxu0 %v1947_v22  ;;  %v57_v15 = vld [vmem:[%s2490_s0 + $0x120] sm:$0xff]  ;;  %v58_v17 = vld [vmem:[%s2490_s0 + $0x128] sm:$0xff] }
  0x19   :  { %1743 = vmatpush3.bf16.msra.mxu1 %v1948_v23  ;;  %1680 = vmatprep.subr.bf16.mxu0 %v1949_v24  ;;  %v1973_v18 = vld [vmem:[%s2489_s1 + $0x160] sm:$0xff]   ;;  %v1494_v22 = vcombine.high %v53_v14, %v57_v15  ;;  %v1496_v24 = vcombine.high %v54_v16, %v58_v17  ;;  %v1979_v32 = vld [vmem:[%s2489_s1 + $0x1e8] sm:$0xff]   ;;  %v1493_v34 = vcombine.low %v53_v14, %v57_v15  ;;  %v39_v14 = vld [vmem:[%s2490_s0 + $0x90] sm:$0xff] }
  0x1a   :  { %1744 = vmatprep.subr.bf16.mxu1 %v1950_v25  ;;  %v1974_v20 = vld [vmem:[%s2489_s1 + $0x120] sm:$0xff]   ;;  %v1980_v33 = vld [vmem:[%s2489_s1 + $0x1a8] sm:$0xff]   ;;  %v43_v15 = vld [vmem:[%s2490_s0 + $0xb0] sm:$0xff] }
  0x1b   :  { %v1975_v23 = vld [vmem:[%s2489_s1 + $0x1e0] sm:$0xff]   ;;  %v70_v44 = vld [vmem:[%s2490_s0 + $0x188] sm:$0xff] }
  0x1c   :  { %1681 = vmatpush3.bf16.msra.mxu0 %v1951_v26  ;;  %v1976_v25 = vld [vmem:[%s2489_s1 + $0x1a0] sm:$0xff]   ;;  %v74_v45 = vld [vmem:[%s2490_s0 + $0x1a8] sm:$0xff] }
  0x1d   :  { %1745 = vmatpush3.bf16.msra.mxu1 %v1952_v27  ;;  %1682 = vmatprep.subr.bf16.mxu0 %v1953_v28  ;;  %v61_v26 = vld [vmem:[%s2490_s0 + $0x140] sm:$0xff]  ;;  %v1977_v28 = vld [vmem:[%s2489_s1 + $0x168] sm:$0xff]   ;;  %v1511_v59 = vcombine.low %v70_v44, %v74_v45 }
  0x1e   :  { %1746 = vmatprep.subr.bf16.mxu1 %v1954_v29  ;;  %v65_v27 = vld [vmem:[%s2490_s0 + $0x160] sm:$0xff]  ;;  %v62_v29 = vld [vmem:[%s2490_s0 + $0x148] sm:$0xff] }
  0x1f   :  { %v1502_v36 = vcombine.high %v61_v26, %v65_v27  ;;  %v1501_v47 = vcombine.low %v61_v26, %v65_v27  ;;  %v78_v56 = vld [vmem:[%s2490_s0 + $0x1c8] sm:$0xff]  ;;  %v1481_v26 = vcombine.low %v39_v14, %v43_v15 }
  0x20   :  { %1683 = vmatpush3.bf16.msra.mxu0 %v1955_v30  ;;  %v66_v30 = vld [vmem:[%s2490_s0 + $0x168] sm:$0xff] }
  0x21   :  { %1747 = vmatpush3.bf16.msra.mxu1 %v1956_v31  ;;  %1796 = vmatprep.subr.bf16.mxu0 %v1957_v40  ;;  %v1978_v31 = vld [vmem:[%s2489_s1 + $0x128] sm:$0xff]   ;;  %v1504_v37 = vcombine.high %v62_v29, %v66_v30  ;;  %v1983_v40 = vld [vmem:[%s2489_s1 + $0x1f0] sm:$0xff]  }
  0x22   :  { %1860 = vmatprep.subr.bf16.mxu1 %v1959_v42  ;;  %v73_v42 = vld [vmem:[%s2490_s0 + $0x1a0] sm:$0xff]  ;;  %v82_v57 = vld [vmem:[%s2490_s0 + $0x1e8] sm:$0xff] }
  0x23   :  { %950 = vmatmul.mubr.bf16.vlgmr.msra.gmra.mrb[0].mxu0 %v1461_v35  ;;  %v1495_v35 = vcombine.low %v54_v16, %v58_v17  ;;  %v1519_v3 = vcombine.low %v78_v56, %v82_v57  ;;  %v40_v16 = vld [vmem:[%s2490_s0 + $0x98] sm:$0xff] }
  0x24   :  { %1047 = vmatmul.mubr.bf16.vlgmr.msra.gmra.mrb[0].mxu1 %v1463_v38  ;;  %1797 = vmatpush3.bf16.msra.mxu0 %v1958_v41  ;;  %v1981_v38 = vld [vmem:[%s2489_s1 + $0x170] sm:$0xff]   ;;  %v69_v41 = vld [vmem:[%s2490_s0 + $0x180] sm:$0xff]  ;;  %v44_v17 = vld [vmem:[%s2490_s0 + $0xb8] sm:$0xff] }
  0x25   :  { %1861 = vmatpush3.bf16.msra.mxu1 %v1960_v43  ;;  %957 = vmatprep.mubr.bf16.mxu0 %v1470_v46  ;;  %v1984_v43 = vld [vmem:[%s2489_s1 + $0x1b0] sm:$0xff]   ;;  %v1985_v46 = vld [vmem:[%s2489_s1 + $0x178] sm:$0xff]   ;;  %v1509_v58 = vcombine.low %v69_v41, %v73_v42  ;;  %v1483_v27 = vcombine.low %v40_v16, %v44_v17 }
  0x26   :  { %1054 = vmatprep.mubr.bf16.mxu1 %v1472_v49  ;;  %1798 = vmatprep.subr.bf16.mxu0 %v1961_v50  ;;  %v1503_v49 = vcombine.low %v62_v29, %v66_v30  ;;  %v1510_v50 = vcombine.high %v69_v41, %v73_v42  ;;  %v55_v30 = vld [vmem:[%s2490_s0 + $0x110] sm:$0xff]  ;;  %v68_v41 = vld [vmem:[%s2490_s0 + $0x178] sm:$0xff] }
  0x27   :  { %1862 = vmatprep.subr.bf16.mxu1 %v1963_v54  ;;  %v77_v54 = vld [vmem:[%s2490_s0 + $0x1c0] sm:$0xff] }
  0x28   :  { %1799 = vmatpush3.bf16.msra.mxu0 %v1962_v52  ;;  %v1512_v52 = vcombine.high %v70_v44, %v74_v45 }
  0x29   :  { %1863 = vmatpush3.bf16.msra.mxu1 %v1964_v55  ;;  %1800 = vmatprep.subr.bf16.mxu0 %v1965_v62  ;;  %v81_v55 = vld [vmem:[%s2490_s0 + $0x1e0] sm:$0xff]  ;;  %v23_v62 = vld [vmem:[%s2490_s0 + $0x10] sm:$0xff] }
  0x2a   :  { %1864 = vmatprep.subr.bf16.mxu1 %v1967_v0  ;;  %v24_v0 = vld [vmem:[%s2490_s0 + $0x18] sm:$0xff] }
  0x2b   :  { %958 = vmatmul.mubr.bf16.gmra.mrb[4].mxu0 %v1469_v51  ;;  %v1987_v51 = vld [vmem:[%s2489_s1 + $0x1f8] sm:$0xff]  }
  0x2c   :  { %1055 = vmatmul.mubr.bf16.gmra.mrb[4].mxu1 %v1471_v53  ;;  %965 = vmatprep.mubr.bf16.mxu0 %v1478_v60  ;;  %v1988_v53 = vld [vmem:[%s2489_s1 + $0x1b8] sm:$0xff]   ;;  %v1518_v60 = vcombine.high %v77_v54, %v81_v55 }
  0x2d   :  { %1062 = vmatprep.mubr.bf16.mxu1 %v1480_v61  ;;  %1801 = vmatpush3.bf16.msra.mxu0 %v1966_v63  ;;  %v1520_v61 = vcombine.high %v78_v56, %v82_v57  ;;  %v27_v63 = vld [vmem:[%s2490_s0 + $0x30] sm:$0xff]  ;;  %v80_v56 = vld [vmem:[%s2490_s0 + $0x1d8] sm:$0xff] }
  0x2e   :  { %1865 = vmatpush3.bf16.msra.mxu1 %v1968_v1  ;;  %1802 = vmatprep.subr.bf16.mxu0 %v1969_v10  ;;  %v28_v1 = vld [vmem:[%s2490_s0 + $0x38] sm:$0xff]  ;;  %v1466_v4 = vcombine.high %v23_v62, %v27_v63  ;;  %v1465_v10 = vcombine.low %v23_v62, %v27_v63 }
  0x2f   :  { %1866 = vmatprep.subr.bf16.mxu1 %v1971_v12  ;;  %v1468_v5 = vcombine.high %v24_v0, %v28_v1  ;;  %v84_v57 = vld [vmem:[%s2490_s0 + $0x1f8] sm:$0xff] }
  0x30   :  { %v1523_v63 = vcombine.low %v80_v56, %v84_v57 }
  0x31   :  { %1803 = vmatpush3.bf16.msra.mxu0 %v1970_v11  ;;  %v1467_v11 = vcombine.low %v24_v0, %v28_v1 }
  0x32   :  { %1867 = vmatpush3.bf16.msra.mxu1 %v1972_v13  ;;  %1804 = vmatprep.subr.bf16.mxu0 %v1973_v18 }
  0x33   :  { %966 = vmatmul.mubr.bf16.gmra.mrb[8].mxu0 %v1477_v2  ;;  %1868 = vmatprep.subr.bf16.mxu1 %v1975_v23  ;;  %v1517_v2 = vcombine.low %v77_v54, %v81_v55  ;;  %v51_v23 = vld [vmem:[%s2490_s0 + $0xf0] sm:$0xff] }
  0x34   :  { %1063 = vmatmul.mubr.bf16.gmra.mrb[8].mxu1 %v1479_v6  ;;  %973 = vmatprep.mubr.bf16.mxu0 %v1486_v7  ;;  %v31_v6 = vld [vmem:[%s2490_s0 + $0x50] sm:$0xff] }
  0x35   :  { %1070 = vmatprep.mubr.bf16.mxu1 %v1488_v9  ;;  %1805 = vmatpush3.bf16.msra.mxu0 %v1974_v20  ;;  %v35_v7 = vld [vmem:[%s2490_s0 + $0x70] sm:$0xff]  ;;  %v36_v9 = vld [vmem:[%s2490_s0 + $0x78] sm:$0xff]  ;;  %v1482_v20 = vcombine.high %v39_v14, %v43_v15 }
  0x36   :  { %1869 = vmatpush3.bf16.msra.mxu1 %v1976_v25  ;;  %1806 = vmatprep.subr.bf16.mxu0 %v1977_v28  ;;  %v1474_v12 = vcombine.high %v31_v6, %v35_v7  ;;  %v1476_v13 = vcombine.high %v32_v8, %v36_v9  ;;  %v1473_v18 = vcombine.low %v31_v6, %v35_v7  ;;  %v52_v25 = vld [vmem:[%s2490_s0 + $0xf8] sm:$0xff]  ;;  %v79_v54 = vld [vmem:[%s2490_s0 + $0x1d0] sm:$0xff] }
  0x37   :  { %1870 = vmatprep.subr.bf16.mxu1 %v1979_v32  ;;  %v56_v32 = vld [vmem:[%s2490_s0 + $0x118] sm:$0xff]  ;;  %v83_v55 = vld [vmem:[%s2490_s0 + $0x1f0] sm:$0xff] }
  0x38   :  { %v1521_v62 = vcombine.low %v79_v54, %v83_v55 }
  0x39   :  { %1807 = vmatpush3.bf16.msra.mxu0 %v1978_v31  ;;  %v59_v31 = vld [vmem:[%s2490_s0 + $0x130] sm:$0xff] }
  0x3a   :  { %1871 = vmatpush3.bf16.msra.mxu1 %v1980_v33  ;;  %1808 = vmatprep.subr.bf16.mxu0 %v1981_v38  ;;  %v60_v33 = vld [vmem:[%s2490_s0 + $0x138] sm:$0xff]  ;;  %v63_v38 = vld [vmem:[%s2490_s0 + $0x150] sm:$0xff]  ;;  %v1497_v42 = vcombine.low %v55_v30, %v59_v31 }
  0x3b   :  { %974 = vmatmul.mubr.bf16.gmra.mrb[12].mxu0 %v1485_v19  ;;  %1872 = vmatprep.subr.bf16.mxu1 %v1983_v40  ;;  %v1475_v19 = vcombine.low %v32_v8, %v36_v9  ;;  %v64_v40 = vld [vmem:[%s2490_s0 + $0x158] sm:$0xff]  ;;  %v1989_v9 = vmov 0.0  }
  0x3c   :  { %1071 = vmatmul.mubr.bf16.gmra.mrb[12].mxu1 %v1487_v21  ;;  %981 = vmatprep.mubr.bf16.mxu0 %v1494_v22  ;;  %v1484_v21 = vcombine.high %v40_v16, %v44_v17  ;;  %v47_v22 = vld [vmem:[%s2490_s0 + $0xd0] sm:$0xff]  ;;  %v1508_v45 = vcombine.high %v64_v40, %v68_v41  ;;  %19 = vst [vmem:[%s2491_s3] sm:$0x1] %v1989_v9  ;;  %20 = vst [vmem:[%s2492_s4] sm:$0x1] %v1989_v9 }
  0x3d   :  { %1078 = vmatprep.mubr.bf16.mxu1 %v1496_v24  ;;  %1809 = vmatpush3.bf16.msra.mxu0 %v1982_v39  ;;  %v48_v24 = vld [vmem:[%s2490_s0 + $0xd8] sm:$0xff]  ;;  %v1490_v28 = vcombine.high %v47_v22, %v51_v23  ;;  %v67_v39 = vld [vmem:[%s2490_s0 + $0x170] sm:$0xff] }
  0x3e   :  { %1873 = vmatpush3.bf16.msra.mxu1 %v1984_v43  ;;  %1810 = vmatprep.subr.bf16.mxu0 %v1985_v46  ;;  %v1492_v29 = vcombine.high %v48_v24, %v52_v25  ;;  %v1499_v43 = vcombine.low %v56_v32, %v60_v33  ;;  %v1506_v44 = vcombine.high %v63_v38, %v67_v39  ;;  %v71_v46 = vld [vmem:[%s2490_s0 + $0x190] sm:$0xff] }
  0x3f   :  { %1874 = vmatprep.subr.bf16.mxu1 %v1987_v51  ;;  %v1507_v51 = vcombine.low %v64_v40, %v68_v41 }
  0x41   :  { %1811 = vmatpush3.bf16.msra.mxu0 %v1986_v48  ;;  %v72_v48 = vld [vmem:[%s2490_s0 + $0x198] sm:$0xff] }
  0x42   :  { %1875 = vmatpush3.bf16.msra.mxu1 %v1988_v53 }
  0x43   :  { %982 = vmatmul.mubr.bf16.gmra.mrb[16].mxu0 %v1493_v34  ;;  %v1489_v34 = vcombine.low %v47_v22, %v51_v23 }
  0x44   :  { %1079 = vmatmul.mubr.bf16.gmra.mrb[16].mxu1 %v1495_v35  ;;  %989 = vmatprep.mubr.bf16.mxu0 %v1502_v36  ;;  %v1491_v35 = vcombine.low %v48_v24, %v52_v25  ;;  %v1498_v36 = vcombine.high %v55_v30, %v59_v31 }
  0x45   :  { %1086 = vmatprep.mubr.bf16.mxu1 %v1504_v37  ;;  %v1500_v37 = vcombine.high %v56_v32, %v60_v33 }
  0x4b   :  { %990 = vmatmul.mubr.bf16.gmra.mrb[20].mxu0 %v1501_v47  ;;  %v75_v47 = vld [vmem:[%s2490_s0 + $0x1b0] sm:$0xff] }
  0x4c   :  { %1087 = vmatmul.mubr.bf16.gmra.mrb[20].mxu1 %v1503_v49  ;;  %997 = vmatprep.mubr.bf16.mxu0 %v1510_v50  ;;  %v76_v49 = vld [vmem:[%s2490_s0 + $0x1b8] sm:$0xff]  ;;  %v1505_v50 = vcombine.low %v63_v38, %v67_v39 }
  0x4d   :  { %1094 = vmatprep.mubr.bf16.mxu1 %v1512_v52  ;;  %v1514_v52 = vcombine.high %v71_v46, %v75_v47  ;;  %v1516_v53 = vcombine.high %v72_v48, %v76_v49 }
  0x53   :  { %998 = vmatmul.mubr.bf16.gmra.mrb[24].mxu0 %v1509_v58  ;;  %v1513_v58 = vcombine.low %v71_v46, %v75_v47 }
  0x54   :  { %1095 = vmatmul.mubr.bf16.gmra.mrb[24].mxu1 %v1511_v59  ;;  %1005 = vmatprep.mubr.bf16.mxu0 %v1518_v60  ;;  %v1515_v59 = vcombine.low %v72_v48, %v76_v49  ;;  %v1522_v60 = vcombine.high %v79_v54, %v83_v55 }
  0x55   :  { %1102 = vmatprep.mubr.bf16.mxu1 %v1520_v61  ;;  %v1524_v61 = vcombine.high %v80_v56, %v84_v57 }
  0x5b   :  { %1006 = vmatmul.mubr.bf16.gmra.mrb[28].mxu0 %v1517_v2 }
  0x5c   :  { %1103 = vmatmul.mubr.bf16.gmra.mrb[28].mxu1 %v1519_v3  ;;  %1143 = vmatprep.mubr.bf16.mxu0 %v1466_v4 }
  0x5d   :  { %1240 = vmatprep.mubr.bf16.mxu1 %v1468_v5 }
  0x63   :  { %1144 = vmatmul.mubr.bf16.vlgmr.msra.gmra.mrb[32].mxu0 %v1465_v10 }
  0x64   :  { %1241 = vmatmul.mubr.bf16.vlgmr.msra.gmra.mrb[32].mxu1 %v1467_v11  ;;  %1151 = vmatprep.mubr.bf16.mxu0 %v1474_v12 }
  0x65   :  { %1248 = vmatprep.mubr.bf16.mxu1 %v1476_v13 }
  0x6b   :  { %1152 = vmatmul.mubr.bf16.gmra.mrb[36].mxu0 %v1473_v18 }
  0x6c   :  { %1249 = vmatmul.mubr.bf16.gmra.mrb[36].mxu1 %v1475_v19  ;;  %1159 = vmatprep.mubr.bf16.mxu0 %v1482_v20 }
  0x6d   :  { %1256 = vmatprep.mubr.bf16.mxu1 %v1484_v21 }
  0x73   :  { %1160 = vmatmul.mubr.bf16.gmra.mrb[40].mxu0 %v1481_v26 }
  0x74   :  { %1257 = vmatmul.mubr.bf16.gmra.mrb[40].mxu1 %v1483_v27  ;;  %1167 = vmatprep.mubr.bf16.mxu0 %v1490_v28 }
  0x75   :  { %1264 = vmatprep.mubr.bf16.mxu1 %v1492_v29 }
  0x7b   :  { %1168 = vmatmul.mubr.bf16.gmra.mrb[44].mxu0 %v1489_v34 }
  0x7c   :  { %1265 = vmatmul.mubr.bf16.gmra.mrb[44].mxu1 %v1491_v35  ;;  %1175 = vmatprep.mubr.bf16.mxu0 %v1498_v36 }
  0x7d   :  { %1272 = vmatprep.mubr.bf16.mxu1 %v1500_v37 }
  0x83   :  { %1176 = vmatmul.mubr.bf16.gmra.mrb[48].mxu0 %v1497_v42 }
  0x84   :  { %1273 = vmatmul.mubr.bf16.gmra.mrb[48].mxu1 %v1499_v43  ;;  %1183 = vmatprep.mubr.bf16.mxu0 %v1506_v44 }
  0x85   :  { %1280 = vmatprep.mubr.bf16.mxu1 %v1508_v45 }
  0x8b   :  { %1184 = vmatmul.mubr.bf16.gmra.mrb[52].mxu0 %v1505_v50 }
  0x8c   :  { %1281 = vmatmul.mubr.bf16.gmra.mrb[52].mxu1 %v1507_v51  ;;  %1191 = vmatprep.mubr.bf16.mxu0 %v1514_v52 }
  0x8d   :  { %1288 = vmatprep.mubr.bf16.mxu1 %v1516_v53 }
  0x93   :  { %1192 = vmatmul.mubr.bf16.gmra.mrb[56].mxu0 %v1513_v58 }
  0x94   :  { %1289 = vmatmul.mubr.bf16.gmra.mrb[56].mxu1 %v1515_v59  ;;  %1199 = vmatprep.mubr.bf16.mxu0 %v1522_v60 }
  0x95   :  { %1296 = vmatprep.mubr.bf16.mxu1 %v1524_v61 }
  0x9b   :  { %1200 = vmatmul.mubr.bf16.gmra.mrb[60].mxu0 %v1521_v62 }
  0x9c   :  { %1297 = vmatmul.mubr.bf16.gmra.mrb[60].mxu1 %v1523_v63 }
  0xf6   :  { %v1684_v0 = vpop.f32.mrb[0].mxu0 }
  0xf7   :  { %v1748_v1 = vpop.f32.mrb[0].mxu1  ;;  %v1685_v2 = vpop.f32.mrb[1].mxu0 }
  0xf8   :  { %v1686_v3 = vadd.f32 %v1685_v2, %v1684_v0  ;;  %v1749_v4 = vpop.f32.mrb[1].mxu1  ;;  %v1687_v5 = vpop.f32.mrb[2].mxu0 }
  0xf9   :  { %v1750_v6 = vadd.f32 %v1749_v4, %v1748_v1  ;;  %v1751_v7 = vpop.f32.mrb[2].mxu1  ;;  %v1688_v8 = vpop.f32.mrb[3].mxu0 }
  0xfa   :  { %v1689_v10 = vadd.f32 %v1688_v8, %v1687_v5  ;;  %v1752_v11 = vpop.f32.mrb[3].mxu1 }
  0xfb   :  { %v2405_v12 = vadd.f32 %v1750_v6, %v1686_v3  ;;  %v1753_v13 = vadd.f32 %v1752_v11, %v1751_v7 }
  0xfd   :  { %v2407_v14 = vadd.f32 %v1753_v13, %v1689_v10 }
  0xfe   :  { %v1690_v15 = vpop.f32.mrb[4].mxu0 }
  0xff   :  { %v1754_v16 = vpop.f32.mrb[4].mxu1  ;;  %v1691_v17 = vpop.f32.mrb[5].mxu0 }
 0x100   :  { %v1692_v18 = vadd.f32 %v1691_v17, %v1690_v15  ;;  %v1755_v19 = vpop.f32.mrb[5].mxu1  ;;  %v1693_v20 = vpop.f32.mrb[6].mxu0 }
 0x101   :  { %v1756_v21 = vadd.f32 %v1755_v19, %v1754_v16  ;;  %v1757_v22 = vpop.f32.mrb[6].mxu1  ;;  %v1694_v23 = vpop.f32.mrb[7].mxu0 }
 0x102   :  { %v1695_v24 = vadd.f32 %v1694_v23, %v1693_v20  ;;  %v1758_v25 = vpop.f32.mrb[7].mxu1 }
 0x103   :  { %v2409_v26 = vadd.f32 %v1756_v21, %v1692_v18  ;;  %v1759_v27 = vadd.f32 %v1758_v25, %v1757_v22 }
 0x105   :  { %v2411_v28 = vadd.f32 %v1759_v27, %v1695_v24 }
 0x106   :  { %v1696_v29 = vpop.f32.mrb[8].mxu0 }
 0x107   :  { %v1760_v30 = vpop.f32.mrb[8].mxu1  ;;  %v1697_v31 = vpop.f32.mrb[9].mxu0 }
 0x108   :  { %v1698_v32 = vadd.f32 %v1697_v31, %v1696_v29  ;;  %v1761_v33 = vpop.f32.mrb[9].mxu1  ;;  %v1699_v34 = vpop.f32.mrb[10].mxu0 }
 0x109   :  { %v1762_v35 = vadd.f32 %v1761_v33, %v1760_v30  ;;  %v1763_v36 = vpop.f32.mrb[10].mxu1  ;;  %v1700_v37 = vpop.f32.mrb[11].mxu0 }
 0x10a   :  { %v1701_v38 = vadd.f32 %v1700_v37, %v1699_v34  ;;  %v1764_v39 = vpop.f32.mrb[11].mxu1 }
 0x10b   :  { %v2413_v40 = vadd.f32 %v1762_v35, %v1698_v32  ;;  %v1765_v41 = vadd.f32 %v1764_v39, %v1763_v36 }
 0x10d   :  { %v2415_v42 = vadd.f32 %v1765_v41, %v1701_v38 }
 0x10e   :  { %v1702_v43 = vpop.f32.mrb[12].mxu0 }
 0x10f   :  { %v1766_v44 = vpop.f32.mrb[12].mxu1  ;;  %v1703_v45 = vpop.f32.mrb[13].mxu0 }
 0x110   :  { %v1704_v46 = vadd.f32 %v1703_v45, %v1702_v43  ;;  %v1767_v47 = vpop.f32.mrb[13].mxu1  ;;  %v1705_v48 = vpop.f32.mrb[14].mxu0 }
 0x111   :  { %v1768_v49 = vadd.f32 %v1767_v47, %v1766_v44  ;;  %v1769_v50 = vpop.f32.mrb[14].mxu1  ;;  %v1706_v51 = vpop.f32.mrb[15].mxu0 }
 0x112   :  { %v1707_v52 = vadd.f32 %v1706_v51, %v1705_v48  ;;  %v1770_v53 = vpop.f32.mrb[15].mxu1 }
 0x113   :  { %v2417_v54 = vadd.f32 %v1768_v49, %v1704_v46  ;;  %v1771_v55 = vadd.f32 %v1770_v53, %v1769_v50 }
 0x115   :  { %v2419_v56 = vadd.f32 %v1771_v55, %v1707_v52 }
 0x116   :  { %v1708_v57 = vpop.f32.mrb[16].mxu0 }
 0x117   :  { %v1772_v58 = vpop.f32.mrb[16].mxu1  ;;  %v1709_v59 = vpop.f32.mrb[17].mxu0 }
 0x118   :  { %v1710_v60 = vadd.f32 %v1709_v59, %v1708_v57  ;;  %v1773_v61 = vpop.f32.mrb[17].mxu1  ;;  %v1711_v62 = vpop.f32.mrb[18].mxu0 }
 0x119   :  { %v1774_v63 = vadd.f32 %v1773_v61, %v1772_v58  ;;  %v1775_v0 = vpop.f32.mrb[18].mxu1  ;;  %v1712_v1 = vpop.f32.mrb[19].mxu0 }
 0x11a   :  { %v1713_v2 = vadd.f32 %v1712_v1, %v1711_v62  ;;  %v1776_v3 = vpop.f32.mrb[19].mxu1 }
 0x11b   :  { %v2421_v4 = vadd.f32 %v1774_v63, %v1710_v60  ;;  %v1777_v5 = vadd.f32 %v1776_v3, %v1775_v0 }
 0x11d   :  { %v2423_v6 = vadd.f32 %v1777_v5, %v1713_v2 }
 0x11e   :  { %v1714_v7 = vpop.f32.mrb[20].mxu0 }
 0x11f   :  { %v1778_v8 = vpop.f32.mrb[20].mxu1  ;;  %v1715_v9 = vpop.f32.mrb[21].mxu0 }
 0x120   :  { %v1716_v10 = vadd.f32 %v1715_v9, %v1714_v7  ;;  %v1779_v11 = vpop.f32.mrb[21].mxu1  ;;  %v1717_v13 = vpop.f32.mrb[22].mxu0 }
 0x121   :  { %v1780_v15 = vadd.f32 %v1779_v11, %v1778_v8  ;;  %v1781_v16 = vpop.f32.mrb[22].mxu1  ;;  %v1718_v17 = vpop.f32.mrb[23].mxu0 }
 0x122   :  { %v1719_v18 = vadd.f32 %v1718_v17, %v1717_v13  ;;  %v1782_v19 = vpop.f32.mrb[23].mxu1 }
 0x123   :  { %v2425_v20 = vadd.f32 %v1780_v15, %v1716_v10  ;;  %v1783_v21 = vadd.f32 %v1782_v19, %v1781_v16 }
 0x125   :  { %v2427_v22 = vadd.f32 %v1783_v21, %v1719_v18 }
 0x126   :  { %v1720_v23 = vpop.f32.mrb[24].mxu0 }
 0x127   :  { %v1784_v24 = vpop.f32.mrb[24].mxu1  ;;  %v1721_v25 = vpop.f32.mrb[25].mxu0 }
 0x128   :  { %v1722_v27 = vadd.f32 %v1721_v25, %v1720_v23  ;;  %v1785_v29 = vpop.f32.mrb[25].mxu1  ;;  %v1723_v30 = vpop.f32.mrb[26].mxu0 }
 0x129   :  { %v1786_v31 = vadd.f32 %v1785_v29, %v1784_v24  ;;  %v1787_v32 = vpop.f32.mrb[26].mxu1  ;;  %v1724_v33 = vpop.f32.mrb[27].mxu0 }
 0x12a   :  { %v1725_v34 = vadd.f32 %v1724_v33, %v1723_v30  ;;  %v1788_v35 = vpop.f32.mrb[27].mxu1 }
 0x12b   :  { %v2429_v36 = vadd.f32 %v1786_v31, %v1722_v27  ;;  %v1789_v37 = vadd.f32 %v1788_v35, %v1787_v32 }
 0x12d   :  { %v2431_v38 = vadd.f32 %v1789_v37, %v1725_v34 }
 0x12e   :  { %v1726_v39 = vpop.f32.mrb[28].mxu0 }
 0x12f   :  { %v1790_v41 = vpop.f32.mrb[28].mxu1  ;;  %v1727_v43 = vpop.f32.mrb[29].mxu0 }
 0x130   :  { %v1728_v44 = vadd.f32 %v1727_v43, %v1726_v39  ;;  %v1791_v45 = vpop.f32.mrb[29].mxu1  ;;  %v1729_v46 = vpop.f32.mrb[30].mxu0 }
 0x131   :  { %v1792_v47 = vadd.f32 %v1791_v45, %v1790_v41  ;;  %v1793_v48 = vpop.f32.mrb[30].mxu1  ;;  %v1730_v49 = vpop.f32.mrb[31].mxu0 }
 0x132   :  { %v1731_v50 = vadd.f32 %v1730_v49, %v1729_v46  ;;  %v1794_v51 = vpop.f32.mrb[31].mxu1 }
 0x133   :  { %v2433_v52 = vadd.f32 %v1792_v47, %v1728_v44  ;;  %v1795_v53 = vadd.f32 %v1794_v51, %v1793_v48 }
 0x135   :  { %v2435_v55 = vadd.f32 %v1795_v53, %v1731_v50 }
 0x136   :  { %v1812_v57 = vpop.f32.mrb[32].mxu0 }
 0x137   :  { %v1876_v58 = vpop.f32.mrb[32].mxu1  ;;  %v1813_v59 = vpop.f32.mrb[33].mxu0 }
 0x138   :  { %v1814_v60 = vadd.f32 %v1813_v59, %v1812_v57  ;;  %v1877_v61 = vpop.f32.mrb[33].mxu1  ;;  %v1815_v62 = vpop.f32.mrb[34].mxu0 }
 0x139   :  { %v1878_v63 = vadd.f32 %v1877_v61, %v1876_v58  ;;  %v1879_v0 = vpop.f32.mrb[34].mxu1  ;;  %v1816_v1 = vpop.f32.mrb[35].mxu0 }
 0x13a   :  { %v1146_v2 = vadd.f32 %v1814_v60, %v2405_v12  ;;  %v1817_v3 = vadd.f32 %v1816_v1, %v1815_v62  ;;  %v1880_v5 = vpop.f32.mrb[35].mxu1 }
 0x13b   :  { %v1881_v7 = vadd.f32 %v1880_v5, %v1879_v0 }
 0x13c   :  { %v1243_v8 = vadd.f32 %v1878_v63, %v1146_v2  ;;  %v1149_v9 = vadd.f32 %v1817_v3, %v2407_v14 }
 0x13e   :  { %v1246_v10 = vadd.f32 %v1881_v7, %v1149_v9  ;;  %v1818_v11 = vpop.f32.mrb[36].mxu0  ;;  %v1410_v13 = vmul.f32 %v1243_v8, %v1243_v8 }
 0x13f   :  { %v1882_v15 = vpop.f32.mrb[36].mxu1  ;;  %v1819_v16 = vpop.f32.mrb[37].mxu0 }
 0x140   :  { %v1624_v17 = vpack.c.bf16 %v1246_v10, %v1243_v8  ;;  %v1386_v18 = vadd.f32 %v1246_v10, %v1243_v8  ;;  %v1411_v19 = vmul.f32 %v1246_v10, %v1246_v10  ;;  %v1820_v21 = vadd.f32 %v1819_v16, %v1818_v11  ;;  %v1883_v23 = vpop.f32.mrb[37].mxu1  ;;  %v1821_v24 = vpop.f32.mrb[38].mxu0 }
 0x141   :  { %v1884_v25 = vadd.f32 %v1883_v23, %v1882_v15  ;;  %v1885_v27 = vpop.f32.mrb[38].mxu1  ;;  %v1822_v12 = vpop.f32.mrb[39].mxu0 }
 0x142   :  { %1625 = vst [vmem:[%s2493_s2] sm:$0xff] %v1624_v17   ;;  %v1426_v29 = vadd.f32 %v1411_v19, %v1410_v13  ;;  %v1154_v14 = vadd.f32 %v1820_v21, %v2409_v26  ;;  %v1823_v30 = vadd.f32 %v1822_v12, %v1821_v24  ;;  %v1886_v31 = vpop.f32.mrb[39].mxu1 }
 0x143   :  { %v1887_v32 = vadd.f32 %v1886_v31, %v1885_v27 }
 0x144   :  { %v1251_v33 = vadd.f32 %v1884_v25, %v1154_v14  ;;  %v1157_v34 = vadd.f32 %v1823_v30, %v2411_v28 }
 0x146   :  { %v1387_v35 = vadd.f32 %v1386_v18, %v1251_v33  ;;  %v1412_v37 = vmul.f32 %v1251_v33, %v1251_v33  ;;  %v1254_v39 = vadd.f32 %v1887_v32, %v1157_v34  ;;  %v1824_v41 = vpop.f32.mrb[40].mxu0 }
 0x147   :  { %v1888_v43 = vpop.f32.mrb[40].mxu1  ;;  %v1825_v44 = vpop.f32.mrb[41].mxu0 }
 0x148   :  { %v1427_v45 = vadd.f32 %v1426_v29, %v1412_v37  ;;  %v1629_v46 = vpack.c.bf16 %v1254_v39, %v1251_v33  ;;  %v1388_v47 = vadd.f32 %v1387_v35, %v1254_v39  ;;  %v1413_v48 = vmul.f32 %v1254_v39, %v1254_v39  ;;  %v1889_v49 = vpop.f32.mrb[41].mxu1  ;;  %v1827_v50 = vpop.f32.mrb[42].mxu0 }
 0x149   :  { %v1826_v51 = vadd.f32 %v1825_v44, %v1824_v41  ;;  %v1890_v26 = vadd.f32 %v1889_v49, %v1888_v43  ;;  %v1891_v53 = vpop.f32.mrb[42].mxu1  ;;  %v1828_v57 = vpop.f32.mrb[43].mxu0 }
 0x14a   :  { %1661 = vst [vmem:[%s2493_s2 + $0x8] sm:$0xff] %v1629_v46   ;;  %v1428_v28 = vadd.f32 %v1427_v45, %v1413_v48  ;;  %v1829_v58 = vadd.f32 %v1828_v57, %v1827_v50  ;;  %v1892_v59 = vpop.f32.mrb[43].mxu1 }
 0x14b   :  { %v1162_v60 = vadd.f32 %v1826_v51, %v2413_v40  ;;  %v1893_v61 = vadd.f32 %v1892_v59, %v1891_v53 }
 0x14c   :  { %v1165_v62 = vadd.f32 %v1829_v58, %v2415_v42 }
 0x14d   :  { %v1259_v63 = vadd.f32 %v1890_v26, %v1162_v60 }
 0x14e   :  { %v1262_v0 = vadd.f32 %v1893_v61, %v1165_v62  ;;  %v1830_v1 = vpop.f32.mrb[44].mxu0 }
 0x14f   :  { %v1389_v2 = vadd.f32 %v1388_v47, %v1259_v63  ;;  %v1414_v3 = vmul.f32 %v1259_v63, %v1259_v63  ;;  %v1894_v5 = vpop.f32.mrb[44].mxu1  ;;  %v1831_v7 = vpop.f32.mrb[45].mxu0 }
 0x150   :  { %v1634_v8 = vpack.c.bf16 %v1262_v0, %v1259_v63  ;;  %v1415_v9 = vmul.f32 %v1262_v0, %v1262_v0  ;;  %v1832_v10 = vadd.f32 %v1831_v7, %v1830_v1  ;;  %v1895_v11 = vpop.f32.mrb[45].mxu1  ;;  %v1833_v13 = vpop.f32.mrb[46].mxu0 }
 0x151   :  { %v1429_v15 = vadd.f32 %v1428_v28, %v1414_v3  ;;  %v1390_v16 = vadd.f32 %v1389_v2, %v1262_v0  ;;  %v1896_v17 = vadd.f32 %v1895_v11, %v1894_v5  ;;  %v1897_v18 = vpop.f32.mrb[46].mxu1  ;;  %v1834_v40 = vpop.f32.mrb[47].mxu0 }
 0x152   :  { %1662 = vst [vmem:[%s2493_s2 + $0x10] sm:$0xff] %v1634_v8   ;;  %v1170_v42 = vadd.f32 %v1832_v10, %v2417_v54  ;;  %v1835_v19 = vadd.f32 %v1834_v40, %v1833_v13  ;;  %v1898_v21 = vpop.f32.mrb[47].mxu1 }
 0x153   :  { %v1430_v23 = vadd.f32 %v1429_v15, %v1415_v9  ;;  %v1899_v24 = vadd.f32 %v1898_v21, %v1897_v18 }
 0x154   :  { %v1267_v25 = vadd.f32 %v1896_v17, %v1170_v42  ;;  %v1173_v27 = vadd.f32 %v1835_v19, %v2419_v56 }
 0x156   :  { %v1391_v12 = vadd.f32 %v1390_v16, %v1267_v25  ;;  %v1416_v29 = vmul.f32 %v1267_v25, %v1267_v25  ;;  %v1270_v14 = vadd.f32 %v1899_v24, %v1173_v27  ;;  %v1836_v30 = vpop.f32.mrb[48].mxu0 }
 0x157   :  { %v1900_v31 = vpop.f32.mrb[48].mxu1  ;;  %v1837_v32 = vpop.f32.mrb[49].mxu0 }
 0x158   :  { %v1431_v33 = vadd.f32 %v1430_v23, %v1416_v29  ;;  %v1639_v34 = vpack.c.bf16 %v1270_v14, %v1267_v25  ;;  %v1392_v35 = vadd.f32 %v1391_v12, %v1270_v14  ;;  %v1417_v37 = vmul.f32 %v1270_v14, %v1270_v14  ;;  %v1901_v39 = vpop.f32.mrb[49].mxu1  ;;  %v1839_v41 = vpop.f32.mrb[50].mxu0 }
 0x159   :  { %v1838_v54 = vadd.f32 %v1837_v32, %v1836_v30  ;;  %v1902_v43 = vadd.f32 %v1901_v39, %v1900_v31  ;;  %v1903_v44 = vpop.f32.mrb[50].mxu1  ;;  %v1840_v45 = vpop.f32.mrb[51].mxu0 }
 0x15a   :  { %1663 = vst [vmem:[%s2493_s2 + $0x18] sm:$0xff] %v1639_v34   ;;  %v1432_v56 = vadd.f32 %v1431_v33, %v1417_v37  ;;  %v1841_v46 = vadd.f32 %v1840_v45, %v1839_v41  ;;  %v1904_v47 = vpop.f32.mrb[51].mxu1 }
 0x15b   :  { %v1178_v48 = vadd.f32 %v1838_v54, %v2421_v4  ;;  %v1905_v49 = vadd.f32 %v1904_v47, %v1903_v44 }
 0x15c   :  { %v1181_v50 = vadd.f32 %v1841_v46, %v2423_v6 }
 0x15d   :  { %v1275_v51 = vadd.f32 %v1902_v43, %v1178_v48 }
 0x15e   :  { %v1278_v26 = vadd.f32 %v1905_v49, %v1181_v50  ;;  %v1842_v53 = vpop.f32.mrb[52].mxu0 }
 0x15f   :  { %v1393_v57 = vadd.f32 %v1392_v35, %v1275_v51  ;;  %v1418_v28 = vmul.f32 %v1275_v51, %v1275_v51  ;;  %v1906_v58 = vpop.f32.mrb[52].mxu1  ;;  %v1843_v59 = vpop.f32.mrb[53].mxu0 }
 0x160   :  { %v1644_v60 = vpack.c.bf16 %v1278_v26, %v1275_v51  ;;  %v1419_v61 = vmul.f32 %v1278_v26, %v1278_v26  ;;  %v1844_v62 = vadd.f32 %v1843_v59, %v1842_v53  ;;  %v1907_v63 = vpop.f32.mrb[53].mxu1  ;;  %v1845_v0 = vpop.f32.mrb[54].mxu0 }
 0x161   :  { %v1433_v1 = vadd.f32 %v1432_v56, %v1418_v28  ;;  %v1394_v2 = vadd.f32 %v1393_v57, %v1278_v26  ;;  %v1908_v3 = vadd.f32 %v1907_v63, %v1906_v58  ;;  %v1909_v5 = vpop.f32.mrb[54].mxu1  ;;  %v1846_v4 = vpop.f32.mrb[55].mxu0 }
 0x162   :  { %1664 = vst [vmem:[%s2493_s2 + $0x20] sm:$0xff] %v1644_v60   ;;  %v1186_v6 = vadd.f32 %v1844_v62, %v2425_v20  ;;  %v1847_v7 = vadd.f32 %v1846_v4, %v1845_v0  ;;  %v1910_v8 = vpop.f32.mrb[55].mxu1 }
 0x163   :  { %v1434_v9 = vadd.f32 %v1433_v1, %v1419_v61  ;;  %v1911_v10 = vadd.f32 %v1910_v8, %v1909_v5 }
 0x164   :  { %v1283_v11 = vadd.f32 %v1908_v3, %v1186_v6  ;;  %v1189_v13 = vadd.f32 %v1847_v7, %v2427_v22 }
 0x166   :  { %v1395_v15 = vadd.f32 %v1394_v2, %v1283_v11  ;;  %v1420_v16 = vmul.f32 %v1283_v11, %v1283_v11  ;;  %v1286_v17 = vadd.f32 %v1911_v10, %v1189_v13  ;;  %v1848_v18 = vpop.f32.mrb[56].mxu0  ;;  %v1385_v13 = vld [vmem:[%s2491_s3] sm:$0x1] }
 0x167   :  { %v1912_v40 = vpop.f32.mrb[56].mxu1  ;;  %v1849_v42 = vpop.f32.mrb[57].mxu0 }
 0x168   :  { %v1435_v19 = vadd.f32 %v1434_v9, %v1420_v16  ;;  %v1649_v21 = vpack.c.bf16 %v1286_v17, %v1283_v11  ;;  %v1396_v23 = vadd.f32 %v1395_v15, %v1286_v17  ;;  %v1421_v24 = vmul.f32 %v1286_v17, %v1286_v17  ;;  %v1913_v25 = vpop.f32.mrb[57].mxu1  ;;  %v1851_v27 = vpop.f32.mrb[58].mxu0  ;;  %v1409_v17 = vld [vmem:[%s2492_s4] sm:$0x1] }
 0x169   :  { %v1850_v20 = vadd.f32 %v1849_v42, %v1848_v18  ;;  %v1914_v12 = vadd.f32 %v1913_v25, %v1912_v40  ;;  %v1915_v29 = vpop.f32.mrb[58].mxu1  ;;  %v1852_v14 = vpop.f32.mrb[59].mxu0 }
 0x16a   :  { %1665 = vst [vmem:[%s2493_s2 + $0x28] sm:$0xff] %v1649_v21   ;;  %v1436_v22 = vadd.f32 %v1435_v19, %v1421_v24  ;;  %v1853_v30 = vadd.f32 %v1852_v14, %v1851_v27  ;;  %v1916_v31 = vpop.f32.mrb[59].mxu1 }
 0x16b   :  { %v1194_v32 = vadd.f32 %v1850_v20, %v2429_v36  ;;  %v1917_v33 = vadd.f32 %v1916_v31, %v1915_v29 }
 0x16c   :  { %v1197_v34 = vadd.f32 %v1853_v30, %v2431_v38 }
 0x16d   :  { %v1291_v35 = vadd.f32 %v1914_v12, %v1194_v32 }
 0x16e   :  { %v1294_v37 = vadd.f32 %v1917_v33, %v1197_v34  ;;  %v1854_v39 = vpop.f32.mrb[60].mxu0 }
 0x16f   :  { %v1397_v41 = vadd.f32 %v1396_v23, %v1291_v35  ;;  %v1422_v54 = vmul.f32 %v1291_v35, %v1291_v35  ;;  %v1918_v43 = vpop.f32.mrb[60].mxu1  ;;  %v1855_v44 = vpop.f32.mrb[61].mxu0 }
 0x170   :  { %v1654_v45 = vpack.c.bf16 %v1294_v37, %v1291_v35  ;;  %v1423_v56 = vmul.f32 %v1294_v37, %v1294_v37  ;;  %v1856_v46 = vadd.f32 %v1855_v44, %v1854_v39  ;;  %v1919_v47 = vpop.f32.mrb[61].mxu1  ;;  %v1857_v48 = vpop.f32.mrb[62].mxu0 }
 0x171   :  { %v1437_v49 = vadd.f32 %v1436_v22, %v1422_v54  ;;  %v1398_v50 = vadd.f32 %v1397_v41, %v1294_v37  ;;  %v1920_v51 = vadd.f32 %v1919_v47, %v1918_v43  ;;  %v1921_v26 = vpop.f32.mrb[62].mxu1  ;;  %v1858_v36 = vpop.f32.mrb[63].mxu0 }
 0x172   :  { %1666 = vst [vmem:[%s2493_s2 + $0x30] sm:$0xff] %v1654_v45   ;;  %v1202_v38 = vadd.f32 %v1856_v46, %v2433_v52  ;;  %v1859_v53 = vadd.f32 %v1858_v36, %v1857_v48  ;;  %v1922_v57 = vpop.f32.mrb[63].mxu1 }
 0x173   :  { %v1438_v28 = vadd.f32 %v1437_v49, %v1423_v56  ;;  %v1923_v58 = vadd.f32 %v1922_v57, %v1921_v26 }
 0x174   :  { %v1299_v59 = vadd.f32 %v1920_v51, %v1202_v38  ;;  %v1205_v60 = vadd.f32 %v1859_v53, %v2435_v55 }
 0x176   :  { %v1399_v61 = vadd.f32 %v1398_v50, %v1299_v59  ;;  %v1424_v62 = vmul.f32 %v1299_v59, %v1299_v59  ;;  %v1302_v63 = vadd.f32 %v1923_v58, %v1205_v60 }
 0x178   :  { %v1439_v0 = vadd.f32 %v1438_v28, %v1424_v62  ;;  %v1659_v1 = vpack.c.bf16 %v1302_v63, %v1299_v59  ;;  %v1400_v2 = vadd.f32 %v1399_v61, %v1302_v63  ;;  %v1425_v3 = vmul.f32 %v1302_v63, %v1302_v63 }
 0x17a   :  { %1667 = vst [vmem:[%s2493_s2 + $0x38] sm:$0xff] %v1659_v1   ;;  %v1401_v5 = vrot.slane %v1400_v2, 4  ;;  %v1440_v52 = vadd.f32 %v1439_v0, %v1425_v3 }
 0x17c   :  { %v1402_v4 = vadd.f32 %v1401_v5, %v1400_v2  ;;  %v1441_v6 = vrot.slane %v1440_v52, 4 }
 0x17e   :  { %v1403_v7 = vrot.slane %v1402_v4, 2  ;;  %v1442_v8 = vadd.f32 %v1441_v6, %v1440_v52 }
 0x180   :  { %v1404_v9 = vadd.f32 %v1403_v7, %v1402_v4  ;;  %v1443_v10 = vrot.slane %v1442_v8, 2 }
 0x182   :  { %v1405_v55 = vrot.slane %v1404_v9, 1  ;;  %v1444_v11 = vadd.f32 %v1443_v10, %v1442_v8 }
 0x184   :  { %v1406_v15 = vadd.f32 %v1405_v55, %v1404_v9  ;;  %v1445_v16 = vrot.slane %v1444_v11, 1 }
 0x186   :  { %v1407_v18 = vadd.f32 %v1406_v15, %v1385_v13  ;;  %v1446_v40 = vadd.f32 %v1445_v16, %v1444_v11 }
 0x188   :  { %1408 = vst [vmem:[%s2491_s3] sm:$0x1] %v1407_v18  ;;  %v1447_v42 = vadd.f32 %v1446_v40, %v1409_v17 }
 0x18a   :  { %1448 = vst [vmem:[%s2492_s4] sm:$0x1] %v1447_v42 }

// kernel: dnet_forward.11
= control target key start
LH: loop header
LB: loop body
LE: loop exit
PB: predicated region body
PF: predicated region fallthrough
CT: control target
= control target key end

     0   :  { %s455_s0 = inlined_call_operand.vmem [shape: bf16[128,128], index: 0, kind: input, shape index: {}]   ;;  %s456_s1 = inlined_call_operand.vmem [shape: f32[1,128], index: 1, kind: input, shape index: {}]   ;;  %s457_s2 = inlined_call_operand.vmem [shape: f32[1,128], index: 2, kind: input, shape index: {}]   ;;  %s458_s3 = inlined_call_operand.vmem [shape: bf16[128,128], index: 3, kind: output, shape index: {}]  }
   0x1   :  { %v259_v0 = vld [vmem:[%s455_s0] sm:$0xff]   ;;  %v330_v4 = vld [vmem:[%s455_s0 + $0x8] sm:$0xff]   ;;  %v331_v5 = vld [vmem:[%s455_s0 + $0x10] sm:$0xff]  }
   0x2   :  { %v370_v1 = vld [vmem:[%s456_s1] ss:$0 sm:$0xff]  ;;  %v260_v2 = vunpack.c.l.bf16 %v259_v0  ;;  %v261_v3 = vunpack.c.h.bf16 %v259_v0  ;;  %v332_v6 = vld [vmem:[%s455_s0 + $0x18] sm:$0xff]   ;;  %v264_v8 = vunpack.c.l.bf16 %v330_v4  ;;  %v265_v9 = vunpack.c.h.bf16 %v330_v4  ;;  %v334_v35 = vld [vmem:[%s455_s0 + $0x28] sm:$0xff]  }
   0x3   :  { %v384_v7 = vld [vmem:[%s457_s2] ss:$0 sm:$0xff]  ;;  %v268_v10 = vunpack.c.l.bf16 %v331_v5  ;;  %v269_v11 = vunpack.c.h.bf16 %v331_v5  ;;  %v272_v14 = vunpack.c.l.bf16 %v332_v6  ;;  %v273_v15 = vunpack.c.h.bf16 %v332_v6  ;;  %v335_v48 = vld [vmem:[%s455_s0 + $0x30] sm:$0xff]   ;;  %v336_v4 = vld [vmem:[%s455_s0 + $0x38] sm:$0xff]  }
   0x4   :  { %v53_v12 = vmul.f32 %v260_v2, %v370_v1  ;;  %v54_v13 = vmul.f32 %v261_v3, %v370_v1  ;;  %v55_v16 = vmul.f32 %v264_v8, %v370_v1  ;;  %v56_v17 = vmul.f32 %v265_v9, %v370_v1  ;;  %v333_v34 = vld [vmem:[%s455_s0 + $0x20] sm:$0xff]  }
   0x5   :  { %v57_v18 = vmul.f32 %v268_v10, %v370_v1  ;;  %v58_v19 = vmul.f32 %v269_v11, %v370_v1  ;;  %v59_v22 = vmul.f32 %v272_v14, %v370_v1  ;;  %v60_v23 = vmul.f32 %v273_v15, %v370_v1 }
   0x6   :  { %v76_v20 = vadd.f32 %v384_v7, %v53_v12  ;;  %v77_v21 = vadd.f32 %v384_v7, %v54_v13  ;;  %v78_v24 = vadd.f32 %v384_v7, %v55_v16  ;;  %v79_v25 = vadd.f32 %v384_v7, %v56_v17 }
   0x7   :  { %v80_v26 = vadd.f32 %v384_v7, %v57_v18  ;;  %v81_v27 = vadd.f32 %v384_v7, %v58_v19  ;;  %v82_v42 = vadd.f32 %v384_v7, %v59_v22  ;;  %v83_v43 = vadd.f32 %v384_v7, %v60_v23 }
   0x8   :  { %vm92_vm0 = vcmp.ge.f32.partialorder %v76_v20, 0.0  ;;  %vm93_vm1 = vcmp.ge.f32.partialorder %v77_v21, 0.0  ;;  %v108_v28 = vmul.f32 0.2, %v76_v20  ;;  %v109_v29 = vmul.f32 0.2, %v77_v21 }
   0x9   :  { %vm94_vm2 = vcmp.ge.f32.partialorder %v78_v24, 0.0  ;;  %vm95_vm3 = vcmp.ge.f32.partialorder %v79_v25, 0.0  ;;  %v110_v30 = vmul.f32 0.2, %v78_v24  ;;  %v111_v31 = vmul.f32 0.2, %v79_v25 }
   0xa   :  { %v124_v32 = vsel %vm92_vm0, %v76_v20, %v108_v28  ;;  %v125_v33 = vsel %vm93_vm1, %v77_v21, %v109_v29  ;;  %vm96_vm4 = vcmp.ge.f32.partialorder %v80_v26, 0.0  ;;  %vm97_vm5 = vcmp.ge.f32.partialorder %v81_v27, 0.0 }
   0xb   :  { %v293_v36 = vpack.c.bf16 %v125_v33, %v124_v32  ;;  %v126_v37 = vsel %vm94_vm2, %v78_v24, %v110_v30  ;;  %v127_v38 = vsel %vm95_vm3, %v79_v25, %v111_v31  ;;  %v112_v39 = vmul.f32 0.2, %v80_v26 }
   0xc   :  { %v298_v40 = vpack.c.bf16 %v127_v38, %v126_v37  ;;  %v113_v41 = vmul.f32 0.2, %v81_v27  ;;  %v276_v45 = vunpack.c.l.bf16 %v333_v34  ;;  %v277_v46 = vunpack.c.h.bf16 %v333_v34 }
   0xd   :  { %294 = vst [vmem:[%s458_s3] sm:$0xff] %v293_v36   ;;  %v128_v44 = vsel %vm96_vm4, %v80_v26, %v112_v39  ;;  %v280_v47 = vunpack.c.l.bf16 %v334_v35  ;;  %vm98_vm6 = vcmp.ge.f32.partialorder %v82_v42, 0.0  ;;  %vm99_vm7 = vcmp.ge.f32.partialorder %v83_v43, 0.0 }
   0xe   :  { %337 = vst [vmem:[%s458_s3 + $0x8] sm:$0xff] %v298_v40   ;;  %v129_v49 = vsel %vm97_vm5, %v81_v27, %v113_v41  ;;  %v114_v50 = vmul.f32 0.2, %v82_v42  ;;  %v115_v52 = vmul.f32 0.2, %v83_v43  ;;  %v61_v53 = vmul.f32 %v276_v45, %v370_v1 }
   0xf   :  { %v303_v51 = vpack.c.bf16 %v129_v49, %v128_v44  ;;  %v62_v54 = vmul.f32 %v277_v46, %v370_v1  ;;  %v281_v56 = vunpack.c.h.bf16 %v334_v35  ;;  %v63_v57 = vmul.f32 %v280_v47, %v370_v1 }
  0x10   :  { %v130_v55 = vsel %vm98_vm6, %v82_v42, %v114_v50  ;;  %v284_v58 = vunpack.c.l.bf16 %v335_v48  ;;  %v131_v59 = vsel %vm99_vm7, %v83_v43, %v115_v52  ;;  %v84_v60 = vadd.f32 %v384_v7, %v61_v53 }
  0x11   :  { %338 = vst [vmem:[%s458_s3 + $0x10] sm:$0xff] %v303_v51   ;;  %v85_v61 = vadd.f32 %v384_v7, %v62_v54  ;;  %v285_v62 = vunpack.c.h.bf16 %v335_v48  ;;  %v308_v63 = vpack.c.bf16 %v131_v59, %v130_v55  ;;  %v64_v0 = vmul.f32 %v281_v56, %v370_v1 }
  0x12   :  { %v86_v2 = vadd.f32 %v384_v7, %v63_v57  ;;  %v65_v3 = vmul.f32 %v284_v58, %v370_v1  ;;  %vm100_vm8 = vcmp.ge.f32.partialorder %v84_v60, 0.0  ;;  %v116_v5 = vmul.f32 0.2, %v84_v60 }
  0x13   :  { %vm101_vm9 = vcmp.ge.f32.partialorder %v85_v61, 0.0  ;;  %v117_v6 = vmul.f32 0.2, %v85_v61  ;;  %339 = vst [vmem:[%s458_s3 + $0x18] sm:$0xff] %v308_v63   ;;  %v87_v8 = vadd.f32 %v384_v7, %v64_v0  ;;  %v66_v10 = vmul.f32 %v285_v62, %v370_v1 }
  0x14   :  { %vm102_vm10 = vcmp.ge.f32.partialorder %v86_v2, 0.0  ;;  %v118_v9 = vmul.f32 0.2, %v86_v2  ;;  %v132_v11 = vsel %vm100_vm8, %v84_v60, %v116_v5  ;;  %v88_v13 = vadd.f32 %v384_v7, %v65_v3 }
  0x15   :  { %v133_v12 = vsel %vm101_vm9, %v85_v61, %v117_v6  ;;  %v288_v14 = vunpack.c.l.bf16 %v336_v4  ;;  %vm103_vm11 = vcmp.ge.f32.partialorder %v87_v8, 0.0  ;;  %v119_v16 = vmul.f32 0.2, %v87_v8 }
  0x16   :  { %v313_v15 = vpack.c.bf16 %v133_v12, %v132_v11  ;;  %v134_v17 = vsel %vm102_vm10, %v86_v2, %v118_v9  ;;  %v89_v18 = vadd.f32 %v384_v7, %v66_v10  ;;  %vm104_vm12 = vcmp.ge.f32.partialorder %v88_v13, 0.0 }
  0x17   :  { %v120_v19 = vmul.f32 0.2, %v88_v13  ;;  %v289_v20 = vunpack.c.h.bf16 %v336_v4  ;;  %v135_v21 = vsel %vm103_vm11, %v87_v8, %v119_v16  ;;  %v67_v22 = vmul.f32 %v288_v14, %v370_v1 }
  0x18   :  { %340 = vst [vmem:[%s458_s3 + $0x20] sm:$0xff] %v313_v15   ;;  %v318_v23 = vpack.c.bf16 %v135_v21, %v134_v17  ;;  %vm105_vm13 = vcmp.ge.f32.partialorder %v89_v18, 0.0  ;;  %v121_v24 = vmul.f32 0.2, %v89_v18 }
  0x19   :  { %v136_v25 = vsel %vm104_vm12, %v88_v13, %v120_v19  ;;  %v68_v26 = vmul.f32 %v289_v20, %v370_v1  ;;  %v90_v27 = vadd.f32 %v384_v7, %v67_v22 }
  0x1a   :  { %341 = vst [vmem:[%s458_s3 + $0x28] sm:$0xff] %v318_v23   ;;  %v137_v28 = vsel %vm105_vm13, %v89_v18, %v121_v24 }
  0x1b   :  { %v323_v29 = vpack.c.bf16 %v137_v28, %v136_v25  ;;  %v91_v30 = vadd.f32 %v384_v7, %v68_v26  ;;  %vm106_vm14 = vcmp.ge.f32.partialorder %v90_v27, 0.0  ;;  %v122_v31 = vmul.f32 0.2, %v90_v27 }
  0x1d   :  { %342 = vst [vmem:[%s458_s3 + $0x30] sm:$0xff] %v323_v29   ;;  %vm107_vm15 = vcmp.ge.f32.partialorder %v91_v30, 0.0  ;;  %v123_v32 = vmul.f32 0.2, %v91_v30  ;;  %v138_v33 = vsel %vm106_vm14, %v90_v27, %v122_v31 }
  0x1f   :  { %v139_v1 = vsel %vm107_vm15, %v91_v30, %v123_v32 }
  0x20   :  { %v328_v34 = vpack.c.bf16 %v139_v1, %v138_v33 }
  0x22   :  { %343 = vst [vmem:[%s458_s3 + $0x38] sm:$0xff] %v328_v34  }

// kernel: dnet_forward.13
= control target key start
LH: loop header
LB: loop body
LE: loop exit
PB: predicated region body
PF: predicated region fallthrough
CT: control target
= control target key end

     0   :  { %v28_v0 = vlaneseq  ;;  %s180_s0 = inlined_call_operand.vmem [shape: bf16[32,256], index: 0, kind: input, shape index: {}]   ;;  %s181_s1 = inlined_call_operand.vmem [shape: f32[1,256], index: 1, kind: input, shape index: {}]   ;;  %s182_s2 = inlined_call_operand.vmem [shape: f32[1,256], index: 2, kind: input, shape index: {}]   ;;  %s183_s3 = inlined_call_operand.vmem [shape: bf16[32,256], index: 3, kind: output, shape index: {}]  }
   0x1   :  { %v14_v1 = vld [vmem:[%s180_s0] sm:$0xff]  ;;  %v15_v3 = vld [vmem:[%s180_s0 + $0x8] sm:$0xff]  ;;  %v16_v4 = vld [vmem:[%s180_s0 + $0x10] sm:$0xff] }
   0x2   :  { %v29_v2 = vshrl.u32 %v28_v0, 7  ;;  %v17_v5 = vld [vmem:[%s180_s0 + $0x18] sm:$0xff]  ;;  %v18_v6 = vunpack.c.l.bf16 %v14_v1  ;;  %v19_v7 = vunpack.c.h.bf16 %v14_v1  ;;  %v26_v8 = vld [vmem:[%s181_s1] sm:$0x3]  ;;  %v20_v12 = vunpack.c.l.bf16 %v15_v3 }
   0x3   :  { %v46_v9 = vld [vmem:[%s182_s2] sm:$0x3]  ;;  %v21_v13 = vunpack.c.h.bf16 %v15_v3  ;;  %v22_v14 = vunpack.c.l.bf16 %v16_v4  ;;  %v23_v15 = vunpack.c.h.bf16 %v16_v4  ;;  %v24_v16 = vunpack.c.l.bf16 %v17_v5 }
   0x4   :  { %v30_v10 = vsub.s32 0, %v29_v2  ;;  %v34_v11 = vsub.s32 1, %v29_v2  ;;  %v25_v17 = vunpack.c.h.bf16 %v17_v5 }
   0x6   :  { %v31_v18 = vrot.slane %v26_v8, %v30_v10  ;;  %v35_v19 = vrot.slane %v26_v8, %v34_v11  ;;  %v51_v20 = vrot.slane %v46_v9, %v30_v10  ;;  %v55_v21 = vrot.slane %v46_v9, %v34_v11 }
   0x8   :  { %v38_v22 = vmul.f32 %v31_v18, %v18_v6  ;;  %v39_v23 = vmul.f32 %v35_v19, %v19_v7  ;;  %v40_v24 = vmul.f32 %v31_v18, %v20_v12  ;;  %v41_v25 = vmul.f32 %v35_v19, %v21_v13 }
   0x9   :  { %v42_v26 = vmul.f32 %v31_v18, %v22_v14  ;;  %v43_v27 = vmul.f32 %v35_v19, %v23_v15  ;;  %v44_v28 = vmul.f32 %v31_v18, %v24_v16  ;;  %v45_v29 = vmul.f32 %v35_v19, %v25_v17 }
   0xa   :  { %v58_v30 = vadd.f32 %v51_v20, %v38_v22  ;;  %v59_v31 = vadd.f32 %v55_v21, %v39_v23  ;;  %v60_v32 = vadd.f32 %v51_v20, %v40_v24  ;;  %v61_v33 = vadd.f32 %v55_v21, %v41_v25 }
   0xb   :  { %v62_v34 = vadd.f32 %v51_v20, %v42_v26  ;;  %v63_v35 = vadd.f32 %v55_v21, %v43_v27  ;;  %v64_v36 = vadd.f32 %v51_v20, %v44_v28  ;;  %v65_v37 = vadd.f32 %v55_v21, %v45_v29 }
   0xc   :  { %vm66_vm0 = vcmp.ge.f32.partialorder %v58_v30, 0.0  ;;  %vm67_vm1 = vcmp.ge.f32.partialorder %v59_v31, 0.0  ;;  %v74_v38 = vmul.f32 0.2, %v58_v30  ;;  %v75_v39 = vmul.f32 0.2, %v59_v31 }
   0xd   :  { %vm68_vm2 = vcmp.ge.f32.partialorder %v60_v32, 0.0  ;;  %vm69_vm3 = vcmp.ge.f32.partialorder %v61_v33, 0.0  ;;  %v76_v40 = vmul.f32 0.2, %v60_v32  ;;  %v77_v41 = vmul.f32 0.2, %v61_v33 }
   0xe   :  { %v82_v42 = vsel %vm66_vm0, %v58_v30, %v74_v38  ;;  %v83_v43 = vsel %vm67_vm1, %v59_v31, %v75_v39  ;;  %vm70_vm4 = vcmp.ge.f32.partialorder %v62_v34, 0.0  ;;  %vm71_vm5 = vcmp.ge.f32.partialorder %v63_v35, 0.0 }
   0xf   :  { %v126_v44 = vpack.c.bf16 %v83_v43, %v82_v42  ;;  %v84_v45 = vsel %vm68_vm2, %v60_v32, %v76_v40  ;;  %v85_v46 = vsel %vm69_vm3, %v61_v33, %v77_v41  ;;  %v78_v47 = vmul.f32 0.2, %v62_v34 }
  0x10   :  { %v127_v48 = vpack.c.bf16 %v85_v46, %v84_v45  ;;  %v79_v49 = vmul.f32 0.2, %v63_v35  ;;  %vm72_vm6 = vcmp.ge.f32.partialorder %v64_v36, 0.0  ;;  %vm73_vm7 = vcmp.ge.f32.partialorder %v65_v37, 0.0 }
  0x11   :  { %114 = vst [vmem:[%s183_s3] sm:$0xff] %v126_v44  ;;  %v86_v50 = vsel %vm70_vm4, %v62_v34, %v78_v47  ;;  %v80_v51 = vmul.f32 0.2, %v64_v36  ;;  %v81_v52 = vmul.f32 0.2, %v65_v37 }
  0x12   :  { %115 = vst [vmem:[%s183_s3 + $0x8] sm:$0xff] %v127_v48  ;;  %v87_v53 = vsel %vm71_vm5, %v63_v35, %v79_v49 }
  0x13   :  { %v128_v54 = vpack.c.bf16 %v87_v53, %v86_v50  ;;  %v88_v55 = vsel %vm72_vm6, %v64_v36, %v80_v51  ;;  %v89_v56 = vsel %vm73_vm7, %v65_v37, %v81_v52 }
  0x14   :  { %v129_v57 = vpack.c.bf16 %v89_v56, %v88_v55 }
  0x15   :  { %116 = vst [vmem:[%s183_s3 + $0x10] sm:$0xff] %v128_v54 }
  0x16   :  { %117 = vst [vmem:[%s183_s3 + $0x18] sm:$0xff] %v129_v57 }

// kernel: dnet_forward.12
= control target key start
LH: loop header
LB: loop body
LE: loop exit
PB: predicated region body
PF: predicated region fallthrough
CT: control target
= control target key end

     0   :  { %s4027_s1 = inlined_call_operand.vmem [shape: bf16[2048,256], index: 1, kind: input, shape index: {}]   ;;  %s4028_s0 = inlined_call_operand.vmem [shape: bf16[32,2048], index: 0, kind: input, shape index: {}]   ;;  %s4029_s3 = inlined_call_operand.vmem [shape: f32[1,256], index: 3, kind: output, shape index: {1}]   ;;  %s4030_s4 = inlined_call_operand.vmem [shape: f32[1,256], index: 4, kind: output, shape index: {2}]   ;;  %s4031_s2 = inlined_call_operand.vmem [shape: bf16[32,256], index: 2, kind: output, shape index: {0}]  }
   0x1   :  { %v2660_v0 = vld [vmem:[%s4027_s1 + $0x4] ss:$8 sps:$4 sm:$0xff]   ;;  %v2664_v2 = vld [vmem:[%s4027_s1] ss:$8 sps:$4 sm:$0xff]   ;;  %v2666_v4 = vld [vmem:[%s4027_s1 + $0x14] ss:$8 sps:$4 sm:$0xff]  }
   0x2   :  { %v2662_v1 = vld [vmem:[%s4027_s1 + $0x404] ss:$8 sps:$4 sm:$0xff]   ;;  %1752 = vmatprep.subr.bf16.mxu1 %v2660_v0  ;;  %v2665_v3 = vld [vmem:[%s4027_s1 + $0x400] ss:$8 sps:$4 sm:$0xff]   ;;  %v2668_v5 = vld [vmem:[%s4027_s1 + $0x414] ss:$8 sps:$4 sm:$0xff]  }
   0x3   :  { %1964 = vmatprep.subr.bf16.mxu0 %v2662_v1  ;;  %1753 = vmatpush1.bf16.msra.mxu1 %v2664_v2  ;;  %v2670_v6 = vld [vmem:[%s4027_s1 + $0x10] ss:$8 sps:$4 sm:$0xff]   ;;  %v2672_v8 = vld [vmem:[%s4027_s1 + $0x24] ss:$8 sps:$4 sm:$0xff]   ;;  %v2676_v10 = vld [vmem:[%s4027_s1 + $0x20] ss:$8 sps:$4 sm:$0xff]  }
   0x4   :  { %1965 = vmatpush1.bf16.msra.mxu0 %v2665_v3  ;;  %1754 = vmatprep.subr.bf16.mxu1 %v2666_v4  ;;  %v2671_v7 = vld [vmem:[%s4027_s1 + $0x410] ss:$8 sps:$4 sm:$0xff]   ;;  %v2674_v9 = vld [vmem:[%s4027_s1 + $0x424] ss:$8 sps:$4 sm:$0xff]   ;;  %v2677_v11 = vld [vmem:[%s4027_s1 + $0x420] ss:$8 sps:$4 sm:$0xff]  }
   0x5   :  { %1966 = vmatprep.subr.bf16.mxu0 %v2668_v5  ;;  %v2678_v12 = vld [vmem:[%s4027_s1 + $0x34] ss:$8 sps:$4 sm:$0xff]   ;;  %v2682_v14 = vld [vmem:[%s4027_s1 + $0x30] ss:$8 sps:$4 sm:$0xff]   ;;  %v2684_v16 = vld [vmem:[%s4027_s1 + $0x44] ss:$8 sps:$4 sm:$0xff]  }
   0x6   :  { %v2680_v13 = vld [vmem:[%s4027_s1 + $0x434] ss:$8 sps:$4 sm:$0xff]   ;;  %v2683_v15 = vld [vmem:[%s4027_s1 + $0x430] ss:$8 sps:$4 sm:$0xff]   ;;  %v2686_v17 = vld [vmem:[%s4027_s1 + $0x444] ss:$8 sps:$4 sm:$0xff]  }
   0x7   :  { %1755 = vmatpush1.bf16.msra.mxu1 %v2670_v6  ;;  %v2688_v18 = vld [vmem:[%s4027_s1 + $0x40] ss:$8 sps:$4 sm:$0xff]   ;;  %v2690_v20 = vld [vmem:[%s4027_s1 + $0x54] ss:$8 sps:$4 sm:$0xff]   ;;  %v2694_v22 = vld [vmem:[%s4027_s1 + $0x50] ss:$8 sps:$4 sm:$0xff]  }
   0x8   :  { %1967 = vmatpush1.bf16.msra.mxu0 %v2671_v7  ;;  %1756 = vmatprep.subr.bf16.mxu1 %v2672_v8  ;;  %v2689_v19 = vld [vmem:[%s4027_s1 + $0x440] ss:$8 sps:$4 sm:$0xff]   ;;  %v2692_v21 = vld [vmem:[%s4027_s1 + $0x454] ss:$8 sps:$4 sm:$0xff]   ;;  %v2695_v23 = vld [vmem:[%s4027_s1 + $0x450] ss:$8 sps:$4 sm:$0xff]  }
   0x9   :  { %1968 = vmatprep.subr.bf16.mxu0 %v2674_v9  ;;  %v2696_v24 = vld [vmem:[%s4027_s1 + $0x64] ss:$8 sps:$4 sm:$0xff]   ;;  %v2700_v26 = vld [vmem:[%s4027_s1 + $0x60] ss:$8 sps:$4 sm:$0xff]   ;;  %v2702_v28 = vld [vmem:[%s4027_s1 + $0x74] ss:$8 sps:$4 sm:$0xff]  }
   0xa   :  { %v2698_v25 = vld [vmem:[%s4027_s1 + $0x464] ss:$8 sps:$4 sm:$0xff]   ;;  %v2701_v27 = vld [vmem:[%s4027_s1 + $0x460] ss:$8 sps:$4 sm:$0xff]   ;;  %v2704_v29 = vld [vmem:[%s4027_s1 + $0x474] ss:$8 sps:$4 sm:$0xff]  }
   0xb   :  { %1757 = vmatpush1.bf16.msra.mxu1 %v2676_v10  ;;  %v2706_v30 = vld [vmem:[%s4027_s1 + $0x70] ss:$8 sps:$4 sm:$0xff]   ;;  %v2708_v32 = vld [vmem:[%s4027_s1 + $0x84] ss:$8 sps:$4 sm:$0xff]   ;;  %v2712_v34 = vld [vmem:[%s4027_s1 + $0x80] ss:$8 sps:$4 sm:$0xff]  }
   0xc   :  { %1969 = vmatpush1.bf16.msra.mxu0 %v2677_v11  ;;  %1758 = vmatprep.subr.bf16.mxu1 %v2678_v12  ;;  %v2707_v31 = vld [vmem:[%s4027_s1 + $0x470] ss:$8 sps:$4 sm:$0xff]   ;;  %v2710_v33 = vld [vmem:[%s4027_s1 + $0x484] ss:$8 sps:$4 sm:$0xff]   ;;  %v2713_v35 = vld [vmem:[%s4027_s1 + $0x480] ss:$8 sps:$4 sm:$0xff]  }
   0xd   :  { %1970 = vmatprep.subr.bf16.mxu0 %v2680_v13  ;;  %v2714_v36 = vld [vmem:[%s4027_s1 + $0x94] ss:$8 sps:$4 sm:$0xff]   ;;  %v2718_v38 = vld [vmem:[%s4027_s1 + $0x90] ss:$8 sps:$4 sm:$0xff]   ;;  %v2720_v40 = vld [vmem:[%s4027_s1 + $0xa4] ss:$8 sps:$4 sm:$0xff]  }
   0xe   :  { %v2716_v37 = vld [vmem:[%s4027_s1 + $0x494] ss:$8 sps:$4 sm:$0xff]   ;;  %v2719_v39 = vld [vmem:[%s4027_s1 + $0x490] ss:$8 sps:$4 sm:$0xff]   ;;  %v2722_v41 = vld [vmem:[%s4027_s1 + $0x4a4] ss:$8 sps:$4 sm:$0xff]  }
   0xf   :  { %1759 = vmatpush1.bf16.msra.mxu1 %v2682_v14  ;;  %v2724_v42 = vld [vmem:[%s4027_s1 + $0xa0] ss:$8 sps:$4 sm:$0xff]   ;;  %v2726_v44 = vld [vmem:[%s4027_s1 + $0xb4] ss:$8 sps:$4 sm:$0xff]   ;;  %v2730_v46 = vld [vmem:[%s4027_s1 + $0xb0] ss:$8 sps:$4 sm:$0xff]  }
  0x10   :  { %1971 = vmatpush1.bf16.msra.mxu0 %v2683_v15  ;;  %1760 = vmatprep.subr.bf16.mxu1 %v2684_v16  ;;  %v2725_v43 = vld [vmem:[%s4027_s1 + $0x4a0] ss:$8 sps:$4 sm:$0xff]   ;;  %v2728_v45 = vld [vmem:[%s4027_s1 + $0x4b4] ss:$8 sps:$4 sm:$0xff]   ;;  %v2731_v47 = vld [vmem:[%s4027_s1 + $0x4b0] ss:$8 sps:$4 sm:$0xff]  }
  0x11   :  { %1972 = vmatprep.subr.bf16.mxu0 %v2686_v17  ;;  %v24_v48 = vld [vmem:[%s4028_s0] sm:$0xff]  ;;  %v2738_v58 = vld [vmem:[%s4027_s1 + $0xd4] ss:$8 sps:$4 sm:$0xff]   ;;  %v2742_v60 = vld [vmem:[%s4027_s1 + $0xd0] ss:$8 sps:$4 sm:$0xff]  }
  0x12   :  { %v32_v49 = vld [vmem:[%s4028_s0 + $0x40] sm:$0xff]  ;;  %v2740_v59 = vld [vmem:[%s4027_s1 + $0x4d4] ss:$8 sps:$4 sm:$0xff]   ;;  %v2743_v61 = vld [vmem:[%s4027_s1 + $0x4d0] ss:$8 sps:$4 sm:$0xff]  }
  0x13   :  { %1761 = vmatpush1.bf16.msra.mxu1 %v2688_v18  ;;  %v2732_v50 = vld [vmem:[%s4027_s1 + $0xc4] ss:$8 sps:$4 sm:$0xff]   ;;  %v2307_v52 = vcombine.high %v24_v48, %v32_v49  ;;  %v2736_v56 = vld [vmem:[%s4027_s1 + $0xc0] ss:$8 sps:$4 sm:$0xff]   ;;  %v2750_v2 = vld [vmem:[%s4027_s1 + $0xf4] ss:$8 sps:$4 sm:$0xff]   ;;  %v2306_v8 = vcombine.low %v24_v48, %v32_v49 }
  0x14   :  { %1973 = vmatpush1.bf16.msra.mxu0 %v2689_v19  ;;  %1762 = vmatprep.subr.bf16.mxu1 %v2690_v20  ;;  %v2734_v51 = vld [vmem:[%s4027_s1 + $0x4c4] ss:$8 sps:$4 sm:$0xff]   ;;  %v2737_v57 = vld [vmem:[%s4027_s1 + $0x4c0] ss:$8 sps:$4 sm:$0xff]   ;;  %v2752_v3 = vld [vmem:[%s4027_s1 + $0x4f4] ss:$8 sps:$4 sm:$0xff]  }
  0x15   :  { %1974 = vmatprep.subr.bf16.mxu0 %v2692_v21  ;;  %v28_v53 = vld [vmem:[%s4028_s0 + $0x20] sm:$0xff]  ;;  %1784 = vmatprep.mubr.bf16.mxu1 %v2307_v52  ;;  %v2754_v4 = vld [vmem:[%s4027_s1 + $0xf0] ss:$8 sps:$4 sm:$0xff]   ;;  %v2764_v12 = vld [vmem:[%s4027_s1 + $0x114] ss:$8 sps:$4 sm:$0xff]  }
  0x16   :  { %v36_v54 = vld [vmem:[%s4028_s0 + $0x60] sm:$0xff]  ;;  %v2755_v5 = vld [vmem:[%s4027_s1 + $0x4f0] ss:$8 sps:$4 sm:$0xff]   ;;  %v2767_v13 = vld [vmem:[%s4027_s1 + $0x514] ss:$8 sps:$4 sm:$0xff]  }
  0x17   :  { %1763 = vmatpush1.bf16.msra.mxu1 %v2694_v22  ;;  %v2315_v55 = vcombine.high %v28_v53, %v36_v54  ;;  %v2744_v62 = vld [vmem:[%s4027_s1 + $0xe4] ss:$8 sps:$4 sm:$0xff]   ;;  %v2748_v0 = vld [vmem:[%s4027_s1 + $0xe0] ss:$8 sps:$4 sm:$0xff]   ;;  %v2314_v10 = vcombine.low %v28_v53, %v36_v54  ;;  %v2762_v14 = vld [vmem:[%s4027_s1 + $0x110] ss:$8 sps:$4 sm:$0xff]  }
  0x18   :  { %1975 = vmatpush1.bf16.msra.mxu0 %v2695_v23  ;;  %1764 = vmatprep.subr.bf16.mxu1 %v2696_v24  ;;  %v2746_v63 = vld [vmem:[%s4027_s1 + $0x4e4] ss:$8 sps:$4 sm:$0xff]   ;;  %v2749_v1 = vld [vmem:[%s4027_s1 + $0x4e0] ss:$8 sps:$4 sm:$0xff]   ;;  %v2765_v15 = vld [vmem:[%s4027_s1 + $0x510] ss:$8 sps:$4 sm:$0xff]  }
  0x19   :  { %1976 = vmatprep.subr.bf16.mxu0 %v2698_v25  ;;  %1996 = vmatprep.mubr.bf16.mxu0 %v2315_v55  ;;  %v2758_v6 = vld [vmem:[%s4027_s1 + $0x104] ss:$8 sps:$4 sm:$0xff]   ;;  %v2756_v9 = vld [vmem:[%s4027_s1 + $0x100] ss:$8 sps:$4 sm:$0xff]   ;;  %v2776_v20 = vld [vmem:[%s4027_s1 + $0x134] ss:$8 sps:$4 sm:$0xff]  }
  0x1a   :  { %v2761_v7 = vld [vmem:[%s4027_s1 + $0x504] ss:$8 sps:$4 sm:$0xff]   ;;  %v2759_v11 = vld [vmem:[%s4027_s1 + $0x500] ss:$8 sps:$4 sm:$0xff]   ;;  %v2779_v21 = vld [vmem:[%s4027_s1 + $0x534] ss:$8 sps:$4 sm:$0xff]  }
  0x1b   :  { %1765 = vmatpush1.bf16.msra.mxu1 %v2700_v26  ;;  %v2770_v16 = vld [vmem:[%s4027_s1 + $0x124] ss:$8 sps:$4 sm:$0xff]   ;;  %v2768_v18 = vld [vmem:[%s4027_s1 + $0x120] ss:$8 sps:$4 sm:$0xff]   ;;  %v2774_v22 = vld [vmem:[%s4027_s1 + $0x130] ss:$8 sps:$4 sm:$0xff]  }
  0x1c   :  { %1977 = vmatpush1.bf16.msra.mxu0 %v2701_v27  ;;  %1766 = vmatprep.subr.bf16.mxu1 %v2702_v28  ;;  %v2773_v17 = vld [vmem:[%s4027_s1 + $0x524] ss:$8 sps:$4 sm:$0xff]   ;;  %v2771_v19 = vld [vmem:[%s4027_s1 + $0x520] ss:$8 sps:$4 sm:$0xff]   ;;  %v2777_v23 = vld [vmem:[%s4027_s1 + $0x530] ss:$8 sps:$4 sm:$0xff]  }
  0x1d   :  { %1978 = vmatprep.subr.bf16.mxu0 %v2704_v29  ;;  %v2782_v24 = vld [vmem:[%s4027_s1 + $0x144] ss:$8 sps:$4 sm:$0xff]   ;;  %v2780_v26 = vld [vmem:[%s4027_s1 + $0x140] ss:$8 sps:$4 sm:$0xff]   ;;  %v2788_v28 = vld [vmem:[%s4027_s1 + $0x154] ss:$8 sps:$4 sm:$0xff]  }
  0x1e   :  { %v2785_v25 = vld [vmem:[%s4027_s1 + $0x544] ss:$8 sps:$4 sm:$0xff]   ;;  %v2783_v27 = vld [vmem:[%s4027_s1 + $0x540] ss:$8 sps:$4 sm:$0xff]   ;;  %v2791_v29 = vld [vmem:[%s4027_s1 + $0x554] ss:$8 sps:$4 sm:$0xff]  }
  0x1f   :  { %1767 = vmatpush1.bf16.msra.mxu1 %v2706_v30  ;;  %v40_v30 = vld [vmem:[%s4028_s0 + $0x80] sm:$0xff]  ;;  %v3392_v49 = vld [vmem:[%s4028_s0 + $0x28] sm:$0xff]  ;;  %v2801_v52 = vld [vmem:[%s4027_s1 + $0x570] ss:$8 sps:$4 sm:$0xff]  }
  0x20   :  { %1979 = vmatpush1.bf16.msra.mxu0 %v2707_v31  ;;  %1768 = vmatprep.subr.bf16.mxu1 %v2708_v32  ;;  %v48_v31 = vld [vmem:[%s4028_s0 + $0xc0] sm:$0xff]  ;;  %v2786_v32 = vld [vmem:[%s4027_s1 + $0x150] ss:$8 sps:$4 sm:$0xff]  }
  0x21   :  { %1980 = vmatprep.subr.bf16.mxu0 %v2710_v33  ;;  %v2323_v33 = vcombine.high %v40_v30, %v48_v31  ;;  %v2806_v54 = vld [vmem:[%s4027_s1 + $0x184] ss:$8 sps:$4 sm:$0xff]  }
  0x22   :  { %v2809_v55 = vld [vmem:[%s4027_s1 + $0x584] ss:$8 sps:$4 sm:$0xff]  }
  0x23   :  { %1769 = vmatpush1.bf16.msra.mxu1 %v2712_v34  ;;  %v2789_v34 = vld [vmem:[%s4027_s1 + $0x550] ss:$8 sps:$4 sm:$0xff]  }
  0x24   :  { %1981 = vmatpush1.bf16.msra.mxu0 %v2713_v35  ;;  %1770 = vmatprep.subr.bf16.mxu1 %v2714_v36  ;;  %v44_v35 = vld [vmem:[%s4028_s0 + $0xa0] sm:$0xff] }
  0x25   :  { %1982 = vmatprep.subr.bf16.mxu0 %v2716_v37  ;;  %v52_v36 = vld [vmem:[%s4028_s0 + $0xe0] sm:$0xff]  ;;  %v2322_v37 = vcombine.low %v40_v30, %v48_v31  ;;  %v2860_v30 = vld [vmem:[%s4027_s1 + $0x214] ss:$8 sps:$4 sm:$0xff]  }
  0x26   :  { %v2863_v31 = vld [vmem:[%s4027_s1 + $0x614] ss:$8 sps:$4 sm:$0xff]  }
  0x27   :  { %1771 = vmatpush1.bf16.msra.mxu1 %v2718_v38  ;;  %v2794_v38 = vld [vmem:[%s4027_s1 + $0x164] ss:$8 sps:$4 sm:$0xff]  }
  0x28   :  { %1983 = vmatpush1.bf16.msra.mxu0 %v2719_v39  ;;  %1772 = vmatprep.subr.bf16.mxu1 %v2720_v40  ;;  %v2331_v39 = vcombine.high %v44_v35, %v52_v36  ;;  %v2330_v40 = vcombine.low %v44_v35, %v52_v36  ;;  %v2858_v36 = vld [vmem:[%s4027_s1 + $0x210] ss:$8 sps:$4 sm:$0xff]  }
  0x29   :  { %1984 = vmatprep.subr.bf16.mxu0 %v2722_v41  ;;  %v2797_v41 = vld [vmem:[%s4027_s1 + $0x564] ss:$8 sps:$4 sm:$0xff]  }
  0x2b   :  { %1773 = vmatpush1.bf16.msra.mxu1 %v2724_v42  ;;  %v2792_v42 = vld [vmem:[%s4027_s1 + $0x160] ss:$8 sps:$4 sm:$0xff]  }
  0x2c   :  { %1985 = vmatpush1.bf16.msra.mxu0 %v2725_v43  ;;  %1774 = vmatprep.subr.bf16.mxu1 %v2726_v44  ;;  %v2795_v43 = vld [vmem:[%s4027_s1 + $0x560] ss:$8 sps:$4 sm:$0xff]  }
  0x2d   :  { %1986 = vmatprep.subr.bf16.mxu0 %v2728_v45  ;;  %v3374_v44 = vld [vmem:[%s4028_s0 + $0x8] sm:$0xff] }
  0x2e   :  { %v3379_v45 = vld [vmem:[%s4028_s0 + $0x48] sm:$0xff] }
  0x2f   :  { %1775 = vmatpush1.bf16.msra.mxu1 %v2730_v46  ;;  %v2800_v46 = vld [vmem:[%s4027_s1 + $0x174] ss:$8 sps:$4 sm:$0xff]   ;;  %v2309_v48 = vcombine.high %v3374_v44, %v3379_v45 }
  0x30   :  { %1987 = vmatpush1.bf16.msra.mxu0 %v2731_v47  ;;  %1776 = vmatprep.subr.bf16.mxu1 %v2732_v50  ;;  %v2803_v47 = vld [vmem:[%s4027_s1 + $0x574] ss:$8 sps:$4 sm:$0xff]   ;;  %v3397_v50 = vld [vmem:[%s4028_s0 + $0x68] sm:$0xff] }
  0x31   :  { %1988 = vmatprep.subr.bf16.mxu0 %v2734_v51  ;;  %v2798_v51 = vld [vmem:[%s4027_s1 + $0x170] ss:$8 sps:$4 sm:$0xff]   ;;  %v2317_v53 = vcombine.high %v3392_v49, %v3397_v50 }
  0x33   :  { %1777 = vmatpush1.bf16.msra.mxu1 %v2736_v56  ;;  %v2804_v56 = vld [vmem:[%s4027_s1 + $0x180] ss:$8 sps:$4 sm:$0xff]  }
  0x34   :  { %1989 = vmatpush1.bf16.msra.mxu0 %v2737_v57  ;;  %1778 = vmatprep.subr.bf16.mxu1 %v2738_v58  ;;  %v2807_v57 = vld [vmem:[%s4027_s1 + $0x580] ss:$8 sps:$4 sm:$0xff]   ;;  %v2812_v58 = vld [vmem:[%s4027_s1 + $0x194] ss:$8 sps:$4 sm:$0xff]  }
  0x35   :  { %1990 = vmatprep.subr.bf16.mxu0 %v2740_v59  ;;  %v2815_v59 = vld [vmem:[%s4027_s1 + $0x594] ss:$8 sps:$4 sm:$0xff]  }
  0x37   :  { %1779 = vmatpush1.bf16.msra.mxu1 %v2742_v60  ;;  %v2810_v60 = vld [vmem:[%s4027_s1 + $0x190] ss:$8 sps:$4 sm:$0xff]  }
  0x38   :  { %1991 = vmatpush1.bf16.msra.mxu0 %v2743_v61  ;;  %1780 = vmatprep.subr.bf16.mxu1 %v2744_v62  ;;  %v2813_v61 = vld [vmem:[%s4027_s1 + $0x590] ss:$8 sps:$4 sm:$0xff]   ;;  %v2818_v62 = vld [vmem:[%s4027_s1 + $0x1a4] ss:$8 sps:$4 sm:$0xff]  }
  0x39   :  { %1992 = vmatprep.subr.bf16.mxu0 %v2746_v63  ;;  %v2821_v63 = vld [vmem:[%s4027_s1 + $0x5a4] ss:$8 sps:$4 sm:$0xff]  }
  0x3b   :  { %1781 = vmatpush1.bf16.msra.mxu1 %v2748_v0  ;;  %v2816_v0 = vld [vmem:[%s4027_s1 + $0x1a0] ss:$8 sps:$4 sm:$0xff]  }
  0x3c   :  { %1993 = vmatpush1.bf16.msra.mxu0 %v2749_v1  ;;  %1782 = vmatprep.subr.bf16.mxu1 %v2750_v2  ;;  %v2819_v1 = vld [vmem:[%s4027_s1 + $0x5a0] ss:$8 sps:$4 sm:$0xff]   ;;  %v2824_v2 = vld [vmem:[%s4027_s1 + $0x1b4] ss:$8 sps:$4 sm:$0xff]  }
  0x3d   :  { %1994 = vmatprep.subr.bf16.mxu0 %v2752_v3  ;;  %v2827_v3 = vld [vmem:[%s4027_s1 + $0x5b4] ss:$8 sps:$4 sm:$0xff]  }
  0x3f   :  { %1783 = vmatpush1.bf16.msra.mxu1 %v2754_v4  ;;  %v2822_v4 = vld [vmem:[%s4027_s1 + $0x1b0] ss:$8 sps:$4 sm:$0xff]  }
  0x40   :  { %1995 = vmatpush1.bf16.msra.mxu0 %v2755_v5  ;;  %1805 = vmatprep.subr.bf16.mxu1 %v2758_v6  ;;  %v2825_v5 = vld [vmem:[%s4027_s1 + $0x5b0] ss:$8 sps:$4 sm:$0xff]   ;;  %v2830_v6 = vld [vmem:[%s4027_s1 + $0x1c4] ss:$8 sps:$4 sm:$0xff]  }
  0x41   :  { %2017 = vmatprep.subr.bf16.mxu0 %v2761_v7  ;;  %v2833_v7 = vld [vmem:[%s4027_s1 + $0x5c4] ss:$8 sps:$4 sm:$0xff]  }
  0x42   :  { %1785 = vmatmul.mubr.bf16.vlgmr.msra.gmra.mrb[0].mxu1 %v2306_v8  ;;  %v2828_v8 = vld [vmem:[%s4027_s1 + $0x1c0] ss:$8 sps:$4 sm:$0xff]  }
  0x43   :  { %1997 = vmatmul.mubr.bf16.vlgmr.msra.gmra.mrb[0].mxu0 %v2314_v10  ;;  %1806 = vmatpush1.bf16.msra.mxu1 %v2756_v9  ;;  %v2831_v9 = vld [vmem:[%s4027_s1 + $0x5c0] ss:$8 sps:$4 sm:$0xff]   ;;  %v2836_v10 = vld [vmem:[%s4027_s1 + $0x1d4] ss:$8 sps:$4 sm:$0xff]  }
  0x44   :  { %2018 = vmatpush1.bf16.msra.mxu0 %v2759_v11  ;;  %1807 = vmatprep.subr.bf16.mxu1 %v2764_v12  ;;  %v2839_v11 = vld [vmem:[%s4027_s1 + $0x5d4] ss:$8 sps:$4 sm:$0xff]   ;;  %v2834_v12 = vld [vmem:[%s4027_s1 + $0x1d0] ss:$8 sps:$4 sm:$0xff]  }
  0x45   :  { %2019 = vmatprep.subr.bf16.mxu0 %v2767_v13  ;;  %1794 = vmatprep.mubr.bf16.mxu1 %v2323_v33  ;;  %v2837_v13 = vld [vmem:[%s4027_s1 + $0x5d0] ss:$8 sps:$4 sm:$0xff]   ;;  %v53_v33 = vld [vmem:[%s4028_s0 + $0xe8] sm:$0xff] }
  0x46   :  { %2006 = vmatprep.mubr.bf16.mxu0 %v2331_v39  ;;  %v2869_v39 = vld [vmem:[%s4027_s1 + $0x624] ss:$8 sps:$4 sm:$0xff]  }
  0x47   :  { %1808 = vmatpush1.bf16.msra.mxu1 %v2762_v14  ;;  %v2842_v14 = vld [vmem:[%s4027_s1 + $0x1e4] ss:$8 sps:$4 sm:$0xff]  }
  0x48   :  { %2020 = vmatpush1.bf16.msra.mxu0 %v2765_v15  ;;  %1809 = vmatprep.subr.bf16.mxu1 %v2770_v16  ;;  %v2845_v15 = vld [vmem:[%s4027_s1 + $0x5e4] ss:$8 sps:$4 sm:$0xff]   ;;  %v2840_v16 = vld [vmem:[%s4027_s1 + $0x1e0] ss:$8 sps:$4 sm:$0xff]  }
  0x49   :  { %2021 = vmatprep.subr.bf16.mxu0 %v2773_v17  ;;  %v2843_v17 = vld [vmem:[%s4027_s1 + $0x5e0] ss:$8 sps:$4 sm:$0xff]  }
  0x4a   :  { %1795 = vmatmul.mubr.bf16.gmra.mrb[4].mxu1 %v2322_v37  ;;  %v2861_v37 = vld [vmem:[%s4027_s1 + $0x610] ss:$8 sps:$4 sm:$0xff]  }
  0x4b   :  { %1810 = vmatpush1.bf16.msra.mxu1 %v2768_v18  ;;  %2007 = vmatmul.mubr.bf16.gmra.mrb[4].mxu0 %v2330_v40  ;;  %v2848_v18 = vld [vmem:[%s4027_s1 + $0x1f4] ss:$8 sps:$4 sm:$0xff]   ;;  %v2864_v40 = vld [vmem:[%s4027_s1 + $0x220] ss:$8 sps:$4 sm:$0xff]  }
  0x4c   :  { %2022 = vmatpush1.bf16.msra.mxu0 %v2771_v19  ;;  %1811 = vmatprep.subr.bf16.mxu1 %v2776_v20  ;;  %v2851_v19 = vld [vmem:[%s4027_s1 + $0x5f4] ss:$8 sps:$4 sm:$0xff]   ;;  %v2846_v20 = vld [vmem:[%s4027_s1 + $0x1f0] ss:$8 sps:$4 sm:$0xff]  }
  0x4d   :  { %2023 = vmatprep.subr.bf16.mxu0 %v2779_v21  ;;  %1837 = vmatprep.mubr.bf16.mxu1 %v2309_v48  ;;  %v2849_v21 = vld [vmem:[%s4027_s1 + $0x5f0] ss:$8 sps:$4 sm:$0xff]   ;;  %v2872_v48 = vld [vmem:[%s4027_s1 + $0x234] ss:$8 sps:$4 sm:$0xff]  }
  0x4e   :  { %2049 = vmatprep.mubr.bf16.mxu0 %v2317_v53  ;;  %v2873_v53 = vld [vmem:[%s4027_s1 + $0x630] ss:$8 sps:$4 sm:$0xff]  }
  0x4f   :  { %1812 = vmatpush1.bf16.msra.mxu1 %v2774_v22  ;;  %v2854_v22 = vld [vmem:[%s4027_s1 + $0x204] ss:$8 sps:$4 sm:$0xff]  }
  0x50   :  { %2024 = vmatpush1.bf16.msra.mxu0 %v2777_v23  ;;  %1813 = vmatprep.subr.bf16.mxu1 %v2782_v24  ;;  %v2857_v23 = vld [vmem:[%s4027_s1 + $0x604] ss:$8 sps:$4 sm:$0xff]   ;;  %v2852_v24 = vld [vmem:[%s4027_s1 + $0x200] ss:$8 sps:$4 sm:$0xff]  }
  0x51   :  { %2025 = vmatprep.subr.bf16.mxu0 %v2785_v25  ;;  %v2855_v25 = vld [vmem:[%s4027_s1 + $0x600] ss:$8 sps:$4 sm:$0xff]  }
  0x53   :  { %1814 = vmatpush1.bf16.msra.mxu1 %v2780_v26  ;;  %v41_v26 = vld [vmem:[%s4028_s0 + $0x88] sm:$0xff] }
  0x54   :  { %2026 = vmatpush1.bf16.msra.mxu0 %v2783_v27  ;;  %1815 = vmatprep.subr.bf16.mxu1 %v2788_v28  ;;  %v2308_v27 = vcombine.low %v3374_v44, %v3379_v45  ;;  %v2316_v28 = vcombine.low %v3392_v49, %v3397_v50  ;;  %v3563_v45 = vld [vmem:[%s4028_s0 + $0x50] sm:$0xff] }
  0x55   :  { %2027 = vmatprep.subr.bf16.mxu0 %v2791_v29  ;;  %v49_v29 = vld [vmem:[%s4028_s0 + $0xc8] sm:$0xff]  ;;  %v2875_v49 = vld [vmem:[%s4027_s1 + $0x634] ss:$8 sps:$4 sm:$0xff]  }
  0x57   :  { %1816 = vmatpush1.bf16.msra.mxu1 %v2786_v32  ;;  %v45_v32 = vld [vmem:[%s4028_s0 + $0xa8] sm:$0xff] }
  0x58   :  { %2028 = vmatpush1.bf16.msra.mxu0 %v2789_v34  ;;  %1817 = vmatprep.subr.bf16.mxu1 %v2794_v38  ;;  %v2325_v34 = vcombine.high %v41_v26, %v49_v29  ;;  %v2333_v35 = vcombine.high %v45_v32, %v53_v33  ;;  %v2866_v38 = vld [vmem:[%s4027_s1 + $0x224] ss:$8 sps:$4 sm:$0xff]   ;;  %v2332_v44 = vcombine.low %v45_v32, %v53_v33  ;;  %v2936_v32 = vld [vmem:[%s4027_s1 + $0x2e0] ss:$8 sps:$4 sm:$0xff]  }
  0x59   :  { %2029 = vmatprep.subr.bf16.mxu0 %v2797_v41  ;;  %v2867_v41 = vld [vmem:[%s4027_s1 + $0x620] ss:$8 sps:$4 sm:$0xff]  }
  0x5a   :  { %v2939_v33 = vld [vmem:[%s4027_s1 + $0x6e0] ss:$8 sps:$4 sm:$0xff]  }
  0x5b   :  { %1818 = vmatpush1.bf16.msra.mxu1 %v2792_v42  ;;  %v3558_v42 = vld [vmem:[%s4028_s0 + $0x10] sm:$0xff] }
  0x5c   :  { %2030 = vmatpush1.bf16.msra.mxu0 %v2795_v43  ;;  %1819 = vmatprep.subr.bf16.mxu1 %v2800_v46  ;;  %v2324_v43 = vcombine.low %v41_v26, %v49_v29  ;;  %v3568_v46 = vld [vmem:[%s4028_s0 + $0x30] sm:$0xff]  ;;  %v2311_v50 = vcombine.high %v3558_v42, %v3563_v45 }
  0x5d   :  { %2031 = vmatprep.subr.bf16.mxu0 %v2803_v47  ;;  %v3573_v47 = vld [vmem:[%s4028_s0 + $0x70] sm:$0xff] }
  0x5e   :  { %v2932_v26 = vld [vmem:[%s4027_s1 + $0x2d4] ss:$8 sps:$4 sm:$0xff]   ;;  %v2933_v29 = vld [vmem:[%s4027_s1 + $0x6d0] ss:$8 sps:$4 sm:$0xff]  }
  0x5f   :  { %1820 = vmatpush1.bf16.msra.mxu1 %v2798_v51  ;;  %v2319_v51 = vcombine.high %v3568_v46, %v3573_v47 }
  0x60   :  { %2032 = vmatpush1.bf16.msra.mxu0 %v2801_v52  ;;  %1821 = vmatprep.subr.bf16.mxu1 %v2806_v54  ;;  %v2870_v52 = vld [vmem:[%s4027_s1 + $0x230] ss:$8 sps:$4 sm:$0xff]   ;;  %v2878_v54 = vld [vmem:[%s4027_s1 + $0x244] ss:$8 sps:$4 sm:$0xff]  }
  0x61   :  { %2033 = vmatprep.subr.bf16.mxu0 %v2809_v55  ;;  %v2881_v55 = vld [vmem:[%s4027_s1 + $0x644] ss:$8 sps:$4 sm:$0xff]  }
  0x63   :  { %1822 = vmatpush1.bf16.msra.mxu1 %v2804_v56  ;;  %v2876_v56 = vld [vmem:[%s4027_s1 + $0x240] ss:$8 sps:$4 sm:$0xff]  }
  0x64   :  { %2034 = vmatpush1.bf16.msra.mxu0 %v2807_v57  ;;  %1823 = vmatprep.subr.bf16.mxu1 %v2812_v58  ;;  %v2879_v57 = vld [vmem:[%s4027_s1 + $0x640] ss:$8 sps:$4 sm:$0xff]   ;;  %v2884_v58 = vld [vmem:[%s4027_s1 + $0x254] ss:$8 sps:$4 sm:$0xff]  }
  0x65   :  { %2035 = vmatprep.subr.bf16.mxu0 %v2815_v59  ;;  %v2887_v59 = vld [vmem:[%s4027_s1 + $0x654] ss:$8 sps:$4 sm:$0xff]  }
  0x67   :  { %1824 = vmatpush1.bf16.msra.mxu1 %v2810_v60  ;;  %v2882_v60 = vld [vmem:[%s4027_s1 + $0x250] ss:$8 sps:$4 sm:$0xff]  }
  0x68   :  { %2036 = vmatpush1.bf16.msra.mxu0 %v2813_v61  ;;  %1825 = vmatprep.subr.bf16.mxu1 %v2818_v62  ;;  %v2885_v61 = vld [vmem:[%s4027_s1 + $0x650] ss:$8 sps:$4 sm:$0xff]   ;;  %v2890_v62 = vld [vmem:[%s4027_s1 + $0x264] ss:$8 sps:$4 sm:$0xff]  }
  0x69   :  { %2037 = vmatprep.subr.bf16.mxu0 %v2821_v63  ;;  %v2893_v63 = vld [vmem:[%s4027_s1 + $0x664] ss:$8 sps:$4 sm:$0xff]  }
  0x6b   :  { %1826 = vmatpush1.bf16.msra.mxu1 %v2816_v0  ;;  %v2888_v0 = vld [vmem:[%s4027_s1 + $0x260] ss:$8 sps:$4 sm:$0xff]  }
  0x6c   :  { %2038 = vmatpush1.bf16.msra.mxu0 %v2819_v1  ;;  %1827 = vmatprep.subr.bf16.mxu1 %v2824_v2  ;;  %v2891_v1 = vld [vmem:[%s4027_s1 + $0x660] ss:$8 sps:$4 sm:$0xff]   ;;  %v2896_v2 = vld [vmem:[%s4027_s1 + $0x274] ss:$8 sps:$4 sm:$0xff]  }
  0x6d   :  { %2039 = vmatprep.subr.bf16.mxu0 %v2827_v3  ;;  %v2899_v3 = vld [vmem:[%s4027_s1 + $0x674] ss:$8 sps:$4 sm:$0xff]  }
  0x6f   :  { %1828 = vmatpush1.bf16.msra.mxu1 %v2822_v4  ;;  %v2894_v4 = vld [vmem:[%s4027_s1 + $0x270] ss:$8 sps:$4 sm:$0xff]  }
  0x70   :  { %2040 = vmatpush1.bf16.msra.mxu0 %v2825_v5  ;;  %1829 = vmatprep.subr.bf16.mxu1 %v2830_v6  ;;  %v2897_v5 = vld [vmem:[%s4027_s1 + $0x670] ss:$8 sps:$4 sm:$0xff]   ;;  %v2902_v6 = vld [vmem:[%s4027_s1 + $0x284] ss:$8 sps:$4 sm:$0xff]  }
  0x71   :  { %2041 = vmatprep.subr.bf16.mxu0 %v2833_v7  ;;  %v2905_v7 = vld [vmem:[%s4027_s1 + $0x684] ss:$8 sps:$4 sm:$0xff]  }
  0x73   :  { %1830 = vmatpush1.bf16.msra.mxu1 %v2828_v8  ;;  %v2900_v8 = vld [vmem:[%s4027_s1 + $0x280] ss:$8 sps:$4 sm:$0xff]  }
  0x74   :  { %2042 = vmatpush1.bf16.msra.mxu0 %v2831_v9  ;;  %1831 = vmatprep.subr.bf16.mxu1 %v2836_v10  ;;  %v2903_v9 = vld [vmem:[%s4027_s1 + $0x680] ss:$8 sps:$4 sm:$0xff]   ;;  %v2908_v10 = vld [vmem:[%s4027_s1 + $0x294] ss:$8 sps:$4 sm:$0xff]  }
  0x75   :  { %2043 = vmatprep.subr.bf16.mxu0 %v2839_v11  ;;  %v2911_v11 = vld [vmem:[%s4027_s1 + $0x694] ss:$8 sps:$4 sm:$0xff]  }
  0x77   :  { %1832 = vmatpush1.bf16.msra.mxu1 %v2834_v12  ;;  %v2906_v12 = vld [vmem:[%s4027_s1 + $0x290] ss:$8 sps:$4 sm:$0xff]  }
  0x78   :  { %2044 = vmatpush1.bf16.msra.mxu0 %v2837_v13  ;;  %1833 = vmatprep.subr.bf16.mxu1 %v2842_v14  ;;  %v2909_v13 = vld [vmem:[%s4027_s1 + $0x690] ss:$8 sps:$4 sm:$0xff]   ;;  %v2914_v14 = vld [vmem:[%s4027_s1 + $0x2a4] ss:$8 sps:$4 sm:$0xff]  }
  0x79   :  { %2045 = vmatprep.subr.bf16.mxu0 %v2845_v15  ;;  %v2917_v15 = vld [vmem:[%s4027_s1 + $0x6a4] ss:$8 sps:$4 sm:$0xff]  }
  0x7b   :  { %1834 = vmatpush1.bf16.msra.mxu1 %v2840_v16  ;;  %v2912_v16 = vld [vmem:[%s4027_s1 + $0x2a0] ss:$8 sps:$4 sm:$0xff]  }
  0x7c   :  { %2046 = vmatpush1.bf16.msra.mxu0 %v2843_v17  ;;  %1835 = vmatprep.subr.bf16.mxu1 %v2848_v18  ;;  %v2915_v17 = vld [vmem:[%s4027_s1 + $0x6a0] ss:$8 sps:$4 sm:$0xff]   ;;  %v2920_v18 = vld [vmem:[%s4027_s1 + $0x2b4] ss:$8 sps:$4 sm:$0xff]  }
  0x7d   :  { %2047 = vmatprep.subr.bf16.mxu0 %v2851_v19  ;;  %v2923_v19 = vld [vmem:[%s4027_s1 + $0x6b4] ss:$8 sps:$4 sm:$0xff]  }
  0x7f   :  { %1836 = vmatpush1.bf16.msra.mxu1 %v2846_v20  ;;  %v2918_v20 = vld [vmem:[%s4027_s1 + $0x2b0] ss:$8 sps:$4 sm:$0xff]  }
  0x80   :  { %2048 = vmatpush1.bf16.msra.mxu0 %v2849_v21  ;;  %1858 = vmatprep.subr.bf16.mxu1 %v2854_v22  ;;  %v2921_v21 = vld [vmem:[%s4027_s1 + $0x6b0] ss:$8 sps:$4 sm:$0xff]   ;;  %v2926_v22 = vld [vmem:[%s4027_s1 + $0x2c4] ss:$8 sps:$4 sm:$0xff]  }
  0x81   :  { %2070 = vmatprep.subr.bf16.mxu0 %v2857_v23  ;;  %v2929_v23 = vld [vmem:[%s4027_s1 + $0x6c4] ss:$8 sps:$4 sm:$0xff]  }
  0x82   :  { %1838 = vmatmul.mubr.bf16.vlgmr.msra.gmra.mrb[0].mxu1 %v2308_v27  ;;  %v2935_v27 = vld [vmem:[%s4027_s1 + $0x6d4] ss:$8 sps:$4 sm:$0xff]  }
  0x83   :  { %2050 = vmatmul.mubr.bf16.vlgmr.msra.gmra.mrb[0].mxu0 %v2316_v28  ;;  %1859 = vmatpush1.bf16.msra.mxu1 %v2852_v24  ;;  %v2924_v24 = vld [vmem:[%s4027_s1 + $0x2c0] ss:$8 sps:$4 sm:$0xff]   ;;  %v2930_v28 = vld [vmem:[%s4027_s1 + $0x2d0] ss:$8 sps:$4 sm:$0xff]  }
  0x84   :  { %2071 = vmatpush1.bf16.msra.mxu0 %v2855_v25  ;;  %1860 = vmatprep.subr.bf16.mxu1 %v2860_v30  ;;  %v2927_v25 = vld [vmem:[%s4027_s1 + $0x6c0] ss:$8 sps:$4 sm:$0xff]   ;;  %v2938_v30 = vld [vmem:[%s4027_s1 + $0x2e4] ss:$8 sps:$4 sm:$0xff]  }
  0x85   :  { %2072 = vmatprep.subr.bf16.mxu0 %v2863_v31  ;;  %1847 = vmatprep.mubr.bf16.mxu1 %v2325_v34  ;;  %v2941_v31 = vld [vmem:[%s4027_s1 + $0x6e4] ss:$8 sps:$4 sm:$0xff]   ;;  %v2944_v34 = vld [vmem:[%s4027_s1 + $0x2f4] ss:$8 sps:$4 sm:$0xff]  }
  0x86   :  { %2059 = vmatprep.mubr.bf16.mxu0 %v2333_v35  ;;  %v2947_v35 = vld [vmem:[%s4027_s1 + $0x6f4] ss:$8 sps:$4 sm:$0xff]  }
  0x87   :  { %1861 = vmatpush1.bf16.msra.mxu1 %v2858_v36  ;;  %v2942_v36 = vld [vmem:[%s4027_s1 + $0x2f0] ss:$8 sps:$4 sm:$0xff]  }
  0x88   :  { %2073 = vmatpush1.bf16.msra.mxu0 %v2861_v37  ;;  %1862 = vmatprep.subr.bf16.mxu1 %v2866_v38  ;;  %v2945_v37 = vld [vmem:[%s4027_s1 + $0x6f0] ss:$8 sps:$4 sm:$0xff]   ;;  %v2950_v38 = vld [vmem:[%s4027_s1 + $0x304] ss:$8 sps:$4 sm:$0xff]  }
  0x89   :  { %2074 = vmatprep.subr.bf16.mxu0 %v2869_v39  ;;  %v2953_v39 = vld [vmem:[%s4027_s1 + $0x704] ss:$8 sps:$4 sm:$0xff]  }
  0x8a   :  { %1848 = vmatmul.mubr.bf16.gmra.mrb[4].mxu1 %v2324_v43  ;;  %v2318_v43 = vcombine.low %v3568_v46, %v3573_v47  ;;  %v2956_v46 = vld [vmem:[%s4027_s1 + $0x314] ss:$8 sps:$4 sm:$0xff]  }
  0x8b   :  { %2060 = vmatmul.mubr.bf16.gmra.mrb[4].mxu0 %v2332_v44  ;;  %1863 = vmatpush1.bf16.msra.mxu1 %v2864_v40  ;;  %v42_v40 = vld [vmem:[%s4028_s0 + $0x90] sm:$0xff] }
  0x8c   :  { %2075 = vmatpush1.bf16.msra.mxu0 %v2867_v41  ;;  %1864 = vmatprep.subr.bf16.mxu1 %v2872_v48  ;;  %v2310_v41 = vcombine.low %v3558_v42, %v3563_v45  ;;  %v50_v44 = vld [vmem:[%s4028_s0 + $0xd0] sm:$0xff]  ;;  %v2948_v42 = vld [vmem:[%s4027_s1 + $0x300] ss:$8 sps:$4 sm:$0xff]  }
  0x8d   :  { %2076 = vmatprep.subr.bf16.mxu0 %v2875_v49  ;;  %1890 = vmatprep.mubr.bf16.mxu1 %v2311_v50  ;;  %v46_v48 = vld [vmem:[%s4028_s0 + $0xb0] sm:$0xff]  ;;  %v2951_v45 = vld [vmem:[%s4027_s1 + $0x700] ss:$8 sps:$4 sm:$0xff]   ;;  %v2327_v50 = vcombine.high %v42_v40, %v50_v44 }
  0x8e   :  { %2102 = vmatprep.mubr.bf16.mxu0 %v2319_v51  ;;  %v54_v49 = vld [vmem:[%s4028_s0 + $0xf0] sm:$0xff] }
  0x8f   :  { %1865 = vmatpush1.bf16.msra.mxu1 %v2870_v52  ;;  %v2959_v47 = vld [vmem:[%s4027_s1 + $0x714] ss:$8 sps:$4 sm:$0xff]   ;;  %v2335_v51 = vcombine.high %v46_v48, %v54_v49  ;;  %v2954_v52 = vld [vmem:[%s4027_s1 + $0x310] ss:$8 sps:$4 sm:$0xff]  }
  0x90   :  { %2077 = vmatpush1.bf16.msra.mxu0 %v2873_v53  ;;  %1866 = vmatprep.subr.bf16.mxu1 %v2878_v54  ;;  %v2957_v53 = vld [vmem:[%s4027_s1 + $0x710] ss:$8 sps:$4 sm:$0xff]   ;;  %v2962_v54 = vld [vmem:[%s4027_s1 + $0x324] ss:$8 sps:$4 sm:$0xff]  }
  0x91   :  { %2078 = vmatprep.subr.bf16.mxu0 %v2881_v55  ;;  %v2965_v55 = vld [vmem:[%s4027_s1 + $0x724] ss:$8 sps:$4 sm:$0xff]  }
  0x93   :  { %1867 = vmatpush1.bf16.msra.mxu1 %v2876_v56  ;;  %v3784_v56 = vld [vmem:[%s4028_s0 + $0x18] sm:$0xff] }
  0x94   :  { %2079 = vmatpush1.bf16.msra.mxu0 %v2879_v57  ;;  %1868 = vmatprep.subr.bf16.mxu1 %v2884_v58  ;;  %v2326_v57 = vcombine.low %v42_v40, %v50_v44  ;;  %v2334_v58 = vcombine.low %v46_v48, %v54_v49  ;;  %v3020_v40 = vld [vmem:[%s4027_s1 + $0x3c0] ss:$8 sps:$4 sm:$0xff]   ;;  %v3031_v44 = vld [vmem:[%s4027_s1 + $0x7d4] ss:$8 sps:$4 sm:$0xff]   ;;  %v3026_v48 = vld [vmem:[%s4027_s1 + $0x3d0] ss:$8 sps:$4 sm:$0xff]  }
  0x95   :  { %2080 = vmatprep.subr.bf16.mxu0 %v2887_v59  ;;  %v3789_v59 = vld [vmem:[%s4028_s0 + $0x58] sm:$0xff] }
  0x96   :  { %v3029_v49 = vld [vmem:[%s4027_s1 + $0x7d0] ss:$8 sps:$4 sm:$0xff]  }
  0x97   :  { %1869 = vmatpush1.bf16.msra.mxu1 %v2882_v60  ;;  %v3794_v60 = vld [vmem:[%s4028_s0 + $0x38] sm:$0xff] }
  0x98   :  { %2081 = vmatpush1.bf16.msra.mxu0 %v2885_v61  ;;  %1870 = vmatprep.subr.bf16.mxu1 %v2890_v62  ;;  %v3799_v61 = vld [vmem:[%s4028_s0 + $0x78] sm:$0xff]  ;;  %v2960_v62 = vld [vmem:[%s4027_s1 + $0x320] ss:$8 sps:$4 sm:$0xff]  }
  0x99   :  { %2082 = vmatprep.subr.bf16.mxu0 %v2893_v63  ;;  %v2963_v63 = vld [vmem:[%s4027_s1 + $0x720] ss:$8 sps:$4 sm:$0xff]  }
  0x9b   :  { %1871 = vmatpush1.bf16.msra.mxu1 %v2888_v0  ;;  %v2968_v0 = vld [vmem:[%s4027_s1 + $0x334] ss:$8 sps:$4 sm:$0xff]  }
  0x9c   :  { %2083 = vmatpush1.bf16.msra.mxu0 %v2891_v1  ;;  %1872 = vmatprep.subr.bf16.mxu1 %v2896_v2  ;;  %v2971_v1 = vld [vmem:[%s4027_s1 + $0x734] ss:$8 sps:$4 sm:$0xff]   ;;  %v2313_v2 = vcombine.high %v3784_v56, %v3789_v59 }
  0x9d   :  { %2084 = vmatprep.subr.bf16.mxu0 %v2899_v3  ;;  %v2321_v3 = vcombine.high %v3794_v60, %v3799_v61 }
  0x9f   :  { %1873 = vmatpush1.bf16.msra.mxu1 %v2894_v4  ;;  %v2966_v4 = vld [vmem:[%s4027_s1 + $0x330] ss:$8 sps:$4 sm:$0xff]  }
  0xa0   :  { %2085 = vmatpush1.bf16.msra.mxu0 %v2897_v5  ;;  %1874 = vmatprep.subr.bf16.mxu1 %v2902_v6  ;;  %v2969_v5 = vld [vmem:[%s4027_s1 + $0x730] ss:$8 sps:$4 sm:$0xff]   ;;  %v2974_v6 = vld [vmem:[%s4027_s1 + $0x344] ss:$8 sps:$4 sm:$0xff]  }
  0xa1   :  { %2086 = vmatprep.subr.bf16.mxu0 %v2905_v7  ;;  %v2977_v7 = vld [vmem:[%s4027_s1 + $0x744] ss:$8 sps:$4 sm:$0xff]  }
  0xa3   :  { %1875 = vmatpush1.bf16.msra.mxu1 %v2900_v8  ;;  %v2972_v8 = vld [vmem:[%s4027_s1 + $0x340] ss:$8 sps:$4 sm:$0xff]  }
  0xa4   :  { %2087 = vmatpush1.bf16.msra.mxu0 %v2903_v9  ;;  %1876 = vmatprep.subr.bf16.mxu1 %v2908_v10  ;;  %v2975_v9 = vld [vmem:[%s4027_s1 + $0x740] ss:$8 sps:$4 sm:$0xff]   ;;  %v2980_v10 = vld [vmem:[%s4027_s1 + $0x354] ss:$8 sps:$4 sm:$0xff]  }
  0xa5   :  { %2088 = vmatprep.subr.bf16.mxu0 %v2911_v11  ;;  %v2983_v11 = vld [vmem:[%s4027_s1 + $0x754] ss:$8 sps:$4 sm:$0xff]  }
  0xa7   :  { %1877 = vmatpush1.bf16.msra.mxu1 %v2906_v12  ;;  %v2978_v12 = vld [vmem:[%s4027_s1 + $0x350] ss:$8 sps:$4 sm:$0xff]  }
  0xa8   :  { %2089 = vmatpush1.bf16.msra.mxu0 %v2909_v13  ;;  %1878 = vmatprep.subr.bf16.mxu1 %v2914_v14  ;;  %v2981_v13 = vld [vmem:[%s4027_s1 + $0x750] ss:$8 sps:$4 sm:$0xff]   ;;  %v2986_v14 = vld [vmem:[%s4027_s1 + $0x364] ss:$8 sps:$4 sm:$0xff]  }
  0xa9   :  { %2090 = vmatprep.subr.bf16.mxu0 %v2917_v15  ;;  %v2989_v15 = vld [vmem:[%s4027_s1 + $0x764] ss:$8 sps:$4 sm:$0xff]  }
  0xab   :  { %1879 = vmatpush1.bf16.msra.mxu1 %v2912_v16  ;;  %v2984_v16 = vld [vmem:[%s4027_s1 + $0x360] ss:$8 sps:$4 sm:$0xff]  }
  0xac   :  { %2091 = vmatpush1.bf16.msra.mxu0 %v2915_v17  ;;  %1880 = vmatprep.subr.bf16.mxu1 %v2920_v18  ;;  %v2987_v17 = vld [vmem:[%s4027_s1 + $0x760] ss:$8 sps:$4 sm:$0xff]   ;;  %v2992_v18 = vld [vmem:[%s4027_s1 + $0x374] ss:$8 sps:$4 sm:$0xff]  }
  0xad   :  { %2092 = vmatprep.subr.bf16.mxu0 %v2923_v19  ;;  %v2995_v19 = vld [vmem:[%s4027_s1 + $0x774] ss:$8 sps:$4 sm:$0xff]  }
  0xaf   :  { %1881 = vmatpush1.bf16.msra.mxu1 %v2918_v20  ;;  %v2990_v20 = vld [vmem:[%s4027_s1 + $0x370] ss:$8 sps:$4 sm:$0xff]  }
  0xb0   :  { %2093 = vmatpush1.bf16.msra.mxu0 %v2921_v21  ;;  %1882 = vmatprep.subr.bf16.mxu1 %v2926_v22  ;;  %v2993_v21 = vld [vmem:[%s4027_s1 + $0x770] ss:$8 sps:$4 sm:$0xff]   ;;  %v2998_v22 = vld [vmem:[%s4027_s1 + $0x384] ss:$8 sps:$4 sm:$0xff]  }
  0xb1   :  { %2094 = vmatprep.subr.bf16.mxu0 %v2929_v23  ;;  %v3001_v23 = vld [vmem:[%s4027_s1 + $0x784] ss:$8 sps:$4 sm:$0xff]  }
  0xb3   :  { %1883 = vmatpush1.bf16.msra.mxu1 %v2924_v24  ;;  %v2996_v24 = vld [vmem:[%s4027_s1 + $0x380] ss:$8 sps:$4 sm:$0xff]  }
  0xb4   :  { %2095 = vmatpush1.bf16.msra.mxu0 %v2927_v25  ;;  %1884 = vmatprep.subr.bf16.mxu1 %v2932_v26  ;;  %v2999_v25 = vld [vmem:[%s4027_s1 + $0x780] ss:$8 sps:$4 sm:$0xff]   ;;  %v3004_v26 = vld [vmem:[%s4027_s1 + $0x394] ss:$8 sps:$4 sm:$0xff]  }
  0xb5   :  { %2096 = vmatprep.subr.bf16.mxu0 %v2935_v27  ;;  %v3007_v27 = vld [vmem:[%s4027_s1 + $0x794] ss:$8 sps:$4 sm:$0xff]  }
  0xb7   :  { %1885 = vmatpush1.bf16.msra.mxu1 %v2930_v28  ;;  %v3002_v28 = vld [vmem:[%s4027_s1 + $0x390] ss:$8 sps:$4 sm:$0xff]  }
  0xb8   :  { %2097 = vmatpush1.bf16.msra.mxu0 %v2933_v29  ;;  %1886 = vmatprep.subr.bf16.mxu1 %v2938_v30  ;;  %v3005_v29 = vld [vmem:[%s4027_s1 + $0x790] ss:$8 sps:$4 sm:$0xff]   ;;  %v3010_v30 = vld [vmem:[%s4027_s1 + $0x3a4] ss:$8 sps:$4 sm:$0xff]  }
  0xb9   :  { %2098 = vmatprep.subr.bf16.mxu0 %v2941_v31  ;;  %v3013_v31 = vld [vmem:[%s4027_s1 + $0x7a4] ss:$8 sps:$4 sm:$0xff]  }
  0xbb   :  { %1887 = vmatpush1.bf16.msra.mxu1 %v2936_v32  ;;  %v3008_v32 = vld [vmem:[%s4027_s1 + $0x3a0] ss:$8 sps:$4 sm:$0xff]  }
  0xbc   :  { %2099 = vmatpush1.bf16.msra.mxu0 %v2939_v33  ;;  %1888 = vmatprep.subr.bf16.mxu1 %v2944_v34  ;;  %v3011_v33 = vld [vmem:[%s4027_s1 + $0x7a0] ss:$8 sps:$4 sm:$0xff]   ;;  %v3016_v34 = vld [vmem:[%s4027_s1 + $0x3b4] ss:$8 sps:$4 sm:$0xff]  }
  0xbd   :  { %2100 = vmatprep.subr.bf16.mxu0 %v2947_v35  ;;  %v3019_v35 = vld [vmem:[%s4027_s1 + $0x7b4] ss:$8 sps:$4 sm:$0xff]  }
  0xbf   :  { %1889 = vmatpush1.bf16.msra.mxu1 %v2942_v36  ;;  %v3014_v36 = vld [vmem:[%s4027_s1 + $0x3b0] ss:$8 sps:$4 sm:$0xff]  }
  0xc0   :  { %2101 = vmatpush1.bf16.msra.mxu0 %v2945_v37  ;;  %1911 = vmatprep.subr.bf16.mxu1 %v2950_v38  ;;  %v3017_v37 = vld [vmem:[%s4027_s1 + $0x7b0] ss:$8 sps:$4 sm:$0xff]   ;;  %v3022_v38 = vld [vmem:[%s4027_s1 + $0x3c4] ss:$8 sps:$4 sm:$0xff]  }
  0xc1   :  { %2123 = vmatprep.subr.bf16.mxu0 %v2953_v39  ;;  %v3025_v39 = vld [vmem:[%s4027_s1 + $0x7c4] ss:$8 sps:$4 sm:$0xff]  }
  0xc2   :  { %1891 = vmatmul.mubr.bf16.vlgmr.msra.gmra.mrb[0].mxu1 %v2310_v41  ;;  %v3023_v41 = vld [vmem:[%s4027_s1 + $0x7c0] ss:$8 sps:$4 sm:$0xff]  }
  0xc3   :  { %2103 = vmatmul.mubr.bf16.vlgmr.msra.gmra.mrb[0].mxu0 %v2318_v43  ;;  %1912 = vmatpush1.bf16.msra.mxu1 %v2948_v42  ;;  %v3028_v43 = vld [vmem:[%s4027_s1 + $0x3d4] ss:$8 sps:$4 sm:$0xff]   ;;  %v3034_v42 = vld [vmem:[%s4027_s1 + $0x3e4] ss:$8 sps:$4 sm:$0xff]  }
  0xc4   :  { %2124 = vmatpush1.bf16.msra.mxu0 %v2951_v45  ;;  %1913 = vmatprep.subr.bf16.mxu1 %v2956_v46  ;;  %v3037_v45 = vld [vmem:[%s4027_s1 + $0x7e4] ss:$8 sps:$4 sm:$0xff]   ;;  %v3032_v46 = vld [vmem:[%s4027_s1 + $0x3e0] ss:$8 sps:$4 sm:$0xff]  }
  0xc5   :  { %2125 = vmatprep.subr.bf16.mxu0 %v2959_v47  ;;  %1900 = vmatprep.mubr.bf16.mxu1 %v2327_v50  ;;  %v3035_v47 = vld [vmem:[%s4027_s1 + $0x7e0] ss:$8 sps:$4 sm:$0xff]   ;;  %v3040_v50 = vld [vmem:[%s4027_s1 + $0x3f4] ss:$8 sps:$4 sm:$0xff]  }
  0xc6   :  { %2112 = vmatprep.mubr.bf16.mxu0 %v2335_v51  ;;  %v3043_v51 = vld [vmem:[%s4027_s1 + $0x7f4] ss:$8 sps:$4 sm:$0xff]  }
  0xc7   :  { %1914 = vmatpush1.bf16.msra.mxu1 %v2954_v52  ;;  %v3038_v52 = vld [vmem:[%s4027_s1 + $0x3f0] ss:$8 sps:$4 sm:$0xff]  }
  0xc8   :  { %2126 = vmatpush1.bf16.msra.mxu0 %v2957_v53  ;;  %1915 = vmatprep.subr.bf16.mxu1 %v2962_v54  ;;  %v3041_v53 = vld [vmem:[%s4027_s1 + $0x7f0] ss:$8 sps:$4 sm:$0xff]  }
  0xc9   :  { %2127 = vmatprep.subr.bf16.mxu0 %v2965_v55  ;;  %v43_v54 = vld [vmem:[%s4028_s0 + $0x98] sm:$0xff] }
  0xca   :  { %1901 = vmatmul.mubr.bf16.gmra.mrb[4].mxu1 %v2326_v57  ;;  %v51_v55 = vld [vmem:[%s4028_s0 + $0xd8] sm:$0xff] }
  0xcb   :  { %2113 = vmatmul.mubr.bf16.gmra.mrb[4].mxu0 %v2334_v58  ;;  %1916 = vmatpush1.bf16.msra.mxu1 %v2960_v62  ;;  %v47_v57 = vld [vmem:[%s4028_s0 + $0xb8] sm:$0xff]  ;;  %v2312_v62 = vcombine.low %v3784_v56, %v3789_v59  ;;  %v3044_v56 = vmov 0.0  }
  0xcc   :  { %2128 = vmatpush1.bf16.msra.mxu0 %v2963_v63  ;;  %1917 = vmatprep.subr.bf16.mxu1 %v2968_v0  ;;  %v55_v58 = vld [vmem:[%s4028_s0 + $0xf8] sm:$0xff]  ;;  %v2320_v63 = vcombine.low %v3794_v60, %v3799_v61  ;;  %v2329_v0 = vcombine.high %v43_v54, %v51_v55 }
  0xcd   :  { %2129 = vmatprep.subr.bf16.mxu0 %v2971_v1  ;;  %1943 = vmatprep.mubr.bf16.mxu1 %v2313_v2  ;;  %v2337_v1 = vcombine.high %v47_v57, %v55_v58  ;;  %v2328_v2 = vcombine.low %v43_v54, %v51_v55 }
  0xce   :  { %2155 = vmatprep.mubr.bf16.mxu0 %v2321_v3  ;;  %v2336_v3 = vcombine.low %v47_v57, %v55_v58  ;;  %v3045_v57 = vmov 1966171168  }
  0xcf   :  { %1918 = vmatpush1.bf16.msra.mxu1 %v2966_v4  ;;  %v18_v4 = vlaneseq  ;;  %v2227_v58 = vunpack.c.l.s4 %v3045_v57 }
  0xd0   :  { %2130 = vmatpush1.bf16.msra.mxu0 %v2969_v5  ;;  %1919 = vmatprep.subr.bf16.mxu1 %v2974_v6 }
  0xd1   :  { %2131 = vmatprep.subr.bf16.mxu0 %v2977_v7  ;;  %vm3984_vm0 = vcmp.lt.s32.totalorder %v18_v4, 256 }
  0xd2   :  { %22 = vst.msk [vmem:[%s4029_s3] sm:$0x3] %vm3984_vm0, %v3044_v56  ;;  %23 = vst.msk [vmem:[%s4030_s4] sm:$0x3] %vm3984_vm0, %v3044_v56 }
  0xd3   :  { %1920 = vmatpush1.bf16.msra.mxu1 %v2972_v8 }
  0xd4   :  { %2132 = vmatpush1.bf16.msra.mxu0 %v2975_v9  ;;  %1921 = vmatprep.subr.bf16.mxu1 %v2980_v10 }
  0xd5   :  { %2133 = vmatprep.subr.bf16.mxu0 %v2983_v11 }
  0xd7   :  { %1922 = vmatpush1.bf16.msra.mxu1 %v2978_v12 }
  0xd8   :  { %2134 = vmatpush1.bf16.msra.mxu0 %v2981_v13  ;;  %1923 = vmatprep.subr.bf16.mxu1 %v2986_v14 }
  0xd9   :  { %2135 = vmatprep.subr.bf16.mxu0 %v2989_v15 }
  0xdb   :  { %1924 = vmatpush1.bf16.msra.mxu1 %v2984_v16 }
  0xdc   :  { %2136 = vmatpush1.bf16.msra.mxu0 %v2987_v17  ;;  %1925 = vmatprep.subr.bf16.mxu1 %v2992_v18 }
  0xdd   :  { %2137 = vmatprep.subr.bf16.mxu0 %v2995_v19 }
  0xdf   :  { %1926 = vmatpush1.bf16.msra.mxu1 %v2990_v20 }
  0xe0   :  { %2138 = vmatpush1.bf16.msra.mxu0 %v2993_v21  ;;  %1927 = vmatprep.subr.bf16.mxu1 %v2998_v22 }
  0xe1   :  { %2139 = vmatprep.subr.bf16.mxu0 %v3001_v23 }
  0xe3   :  { %1928 = vmatpush1.bf16.msra.mxu1 %v2996_v24 }
  0xe4   :  { %2140 = vmatpush1.bf16.msra.mxu0 %v2999_v25  ;;  %1929 = vmatprep.subr.bf16.mxu1 %v3004_v26 }
  0xe5   :  { %2141 = vmatprep.subr.bf16.mxu0 %v3007_v27 }
  0xe7   :  { %1930 = vmatpush1.bf16.msra.mxu1 %v3002_v28 }
  0xe8   :  { %2142 = vmatpush1.bf16.msra.mxu0 %v3005_v29  ;;  %1931 = vmatprep.subr.bf16.mxu1 %v3010_v30 }
  0xe9   :  { %2143 = vmatprep.subr.bf16.mxu0 %v3013_v31 }
  0xeb   :  { %1932 = vmatpush1.bf16.msra.mxu1 %v3008_v32 }
  0xec   :  { %2144 = vmatpush1.bf16.msra.mxu0 %v3011_v33  ;;  %1933 = vmatprep.subr.bf16.mxu1 %v3016_v34 }
  0xed   :  { %2145 = vmatprep.subr.bf16.mxu0 %v3019_v35 }
  0xef   :  { %1934 = vmatpush1.bf16.msra.mxu1 %v3014_v36 }
  0xf0   :  { %2146 = vmatpush1.bf16.msra.mxu0 %v3017_v37  ;;  %1935 = vmatprep.subr.bf16.mxu1 %v3022_v38 }
  0xf1   :  { %2147 = vmatprep.subr.bf16.mxu0 %v3025_v39 }
  0xf3   :  { %1936 = vmatpush1.bf16.msra.mxu1 %v3020_v40 }
  0xf4   :  { %2148 = vmatpush1.bf16.msra.mxu0 %v3023_v41  ;;  %1937 = vmatprep.subr.bf16.mxu1 %v3028_v43 }
  0xf5   :  { %2149 = vmatprep.subr.bf16.mxu0 %v3031_v44 }
  0xf7   :  { %1938 = vmatpush1.bf16.msra.mxu1 %v3026_v48 }
  0xf8   :  { %2150 = vmatpush1.bf16.msra.mxu0 %v3029_v49  ;;  %1939 = vmatprep.subr.bf16.mxu1 %v3034_v42 }
  0xf9   :  { %2151 = vmatprep.subr.bf16.mxu0 %v3037_v45 }
  0xfb   :  { %1940 = vmatpush1.bf16.msra.mxu1 %v3032_v46 }
  0xfc   :  { %2152 = vmatpush1.bf16.msra.mxu0 %v3035_v47  ;;  %1941 = vmatprep.subr.bf16.mxu1 %v3040_v50 }
  0xfd   :  { %2153 = vmatprep.subr.bf16.mxu0 %v3043_v51 }
  0xff   :  { %1942 = vmatpush1.bf16.msra.mxu1 %v3038_v52 }
 0x100   :  { %2154 = vmatpush1.bf16.msra.mxu0 %v3041_v53 }
 0x102   :  { %1944 = vmatmul.mubr.bf16.vlgmr.msra.gmra.mrb[0].mxu1 %v2312_v62 }
 0x103   :  { %2156 = vmatmul.mubr.bf16.vlgmr.msra.gmra.mrb[0].mxu0 %v2320_v63  ;;  %1953 = vmatprep.mubr.bf16.mxu1 %v2329_v0 }
 0x104   :  { %2165 = vmatprep.mubr.bf16.mxu0 %v2337_v1 }
 0x10a   :  { %1954 = vmatmul.mubr.bf16.gmra.mrb[4].mxu1 %v2328_v2 }
 0x10b   :  { %2166 = vmatmul.mubr.bf16.gmra.mrb[4].mxu0 %v2336_v3 }
 0x1d5   :  { %v1945_v59 = vpop.f32.mrb[0].mxu1 }
 0x1d6   :  { %v2157_v60 = vpop.f32.mrb[0].mxu0  ;;  %v1947_v6 = vpop.f32.mrb[1].mxu1 }
 0x1d7   :  { %v2602_v61 = vadd.f32 %v2157_v60, %v1945_v59  ;;  %v2159_v7 = vpop.f32.mrb[1].mxu0  ;;  %v1949_v9 = vpop.f32.mrb[2].mxu1  ;;  %v2228_v60 = vunpack.c.0.s8 %v2227_v58 }
 0x1d8   :  { %v2603_v8 = vadd.f32 %v2159_v7, %v1947_v6  ;;  %v2161_v10 = vpop.f32.mrb[2].mxu0  ;;  %v1951_v12 = vpop.f32.mrb[3].mxu1 }
 0x1d9   :  { %v2604_v11 = vadd.f32 %v2161_v10, %v1949_v9  ;;  %v2163_v13 = vpop.f32.mrb[3].mxu0  ;;  %v2248_v16 = vmul.f32 %v2602_v61, %v2602_v61 }
 0x1da   :  { %v2598_v14 = vpack.c.bf16 %v2603_v8, %v2602_v61  ;;  %v2605_v15 = vadd.f32 %v2163_v13, %v1951_v12  ;;  %v2249_v19 = vmul.f32 %v2603_v8, %v2603_v8 }
 0x1db   :  { %v2205_v17 = vadd.f32 %v2604_v11, %v2602_v61  ;;  %v2250_v18 = vmul.f32 %v2604_v11, %v2604_v11  ;;  %v2230_v61 = vshrl.u32 %v18_v4, 7 }
 0x1dc   :  { %2200 = vst [vmem:[%s4031_s2] sm:$0xff] %v2598_v14  ;;  %v2599_v20 = vpack.c.bf16 %v2605_v15, %v2604_v11  ;;  %v2214_v21 = vadd.f32 %v2605_v15, %v2603_v8  ;;  %v2251_v22 = vmul.f32 %v2605_v15, %v2605_v15 }
 0x1dd   :  { %v2256_v23 = vadd.f32 %v2250_v18, %v2248_v16  ;;  %v1955_v25 = vpop.f32.mrb[4].mxu1  ;;  %v2231_v14 = vsub.s32 %v2228_v60, %v2230_v61 }
 0x1de   :  { %2201 = vst [vmem:[%s4031_s2 + $0x8] sm:$0xff] %v2599_v20  ;;  %v2265_v24 = vadd.f32 %v2251_v22, %v2249_v19  ;;  %v2167_v26 = vpop.f32.mrb[4].mxu0  ;;  %v1957_v28 = vpop.f32.mrb[5].mxu1 }
 0x1df   :  { %v2606_v27 = vadd.f32 %v2167_v26, %v1955_v25  ;;  %v2169_v29 = vpop.f32.mrb[5].mxu0  ;;  %v1959_v31 = vpop.f32.mrb[6].mxu1 }
 0x1e0   :  { %v2607_v30 = vadd.f32 %v2169_v29, %v1957_v28  ;;  %v2171_v32 = vpop.f32.mrb[6].mxu0  ;;  %v1961_v36 = vpop.f32.mrb[7].mxu1 }
 0x1e1   :  { %v2206_v33 = vadd.f32 %v2606_v27, %v2205_v17  ;;  %v2252_v34 = vmul.f32 %v2606_v27, %v2606_v27  ;;  %v2608_v35 = vadd.f32 %v2171_v32, %v1959_v31  ;;  %v2173_v37 = vpop.f32.mrb[7].mxu0 }
 0x1e2   :  { %v2600_v38 = vpack.c.bf16 %v2607_v30, %v2606_v27  ;;  %v2215_v39 = vadd.f32 %v2607_v30, %v2214_v21  ;;  %v2253_v40 = vmul.f32 %v2607_v30, %v2607_v30  ;;  %v2609_v41 = vadd.f32 %v2173_v37, %v1961_v36  ;;  %v2204_v21 = vld [vmem:[%s4029_s3] sm:$0x3] }
 0x1e3   :  { %v2257_v43 = vadd.f32 %v2256_v23, %v2252_v34  ;;  %v2207_v44 = vadd.f32 %v2608_v35, %v2206_v33  ;;  %v2254_v48 = vmul.f32 %v2608_v35, %v2608_v35  ;;  %v2247_v23 = vld [vmem:[%s4030_s4] sm:$0x3] }
 0x1e4   :  { %2202 = vst [vmem:[%s4031_s2 + $0x10] sm:$0xff] %v2600_v38  ;;  %v2266_v49 = vadd.f32 %v2265_v24, %v2253_v40  ;;  %v2601_v42 = vpack.c.bf16 %v2609_v41, %v2608_v35  ;;  %v2216_v45 = vadd.f32 %v2609_v41, %v2215_v39  ;;  %v2255_v46 = vmul.f32 %v2609_v41, %v2609_v41 }
 0x1e5   :  { %v2208_v47 = vrot.slane %v2207_v44, 4  ;;  %v2258_v50 = vadd.f32 %v2257_v43, %v2254_v48 }
 0x1e6   :  { %2203 = vst [vmem:[%s4031_s2 + $0x18] sm:$0xff] %v2601_v42  ;;  %v2217_v51 = vrot.slane %v2216_v45, 4  ;;  %v2267_v52 = vadd.f32 %v2266_v49, %v2255_v46 }
 0x1e7   :  { %v2209_v53 = vadd.f32 %v2208_v47, %v2207_v44  ;;  %v2259_v54 = vrot.slane %v2258_v50, 4 }
 0x1e8   :  { %v2218_v55 = vadd.f32 %v2217_v51, %v2216_v45  ;;  %v2268_v62 = vrot.slane %v2267_v52, 4 }
 0x1e9   :  { %v2210_v63 = vrot.slane %v2209_v53, 2  ;;  %v2260_v0 = vadd.f32 %v2259_v54, %v2258_v50 }
 0x1ea   :  { %v2219_v1 = vrot.slane %v2218_v55, 2  ;;  %v2269_v2 = vadd.f32 %v2268_v62, %v2267_v52 }
 0x1eb   :  { %v2211_v3 = vadd.f32 %v2210_v63, %v2209_v53  ;;  %v2261_v56 = vrot.slane %v2260_v0, 2 }
 0x1ec   :  { %v2220_v59 = vadd.f32 %v2219_v1, %v2218_v55  ;;  %v2270_v6 = vrot.slane %v2269_v2, 2 }
 0x1ed   :  { %v2212_v7 = vrot.slane %v2211_v3, 1  ;;  %v2262_v8 = vadd.f32 %v2261_v56, %v2260_v0 }
 0x1ee   :  { %v2221_v9 = vrot.slane %v2220_v59, 1  ;;  %v2271_v10 = vadd.f32 %v2270_v6, %v2269_v2 }
 0x1ef   :  { %v2213_v11 = vadd.f32 %v2212_v7, %v2211_v3  ;;  %v2263_v12 = vrot.slane %v2262_v8, 1 }
 0x1f0   :  { %v2222_v13 = vadd.f32 %v2221_v9, %v2220_v59  ;;  %v2272_v15 = vrot.slane %v2271_v10, 1 }
 0x1f1   :  { %v2264_v16 = vadd.f32 %v2263_v12, %v2262_v8 }
 0x1f2   :  { %v2225_v17 = vcombine.low %v2213_v11, %v2222_v13  ;;  %v2273_v18 = vadd.f32 %v2272_v15, %v2271_v10 }
 0x1f4   :  { %v2232_v19 = vrot.slane %v2225_v17, %v2231_v14  ;;  %v2276_v20 = vcombine.low %v2264_v16, %v2273_v18 }
 0x1f6   :  { %v2239_v4 = vrot.slane %v2232_v19, %v2231_v14  ;;  %v2283_v22 = vrot.slane %v2276_v20, %v2231_v14 }
 0x1f8   :  { %v2241_v24 = vadd.f32 %v2239_v4, %v2204_v21  ;;  %v2290_v25 = vrot.slane %v2283_v22, %v2231_v14 }
 0x1fa   :  { %2246 = vst.msk [vmem:[%s4029_s3] sm:$0x3] %vm3984_vm0, %v2241_v24  ;;  %v2292_v26 = vadd.f32 %v2290_v25, %v2247_v23 }
 0x1fc   :  { %2293 = vst.msk [vmem:[%s4030_s4] sm:$0x3] %vm3984_vm0, %v2292_v26 }

</bundles_post_ra>
